<compile_context>
chip_gen: v5e
topology: v5e:2x2
jax: 0.10.0
libtpu: 0.0.40
codegen_flags: <defaults>
</compile_context>

<pallas_src>
import functools
import math

import jax
import jax.numpy as jnp
from jax.experimental import pallas as pl
from jax.experimental.pallas import tpu as pltpu


def _padded_width(W):
    """Padded width Wp >= W + 2 with (Wp + 1) a multiple of 8.

    The conv1 activation is stored into the VMEM scratch at sublane offset
    Wp + 1; choosing (Wp + 1) % 8 == 0 keeps that store fully aligned.
    """
    return ((W + 3 + 7) // 8) * 8 - 1


def _double_conv_kernel(xf_ref, w1_ref, s1_ref, w2_ref, s2_ref, mask_ref,
                        o_ref, mid_ref, *, Wp):
    """One batch image: (conv3x3 + folded-BN + ReLU) x 2, entirely in VMEM.

    xf_ref  : (Lp, Cin)        bf16  flattened zero-padded NHWC image
    w1_ref  : (9, Cin, Cmid)   bf16  conv1 weights per tap (BN scale folded in)
    s1_ref  : (1, Cmid)        f32   conv1 folded-BN shift
    w2_ref  : (9, Cmid, Cout)  bf16  conv2 weights per tap (BN scale folded in)
    s2_ref  : (1, Cout)        f32   conv2 folded-BN shift
    mask_ref: (M, 1)           f32   1.0 on valid columns, 0.0 on pad columns
    o_ref   : (M, Cout)        f32   flattened output (pad columns kept; the
                                     wrapper slices them off)
    mid_ref : (Lp, Cmid)       f32   VMEM scratch: zero-padded conv1 activation
    """
    M = o_ref.shape[0]
    taps = [(ki, kj) for ki in range(3) for kj in range(3)]

    # ---- conv1: 9 shifted matmuls, BN shift + ReLU fused in the epilogue ----
    acc = jnp.zeros((M, w1_ref.shape[2]), jnp.float32)
    for t, (ki, kj) in enumerate(taps):
        off = ki * Wp + kj
        a = xf_ref[pl.ds(off, M), :]                        # (M, Cin) bf16
        acc = acc + jnp.dot(a, w1_ref[t], preferred_element_type=jnp.float32)
    y1 = jnp.maximum(acc + s1_ref[...], 0.0) * mask_ref[...]

    # Place conv1's activation inside its own zero-padding ring, in VMEM only.
    mid_ref[...] = jnp.zeros_like(mid_ref)
    mid_ref[pl.ds(Wp + 1, M), :] = y1                       # aligned store

    # ---- conv2: same structure, reading the VMEM-resident activation ----
    acc = jnp.zeros((M, w2_ref.shape[2]), jnp.float32)
    for t, (ki, kj) in enumerate(taps):
        off = ki * Wp + kj
        a = mid_ref[pl.ds(off, M), :].astype(jnp.bfloat16)  # (M, Cmid) bf16
        acc = acc + jnp.dot(a, w2_ref[t], preferred_element_type=jnp.float32)
    o_ref[...] = jnp.maximum(acc + s2_ref[...], 0.0).astype(o_ref.dtype)


def prepare_double_conv_params(torch_like, eps=1e-5):
    """Fold eval-mode BatchNorm into the conv weights (conv has bias=False).

    torch_like = {'w1': (Cmid,Cin,3,3), 'bn1': {gamma,beta,mean,var},
                  'w2': (Cout,Cmid,3,3), 'bn2': {gamma,beta,mean,var}}
    """
    def fold(w, bn):
        scale = bn['gamma'] / jnp.sqrt(bn['var'] + eps)          # (Cout,)
        shift = bn['beta'] - bn['mean'] * scale                  # (Cout,)
        # (Cout,Cin,3,3) -> (3,3,Cin,Cout) -> (9,Cin,Cout); fold scale on Cout.
        w9 = jnp.transpose(w, (2, 3, 1, 0)).reshape(9, w.shape[1], w.shape[0])
        w9 = (w9 * scale[None, None, :]).astype(jnp.bfloat16)
        return w9, shift.reshape(1, -1).astype(jnp.float32)

    w1_9, s1 = fold(torch_like['w1'], torch_like['bn1'])
    w2_9, s2 = fold(torch_like['w2'], torch_like['bn2'])
    return {'w1': w1_9, 's1': s1, 'w2': w2_9, 's2': s2}


@jax.jit
def double_conv_forward(kparams, x):
    """x: (B, Cin, H, W) float32 (PyTorch NCHW) -> (B, Cout, H, W) float32."""
    B, Cin, H, W = x.shape
    Cmid = kparams['w1'].shape[2]
    Cout = kparams['w2'].shape[2]
    Wp = _padded_width(W)          # padded width (>= W+2, alignment friendly)
    M = H * Wp                     # flattened output rows per image
    Lp = (H + 3) * Wp              # (H+2) padded rows + 1 slack row of zeros

    # NCHW -> NHWC once; zero-pad the conv ring (top 1, bottom 1 + 1 slack row,
    # left 1, right Wp-W-1); flatten the spatial grid; cast to bf16 for the MXU.
    x_nhwc = jnp.transpose(x, (0, 2, 3, 1))
    xp = jnp.pad(x_nhwc, ((0, 0), (1, 2), (1, Wp - W - 1), (0, 0)))
    xf = xp.reshape(B, Lp, Cin).astype(jnp.bfloat16)

    # Column-validity mask for the flattened layout (zeroes the pad columns of
    # the conv1 activation so they act as conv2's zero-padding ring).
    cols = jnp.arange(M, dtype=jnp.int32) % Wp
    mask = (cols < W).astype(jnp.float32).reshape(M, 1)

    flops = 2 * B * M * 9 * (Cin * Cmid + Cmid * Cout)
    bytes_accessed = (B * Lp * Cin * 2 + 9 * (Cin * Cmid + Cmid * Cout) * 2
                      + B * M * Cout * 4)

    out_flat = pl.pallas_call(
        functools.partial(_double_conv_kernel, Wp=Wp),
        out_shape=jax.ShapeDtypeStruct((B, M, Cout), jnp.float32),
        grid_spec=pltpu.PrefetchScalarGridSpec(
            num_scalar_prefetch=0,
            grid=(B,),
            in_specs=[
                pl.BlockSpec((None, Lp, Cin), lambda b: (b, 0, 0)),   # image
                pl.BlockSpec((9, Cin, Cmid), lambda b: (0, 0, 0)),    # w1
                pl.BlockSpec((1, Cmid), lambda b: (0, 0)),            # shift1
                pl.BlockSpec((9, Cmid, Cout), lambda b: (0, 0, 0)),   # w2
                pl.BlockSpec((1, Cout), lambda b: (0, 0)),            # shift2
                pl.BlockSpec((M, 1), lambda b: (0, 0)),               # mask
            ],
            out_specs=pl.BlockSpec((None, M, Cout), lambda b: (b, 0, 0)),
            scratch_shapes=[pltpu.VMEM((Lp, Cmid), jnp.float32)],
        ),
        compiler_params=pltpu.CompilerParams(
            dimension_semantics=("parallel",)),
        cost_estimate=pl.CostEstimate(flops=flops, transcendentals=0,
                                      bytes_accessed=bytes_accessed),
    )(xf, kparams['w1'], kparams['s1'], kparams['w2'], kparams['s2'], mask)

    # Drop the alignment/pad columns and go back to PyTorch's NCHW layout.
    out = out_flat.reshape(B, H, Wp, Cout)[:, :, :W, :]
    return jnp.transpose(out, (0, 3, 1, 2))


# ------------------------------------ main ---------------------------------

if __name__ == "__main__":
    B, Cin, H, W = 2, 4, 16, 16
    Cout = 32              # DoubleConv(in=4, out=32); mid_channels defaults to out
    Cmid = Cout

    key = jax.random.PRNGKey(0)
    kw1, kw2, kb1, kb2, kx = jax.random.split(key, 5)

    # Conv weights in the PyTorch (Cout, Cin, kh, kw) layout, bias=False.
    w1 = jax.random.normal(kw1, (Cmid, Cin, 3, 3), jnp.float32) * math.sqrt(2.0 / (Cin * 9))
    w2 = jax.random.normal(kw2, (Cout, Cmid, 3, 3), jnp.float32) * math.sqrt(2.0 / (Cmid * 9))

    def make_bn(k, c):
        k1, k2, k3, k4 = jax.random.split(k, 4)
        return {'gamma': 1.0 + 0.1 * jax.random.normal(k1, (c,), jnp.float32),
                'beta': 0.1 * jax.random.normal(k2, (c,), jnp.float32),
                'mean': 0.1 * jax.random.normal(k3, (c,), jnp.float32),
                'var': 0.5 + jax.random.uniform(k4, (c,), jnp.float32)}

    torch_like = {'w1': w1, 'bn1': make_bn(kb1, Cmid),
                  'w2': w2, 'bn2': make_bn(kb2, Cout)}
    kparams = prepare_double_conv_params(torch_like)

    x = jax.random.normal(kx, (B, Cin, H, W), jnp.float32)

    y = jax.block_until_ready(double_conv_forward(kparams, x))

    assert y.shape == (B, Cout, H, W), y.shape
    assert bool(jnp.all(jnp.isfinite(y)))

    # Pure-JAX reference: eval-mode BN, f32, HIGHEST-precision convs.
    def ref_conv_bn_relu(inp, w, bn, eps=1e-5):
        z = jax.lax.conv_general_dilated(
            inp, w, window_strides=(1, 1), padding=((1, 1), (1, 1)),
            dimension_numbers=('NCHW', 'OIHW', 'NCHW'),
            precision=jax.lax.Precision.HIGHEST)
        scale = bn['gamma'] / jnp.sqrt(bn['var'] + eps)
        shift = bn['beta'] - bn['mean'] * scale
        z = z * scale[None, :, None, None] + shift[None, :, None, None]
        return jnp.maximum(z, 0.0)

    ref = ref_conv_bn_relu(ref_conv_bn_relu(x, w1, torch_like['bn1']),
                           w2, torch_like['bn2'])
    err = float(jnp.max(jnp.abs(y - ref)))
    tol = 0.05 * (float(jnp.max(jnp.abs(ref))) + 1.0)   # bf16-operand tolerance
    assert err <= tol, (err, tol)

    print("KERNEL_OK")
</pallas_src>

<mosaic_0001>
module attributes {stable_mosaic.version = 11 : i64} {
  func.func @_double_conv_kernel(%arg0: i32, %arg1: memref<1x437x4xbf16, #tpu.memory_space<vmem>>, %arg2: memref<9x4x32xbf16, #tpu.memory_space<vmem>>, %arg3: memref<1x32xf32, #tpu.memory_space<vmem>>, %arg4: memref<9x32x32xbf16, #tpu.memory_space<vmem>>, %arg5: memref<1x32xf32, #tpu.memory_space<vmem>>, %arg6: memref<368x1xf32, #tpu.memory_space<vmem>>, %arg7: memref<1x368x32xf32, #tpu.memory_space<vmem>>, %arg8: memref<437x32xf32, #tpu.memory_space<vmem>>) attributes {dimension_semantics = [#tpu.dimension_semantics<parallel>], iteration_bounds = array<i64: 2>, scalar_prefetch = 0 : i64, scratch_operands = 1 : i64, tpu.core_type = #tpu.core_type<tc>, window_params = [{transform_indices = @transform_0, window_bounds = array<i64: 1, 437, 4>}, {pipeline_mode = #tpu.pipeline_mode<synchronous>, transform_indices = @transform_1, window_bounds = array<i64: 9, 4, 32>}, {pipeline_mode = #tpu.pipeline_mode<synchronous>, transform_indices = @transform_2, window_bounds = array<i64: 1, 32>}, {pipeline_mode = #tpu.pipeline_mode<synchronous>, transform_indices = @transform_3, window_bounds = array<i64: 9, 32, 32>}, {pipeline_mode = #tpu.pipeline_mode<synchronous>, transform_indices = @transform_4, window_bounds = array<i64: 1, 32>}, {pipeline_mode = #tpu.pipeline_mode<synchronous>, transform_indices = @transform_5, window_bounds = array<i64: 368, 1>}, {transform_indices = @transform_6, window_bounds = array<i64: 1, 368, 32>}]} {
    %cst = arith.constant 0.000000e+00 : f32
    %0 = vector.broadcast %cst : f32 to vector<368x32xf32>
    %c0 = arith.constant 0 : index
    %c0_0 = arith.constant 0 : index
    %c0_1 = arith.constant 0 : index
    %1 = vector.load %arg1[%c0, %c0_0, %c0_1] : memref<1x437x4xbf16, #tpu.memory_space<vmem>>, vector<1x368x4xbf16>
    %2 = vector.shape_cast %1 : vector<1x368x4xbf16> to vector<368x4xbf16>
    %c0_2 = arith.constant 0 : index
    %c0_3 = arith.constant 0 : index
    %c0_4 = arith.constant 0 : index
    %3 = vector.load %arg2[%c0_2, %c0_3, %c0_4] : memref<9x4x32xbf16, #tpu.memory_space<vmem>>, vector<1x4x32xbf16>
    %4 = vector.shape_cast %3 : vector<1x4x32xbf16> to vector<4x32xbf16>
    %cst_5 = arith.constant dense<0.000000e+00> : vector<368x32xf32>
    %5 = tpu.matmul %2, %4, %cst_5 {dimension_numbers = #tpu.dot_dimension_numbers<[1], [0], [0], [1], [0, 0, 1, 1], [], []>} : vector<368x4xbf16>, vector<4x32xbf16>, vector<368x32xf32> -> vector<368x32xf32>
    %6 = arith.addf %0, %5 : vector<368x32xf32>
    %c0_6 = arith.constant 0 : index
    %c1 = arith.constant 1 : index
    %c0_7 = arith.constant 0 : index
    %7 = vector.load %arg1[%c0_6, %c1, %c0_7] : memref<1x437x4xbf16, #tpu.memory_space<vmem>>, vector<1x368x4xbf16>
    %8 = vector.shape_cast %7 : vector<1x368x4xbf16> to vector<368x4xbf16>
    %c1_8 = arith.constant 1 : index
    %c0_9 = arith.constant 0 : index
    %c0_10 = arith.constant 0 : index
    %9 = vector.load %arg2[%c1_8, %c0_9, %c0_10] : memref<9x4x32xbf16, #tpu.memory_space<vmem>>, vector<1x4x32xbf16>
    %10 = vector.shape_cast %9 : vector<1x4x32xbf16> to vector<4x32xbf16>
    %cst_11 = arith.constant dense<0.000000e+00> : vector<368x32xf32>
    %11 = tpu.matmul %8, %10, %cst_11 {dimension_numbers = #tpu.dot_dimension_numbers<[1], [0], [0], [1], [0, 0, 1, 1], [], []>} : vector<368x4xbf16>, vector<4x32xbf16>, vector<368x32xf32> -> vector<368x32xf32>
    %12 = arith.addf %6, %11 : vector<368x32xf32>
    %c0_12 = arith.constant 0 : index
    %c2 = arith.constant 2 : index
    %c0_13 = arith.constant 0 : index
    %13 = vector.load %arg1[%c0_12, %c2, %c0_13] : memref<1x437x4xbf16, #tpu.memory_space<vmem>>, vector<1x368x4xbf16>
    %14 = vector.shape_cast %13 : vector<1x368x4xbf16> to vector<368x4xbf16>
    %c2_14 = arith.constant 2 : index
    %c0_15 = arith.constant 0 : index
    %c0_16 = arith.constant 0 : index
    %15 = vector.load %arg2[%c2_14, %c0_15, %c0_16] : memref<9x4x32xbf16, #tpu.memory_space<vmem>>, vector<1x4x32xbf16>
    %16 = vector.shape_cast %15 : vector<1x4x32xbf16> to vector<4x32xbf16>
    %cst_17 = arith.constant dense<0.000000e+00> : vector<368x32xf32>
    %17 = tpu.matmul %14, %16, %cst_17 {dimension_numbers = #tpu.dot_dimension_numbers<[1], [0], [0], [1], [0, 0, 1, 1], [], []>} : vector<368x4xbf16>, vector<4x32xbf16>, vector<368x32xf32> -> vector<368x32xf32>
    %18 = arith.addf %12, %17 : vector<368x32xf32>
    %c0_18 = arith.constant 0 : index
    %c23 = arith.constant 23 : index
    %c0_19 = arith.constant 0 : index
    %19 = vector.load %arg1[%c0_18, %c23, %c0_19] : memref<1x437x4xbf16, #tpu.memory_space<vmem>>, vector<1x368x4xbf16>
    %20 = vector.shape_cast %19 : vector<1x368x4xbf16> to vector<368x4xbf16>
    %c3 = arith.constant 3 : index
    %c0_20 = arith.constant 0 : index
    %c0_21 = arith.constant 0 : index
    %21 = vector.load %arg2[%c3, %c0_20, %c0_21] : memref<9x4x32xbf16, #tpu.memory_space<vmem>>, vector<1x4x32xbf16>
    %22 = vector.shape_cast %21 : vector<1x4x32xbf16> to vector<4x32xbf16>
    %cst_22 = arith.constant dense<0.000000e+00> : vector<368x32xf32>
    %23 = tpu.matmul %20, %22, %cst_22 {dimension_numbers = #tpu.dot_dimension_numbers<[1], [0], [0], [1], [0, 0, 1, 1], [], []>} : vector<368x4xbf16>, vector<4x32xbf16>, vector<368x32xf32> -> vector<368x32xf32>
    %24 = arith.addf %18, %23 : vector<368x32xf32>
    %c0_23 = arith.constant 0 : index
    %c24 = arith.constant 24 : index
    %c0_24 = arith.constant 0 : index
    %25 = vector.load %arg1[%c0_23, %c24, %c0_24] : memref<1x437x4xbf16, #tpu.memory_space<vmem>>, vector<1x368x4xbf16>
    %26 = vector.shape_cast %25 : vector<1x368x4xbf16> to vector<368x4xbf16>
    %c4 = arith.constant 4 : index
    %c0_25 = arith.constant 0 : index
    %c0_26 = arith.constant 0 : index
    %27 = vector.load %arg2[%c4, %c0_25, %c0_26] : memref<9x4x32xbf16, #tpu.memory_space<vmem>>, vector<1x4x32xbf16>
    %28 = vector.shape_cast %27 : vector<1x4x32xbf16> to vector<4x32xbf16>
    %cst_27 = arith.constant dense<0.000000e+00> : vector<368x32xf32>
    %29 = tpu.matmul %26, %28, %cst_27 {dimension_numbers = #tpu.dot_dimension_numbers<[1], [0], [0], [1], [0, 0, 1, 1], [], []>} : vector<368x4xbf16>, vector<4x32xbf16>, vector<368x32xf32> -> vector<368x32xf32>
    %30 = arith.addf %24, %29 : vector<368x32xf32>
    %c0_28 = arith.constant 0 : index
    %c25 = arith.constant 25 : index
    %c0_29 = arith.constant 0 : index
    %31 = vector.load %arg1[%c0_28, %c25, %c0_29] : memref<1x437x4xbf16, #tpu.memory_space<vmem>>, vector<1x368x4xbf16>
    %32 = vector.shape_cast %31 : vector<1x368x4xbf16> to vector<368x4xbf16>
    %c5 = arith.constant 5 : index
    %c0_30 = arith.constant 0 : index
    %c0_31 = arith.constant 0 : index
    %33 = vector.load %arg2[%c5, %c0_30, %c0_31] : memref<9x4x32xbf16, #tpu.memory_space<vmem>>, vector<1x4x32xbf16>
    %34 = vector.shape_cast %33 : vector<1x4x32xbf16> to vector<4x32xbf16>
    %cst_32 = arith.constant dense<0.000000e+00> : vector<368x32xf32>
    %35 = tpu.matmul %32, %34, %cst_32 {dimension_numbers = #tpu.dot_dimension_numbers<[1], [0], [0], [1], [0, 0, 1, 1], [], []>} : vector<368x4xbf16>, vector<4x32xbf16>, vector<368x32xf32> -> vector<368x32xf32>
    %36 = arith.addf %30, %35 : vector<368x32xf32>
    %c0_33 = arith.constant 0 : index
    %c46 = arith.constant 46 : index
    %c0_34 = arith.constant 0 : index
    %37 = vector.load %arg1[%c0_33, %c46, %c0_34] : memref<1x437x4xbf16, #tpu.memory_space<vmem>>, vector<1x368x4xbf16>
    %38 = vector.shape_cast %37 : vector<1x368x4xbf16> to vector<368x4xbf16>
    %c6 = arith.constant 6 : index
    %c0_35 = arith.constant 0 : index
    %c0_36 = arith.constant 0 : index
    %39 = vector.load %arg2[%c6, %c0_35, %c0_36] : memref<9x4x32xbf16, #tpu.memory_space<vmem>>, vector<1x4x32xbf16>
    %40 = vector.shape_cast %39 : vector<1x4x32xbf16> to vector<4x32xbf16>
    %cst_37 = arith.constant dense<0.000000e+00> : vector<368x32xf32>
    %41 = tpu.matmul %38, %40, %cst_37 {dimension_numbers = #tpu.dot_dimension_numbers<[1], [0], [0], [1], [0, 0, 1, 1], [], []>} : vector<368x4xbf16>, vector<4x32xbf16>, vector<368x32xf32> -> vector<368x32xf32>
    %42 = arith.addf %36, %41 : vector<368x32xf32>
    %c0_38 = arith.constant 0 : index
    %c47 = arith.constant 47 : index
    %c0_39 = arith.constant 0 : index
    %43 = vector.load %arg1[%c0_38, %c47, %c0_39] : memref<1x437x4xbf16, #tpu.memory_space<vmem>>, vector<1x368x4xbf16>
    %44 = vector.shape_cast %43 : vector<1x368x4xbf16> to vector<368x4xbf16>
    %c7 = arith.constant 7 : index
    %c0_40 = arith.constant 0 : index
    %c0_41 = arith.constant 0 : index
    %45 = vector.load %arg2[%c7, %c0_40, %c0_41] : memref<9x4x32xbf16, #tpu.memory_space<vmem>>, vector<1x4x32xbf16>
    %46 = vector.shape_cast %45 : vector<1x4x32xbf16> to vector<4x32xbf16>
    %cst_42 = arith.constant dense<0.000000e+00> : vector<368x32xf32>
    %47 = tpu.matmul %44, %46, %cst_42 {dimension_numbers = #tpu.dot_dimension_numbers<[1], [0], [0], [1], [0, 0, 1, 1], [], []>} : vector<368x4xbf16>, vector<4x32xbf16>, vector<368x32xf32> -> vector<368x32xf32>
    %48 = arith.addf %42, %47 : vector<368x32xf32>
    %c0_43 = arith.constant 0 : index
    %c48 = arith.constant 48 : index
    %c0_44 = arith.constant 0 : index
    %49 = vector.load %arg1[%c0_43, %c48, %c0_44] : memref<1x437x4xbf16, #tpu.memory_space<vmem>>, vector<1x368x4xbf16>
    %50 = vector.shape_cast %49 : vector<1x368x4xbf16> to vector<368x4xbf16>
    %c8 = arith.constant 8 : index
    %c0_45 = arith.constant 0 : index
    %c0_46 = arith.constant 0 : index
    %51 = vector.load %arg2[%c8, %c0_45, %c0_46] : memref<9x4x32xbf16, #tpu.memory_space<vmem>>, vector<1x4x32xbf16>
    %52 = vector.shape_cast %51 : vector<1x4x32xbf16> to vector<4x32xbf16>
    %cst_47 = arith.constant dense<0.000000e+00> : vector<368x32xf32>
    %53 = tpu.matmul %50, %52, %cst_47 {dimension_numbers = #tpu.dot_dimension_numbers<[1], [0], [0], [1], [0, 0, 1, 1], [], []>} : vector<368x4xbf16>, vector<4x32xbf16>, vector<368x32xf32> -> vector<368x32xf32>
    %54 = arith.addf %48, %53 : vector<368x32xf32>
    %c0_48 = arith.constant 0 : index
    %c0_49 = arith.constant 0 : index
    %55 = vector.load %arg3[%c0_48, %c0_49] : memref<1x32xf32, #tpu.memory_space<vmem>>, vector<1x32xf32>
    %56 = vector.broadcast %55 : vector<1x32xf32> to vector<368x32xf32>
    %57 = arith.addf %54, %56 : vector<368x32xf32>
    %cst_50 = arith.constant 0.000000e+00 : f32
    %58 = vector.broadcast %cst_50 : f32 to vector<368x32xf32>
    %59 = arith.maximumf %57, %58 : vector<368x32xf32>
    %c0_51 = arith.constant 0 : index
    %c0_52 = arith.constant 0 : index
    %60 = vector.load %arg6[%c0_51, %c0_52] : memref<368x1xf32, #tpu.memory_space<vmem>>, vector<368x1xf32>
    %61 = vector.broadcast %60 : vector<368x1xf32> to vector<368x32xf32>
    %62 = arith.mulf %59, %61 : vector<368x32xf32>
    %cst_53 = arith.constant 0.000000e+00 : f32
    %63 = vector.broadcast %cst_53 : f32 to vector<437x32xf32>
    %c0_54 = arith.constant 0 : index
    %c0_55 = arith.constant 0 : index
    %64 = vector.load %arg8[%c0_54, %c0_55] : memref<437x32xf32, #tpu.memory_space<vmem>>, vector<437x32xf32>
    tpu.vector_store %arg8[%c0_54, %c0_55], %63 {strides = array<i32>} : memref<437x32xf32, #tpu.memory_space<vmem>>, vector<437x32xf32>,
    %c24_56 = arith.constant 24 : index
    %c0_57 = arith.constant 0 : index
    %65 = vector.load %arg8[%c24_56, %c0_57] : memref<437x32xf32, #tpu.memory_space<vmem>>, vector<368x32xf32>
    tpu.vector_store %arg8[%c24_56, %c0_57], %62 {strides = array<i32>} : memref<437x32xf32, #tpu.memory_space<vmem>>, vector<368x32xf32>,
    %cst_58 = arith.constant 0.000000e+00 : f32
    %66 = vector.broadcast %cst_58 : f32 to vector<368x32xf32>
    %c0_59 = arith.constant 0 : index
    %c0_60 = arith.constant 0 : index
    %67 = vector.load %arg8[%c0_59, %c0_60] : memref<437x32xf32, #tpu.memory_space<vmem>>, vector<368x32xf32>
    %68 = arith.truncf %67 : vector<368x32xf32> to vector<368x32xbf16>
    %c0_61 = arith.constant 0 : index
    %c0_62 = arith.constant 0 : index
    %c0_63 = arith.constant 0 : index
    %69 = vector.load %arg4[%c0_61, %c0_62, %c0_63] : memref<9x32x32xbf16, #tpu.memory_space<vmem>>, vector<1x32x32xbf16>
    %70 = vector.shape_cast %69 : vector<1x32x32xbf16> to vector<32x32xbf16>
    %cst_64 = arith.constant dense<0.000000e+00> : vector<368x32xf32>
    %71 = tpu.matmul %68, %70, %cst_64 {dimension_numbers = #tpu.dot_dimension_numbers<[1], [0], [0], [1], [0, 0, 1, 1], [], []>} : vector<368x32xbf16>, vector<32x32xbf16>, vector<368x32xf32> -> vector<368x32xf32>
    %72 = arith.addf %66, %71 : vector<368x32xf32>
    %c1_65 = arith.constant 1 : index
    %c0_66 = arith.constant 0 : index
    %73 = vector.load %arg8[%c1_65, %c0_66] : memref<437x32xf32, #tpu.memory_space<vmem>>, vector<368x32xf32>
    %74 = arith.truncf %73 : vector<368x32xf32> to vector<368x32xbf16>
    %c1_67 = arith.constant 1 : index
    %c0_68 = arith.constant 0 : index
    %c0_69 = arith.constant 0 : index
    %75 = vector.load %arg4[%c1_67, %c0_68, %c0_69] : memref<9x32x32xbf16, #tpu.memory_space<vmem>>, vector<1x32x32xbf16>
    %76 = vector.shape_cast %75 : vector<1x32x32xbf16> to vector<32x32xbf16>
    %cst_70 = arith.constant dense<0.000000e+00> : vector<368x32xf32>
    %77 = tpu.matmul %74, %76, %cst_70 {dimension_numbers = #tpu.dot_dimension_numbers<[1], [0], [0], [1], [0, 0, 1, 1], [], []>} : vector<368x32xbf16>, vector<32x32xbf16>, vector<368x32xf32> -> vector<368x32xf32>
    %78 = arith.addf %72, %77 : vector<368x32xf32>
    %c2_71 = arith.constant 2 : index
    %c0_72 = arith.constant 0 : index
    %79 = vector.load %arg8[%c2_71, %c0_72] : memref<437x32xf32, #tpu.memory_space<vmem>>, vector<368x32xf32>
    %80 = arith.truncf %79 : vector<368x32xf32> to vector<368x32xbf16>
    %c2_73 = arith.constant 2 : index
    %c0_74 = arith.constant 0 : index
    %c0_75 = arith.constant 0 : index
    %81 = vector.load %arg4[%c2_73, %c0_74, %c0_75] : memref<9x32x32xbf16, #tpu.memory_space<vmem>>, vector<1x32x32xbf16>
    %82 = vector.shape_cast %81 : vector<1x32x32xbf16> to vector<32x32xbf16>
    %cst_76 = arith.constant dense<0.000000e+00> : vector<368x32xf32>
    %83 = tpu.matmul %80, %82, %cst_76 {dimension_numbers = #tpu.dot_dimension_numbers<[1], [0], [0], [1], [0, 0, 1, 1], [], []>} : vector<368x32xbf16>, vector<32x32xbf16>, vector<368x32xf32> -> vector<368x32xf32>
    %84 = arith.addf %78, %83 : vector<368x32xf32>
    %c23_77 = arith.constant 23 : index
    %c0_78 = arith.constant 0 : index
    %85 = vector.load %arg8[%c23_77, %c0_78] : memref<437x32xf32, #tpu.memory_space<vmem>>, vector<368x32xf32>
    %86 = arith.truncf %85 : vector<368x32xf32> to vector<368x32xbf16>
    %c3_79 = arith.constant 3 : index
    %c0_80 = arith.constant 0 : index
    %c0_81 = arith.constant 0 : index
    %87 = vector.load %arg4[%c3_79, %c0_80, %c0_81] : memref<9x32x32xbf16, #tpu.memory_space<vmem>>, vector<1x32x32xbf16>
    %88 = vector.shape_cast %87 : vector<1x32x32xbf16> to vector<32x32xbf16>
    %cst_82 = arith.constant dense<0.000000e+00> : vector<368x32xf32>
    %89 = tpu.matmul %86, %88, %cst_82 {dimension_numbers = #tpu.dot_dimension_numbers<[1], [0], [0], [1], [0, 0, 1, 1], [], []>} : vector<368x32xbf16>, vector<32x32xbf16>, vector<368x32xf32> -> vector<368x32xf32>
    %90 = arith.addf %84, %89 : vector<368x32xf32>
    %c24_83 = arith.constant 24 : index
    %c0_84 = arith.constant 0 : index
    %91 = vector.load %arg8[%c24_83, %c0_84] : memref<437x32xf32, #tpu.memory_space<vmem>>, vector<368x32xf32>
    %92 = arith.truncf %91 : vector<368x32xf32> to vector<368x32xbf16>
    %c4_85 = arith.constant 4 : index
    %c0_86 = arith.constant 0 : index
    %c0_87 = arith.constant 0 : index
    %93 = vector.load %arg4[%c4_85, %c0_86, %c0_87] : memref<9x32x32xbf16, #tpu.memory_space<vmem>>, vector<1x32x32xbf16>
    %94 = vector.shape_cast %93 : vector<1x32x32xbf16> to vector<32x32xbf16>
    %cst_88 = arith.constant dense<0.000000e+00> : vector<368x32xf32>
    %95 = tpu.matmul %92, %94, %cst_88 {dimension_numbers = #tpu.dot_dimension_numbers<[1], [0], [0], [1], [0, 0, 1, 1], [], []>} : vector<368x32xbf16>, vector<32x32xbf16>, vector<368x32xf32> -> vector<368x32xf32>
    %96 = arith.addf %90, %95 : vector<368x32xf32>
    %c25_89 = arith.constant 25 : index
    %c0_90 = arith.constant 0 : index
    %97 = vector.load %arg8[%c25_89, %c0_90] : memref<437x32xf32, #tpu.memory_space<vmem>>, vector<368x32xf32>
    %98 = arith.truncf %97 : vector<368x32xf32> to vector<368x32xbf16>
    %c5_91 = arith.constant 5 : index
    %c0_92 = arith.constant 0 : index
    %c0_93 = arith.constant 0 : index
    %99 = vector.load %arg4[%c5_91, %c0_92, %c0_93] : memref<9x32x32xbf16, #tpu.memory_space<vmem>>, vector<1x32x32xbf16>
    %100 = vector.shape_cast %99 : vector<1x32x32xbf16> to vector<32x32xbf16>
    %cst_94 = arith.constant dense<0.000000e+00> : vector<368x32xf32>
    %101 = tpu.matmul %98, %100, %cst_94 {dimension_numbers = #tpu.dot_dimension_numbers<[1], [0], [0], [1], [0, 0, 1, 1], [], []>} : vector<368x32xbf16>, vector<32x32xbf16>, vector<368x32xf32> -> vector<368x32xf32>
    %102 = arith.addf %96, %101 : vector<368x32xf32>
    %c46_95 = arith.constant 46 : index
    %c0_96 = arith.constant 0 : index
    %103 = vector.load %arg8[%c46_95, %c0_96] : memref<437x32xf32, #tpu.memory_space<vmem>>, vector<368x32xf32>
    %104 = arith.truncf %103 : vector<368x32xf32> to vector<368x32xbf16>
    %c6_97 = arith.constant 6 : index
    %c0_98 = arith.constant 0 : index
    %c0_99 = arith.constant 0 : index
    %105 = vector.load %arg4[%c6_97, %c0_98, %c0_99] : memref<9x32x32xbf16, #tpu.memory_space<vmem>>, vector<1x32x32xbf16>
    %106 = vector.shape_cast %105 : vector<1x32x32xbf16> to vector<32x32xbf16>
    %cst_100 = arith.constant dense<0.000000e+00> : vector<368x32xf32>
    %107 = tpu.matmul %104, %106, %cst_100 {dimension_numbers = #tpu.dot_dimension_numbers<[1], [0], [0], [1], [0, 0, 1, 1], [], []>} : vector<368x32xbf16>, vector<32x32xbf16>, vector<368x32xf32> -> vector<368x32xf32>
    %108 = arith.addf %102, %107 : vector<368x32xf32>
    %c47_101 = arith.constant 47 : index
    %c0_102 = arith.constant 0 : index
    %109 = vector.load %arg8[%c47_101, %c0_102] : memref<437x32xf32, #tpu.memory_space<vmem>>, vector<368x32xf32>
    %110 = arith.truncf %109 : vector<368x32xf32> to vector<368x32xbf16>
    %c7_103 = arith.constant 7 : index
    %c0_104 = arith.constant 0 : index
    %c0_105 = arith.constant 0 : index
    %111 = vector.load %arg4[%c7_103, %c0_104, %c0_105] : memref<9x32x32xbf16, #tpu.memory_space<vmem>>, vector<1x32x32xbf16>
    %112 = vector.shape_cast %111 : vector<1x32x32xbf16> to vector<32x32xbf16>
    %cst_106 = arith.constant dense<0.000000e+00> : vector<368x32xf32>
    %113 = tpu.matmul %110, %112, %cst_106 {dimension_numbers = #tpu.dot_dimension_numbers<[1], [0], [0], [1], [0, 0, 1, 1], [], []>} : vector<368x32xbf16>, vector<32x32xbf16>, vector<368x32xf32> -> vector<368x32xf32>
    %114 = arith.addf %108, %113 : vector<368x32xf32>
    %c48_107 = arith.constant 48 : index
    %c0_108 = arith.constant 0 : index
    %115 = vector.load %arg8[%c48_107, %c0_108] : memref<437x32xf32, #tpu.memory_space<vmem>>, vector<368x32xf32>
    %116 = arith.truncf %115 : vector<368x32xf32> to vector<368x32xbf16>
    %c8_109 = arith.constant 8 : index
    %c0_110 = arith.constant 0 : index
    %c0_111 = arith.constant 0 : index
    %117 = vector.load %arg4[%c8_109, %c0_110, %c0_111] : memref<9x32x32xbf16, #tpu.memory_space<vmem>>, vector<1x32x32xbf16>
    %118 = vector.shape_cast %117 : vector<1x32x32xbf16> to vector<32x32xbf16>
    %cst_112 = arith.constant dense<0.000000e+00> : vector<368x32xf32>
    %119 = tpu.matmul %116, %118, %cst_112 {dimension_numbers = #tpu.dot_dimension_numbers<[1], [0], [0], [1], [0, 0, 1, 1], [], []>} : vector<368x32xbf16>, vector<32x32xbf16>, vector<368x32xf32> -> vector<368x32xf32>
    %120 = arith.addf %114, %119 : vector<368x32xf32>
    %c0_113 = arith.constant 0 : index
    %c0_114 = arith.constant 0 : index
    %121 = vector.load %arg5[%c0_113, %c0_114] : memref<1x32xf32, #tpu.memory_space<vmem>>, vector<1x32xf32>
    %122 = vector.broadcast %121 : vector<1x32xf32> to vector<368x32xf32>
    %123 = arith.addf %120, %122 : vector<368x32xf32>
    %cst_115 = arith.constant 0.000000e+00 : f32
    %124 = vector.broadcast %cst_115 : f32 to vector<368x32xf32>
    %125 = arith.maximumf %123, %124 : vector<368x32xf32>
    %c0_116 = arith.constant 0 : index
    %c0_117 = arith.constant 0 : index
    %c0_118 = arith.constant 0 : index
    %126 = vector.load %arg7[%c0_116, %c0_117, %c0_118] : memref<1x368x32xf32, #tpu.memory_space<vmem>>, vector<1x368x32xf32>
    %127 = vector.shape_cast %126 : vector<1x368x32xf32> to vector<368x32xf32>
    %128 = vector.shape_cast %125 : vector<368x32xf32> to vector<1x368x32xf32>
    tpu.vector_store %arg7[%c0_116, %c0_117, %c0_118], %128 {strides = array<i32>} : memref<1x368x32xf32, #tpu.memory_space<vmem>>, vector<1x368x32xf32>,
    return
  }
  func.func @transform_0(%arg0: i32) -> (i32, i32, i32) {
    %c0_i32 = arith.constant 0 : i32
    %c0_i32_0 = arith.constant 0 : i32
    %c0_i32_1 = arith.constant 0 : i32
    return %arg0, %c0_i32, %c0_i32_0 : i32, i32, i32
  }
  func.func @transform_1(%arg0: i32) -> (i32, i32, i32) {
    %c0_i32 = arith.constant 0 : i32
    %c0_i32_0 = arith.constant 0 : i32
    %c0_i32_1 = arith.constant 0 : i32
    %c0_i32_2 = arith.constant 0 : i32
    return %c0_i32, %c0_i32_0, %c0_i32_1 : i32, i32, i32
  }
  func.func @transform_2(%arg0: i32) -> (i32, i32) {
    %c0_i32 = arith.constant 0 : i32
    %c0_i32_0 = arith.constant 0 : i32
    %c0_i32_1 = arith.constant 0 : i32
    return %c0_i32, %c0_i32_0 : i32, i32
  }
  func.func @transform_3(%arg0: i32) -> (i32, i32, i32) {
    %c0_i32 = arith.constant 0 : i32
    %c0_i32_0 = arith.constant 0 : i32
    %c0_i32_1 = arith.constant 0 : i32
    %c0_i32_2 = arith.constant 0 : i32
    return %c0_i32, %c0_i32_0, %c0_i32_1 : i32, i32, i32
  }
  func.func @transform_4(%arg0: i32) -> (i32, i32) {
    %c0_i32 = arith.constant 0 : i32
    %c0_i32_0 = arith.constant 0 : i32
    %c0_i32_1 = arith.constant 0 : i32
    return %c0_i32, %c0_i32_0 : i32, i32
  }
  func.func @transform_5(%arg0: i32) -> (i32, i32) {
    %c0_i32 = arith.constant 0 : i32
    %c0_i32_0 = arith.constant 0 : i32
    %c0_i32_1 = arith.constant 0 : i32
    return %c0_i32, %c0_i32_0 : i32, i32
  }
  func.func @transform_6(%arg0: i32) -> (i32, i32, i32) {
    %c0_i32 = arith.constant 0 : i32
    %c0_i32_0 = arith.constant 0 : i32
    %c0_i32_1 = arith.constant 0 : i32
    return %arg0, %c0_i32, %c0_i32_0 : i32, i32, i32
  }
}

</mosaic_0001>

<bundles_post_ra>
// kernel: double_conv_forward.1
= control target key start
LH: loop header
LB: loop body
LE: loop exit
PB: predicated region body
PF: predicated region fallthrough
CT: control target
= control target key end

     0   :  { %s8917_s21 = smov 0   ;;  %s11521_s0 = inlined_call_operand.vmem [shape: bf16[2,437,4], index: 0, kind: input, shape index: {}]   ;;  %s11522_s1 = inlined_call_operand.vmem [shape: bf16[9,4,32], index: 1, kind: input, shape index: {}]   ;;  %s11523_s2 = inlined_call_operand.vmem [shape: f32[1,32], index: 2, kind: input, shape index: {}]   ;;  %s11524_s3 = inlined_call_operand.vmem [shape: bf16[9,32,32], index: 3, kind: input, shape index: {}]   ;;  %s11525_s4 = inlined_call_operand.vmem [shape: f32[1,32], index: 4, kind: input, shape index: {}]   ;;  %s11526_s5 = inlined_call_operand.vmem [shape: f32[368,1], index: 5, kind: input, shape index: {}]   ;;  %s11527_s6 = inlined_call_operand.vmem [shape: f32[2,368,32], index: 6, kind: output, shape index: {}]  }
   0x1 LB: > { %s7503_s22 = sadd.s32 4294967295, %s8878_s21   ;;  %p7507_p0 = scmp.ge.s32.totalorder %s8878_s21, 1  ;;  %s8878_s21 = sphi %s8917_s21, %s16_s21  }
   0x2   : > { %p212_p1 = scmp.lt.s32.totalorder %s8878_s21, 3 }
   0x4   : > { %p213_p2 = pnand %p7507_p0, %p212_p1 }
   0x6   : > { %216 = sbr.rel (%p213_p2) target bundleno = 1951 (0x79f), region = 44 }
   0xb   : > { %v299_v0 = vld [vmem:[%s11522_s1] sm:$0x3]  ;;  %vm680_vm0 = vcmask 1041408   ;;  %p242_p3 = scmp.lt.s32.totalorder %s7503_s22, 1  ;;  %v7510_v2 = vld [vmem:[%s11522_s1 + $0x2] sm:$0x3] }
   0xc   : > { %v855_v1 = vsel %vm680_vm0, %v299_v0, 0  ;;  %v682_v3 = vsel %vm680_vm0, %v7510_v2, 0  ;;  %v7693_v4 = vld [vmem:[%s11522_s1 + $0x8] sm:$0x3]  ;;  %v7645_v5 = vld [vmem:[%s11522_s1 + $0x4] sm:$0x3] }
   0xd   : > { %8765 = vmatpush.bf16.msra.mxu3 %v855_v1  ;;  %s11724_s22 = smov (!%p242_p3, %s7503_s22), 1  ;;  %864 = vmatpush.bf16.msra.mxu1 %v855_v1  ;;  %v1997_v6 = vsel %vm680_vm0, %v7693_v4, 0  ;;  %v1105_v7 = vsel %vm680_vm0, %v7645_v5, 0  ;;  %v7669_v8 = vld [vmem:[%s11522_s1 + $0x6] sm:$0x3]  ;;  %vm610_vm1 = vcmask 31744  }
   0xe   : > { %691 = vmatpush.bf16.msra.mxu0 %v682_v3  ;;  %8764 = vmatpush.bf16.msra.mxu2 %v682_v3  ;;  %s8809_s9 = smul.u32 220, %s11724_s22  ;;  %v1730_v9 = vsel %vm680_vm0, %v7669_v8, 0  ;;  %vm421_vm2 = vsmask.f32 7424  ;;  %vm1444_vm3 = vsmask.f32 4352 }
   0xf   : > { %vm987_vm4 = vcmask 1046528   ;;  %vm2933_vm5 = vcmask 1044480   ;;  %vm4371_vm6 = vcmask 261120   ;;  %s8810_s30 = smul.u32 368, %s11724_s22 }
  0x10   : > { %s8951_s12 = scalar_lea.vmem %s11521_s0, %s8809_s9 }
  0x11   : > { %1739 = vmatpush.bf16.msrb.mxu3 %v1730_v9  ;;  %v8229_v10 = vld [vmem:[%s8951_s12 + $0x60] sm:$0xff]  ;;  %v8956_v12 = vld [vmem:[%s8951_s12 + $0x8] sm:$0xff]  ;;  %v8970_v28 = vld [vmem:[%s8951_s12 + $0x10] sm:$0xff]  ;;  %s11291_s9 = scalar_lea.vmem %s11527_s6, %s8810_s30 }
  0x12   : > { %2006 = vmatpush.bf16.msrb.mxu0 %v1997_v6  ;;  %1114 = vmatpush.bf16.msrb.mxu2 %v1105_v7  ;;  %v8282_v11 = vld [vmem:[%s8951_s12] sm:$0xff]   ;;  %v8230_v15 = vld [vmem:[%s8951_s12 + $0x68] sm:$0xff]  ;;  %v430_v16 = vshll.u32 %v8956_v12, 16  ;;  %v518_v17 = vshll.u32 %v8229_v10, 16  ;;  %v522_v18 = vshrl.u32 %v8229_v10, 16  ;;  %v8231_v29 = vld [vmem:[%s8951_s12 + $0x70] sm:$0xff] }
  0x13   : > { %v423_v13 = vshrl.u32 %v8282_v11, 16  ;;  %v425_v14 = vshll.u32 %v8282_v11, 16  ;;  %7622 = vmatmul.msk.bf16.vlgmr.msra.gmra.mxu1 %vm610_vm1, %v8282_v11  ;;  %7634 = vmatmul.msk.bf16.vlgmr.msra.gmra.mxu3 %vm610_vm1, %v8229_v10  ;;  %v526_v20 = vshll.u32 %v8230_v15, 16  ;;  %v434_v30 = vshrl.u32 %v8956_v12, 16  ;;  %v8983_v40 = vld [vmem:[%s8951_s12 + $0x18] sm:$0xff]  ;;  %v8996_v52 = vld [vmem:[%s8951_s12 + $0x20] sm:$0xff] }
  0x14   : > { %v432_v21 = vrot.slane %v430_v16, 1  ;;  %v8962_v22 = vrot.slane %v518_v17, 1  ;;  %v438_v31 = vshll.u32 %v8970_v28, 16  ;;  %v530_v32 = vshrl.u32 %v8230_v15, 16  ;;  %v8232_v41 = vld [vmem:[%s8951_s12 + $0x78] sm:$0xff]  ;;  %v8233_v53 = vld [vmem:[%s8951_s12 + $0x80] sm:$0xff] }
  0x15   : > { %v427_v19 = vrot.slane %v425_v14, 1  ;;  %v528_v24 = vrot.slane %v526_v20, 1  ;;  %v534_v33 = vshll.u32 %v8231_v29, 16  ;;  %v442_v42 = vshrl.u32 %v8970_v28, 16  ;;  %v9009_v0 = vld [vmem:[%s8951_s12 + $0x28] sm:$0xff]  ;;  %v8235_v14 = vld [vmem:[%s8951_s12 + $0x90] sm:$0xff] }
  0x16   : > { %v524_v25 = vor.u32 %v522_v18, %v8962_v22  ;;  %v436_v34 = vor.u32 %v434_v30, %v432_v21  ;;  %v440_v35 = vrot.slane %v438_v31, 1  ;;  %v446_v43 = vshll.u32 %v8983_v40, 16  ;;  %v8234_v1 = vld [vmem:[%s8951_s12 + $0x88] sm:$0xff] }
  0x17   : > { %v428_v23 = vor.u32 %v427_v19, %v423_v13  ;;  %v532_v36 = vor.u32 %v530_v32, %v528_v24  ;;  %v536_v37 = vrot.slane %v534_v33, 1  ;;  %v538_v44 = vshrl.u32 %v8231_v29, 16  ;;  %v9022_v13 = vld [vmem:[%s8951_s12 + $0x30] sm:$0xff] }
  0x18   : > { %v529_v27 = vsel %vm421_vm2, %v524_v25, %v528_v24  ;;  %v441_v38 = vsel %vm421_vm2, %v436_v34, %v440_v35  ;;  %v542_v45 = vshll.u32 %v8232_v41, 16  ;;  %v444_v46 = vor.u32 %v442_v42, %v440_v35 }
  0x19   : > { %v433_v26 = vsel %vm421_vm2, %v428_v23, %v432_v21  ;;  %7611 = vmatmul.msk.bf16.vlgmr.msra.gmra.mxu2 %vm610_vm1, %v529_v27  ;;  %v537_v39 = vsel %vm421_vm2, %v532_v36, %v536_v37  ;;  %v448_v47 = vrot.slane %v446_v43, 1  ;;  %v540_v48 = vor.u32 %v538_v44, %v536_v37  ;;  %v8236_v27 = vld [vmem:[%s8951_s12 + $0x98] sm:$0xff] }
  0x1a   : > { %7599 = vmatmul.msk.bf16.vlgmr.msra.gmra.mxu0 %vm610_vm1, %v433_v26  ;;  %v544_v49 = vrot.slane %v542_v45, 1  ;;  %v450_v54 = vshrl.u32 %v8983_v40, 16  ;;  %v454_v55 = vshll.u32 %v8996_v52, 16  ;;  %v546_v56 = vshrl.u32 %v8232_v41, 16  ;;  %v9035_v26 = vld [vmem:[%s8951_s12 + $0x38] sm:$0xff] }
  0x1b   : > { %v449_v50 = vsel %vm421_vm2, %v444_v46, %v448_v47  ;;  %v550_v57 = vshll.u32 %v8233_v53, 16  ;;  %v458_v2 = vshrl.u32 %v8996_v52, 16  ;;  %v462_v3 = vshll.u32 %v9009_v0, 16  ;;  %v7717_v46 = vld [vmem:[%s11522_s1 + $0xa] sm:$0x3] }
  0x1c   : > { %v545_v51 = vsel %vm421_vm2, %v540_v48, %v544_v49  ;;  %v452_v58 = vor.u32 %v450_v54, %v448_v47  ;;  %v456_v59 = vrot.slane %v454_v55, 1  ;;  %v548_v60 = vor.u32 %v546_v56, %v544_v49  ;;  %v9065_v55 = vld [vmem:[%s8951_s12 + $0x48] sm:$0xff] }
  0x1d   : > { %v552_v61 = vrot.slane %v550_v57, 1  ;;  %v554_v4 = vshrl.u32 %v8233_v53, 16  ;;  %v558_v5 = vshll.u32 %v8234_v1, 16  ;;  %v464_v7 = vrot.slane %v462_v3, 1  ;;  %v8238_v56 = vld [vmem:[%s8951_s12 + $0xa8] sm:$0xff] }
  0x1e   : > { %v457_v62 = vsel %vm421_vm2, %v452_v58, %v456_v59  ;;  %v460_v6 = vor.u32 %v458_v2, %v456_v59  ;;  %v470_v16 = vshll.u32 %v9022_v13, 16  ;;  %v562_v17 = vshrl.u32 %v8234_v1, 16 }
  0x1f   : > { %v553_v63 = vsel %vm421_vm2, %v548_v60, %v552_v61  ;;  %v556_v8 = vor.u32 %v554_v4, %v552_v61  ;;  %v560_v9 = vrot.slane %v558_v5, 1  ;;  %v566_v18 = vshll.u32 %v8235_v14, 16 }
  0x20   : > { %v465_v10 = vsel %vm421_vm2, %v460_v6, %v464_v7  ;;  %v472_v20 = vrot.slane %v470_v16, 1  ;;  %v478_v30 = vshll.u32 %v9035_v26, 16  ;;  %v570_v31 = vshrl.u32 %v8235_v14, 16 }
  0x21   : > { %v561_v11 = vsel %vm421_vm2, %v556_v8, %v560_v9  ;;  %v564_v21 = vor.u32 %v562_v17, %v560_v9  ;;  %v568_v23 = vrot.slane %v566_v18, 1  ;;  %v574_v32 = vshll.u32 %v8236_v27, 16  ;;  %v9080_v9 = vld [vmem:[%s8951_s12 + $0x50] sm:$0xff] }
  0x22   : > { %v480_v34 = vrot.slane %v478_v30, 1  ;;  %v482_v42 = vshrl.u32 %v9035_v26, 16  ;;  %v578_v44 = vshrl.u32 %v8236_v27, 16  ;;  %v2594_v47 = vsel %vm680_vm0, %v7717_v46, 0  ;;  %v300_v30 = vld [vmem:[%s8951_s12 + $0xb8] sm:$0x1] }
  0x23   : > { %7623 = vmatmul.msk.bf16.gmra.mxu1 %vm610_vm1, %v8956_v12  ;;  %7635 = vmatmul.msk.bf16.gmra.mxu3 %vm610_vm1, %v8230_v15  ;;  %v466_v15 = vshrl.u32 %v9009_v0, 16  ;;  %v569_v25 = vsel %vm421_vm2, %v564_v21, %v568_v23  ;;  %v572_v35 = vor.u32 %v570_v31, %v568_v23  ;;  %v576_v36 = vrot.slane %v574_v32, 1 }
  0x24   : > { %2603 = vmatpush.bf16.msrb.mxu1 %v2594_v47  ;;  %v484_v48 = vor.u32 %v482_v42, %v480_v34  ;;  %v494_v58 = vshll.u32 %v9065_v55, 16  ;;  %v590_v61 = vshll.u32 %v8238_v56, 16  ;;  %v498_v17 = vshrl.u32 %v9065_v55, 16  ;;  %v1277_v42 = vld [vmem:[%s8951_s12 + $0x8] sm:$0x8] }
  0x25   : > { %v468_v19 = vor.u32 %v466_v15, %v464_v7  ;;  %v502_v18 = vshll.u32 %v9080_v9, 16  ;;  %v594_v21 = vshrl.u32 %v8238_v56, 16  ;;  %v1373_v46 = vunpack.c.l.b16 %v1277_v42 }
  0x26   : > { %v592_v2 = vrot.slane %v590_v61, 1  ;;  %v7857_v61 = vld [vmem:[%s11522_s1 + $0xe] sm:$0x3] }
  0x27   : > { %v473_v24 = vsel %vm421_vm2, %v468_v19, %v472_v20 }
  0x29   : > { %7612 = vmatmul.msk.bf16.gmra.mxu2 %vm610_vm1, %v537_v39  ;;  %v9048_v39 = vld [vmem:[%s8951_s12 + $0x40] sm:$0xff] }
  0x2a   : > { %7600 = vmatmul.msk.bf16.gmra.mxu0 %vm610_vm1, %v441_v38  ;;  %v577_v38 = vsel %vm421_vm2, %v572_v35, %v576_v36  ;;  %v486_v43 = vshll.u32 %v9048_v39, 16  ;;  %v490_v57 = vshrl.u32 %v9048_v39, 16 }
  0x2c   : > { %v488_v49 = vrot.slane %v486_v43, 1  ;;  %v9102_v43 = vld [vmem:[%s8951_s12 + $0xc] sm:$0xf] }
  0x2d   : > { %v1374_v47 = vunpack.c.l.b16 %v9102_v43 }
  0x33   : > { %7624 = vmatmul.msk.bf16.gmra.mxu1 %vm610_vm1, %v8970_v28  ;;  %7636 = vmatmul.msk.bf16.gmra.mxu3 %vm610_vm1, %v8231_v29  ;;  %v474_v29 = vshrl.u32 %v9022_v13, 16 }
  0x35   : > { %v476_v33 = vor.u32 %v474_v29, %v472_v20 }
  0x37   : > { %v481_v37 = vsel %vm421_vm2, %v476_v33, %v480_v34 }
  0x39   : > { %7613 = vmatmul.msk.bf16.gmra.mxu2 %vm610_vm1, %v545_v51 }
  0x3a   : > { %7601 = vmatmul.msk.bf16.gmra.mxu0 %vm610_vm1, %v449_v50  ;;  %v580_v50 = vor.u32 %v578_v44, %v576_v36  ;;  %v9106_v44 = vld [vmem:[%s8951_s12 + $0x58] sm:$0xff] }
  0x43   : > { %7625 = vmatmul.msk.bf16.gmra.mxu1 %vm610_vm1, %v8983_v40  ;;  %7637 = vmatmul.msk.bf16.gmra.mxu3 %vm610_vm1, %v8232_v41  ;;  %v8237_v41 = vld [vmem:[%s8951_s12 + $0xa0] sm:$0xff] }
  0x44   : > { %v582_v45 = vshll.u32 %v8237_v41, 16  ;;  %v586_v60 = vshrl.u32 %v8237_v41, 16 }
  0x46   : > { %v584_v51 = vrot.slane %v582_v45, 1 }
  0x48   : > { %v585_v54 = vsel %vm421_vm2, %v580_v50, %v584_v51 }
  0x49   : > { %7614 = vmatmul.msk.bf16.gmra.mxu2 %vm610_vm1, %v553_v63  ;;  %v496_v63 = vrot.slane %v494_v58, 1 }
  0x4a   : > { %7602 = vmatmul.msk.bf16.gmra.mxu0 %vm610_vm1, %v457_v62  ;;  %v492_v62 = vor.u32 %v490_v57, %v488_v49 }
  0x4c   : > { %v497_v5 = vsel %vm421_vm2, %v492_v62, %v496_v63  ;;  %v1420_v62 = vpack.c.b16 %v1374_v47, %v1373_v46 }
  0x53   : > { %7626 = vmatmul.msk.bf16.gmra.mxu1 %vm610_vm1, %v8996_v52  ;;  %7638 = vmatmul.msk.bf16.gmra.mxu3 %vm610_vm1, %v8233_v53  ;;  %v489_v53 = vsel %vm421_vm2, %v484_v48, %v488_v49 }
  0x59   : > { %7615 = vmatmul.msk.bf16.gmra.mxu2 %vm610_vm1, %v561_v11 }
  0x5a   : > { %7603 = vmatmul.msk.bf16.gmra.mxu0 %vm610_vm1, %v465_v10  ;;  %v8239_v10 = vld [vmem:[%s8951_s12 + $0xb0] sm:$0xff] }
  0x5b   : > { %v598_v23 = vshll.u32 %v8239_v10, 16  ;;  %v602_v58 = vshrl.u32 %v8239_v10, 16 }
  0x5d   : > { %v600_v29 = vrot.slane %v598_v23, 1 }
  0x63   : > { %7627 = vmatmul.msk.bf16.gmra.mxu1 %vm610_vm1, %v9009_v0  ;;  %7639 = vmatmul.msk.bf16.gmra.mxu3 %vm610_vm1, %v8234_v1  ;;  %v588_v1 = vor.u32 %v586_v60, %v584_v51  ;;  %v7833_v60 = vld [vmem:[%s11522_s1 + $0xc] sm:$0x3] }
  0x65   : > { %v593_v7 = vsel %vm421_vm2, %v588_v1, %v592_v2  ;;  %v3514_v1 = vsel %vm680_vm0, %v7857_v61, 0 }
  0x66   : > { %3523 = vmatpush.bf16.msra.mxu3 %v3514_v1  ;;  %v8241_v1 = vld [vmem:[%s8951_s12 + $0x14] sm:$0xff] }
  0x69   : > { %7616 = vmatmul.msk.bf16.gmra.mxu2 %vm610_vm1, %v569_v25  ;;  %v504_v25 = vrot.slane %v502_v18, 1 }
  0x6a   : > { %7604 = vmatmul.msk.bf16.gmra.mxu0 %vm610_vm1, %v473_v24  ;;  %v500_v24 = vor.u32 %v498_v17, %v496_v63  ;;  %v3051_v63 = vsel %vm680_vm0, %v7833_v60, 0  ;;  %v8465_v60 = vld [vmem:[%s8951_s12 + $0x18] sm:$0xff]  }
  0x6b   : > { %3060 = vmatpush.bf16.msra.mxu2 %v3051_v63  ;;  %v989_v63 = vrot.slane %v8956_v12, 1 }
  0x6c   : > { %v505_v35 = vsel %vm421_vm2, %v500_v24, %v504_v25 }
  0x73   : > { %7628 = vmatmul.msk.bf16.gmra.mxu1 %vm610_vm1, %v9022_v13  ;;  %7640 = vmatmul.msk.bf16.gmra.mxu3 %vm610_vm1, %v8235_v14 }
  0x79   : > { %7617 = vmatmul.msk.bf16.gmra.mxu2 %vm610_vm1, %v577_v38 }
  0x7a   : > { %7605 = vmatmul.msk.bf16.gmra.mxu0 %vm610_vm1, %v481_v37 }
  0x83   : > { %7629 = vmatmul.msk.bf16.gmra.mxu1 %vm610_vm1, %v9035_v26  ;;  %7641 = vmatmul.msk.bf16.gmra.mxu3 %vm610_vm1, %v8236_v27  ;;  %v596_v27 = vor.u32 %v594_v21, %v592_v2  ;;  %v9129_v2 = vld [vmem:[%s8951_s12 + $0x10] sm:$0xff]  }
  0x85   : > { %v601_v37 = vsel %vm421_vm2, %v596_v27, %v600_v29 }
  0x89   : > { %7618 = vmatmul.msk.bf16.gmra.mxu2 %vm610_vm1, %v585_v54  ;;  %v510_v54 = vshll.u32 %v9106_v44, 16 }
  0x8a   : > { %7606 = vmatmul.msk.bf16.gmra.mxu0 %vm610_vm1, %v489_v53  ;;  %v506_v53 = vshrl.u32 %v9080_v9, 16 }
  0x90   : > { %v866_v59 = vpop.f32.mrf.mxu1 }
  0x93   : > { %7630 = vmatmul.msk.bf16.gmra.mxu1 %vm610_vm1, %v9048_v39  ;;  %7642 = vmatmul.msk.bf16.gmra.mxu3 %vm610_vm1, %v8237_v41  ;;  %v396_v41 = vunpack.c.l.b16 %v300_v30 }
  0x95   : > { %v9108_v45 = vpack.c.b16 %v396_v41, %v396_v41 }
  0x96   : > { %v926_v4 = vpop.f32.mrf.mxu3 }
  0x97   : > { %v693_v3 = vpop.f32.mrf.mxu0 }
  0x98   : > { %v9074_v6 = vadd.f32 %v866_v59, %v693_v3  ;;  %v868_v8 = vpop.f32.mrf.mxu1  ;;  %v606_v59 = vshll.u32 %v9108_v45, 16  ;;  %v508_v3 = vor.u32 %v506_v53, %v504_v25 }
  0x99   : > { %7619 = vmatmul.msk.bf16.gmra.mxu2 %vm610_vm1, %v593_v7 }
  0x9a   : > { %7607 = vmatmul.msk.bf16.gmra.mxu0 %vm610_vm1, %v497_v5  ;;  %v604_v5 = vor.u32 %v602_v58, %v600_v29  ;;  %v608_v7 = vrot.slane %v606_v59, 1  ;;  %v8240_v58 = vld [vmem:[%s8951_s12 + $0xc] sm:$0xff] }
  0x9c   : > { %v753_v11 = vpop.f32.mrf.mxu2 }
  0x9d   : > { %v9083_v15 = vadd.f32 %v926_v4, %v753_v11  ;;  %v512_v4 = vrot.slane %v510_v54, 1  ;;  %v1449_v11 = vshll.u32 %v1420_v62, 16 }
  0x9e   : > { %v928_v16 = vpop.f32.mrf.mxu3 }
  0x9f   : > { %v695_v14 = vpop.f32.mrf.mxu0  ;;  %v513_v23 = vsel %vm421_vm2, %v508_v3, %v512_v4  ;;  %v1451_v29 = vrot.slane %v1449_v11, 4  ;;  %v2339_v3 = vshll.u32 %v8240_v58, 16 }
  0xa0   : > { %v9087_v19 = vadd.f32 %v868_v8, %v695_v14  ;;  %v871_v20 = vpop.f32.mrf.mxu1  ;;  %v1446_v8 = vshrl.u32 %v1420_v62, 16  ;;  %v1454_v14 = vshrl.u32 %v9129_v2, 16 }
  0xa2   : > { %v1448_v27 = vrot.slane %v1446_v8, 3  ;;  %v1456_v30 = vrot.slane %v1454_v14, 3 }
  0xa3   : > { %7631 = vmatmul.msk.bf16.gmra.mxu1 %vm610_vm1, %v9065_v55  ;;  %7643 = vmatmul.msk.bf16.gmra.mxu3 %vm610_vm1, %v8238_v56 }
  0xa4   : > { %v755_v31 = vpop.f32.mrf.mxu2 }
  0xa5   : > { %v9093_v33 = vadd.f32 %v928_v16, %v755_v31  ;;  %v1457_v16 = vshll.u32 %v9129_v2, 16 }
  0xa6   : > { %v931_v34 = vpop.f32.mrf.mxu3 }
  0xa7   : > { %v698_v32 = vpop.f32.mrf.mxu0  ;;  %v1459_v31 = vrot.slane %v1457_v16, 4 }
  0xa8   : > { %v9096_v36 = vadd.f32 %v871_v20, %v698_v32  ;;  %v873_v38 = vpop.f32.mrf.mxu1  ;;  %v7881_v32 = vld [vmem:[%s11522_s1 + $0x10] sm:$0x3] }
  0xa9   : > { %7620 = vmatmul.msk.bf16.gmra.mxu2 %vm610_vm1, %v601_v37  ;;  %v8462_v37 = vld [vmem:[%s8951_s12] sm:$0xe]  ;;  %v1460_v41 = vor.u32 %v1459_v31, %v1456_v30 }
  0xaa   : > { %7608 = vmatmul.msk.bf16.gmra.mxu0 %vm610_vm1, %v505_v35  ;;  %v8461_v35 = vld [vmem:[%s8951_s12] sm:$0xf0] }
  0xab   : > { %v8463_v53 = vor.u32 %v8462_v37, %v8461_v35 }
  0xac   : > { %v758_v48 = vpop.f32.mrf.mxu2 }
  0xad   : > { %v9111_v50 = vadd.f32 %v931_v34, %v758_v48  ;;  %v3781_v34 = vsel %vm680_vm0, %v7881_v32, 0  ;;  %v988_v62 = vrot.slane %v8463_v53, 1  ;;  %v991_v53 = vrot.slane %v8970_v28, 1 }
  0xae   : > { %v933_v51 = vpop.f32.mrf.mxu3  ;;  %3790 = vmatpush.bf16.msra.mxu0 %v3781_v34 }
  0xaf   : > { %v700_v49 = vpop.f32.mrf.mxu0 }
  0xb0   : > { %v9115_v56 = vadd.f32 %v873_v38, %v700_v49  ;;  %v876_v57 = vpop.f32.mrf.mxu1  ;;  %v1452_v38 = vor.u32 %v1451_v29, %v1448_v27 }
  0xb2   : > { %v1461_v59 = vsel %vm1444_vm3, %v1452_v38, %v1460_v41 }
  0xb3   : > { %7632 = vmatmul.msk.bf16.gmra.mxu1 %vm610_vm1, %v9080_v9  ;;  %7644 = vmatmul.msk.bf16.gmra.mxu3 %vm610_vm1, %v8239_v10  ;;  %v609_v10 = vsel %vm421_vm2, %v604_v5, %v608_v7  ;;  %v1463_v5 = vshrl.u32 %v8465_v60, 16  ;;  %v1466_v7 = vshll.u32 %v8465_v60, 16 }
  0xb4   : > { %v760_v17 = vpop.f32.mrf.mxu2 }
  0xb5   : > { %v9136_v20 = vadd.f32 %v933_v51, %v760_v17  ;;  %v514_v51 = vshrl.u32 %v9106_v44, 16  ;;  %v990_v17 = vsel %vm987_vm4, %v988_v62, %v989_v63  ;;  %v1468_v27 = vrot.slane %v1466_v7, 4 }
  0xb6   : > { %v936_v21 = vpop.f32.mrf.mxu3 }
  0xb7   : > { %v703_v18 = vpop.f32.mrf.mxu0  ;;  %v516_v61 = vor.u32 %v514_v51, %v512_v4  ;;  %v8466_v51 = vld [vmem:[%s8951_s12 + $0x20] sm:$0xff]  }
  0xb8   : > { %v9139_v24 = vadd.f32 %v876_v57, %v703_v18  ;;  %v878_v25 = vpop.f32.mrf.mxu1 }
  0xb9   : > { %7621 = vmatmul.msk.bf16.gmra.mxu2 %vm610_vm1, %v609_v10  ;;  %v521_v4 = vsel %vm421_vm2, %v516_v61, %v8962_v22  ;;  %v2344_v10 = vshll.u32 %v8241_v1, 16 }
  0xba   : > { %7609 = vmatmul.msk.bf16.gmra.mxu0 %vm610_vm1, %v513_v23  ;;  %v2341_v23 = vrot.slane %v2339_v3, 1 }
  0xbb   : > { %v2346_v30 = vrot.slane %v2344_v10, 1 }
  0xbc   : > { %v763_v42 = vpop.f32.mrf.mxu2 }
  0xbd   : > { %v9150_v48 = vadd.f32 %v936_v21, %v763_v42  ;;  %v2337_v21 = vshrl.u32 %v8240_v58, 16  ;;  %v1472_v58 = vshrl.u32 %v8466_v51, 16 }
  0xbe   : > { %v938_v49 = vpop.f32.mrf.mxu3 }
  0xbf   : > { %v705_v46 = vpop.f32.mrf.mxu0  ;;  %v2342_v29 = vor.u32 %v2341_v23, %v2337_v21  ;;  %v1474_v28 = vrot.slane %v1472_v58, 3 }
  0xc0   : > { %v9153_v54 = vadd.f32 %v878_v25, %v705_v46  ;;  %v881_v57 = vpop.f32.mrf.mxu1  ;;  %v1465_v25 = vrot.slane %v1463_v5, 3 }
  0xc1   : > { %v2347_v42 = vsel %vm421_vm2, %v2342_v29, %v2346_v30  ;;  %v993_v29 = vrot.slane %v8983_v40, 1 }
  0xc2   : > { %v1469_v31 = vor.u32 %v1468_v27, %v1465_v25  ;;  %v8467_v27 = vld [vmem:[%s8951_s12 + $0x28] sm:$0xff]  }
  0xc3   : > { %7633 = vmatmul.msk.bf16.gmra.mxu1 %vm610_vm1, %v9106_v44  ;;  %7670 = vmatmul.msk.bf16.vlgmr.msrb.gmra.mxu3 %vm610_vm1, %v1461_v59  ;;  %v1475_v59 = vshll.u32 %v8466_v51, 16 }
  0xc4   : > { %v765_v8 = vpop.f32.mrf.mxu2  ;;  %v1470_v46 = vsel %vm1444_vm3, %v1460_v41, %v1469_v31 }
  0xc5   : > { %v9163_v14 = vadd.f32 %v938_v49, %v765_v8  ;;  %v8287_v49 = vunpack.c.l.b16 %v9129_v2  ;;  %v992_v2 = vsel %vm987_vm4, %v989_v63, %v991_v53  ;;  %v2348_v8 = vshrl.u32 %v8241_v1, 16 }
  0xc6   : > { %v941_v16 = vpop.f32.mrf.mxu3 }
  0xc7   : > { %v708_v11 = vpop.f32.mrf.mxu0  ;;  %v1904_v61 = vpack.c.b16 %v8287_v49, %v1374_v47  ;;  %v2350_v43 = vor.u32 %v2348_v8, %v2346_v30  ;;  %v8243_v30 = vld [vmem:[%s8951_s12 + $0x24] sm:$0xff] }
  0xc8   : > { %v9168_v18 = vadd.f32 %v881_v57, %v708_v11  ;;  %v883_v12 = vpop.f32.mrf.mxu1  ;;  %v8242_v57 = vld [vmem:[%s8951_s12 + $0x1c] sm:$0xff] }
  0xc9   : > { %7646 = vmatmul.msk.bf16.vlgmr.msrb.gmra.mxu2 %vm610_vm1, %v990_v17  ;;  %v2352_v11 = vshll.u32 %v8242_v57, 16 }
  0xca   : > { %7610 = vmatmul.msk.bf16.gmra.mxu0 %vm610_vm1, %v521_v4 }
  0xcb   : > { %v2354_v47 = vrot.slane %v2352_v11, 1 }
  0xcc   : > { %v768_v22 = vpop.f32.mrf.mxu2 }
  0xcd   : > { %v9172_v34 = vadd.f32 %v941_v16, %v768_v22  ;;  %v1477_v16 = vrot.slane %v1475_v59, 4  ;;  %v2355_v10 = vsel %vm421_vm2, %v2350_v43, %v2354_v47  ;;  %v1481_v22 = vshrl.u32 %v8467_v27, 16 }
  0xce   : > { %v943_v35 = vpop.f32.mrf.mxu3  ;;  %v2356_v59 = vshrl.u32 %v8242_v57, 16 }
  0xcf   : > { %v710_v32 = vpop.f32.mrf.mxu0  ;;  %v1478_v4 = vor.u32 %v1477_v16, %v1474_v28 }
  0xd0   : > { %v9174_v37 = vadd.f32 %v883_v12, %v710_v32  ;;  %v886_v38 = vpop.f32.mrf.mxu1  ;;  %v1484_v32 = vshll.u32 %v8467_v27, 16  ;;  %v2358_v40 = vor.u32 %v2356_v59, %v2354_v47  ;;  %v995_v47 = vrot.slane %v8996_v52, 1 }
  0xd1   : > { %v1479_v25 = vsel %vm1444_vm3, %v1469_v31, %v1478_v4  ;;  %v994_v31 = vsel %vm987_vm4, %v991_v53, %v993_v29 }
  0xd3   : > { %7810 = vmatmul.msk.bf16.vlgmr.msrb.gmra.mxu1 %vm610_vm1, %v2347_v42  ;;  %7671 = vmatmul.msk.bf16.gmra.mxu3 %vm610_vm1, %v1470_v46 }
  0xd4   : > { %v770_v60 = vpop.f32.mrf.mxu2 }
  0xd5   : > { %v9186_v3 = vadd.f32 %v943_v35, %v770_v60  ;;  %v2360_v60 = vshll.u32 %v8243_v30, 16 }
  0xd6   : > { %v946_v41 = vpop.f32.mrf.mxu3 }
  0xd7   : > { %v713_v62 = vpop.f32.mrf.mxu0 }
  0xd8   : > { %v9188_v5 = vadd.f32 %v886_v38, %v713_v62  ;;  %v888_v7 = vpop.f32.mrf.mxu1  ;;  %v8615_v38 = vld [vmem:[%s8951_s12 + $0x14] sm:$0xff]   ;;  %v1486_v62 = vrot.slane %v1484_v32, 4 }
  0xd9   : > { %7647 = vmatmul.msk.bf16.gmra.mxu2 %vm610_vm1, %v992_v2 }
  0xda   : > { %7694 = vmatmul.msk.bf16.vlgmr.msrb.gmra.mxu0 %vm610_vm1, %v1904_v61  ;;  %v1483_v61 = vrot.slane %v1481_v22, 3 }
  0xdc   : > { %v773_v17 = vpop.f32.mrf.mxu2  ;;  %v1487_v2 = vor.u32 %v1486_v62, %v1483_v61 }
  0xdd   : > { %v9193_v21 = vadd.f32 %v946_v41, %v773_v17  ;;  %v2362_v41 = vrot.slane %v2360_v60, 1  ;;  %v8468_v17 = vld [vmem:[%s8951_s12 + $0x30] sm:$0xff]  }
  0xde   : > { %v948_v63 = vpop.f32.mrf.mxu3  ;;  %v1488_v43 = vsel %vm1444_vm3, %v1478_v4, %v1487_v2  ;;  %v996_v4 = vsel %vm987_vm4, %v993_v29, %v995_v47 }
  0xdf   : > { %v715_v12 = vpop.f32.mrf.mxu0  ;;  %v2363_v16 = vsel %vm421_vm2, %v2358_v40, %v2362_v41 }
  0xe0   : > { %v9195_v23 = vadd.f32 %v888_v7, %v715_v12  ;;  %v891_v1 = vpop.f32.mrf.mxu1  ;;  %v8244_v12 = vld [vmem:[%s8951_s12 + $0x2c] sm:$0xff] }
  0xe3   : > { %7811 = vmatmul.msk.bf16.gmra.mxu1 %vm610_vm1, %v2355_v10  ;;  %7672 = vmatmul.msk.bf16.gmra.mxu3 %vm610_vm1, %v1479_v25  ;;  %v8617_v25 = vld [vmem:[%s8951_s12 + $0x1c] sm:$0xff]  }
  0xe4   : > { %v775_v35 = vpop.f32.mrf.mxu2 }
  0xe5   : > { %v9205_v46 = vadd.f32 %v948_v63, %v775_v35  ;;  %v1490_v63 = vshrl.u32 %v8468_v17, 16 }
  0xe6   : > { %v951_v49 = vpop.f32.mrf.mxu3 }
  0xe7   : > { %v718_v42 = vpop.f32.mrf.mxu0 }
  0xe8   : > { %v9207_v51 = vadd.f32 %v891_v1, %v718_v42  ;;  %v893_v58 = vpop.f32.mrf.mxu1  ;;  %v1493_v1 = vshll.u32 %v8468_v17, 16  ;;  %v2364_v42 = vshrl.u32 %v8243_v30, 16 }
  0xe9   : > { %7648 = vmatmul.msk.bf16.gmra.mxu2 %vm610_vm1, %v994_v31  ;;  %v1492_v31 = vrot.slane %v1490_v63, 3 }
  0xea   : > { %7695 = vmatmul.msk.bf16.gmra.mxu0 %vm610_vm1, %v8615_v38  ;;  %v2366_v52 = vor.u32 %v2364_v42, %v2362_v41  ;;  %v997_v41 = vrot.slane %v9009_v0, 1 }
  0xec   : > { %v778_v7 = vpop.f32.mrf.mxu2 }
  0xed   : > { %v9212_v11 = vadd.f32 %v951_v49, %v778_v7  ;;  %v2368_v49 = vshll.u32 %v8244_v12, 16 }
  0xee   : > { %v953_v53 = vpop.f32.mrf.mxu3 }
  0xef   : > { %v720_v8 = vpop.f32.mrf.mxu0  ;;  %v2370_v59 = vrot.slane %v2368_v49, 1 }
  0xf0   : > { %v9214_v28 = vadd.f32 %v893_v58, %v720_v8  ;;  %v896_v57 = vpop.f32.mrf.mxu1  ;;  %v1495_v58 = vrot.slane %v1493_v1, 4  ;;  %v8619_v1 = vld [vmem:[%s8951_s12 + $0x24] sm:$0xff]  }
  0xf1   : > { %v2371_v8 = vsel %vm421_vm2, %v2366_v52, %v2370_v59 }
  0xf2   : > { %v1496_v60 = vor.u32 %v1495_v58, %v1492_v31 }
  0xf3   : > { %7812 = vmatmul.msk.bf16.gmra.mxu1 %vm610_vm1, %v2363_v16  ;;  %7673 = vmatmul.msk.bf16.gmra.mxu3 %vm610_vm1, %v1488_v43  ;;  %v8245_v16 = vld [vmem:[%s8951_s12 + $0x34] sm:$0xff] }
  0xf4   : > { %v780_v10 = vpop.f32.mrf.mxu2  ;;  %v2376_v42 = vshll.u32 %v8245_v16, 16 }
  0xf5   : > { %v9224_v22 = vadd.f32 %v953_v53, %v780_v10  ;;  %v1497_v53 = vsel %vm1444_vm3, %v1487_v2, %v1496_v60  ;;  %v998_v2 = vsel %vm987_vm4, %v995_v47, %v997_v41 }
  0xf6   : > { %v956_v32 = vpop.f32.mrf.mxu3  ;;  %v2378_v58 = vrot.slane %v2376_v42, 1 }
  0xf7   : > { %v723_v27 = vpop.f32.mrf.mxu0 }
  0xf8   : > { %v9226_v35 = vadd.f32 %v896_v57, %v723_v27  ;;  %v898_v38 = vpop.f32.mrf.mxu1  ;;  %v8469_v57 = vld [vmem:[%s8951_s12 + $0x38] sm:$0xff]  }
  0xf9   : > { %7649 = vmatmul.msk.bf16.gmra.mxu2 %vm610_vm1, %v996_v4  ;;  %v1499_v43 = vshrl.u32 %v8469_v57, 16  ;;  %v1502_v17 = vshll.u32 %v8469_v57, 16  ;;  %v8470_v57 = vld [vmem:[%s8951_s12 + $0x40] sm:$0xff]  }
  0xfa   : > { %7696 = vmatmul.msk.bf16.gmra.mxu0 %vm610_vm1, %v8617_v25 }
  0xfb   : > { %v1501_v49 = vrot.slane %v1499_v43, 3  ;;  %v1504_v31 = vrot.slane %v1502_v17, 4  ;;  %v8246_v43 = vld [vmem:[%s8951_s12 + $0x3c] sm:$0xff]  ;;  %v1508_v17 = vshrl.u32 %v8470_v57, 16 }
  0xfc   : > { %v783_v61 = vpop.f32.mrf.mxu2 }
  0xfd   : > { %v9231_v40 = vadd.f32 %v956_v32, %v783_v61  ;;  %v1505_v52 = vor.u32 %v1504_v31, %v1501_v49  ;;  %v2380_v49 = vshrl.u32 %v8245_v16, 16  ;;  %v2384_v31 = vshll.u32 %v8246_v43, 16 }
  0xfe   : > { %v958_v29 = vpop.f32.mrf.mxu3 }
  0xff   : > { %v725_v62 = vpop.f32.mrf.mxu0  ;;  %11558 = vst [vmem:[#allocation3_spill] sm:$0xff] %v9231_v40 }
 0x100   : > { %v9233_v7 = vadd.f32 %v898_v38, %v725_v62  ;;  %v901_v30 = vpop.f32.mrf.mxu1  ;;  %v2372_v38 = vshrl.u32 %v8244_v12, 16 }
 0x102   : > { %v2374_v0 = vor.u32 %v2372_v38, %v2370_v59  ;;  %v999_v59 = vrot.slane %v9022_v13, 1  ;;  %v2382_v13 = vor.u32 %v2380_v49, %v2378_v58  ;;  %v8623_v49 = vld [vmem:[%s8951_s12 + $0x34] sm:$0xff]  }
 0x103   : > { %7813 = vmatmul.msk.bf16.gmra.mxu1 %vm610_vm1, %v2371_v8  ;;  %7674 = vmatmul.msk.bf16.gmra.mxu3 %vm610_vm1, %v1497_v53  ;;  %v1506_v53 = vsel %vm1444_vm3, %v1496_v60, %v1505_v52 }
 0x104   : > { %v785_v63 = vpop.f32.mrf.mxu2  ;;  %v2379_v8 = vsel %vm421_vm2, %v2374_v0, %v2378_v58  ;;  %v1000_v60 = vsel %vm987_vm4, %v997_v41, %v999_v59  ;;  %v1510_v0 = vrot.slane %v1508_v17, 3  ;;  %v1001_v58 = vrot.slane %v9035_v26, 1 }
 0x105   : > { %v9243_v25 = vadd.f32 %v958_v29, %v785_v63  ;;  %v1511_v63 = vshll.u32 %v8470_v57, 16 }
 0x106   : > { %v961_v27 = vpop.f32.mrf.mxu3 }
 0x107   : > { %v728_v10 = vpop.f32.mrf.mxu0  ;;  %11559 = vst [vmem:[#allocation4_spill] sm:$0xff] %v9243_v25 }
 0x108   : > { %v9245_v32 = vadd.f32 %v901_v30, %v728_v10  ;;  %v903_v4 = vpop.f32.mrf.mxu1  ;;  %v8621_v10 = vld [vmem:[%s8951_s12 + $0x2c] sm:$0xff]  }
 0x109   : > { %7650 = vmatmul.msk.bf16.gmra.mxu2 %vm610_vm1, %v998_v2 }
 0x10a   : > { %7697 = vmatmul.msk.bf16.gmra.mxu0 %vm610_vm1, %v8619_v1 }
 0x10c   : > { %v788_v61 = vpop.f32.mrf.mxu2 }
 0x10d   : > { %v9250_v29 = vadd.f32 %v961_v27, %v788_v61  ;;  %v1513_v61 = vrot.slane %v1511_v63, 4 }
 0x10e   : > { %v963_v47 = vpop.f32.mrf.mxu3 }
 0x10f   : > { %v730_v62 = vpop.f32.mrf.mxu0  ;;  %11560 = vst [vmem:[#allocation5_spill] sm:$0xff] %v9250_v29  ;;  %v8474_v29 = vld [vmem:[%s8951_s12 + $0x60] sm:$0xff]  }
 0x110   : > { %v9252_v30 = vadd.f32 %v903_v4, %v730_v62  ;;  %v906_v12 = vpop.f32.mrf.mxu1  ;;  %v2386_v62 = vrot.slane %v2384_v31, 1 }
 0x112   : > { %v2387_v17 = vsel %vm421_vm2, %v2382_v13, %v2386_v62 }
 0x113   : > { %7814 = vmatmul.msk.bf16.gmra.mxu1 %vm610_vm1, %v2379_v8  ;;  %7675 = vmatmul.msk.bf16.gmra.mxu3 %vm610_vm1, %v1506_v53 }
 0x114   : > { %v790_v1 = vpop.f32.mrf.mxu2 }
 0x115   : > { %v9262_v2 = vadd.f32 %v963_v47, %v790_v1  ;;  %v1514_v47 = vor.u32 %v1513_v61, %v1510_v0  ;;  %v8471_v1 = vld [vmem:[%s8951_s12 + $0x48] sm:$0xff]  }
 0x116   : > { %v966_v4 = vpop.f32.mrf.mxu3 }
 0x117   : > { %v733_v27 = vpop.f32.mrf.mxu0  ;;  %11561 = vst [vmem:[#allocation6_spill] sm:$0xff] %v9262_v2  ;;  %v1515_v63 = vsel %vm1444_vm3, %v1505_v52, %v1514_v47  ;;  %v1002_v52 = vsel %vm987_vm4, %v999_v59, %v1001_v58 }
 0x118   : > { %v9264_v38 = vadd.f32 %v906_v12, %v733_v27  ;;  %v908_v42 = vpop.f32.mrf.mxu1  ;;  %v1517_v27 = vshrl.u32 %v8471_v1, 16 }
 0x119   : > { %7651 = vmatmul.msk.bf16.gmra.mxu2 %vm610_vm1, %v1000_v60  ;;  %v1520_v60 = vshll.u32 %v8471_v1, 16 }
 0x11a   : > { %7698 = vmatmul.msk.bf16.gmra.mxu0 %vm610_vm1, %v8621_v10  ;;  %v8247_v10 = vld [vmem:[%s8951_s12 + $0x44] sm:$0xff] }
 0x11c   : > { %v793_v8 = vpop.f32.mrf.mxu2 }
 0x11d   : > { %v9269_v53 = vadd.f32 %v966_v4, %v793_v8  ;;  %v2388_v8 = vshrl.u32 %v8246_v43, 16 }
 0x11e   : > { %v968_v41 = vpop.f32.mrf.mxu3 }
 0x11f   : > { %v735_v12 = vpop.f32.mrf.mxu0  ;;  %11562 = vst [vmem:[#allocation7_spill] sm:$0xff] %v9269_v53  ;;  %v2390_v26 = vor.u32 %v2388_v8, %v2386_v62  ;;  %v1003_v62 = vrot.slane %v9048_v39, 1 }
 0x120   : > { %v9271_v57 = vadd.f32 %v908_v42, %v735_v12  ;;  %v911_v16 = vpop.f32.mrf.mxu1  ;;  %v2392_v12 = vshll.u32 %v8247_v10, 16 }
 0x122   : > { %v2394_v1 = vrot.slane %v2392_v12, 1 }
 0x123   : > { %7815 = vmatmul.msk.bf16.gmra.mxu1 %vm610_vm1, %v2387_v17  ;;  %7676 = vmatmul.msk.bf16.gmra.mxu3 %vm610_vm1, %v1515_v63  ;;  %v1519_v17 = vrot.slane %v1517_v27, 3  ;;  %v1522_v63 = vrot.slane %v1520_v60, 4 }
 0x124   : > { %v795_v4 = vpop.f32.mrf.mxu2  ;;  %v2395_v27 = vsel %vm421_vm2, %v2390_v26, %v2394_v1 }
 0x125   : > { %v9281_v42 = vadd.f32 %v968_v41, %v795_v4  ;;  %v1523_v41 = vor.u32 %v1522_v63, %v1519_v17  ;;  %v8625_v17 = vld [vmem:[%s8951_s12 + $0x3c] sm:$0xff]  }
 0x126   : > { %v971_v0 = vpop.f32.mrf.mxu3 }
 0x127   : > { %v738_v31 = vpop.f32.mrf.mxu0  ;;  %11563 = vst [vmem:[#allocation8_spill] sm:$0xff] %v9281_v42  ;;  %v1524_v60 = vsel %vm1444_vm3, %v1514_v47, %v1523_v41  ;;  %v1004_v47 = vsel %vm987_vm4, %v1001_v58, %v1003_v62 }
 0x128   : > { %v9283_v61 = vadd.f32 %v911_v16, %v738_v31  ;;  %v913_v13 = vpop.f32.mrf.mxu1 }
 0x129   : > { %7652 = vmatmul.msk.bf16.gmra.mxu2 %vm610_vm1, %v1002_v52  ;;  %v8248_v52 = vld [vmem:[%s8951_s12 + $0x4c] sm:$0xff] }
 0x12a   : > { %7699 = vmatmul.msk.bf16.gmra.mxu0 %vm610_vm1, %v8623_v49  ;;  %v8472_v49 = vld [vmem:[%s8951_s12 + $0x50] sm:$0xff]  }
 0x12b   : > { %v1526_v8 = vshrl.u32 %v8472_v49, 16  ;;  %v1529_v12 = vshll.u32 %v8472_v49, 16 }
 0x12c   : > { %v798_v4 = vpop.f32.mrf.mxu2 }
 0x12d   : > { %v9288_v31 = vadd.f32 %v971_v0, %v798_v4  ;;  %v1531_v53 = vrot.slane %v1529_v12, 4 }
 0x12e   : > { %v973_v59 = vpop.f32.mrf.mxu3 }
 0x12f   : > { %v740_v16 = vpop.f32.mrf.mxu0  ;;  %11564 = vst [vmem:[#allocation9_spill] sm:$0xff] %v9288_v31  ;;  %v2396_v31 = vshrl.u32 %v8247_v10, 16 }
 0x130   : > { %v9290_v42 = vadd.f32 %v913_v13, %v740_v16  ;;  %v916_v43 = vpop.f32.mrf.mxu1 }
 0x131   : > { %v2398_v39 = vor.u32 %v2396_v31, %v2394_v1  ;;  %v8266_v1 = vld [vmem:[%s11524_s3 + $0x18] sm:$0xff] }
 0x132   : > { %v8249_v31 = vld [vmem:[%s8951_s12 + $0x54] sm:$0xff]  ;;  %4708 = vmatpush.bf16.msra.mxu1 %v8266_v1 }
 0x133   : > { %7816 = vmatmul.msk.bf16.gmra.mxu1 %vm610_vm1, %v2395_v27  ;;  %7677 = vmatmul.msk.bf16.gmra.mxu3 %vm610_vm1, %v1524_v60  ;;  %v2400_v27 = vshll.u32 %v8248_v52, 16  ;;  %v1528_v60 = vrot.slane %v1526_v8, 3  ;;  %v2408_v2 = vshll.u32 %v8249_v31, 16 }
 0x134   : > { %v800_v0 = vpop.f32.mrf.mxu2 }
 0x135   : > { %v9300_v13 = vadd.f32 %v973_v59, %v800_v0  ;;  %v2402_v49 = vrot.slane %v2400_v27, 1  ;;  %v1532_v59 = vor.u32 %v1531_v53, %v1528_v60  ;;  %v1005_v53 = vrot.slane %v9065_v55, 1 }
 0x136   : > { %v976_v4 = vpop.f32.mrf.mxu3  ;;  %v2410_v1 = vrot.slane %v2408_v2, 1  ;;  %v1007_v2 = vrot.slane %v9080_v9, 1 }
 0x137   : > { %v743_v63 = vpop.f32.mrf.mxu0  ;;  %11565 = vst [vmem:[#allocation10_spill] sm:$0xff] %v9300_v13  ;;  %v2403_v8 = vsel %vm421_vm2, %v2398_v39, %v2402_v49  ;;  %v1533_v12 = vsel %vm1444_vm3, %v1523_v41, %v1532_v59 }
 0x138   : > { %v9302_v16 = vadd.f32 %v916_v43, %v743_v63  ;;  %v918_v26 = vpop.f32.mrf.mxu1 }
 0x139   : > { %7653 = vmatmul.msk.bf16.gmra.mxu2 %vm610_vm1, %v1004_v47 }
 0x13a   : > { %7700 = vmatmul.msk.bf16.gmra.mxu0 %vm610_vm1, %v8625_v17  ;;  %v8473_v17 = vld [vmem:[%s8951_s12 + $0x58] sm:$0xff]  }
 0x13c   : > { %v803_v0 = vpop.f32.mrf.mxu2 }
 0x13d   : > { %v9307_v43 = vadd.f32 %v976_v4, %v803_v0  ;;  %v1538_v4 = vshll.u32 %v8473_v17, 16  ;;  %v1006_v0 = vsel %vm987_vm4, %v1003_v62, %v1005_v53 }
 0x13e   : > { %v978_v58 = vpop.f32.mrf.mxu3 }
 0x13f   : > { %v745_v13 = vpop.f32.mrf.mxu0  ;;  %11566 = vst [vmem:[#allocation11_spill] sm:$0xff] %v9307_v43  ;;  %v1540_v55 = vrot.slane %v1538_v4, 4 }
 0x140   : > { %v9309_v63 = vadd.f32 %v918_v26, %v745_v13  ;;  %v921_v10 = vpop.f32.mrf.mxu1  ;;  %v1535_v13 = vshrl.u32 %v8473_v17, 16  ;;  %v8627_v26 = vld [vmem:[%s8951_s12 + $0x44] sm:$0xff]  }
 0x143   : > { %7817 = vmatmul.msk.bf16.gmra.mxu1 %vm610_vm1, %v2403_v8  ;;  %7678 = vmatmul.msk.bf16.gmra.mxu3 %vm610_vm1, %v1533_v12  ;;  %v2404_v8 = vshrl.u32 %v8248_v52, 16  ;;  %v1537_v12 = vrot.slane %v1535_v13, 3 }
 0x144   : > { %v805_v47 = vpop.f32.mrf.mxu2 }
 0x145   : > { %v9322_v60 = vadd.f32 %v978_v58, %v805_v47  ;;  %v2406_v17 = vor.u32 %v2404_v8, %v2402_v49  ;;  %v1541_v58 = vor.u32 %v1540_v55, %v1537_v12  ;;  %v8250_v49 = vld [vmem:[%s8951_s12 + $0x5c] sm:$0xff]  ;;  %v1547_v8 = vshll.u32 %v8474_v29, 16  ;;  %v8629_v12 = vld [vmem:[%s8951_s12 + $0x4c] sm:$0xff]  }
 0x146   : > { %v1741_v41 = vpop.f32.mrf.mxu3 }
 0x147   : > { %v748_v27 = vpop.f32.mrf.mxu0  ;;  %11567 = vst [vmem:[#allocation12_spill] sm:$0xff] %v9322_v60  ;;  %v2411_v13 = vsel %vm421_vm2, %v2406_v17, %v2410_v1  ;;  %v1542_v4 = vsel %vm1444_vm3, %v1532_v59, %v1541_v58  ;;  %v1008_v59 = vsel %vm987_vm4, %v1005_v53, %v1007_v2 }
 0x148   : > { %v9324_v39 = vadd.f32 %v921_v10, %v748_v27  ;;  %v923_v43 = vpop.f32.mrf.mxu1 }
 0x149   : > { %7654 = vmatmul.msk.bf16.gmra.mxu2 %vm610_vm1, %v1006_v0  ;;  %v1544_v0 = vshrl.u32 %v8474_v29, 16 }
 0x14a   : > { %7701 = vmatmul.msk.bf16.gmra.mxu0 %vm610_vm1, %v8627_v26 }
 0x14b   : > { %v1546_v25 = vrot.slane %v1544_v0, 3 }
 0x14c   : > { %v1116_v47 = vpop.f32.mrf.mxu2 }
 0x14d   : > { %v1231_v10 = vadd.f32 %v1116_v47, %v9074_v6  ;;  %v2412_v47 = vshrl.u32 %v8249_v31, 16 }
 0x14e   : > { %v1743_v62 = vpop.f32.mrf.mxu3 }
 0x14f   : > { %v750_v60 = vpop.f32.mrf.mxu0  ;;  %v1856_v26 = vadd.f32 %v1741_v41, %v1231_v10  ;;  %v2416_v10 = vshll.u32 %v8250_v49, 16  ;;  %v2414_v9 = vor.u32 %v2412_v47, %v2410_v1  ;;  %v8631_v47 = vld [vmem:[%s8951_s12 + $0x54] sm:$0xff]  }
 0x150   : > { %v9330_v27 = vadd.f32 %v923_v43, %v750_v60  ;;  %v2605_v52 = vpop.f32.mrf.mxu1 }
 0x153   : > { %7818 = vmatmul.msk.bf16.gmra.mxu1 %vm610_vm1, %v2411_v13  ;;  %7679 = vmatmul.msk.bf16.gmra.mxu3 %vm610_vm1, %v1542_v4  ;;  %v1549_v4 = vrot.slane %v1547_v8, 4 }
 0x154   : > { %v1118_v6 = vpop.f32.mrf.mxu2 }
 0x155   : > { %v1232_v43 = vadd.f32 %v1118_v6, %v9087_v19  ;;  %v2418_v19 = vrot.slane %v2416_v10, 1  ;;  %v1550_v29 = vor.u32 %v1549_v4, %v1546_v25  ;;  %v1009_v25 = vrot.slane %v9106_v44, 1 }
 0x156   : > { %v1746_v55 = vpop.f32.mrf.mxu3 }
 0x157   : > { %v2008_v60 = vpop.f32.mrf.mxu0  ;;  %v1857_v13 = vadd.f32 %v1743_v62, %v1232_v43  ;;  %v1551_v8 = vsel %vm1444_vm3, %v1541_v58, %v1550_v29 }
 0x158   : > { %v2123_v17 = vadd.f32 %v2008_v60, %v1856_v26  ;;  %v2607_v41 = vpop.f32.mrf.mxu1  ;;  %v8475_v60 = vld [vmem:[%s8951_s12 + $0x68] sm:$0xff]  }
 0x159   : > { %7655 = vmatmul.msk.bf16.gmra.mxu2 %vm610_vm1, %v1008_v59  ;;  %v1553_v1 = vshrl.u32 %v8475_v60, 16 }
 0x15a   : > { %v9342_v40 = vadd.f32 %v2605_v52, %v2123_v17  ;;  %7702 = vmatmul.msk.bf16.gmra.mxu0 %vm610_vm1, %v8629_v12  ;;  %v2419_v52 = vsel %vm421_vm2, %v2414_v9, %v2418_v19  ;;  %v1556_v17 = vshll.u32 %v8475_v60, 16  ;;  %v2420_v9 = vshrl.u32 %v8250_v49, 16 }
 0x15c   : > { %v1121_v26 = vpop.f32.mrf.mxu2  ;;  %v2422_v44 = vor.u32 %v2420_v9, %v2418_v19  ;;  %v8476_v19 = vld [vmem:[%s8951_s12 + $0x70] sm:$0xff]  }
 0x15d   : > { %v1233_v53 = vadd.f32 %v1121_v26, %v9096_v36  ;;  %v8251_v36 = vld [vmem:[%s8951_s12 + $0x64] sm:$0xff] }
 0x15e   : > { %v1748_v31 = vpop.f32.mrf.mxu3  ;;  %v2424_v26 = vshll.u32 %v8251_v36, 16 }
 0x15f   : > { %v2010_v6 = vpop.f32.mrf.mxu0  ;;  %v1858_v43 = vadd.f32 %v1746_v55, %v1233_v53  ;;  %v1010_v55 = vsel %vm987_vm4, %v1007_v2, %v1009_v25 }
 0x160   : > { %v2124_v62 = vadd.f32 %v2010_v6, %v1857_v13  ;;  %v2610_v0 = vpop.f32.mrf.mxu1  ;;  %v1555_v6 = vrot.slane %v1553_v1, 3 }
 0x162   : > { %v9349_v12 = vadd.f32 %v2607_v41, %v2124_v62  ;;  %v1558_v62 = vrot.slane %v1556_v17, 4 }
 0x163   : > { %7819 = vmatmul.msk.bf16.gmra.mxu1 %vm610_vm1, %v2419_v52  ;;  %7680 = vmatmul.msk.bf16.gmra.mxu3 %vm610_vm1, %v1551_v8 }
 0x164   : > { %v1123_v59 = vpop.f32.mrf.mxu2  ;;  %v1559_v8 = vor.u32 %v1558_v62, %v1555_v6 }
 0x165   : > { %v1234_v10 = vadd.f32 %v1123_v59, %v9115_v56  ;;  %v2426_v56 = vrot.slane %v2424_v26, 1  ;;  %v8633_v26 = vld [vmem:[%s8951_s12 + $0x5c] sm:$0xff]  }
 0x166   : > { %v1751_v4 = vpop.f32.mrf.mxu3  ;;  %v1560_v17 = vsel %vm1444_vm3, %v1550_v29, %v1559_v8 }
 0x167   : > { %v2013_v13 = vpop.f32.mrf.mxu0  ;;  %v1859_v53 = vadd.f32 %v1748_v31, %v1234_v10  ;;  %v8826_v10 = vld [vmem:[%s8951_s12 + $0x60] sm:$0xff] }
 0x168   : > { %v2125_v58 = vadd.f32 %v2013_v13, %v1858_v43  ;;  %v2612_v41 = vpop.f32.mrf.mxu1  ;;  %v1011_v13 = vrot.slane %v8826_v10, 1 }
 0x169   : > { %7656 = vmatmul.msk.bf16.gmra.mxu2 %vm610_vm1, %v1010_v55  ;;  %v1565_v55 = vshll.u32 %v8476_v19, 16 }
 0x16a   : > { %v9359_v52 = vadd.f32 %v2610_v0, %v2125_v58  ;;  %7703 = vmatmul.msk.bf16.gmra.mxu0 %vm610_vm1, %v8631_v47  ;;  %v2427_v0 = vsel %vm421_vm2, %v2422_v44, %v2426_v56  ;;  %v1562_v58 = vshrl.u32 %v8476_v19, 16  ;;  %v2428_v44 = vshrl.u32 %v8251_v36, 16 }
 0x16c   : > { %v1126_v43 = vpop.f32.mrf.mxu2 }
 0x16d   : > { %v1235_v2 = vadd.f32 %v1126_v43, %v9139_v24  ;;  %v8252_v24 = vld [vmem:[%s8951_s12 + $0x6c] sm:$0xff] }
 0x16e   : > { %v1753_v60 = vpop.f32.mrf.mxu3  ;;  %v2432_v43 = vshll.u32 %v8252_v24, 16 }
 0x16f   : > { %v2015_v49 = vpop.f32.mrf.mxu0  ;;  %v1860_v59 = vadd.f32 %v1751_v4, %v1235_v2  ;;  %v1012_v4 = vsel %vm987_vm4, %v1009_v25, %v1011_v13 }
 0x170   : > { %v2126_v31 = vadd.f32 %v2015_v49, %v1859_v53  ;;  %v2615_v1 = vpop.f32.mrf.mxu1  ;;  %v1564_v49 = vrot.slane %v1562_v58, 3 }
 0x172   : > { %v9366_v47 = vadd.f32 %v2612_v41, %v2126_v31  ;;  %v1567_v31 = vrot.slane %v1565_v55, 4 }
 0x173   : > { %7820 = vmatmul.msk.bf16.gmra.mxu1 %vm610_vm1, %v2427_v0  ;;  %7681 = vmatmul.msk.bf16.gmra.mxu3 %vm610_vm1, %v1560_v17  ;;  %v2430_v17 = vor.u32 %v2428_v44, %v2426_v56  ;;  %v8477_v56 = vld [vmem:[%s8951_s12 + $0x78] sm:$0xff]  }
 0x174   : > { %v1128_v9 = vpop.f32.mrf.mxu2  ;;  %v1568_v19 = vor.u32 %v1567_v31, %v1564_v49 }
 0x175   : > { %v1236_v53 = vadd.f32 %v1128_v9, %v9153_v54  ;;  %v2434_v54 = vrot.slane %v2432_v43, 1  ;;  %v8635_v43 = vld [vmem:[%s8951_s12 + $0x64] sm:$0xff]  }
 0x176   : > { %v1756_v62 = vpop.f32.mrf.mxu3  ;;  %v1569_v55 = vsel %vm1444_vm3, %v1559_v8, %v1568_v19 }
 0x177   : > { %v2018_v6 = vpop.f32.mrf.mxu0  ;;  %v1861_v2 = vadd.f32 %v1753_v60, %v1236_v53  ;;  %v8827_v53 = vld [vmem:[%s8951_s12 + $0x68] sm:$0xff] }
 0x178   : > { %v2127_v29 = vadd.f32 %v2018_v6, %v1860_v59  ;;  %v2617_v41 = vpop.f32.mrf.mxu1  ;;  %v1013_v6 = vrot.slane %v8827_v53, 1 }
 0x179   : > { %7657 = vmatmul.msk.bf16.gmra.mxu2 %vm610_vm1, %v1012_v4  ;;  %v1574_v4 = vshll.u32 %v8477_v56, 16 }
 0x17a   : > { %v9376_v0 = vadd.f32 %v2615_v1, %v2127_v29  ;;  %7704 = vmatmul.msk.bf16.gmra.mxu0 %vm610_vm1, %v8633_v26  ;;  %v2435_v1 = vsel %vm421_vm2, %v2430_v17, %v2434_v54  ;;  %v1571_v29 = vshrl.u32 %v8477_v56, 16  ;;  %v2436_v17 = vshrl.u32 %v8252_v24, 16 }
 0x17c   : > { %v1131_v59 = vpop.f32.mrf.mxu2 }
 0x17d   : > { %v1237_v25 = vadd.f32 %v1131_v59, %v9168_v18  ;;  %v8253_v18 = vld [vmem:[%s8951_s12 + $0x74] sm:$0xff] }
 0x17e   : > { %v1758_v10 = vpop.f32.mrf.mxu3  ;;  %v2440_v59 = vshll.u32 %v8253_v18, 16 }
 0x17f   : > { %v2020_v36 = vpop.f32.mrf.mxu0  ;;  %v1862_v9 = vadd.f32 %v1756_v62, %v1237_v25  ;;  %v1014_v62 = vsel %vm987_vm4, %v1011_v13, %v1013_v6 }
 0x180   : > { %v2128_v60 = vadd.f32 %v2020_v36, %v1861_v2  ;;  %v2620_v58 = vpop.f32.mrf.mxu1  ;;  %v1573_v36 = vrot.slane %v1571_v29, 3 }
 0x182   : > { %v9383_v26 = vadd.f32 %v2617_v41, %v2128_v60  ;;  %v1576_v60 = vrot.slane %v1574_v4, 4 }
 0x183   : > { %7821 = vmatmul.msk.bf16.gmra.mxu1 %vm610_vm1, %v2435_v1  ;;  %7682 = vmatmul.msk.bf16.gmra.mxu3 %vm610_vm1, %v1569_v55  ;;  %v2438_v55 = vor.u32 %v2436_v17, %v2434_v54  ;;  %v8478_v54 = vld [vmem:[%s8951_s12 + $0x80] sm:$0xff]  }
 0x184   : > { %v1133_v44 = vpop.f32.mrf.mxu2  ;;  %v1577_v56 = vor.u32 %v1576_v60, %v1573_v36 }
 0x185   : > { %v1238_v2 = vadd.f32 %v1133_v44, %v9174_v37  ;;  %v2442_v37 = vrot.slane %v2440_v59, 1  ;;  %v8637_v59 = vld [vmem:[%s8951_s12 + $0x6c] sm:$0xff]  }
 0x186   : > { %v1761_v31 = vpop.f32.mrf.mxu3  ;;  %v1578_v4 = vsel %vm1444_vm3, %v1568_v19, %v1577_v56 }
 0x187   : > { %v2023_v49 = vpop.f32.mrf.mxu0  ;;  %v1863_v25 = vadd.f32 %v1758_v10, %v1238_v2  ;;  %v8828_v2 = vld [vmem:[%s8951_s12 + $0x70] sm:$0xff] }
 0x188   : > { %v2129_v8 = vadd.f32 %v2023_v49, %v1862_v9  ;;  %v2622_v41 = vpop.f32.mrf.mxu1  ;;  %v1015_v49 = vrot.slane %v8828_v2, 1 }
 0x189   : > { %7658 = vmatmul.msk.bf16.gmra.mxu2 %vm610_vm1, %v1014_v62  ;;  %v1583_v62 = vshll.u32 %v8478_v54, 16 }
 0x18a   : > { %v9393_v1 = vadd.f32 %v2620_v58, %v2129_v8  ;;  %7705 = vmatmul.msk.bf16.gmra.mxu0 %vm610_vm1, %v8635_v43  ;;  %v2443_v58 = vsel %vm421_vm2, %v2438_v55, %v2442_v37  ;;  %v1580_v8 = vshrl.u32 %v8478_v54, 16  ;;  %v2444_v55 = vshrl.u32 %v8253_v18, 16 }
 0x18c   : > { %v1136_v9 = vpop.f32.mrf.mxu2 }
 0x18d   : > { %v1239_v13 = vadd.f32 %v1136_v9, %v9188_v5  ;;  %v8254_v5 = vld [vmem:[%s8951_s12 + $0x7c] sm:$0xff] }
 0x18e   : > { %v1763_v53 = vpop.f32.mrf.mxu3  ;;  %v2448_v9 = vshll.u32 %v8254_v5, 16 }
 0x18f   : > { %v2025_v24 = vpop.f32.mrf.mxu0  ;;  %v1864_v44 = vadd.f32 %v1761_v31, %v1239_v13  ;;  %v1016_v31 = vsel %vm987_vm4, %v1013_v6, %v1015_v49 }
 0x190   : > { %v2130_v10 = vadd.f32 %v2025_v24, %v1863_v25  ;;  %v2625_v29 = vpop.f32.mrf.mxu1  ;;  %v1582_v24 = vrot.slane %v1580_v8, 3 }
 0x192   : > { %v9400_v43 = vadd.f32 %v2622_v41, %v2130_v10  ;;  %v1585_v10 = vrot.slane %v1583_v62, 4 }
 0x193   : > { %7822 = vmatmul.msk.bf16.gmra.mxu1 %vm610_vm1, %v2443_v58  ;;  %7683 = vmatmul.msk.bf16.gmra.mxu3 %vm610_vm1, %v1578_v4  ;;  %v2446_v4 = vor.u32 %v2444_v55, %v2442_v37  ;;  %v8479_v37 = vld [vmem:[%s8951_s12 + $0x88] sm:$0xff]  }
 0x194   : > { %v1138_v17 = vpop.f32.mrf.mxu2  ;;  %v1586_v54 = vor.u32 %v1585_v10, %v1582_v24 }
 0x195   : > { %v1240_v25 = vadd.f32 %v1138_v17, %v9195_v23  ;;  %v2450_v23 = vrot.slane %v2448_v9, 1  ;;  %v8639_v9 = vld [vmem:[%s8951_s12 + $0x74] sm:$0xff]  }
 0x196   : > { %v1766_v60 = vpop.f32.mrf.mxu3  ;;  %v1587_v62 = vsel %vm1444_vm3, %v1577_v56, %v1586_v54 }
 0x197   : > { %v2028_v36 = vpop.f32.mrf.mxu0  ;;  %v1865_v13 = vadd.f32 %v1763_v53, %v1240_v25  ;;  %v8829_v25 = vld [vmem:[%s8951_s12 + $0x78] sm:$0xff] }
 0x198   : > { %v2131_v19 = vadd.f32 %v2028_v36, %v1864_v44  ;;  %v2627_v41 = vpop.f32.mrf.mxu1  ;;  %v1017_v36 = vrot.slane %v8829_v25, 1 }
 0x199   : > { %7659 = vmatmul.msk.bf16.gmra.mxu2 %vm610_vm1, %v1016_v31  ;;  %v1592_v31 = vshll.u32 %v8479_v37, 16 }
 0x19a   : > { %v9410_v58 = vadd.f32 %v2625_v29, %v2131_v19  ;;  %7706 = vmatmul.msk.bf16.gmra.mxu0 %vm610_vm1, %v8637_v59  ;;  %v2451_v29 = vsel %vm421_vm2, %v2446_v4, %v2450_v23  ;;  %v1589_v19 = vshrl.u32 %v8479_v37, 16  ;;  %v2452_v4 = vshrl.u32 %v8254_v5, 16 }
 0x19c   : > { %v1141_v44 = vpop.f32.mrf.mxu2 }
 0x19d   : > { %v1241_v6 = vadd.f32 %v1141_v44, %v9207_v51  ;;  %v8255_v51 = vld [vmem:[%s8951_s12 + $0x84] sm:$0xff] }
 0x19e   : > { %v1768_v2 = vpop.f32.mrf.mxu3  ;;  %v2456_v44 = vshll.u32 %v8255_v51, 16 }
 0x19f   : > { %v2030_v18 = vpop.f32.mrf.mxu0  ;;  %v1866_v17 = vadd.f32 %v1766_v60, %v1241_v6  ;;  %v1018_v60 = vsel %vm987_vm4, %v1015_v49, %v1017_v36 }
 0x1a0   : > { %v2132_v53 = vadd.f32 %v2030_v18, %v1865_v13  ;;  %v2630_v8 = vpop.f32.mrf.mxu1  ;;  %v1591_v18 = vrot.slane %v1589_v19, 3 }
 0x1a2   : > { %v9417_v59 = vadd.f32 %v2627_v41, %v2132_v53  ;;  %v1594_v53 = vrot.slane %v1592_v31, 4 }
 0x1a3   : > { %7823 = vmatmul.msk.bf16.gmra.mxu1 %vm610_vm1, %v2451_v29  ;;  %7684 = vmatmul.msk.bf16.gmra.mxu3 %vm610_vm1, %v1587_v62  ;;  %v2454_v62 = vor.u32 %v2452_v4, %v2450_v23  ;;  %v8480_v23 = vld [vmem:[%s8951_s12 + $0x90] sm:$0xff]  }
 0x1a4   : > { %v1143_v55 = vpop.f32.mrf.mxu2  ;;  %v1595_v37 = vor.u32 %v1594_v53, %v1591_v18 }
 0x1a5   : > { %v1242_v13 = vadd.f32 %v1143_v55, %v9214_v28  ;;  %v2458_v28 = vrot.slane %v2456_v44, 1  ;;  %v8641_v44 = vld [vmem:[%s8951_s12 + $0x7c] sm:$0xff]  }
 0x1a6   : > { %v1771_v10 = vpop.f32.mrf.mxu3  ;;  %v1596_v31 = vsel %vm1444_vm3, %v1586_v54, %v1595_v37 }
 0x1a7   : > { %v2033_v24 = vpop.f32.mrf.mxu0  ;;  %v1867_v6 = vadd.f32 %v1768_v2, %v1242_v13  ;;  %v8830_v13 = vld [vmem:[%s8951_s12 + $0x80] sm:$0xff] }
 0x1a8   : > { %v2133_v56 = vadd.f32 %v2033_v24, %v1866_v17  ;;  %v2632_v41 = vpop.f32.mrf.mxu1  ;;  %v1019_v24 = vrot.slane %v8830_v13, 1 }
 0x1a9   : > { %7660 = vmatmul.msk.bf16.gmra.mxu2 %vm610_vm1, %v1018_v60  ;;  %v1601_v60 = vshll.u32 %v8480_v23, 16 }
 0x1aa   : > { %v9427_v29 = vadd.f32 %v2630_v8, %v2133_v56  ;;  %7707 = vmatmul.msk.bf16.gmra.mxu0 %vm610_vm1, %v8639_v9  ;;  %v2459_v8 = vsel %vm421_vm2, %v2454_v62, %v2458_v28  ;;  %v1598_v56 = vshrl.u32 %v8480_v23, 16  ;;  %v2460_v62 = vshrl.u32 %v8255_v51, 16 }
 0x1ac   : > { %v1146_v17 = vpop.f32.mrf.mxu2 }
 0x1ad   : > { %v1243_v49 = vadd.f32 %v1146_v17, %v9226_v35  ;;  %v9441_v35 = vld [vmem:[%s8951_s12 + $0x8c] sm:$0xff] }
 0x1ae   : > { %v1773_v25 = vpop.f32.mrf.mxu3  ;;  %v2464_v17 = vshll.u32 %v9441_v35, 16 }
 0x1af   : > { %v2035_v5 = vpop.f32.mrf.mxu0  ;;  %v1868_v55 = vadd.f32 %v1771_v10, %v1243_v49 }
 0x1b0   : > { %v2134_v2 = vadd.f32 %v2035_v5, %v1867_v6  ;;  %v2635_v19 = vpop.f32.mrf.mxu1  ;;  %v1600_v5 = vrot.slane %v1598_v56, 3 }
 0x1b2   : > { %v9434_v9 = vadd.f32 %v2632_v41, %v2134_v2  ;;  %v1020_v41 = vsel %vm987_vm4, %v1017_v36, %v1019_v24  ;;  %v1603_v2 = vrot.slane %v1601_v60, 4 }
 0x1b3   : > { %7824 = vmatmul.msk.bf16.gmra.mxu1 %vm610_vm1, %v2459_v8  ;;  %7685 = vmatmul.msk.bf16.gmra.mxu3 %vm610_vm1, %v1596_v31  ;;  %v2466_v31 = vrot.slane %v2464_v17, 1 }
 0x1b4   : > { %v1148_v4 = vpop.f32.mrf.mxu2  ;;  %v1604_v23 = vor.u32 %v1603_v2, %v1600_v5 }
 0x1b5   : > { %v1244_v6 = vadd.f32 %v1148_v4, %v9233_v7  ;;  %v2462_v7 = vor.u32 %v2460_v62, %v2458_v28  ;;  %v8481_v28 = vld [vmem:[%s8951_s12 + $0x98] sm:$0xff]   ;;  %v8643_v62 = vld [vmem:[%s8951_s12 + $0x84] sm:$0xff]  }
 0x1b6   : > { %v1776_v54 = vpop.f32.mrf.mxu3  ;;  %v1605_v56 = vsel %vm1444_vm3, %v1595_v37, %v1604_v23  ;;  %v9464_v37 = vld [vmem:[%s8951_s12 + $0x94] sm:$0xff] }
 0x1b7   : > { %v2038_v18 = vpop.f32.mrf.mxu0  ;;  %v1869_v49 = vadd.f32 %v1773_v25, %v1244_v6  ;;  %v8880_v6 = vmov 0  }
 0x1b8   : > { %v2135_v10 = vadd.f32 %v2038_v18, %v1868_v55  ;;  %v2637_v53 = vpop.f32.mrf.mxu1  ;;  %8821 = vset.pattern.permute.xlu0 %v8880_v6  ;;  %8822 = vset.pattern.permute.xlu1 %v8880_v6  ;;  %v8831_v18 = vld [vmem:[%s8951_s12 + $0x88] sm:$0xff] }
 0x1b9   : > { %7661 = vmatmul.msk.bf16.gmra.mxu2 %vm610_vm1, %v1020_v41  ;;  %8823 = vset.pattern.permute.xlu2 %v8880_v6  ;;  %v1610_v41 = vshll.u32 %v8481_v28, 16 }
 0x1ba   : > { %v9447_v8 = vadd.f32 %v2635_v19, %v2135_v10  ;;  %7708 = vmatmul.msk.bf16.gmra.mxu0 %vm610_vm1, %v8641_v44  ;;  %v2467_v19 = vsel %vm421_vm2, %v2462_v7, %v2466_v31  ;;  %v1021_v10 = vrot.slane %v8831_v18, 1 }
 0x1bc   : > { %v1151_v55 = vpop.f32.mrf.mxu2  ;;  %v1022_v7 = vsel %vm987_vm4, %v1019_v24, %v1021_v10 }
 0x1bd   : > { %v1245_v36 = vadd.f32 %v1151_v55, %v9245_v32  ;;  %v4049_v32 = vld [vmem:[%s11526_s5] sm:$0xff] }
 0x1be   : > { %v1778_v51 = vpop.f32.mrf.mxu3  ;;  %4097 = vperm.xlu0 %8821, %v4049_v32  }
 0x1bf   : > { %v2040_v13 = vpop.f32.mrf.mxu0  ;;  %v1870_v60 = vadd.f32 %v1776_v54, %v1245_v36  ;;  %v1607_v54 = vshrl.u32 %v8481_v28, 16  ;;  %v2468_v36 = vshrl.u32 %v9441_v35, 16 }
 0x1c0   : > { %v2136_v4 = vadd.f32 %v2040_v13, %v1869_v49  ;;  %v2640_v25 = vpop.f32.mrf.mxu1  ;;  %v2472_v13 = vshll.u32 %v9464_v37, 16 }
 0x1c1   : > { %v2470_v24 = vor.u32 %v2468_v36, %v2466_v31  ;;  %v8482_v31 = vld [vmem:[%s8951_s12 + $0xa0] sm:$0xff]  }
 0x1c2   : > { %v9454_v44 = vadd.f32 %v2637_v53, %v2136_v4  ;;  %v1616_v36 = vshrl.u32 %v8482_v31, 16 }
 0x1c3   : > { %7825 = vmatmul.msk.bf16.gmra.mxu1 %vm610_vm1, %v2467_v19  ;;  %7686 = vmatmul.msk.bf16.gmra.mxu3 %vm610_vm1, %v1605_v56  ;;  %v1609_v19 = vrot.slane %v1607_v54, 3  ;;  %v1612_v56 = vrot.slane %v1610_v41, 4 }
 0x1c4   : > { %v1153_v53 = vpop.f32.mrf.mxu2 }
 0x1c5   : > { %v1246_v17 = vadd.f32 %v1153_v53, %v9252_v30  ;;  %v4050_v30 = vld [vmem:[%s11526_s5 + $0x8] sm:$0xff]  ;;  %v1613_v35 = vor.u32 %v1612_v56, %v1609_v19 }
 0x1c6   : > { %v1781_v5 = vpop.f32.mrf.mxu3  ;;  %4102 = vperm.xlu0 %8821, %v4050_v30  }
 0x1c7   : > { %v2043_v49 = vpop.f32.mrf.mxu0  ;;  %v1871_v4 = vadd.f32 %v1778_v51, %v1246_v17  ;;  %v1614_v53 = vsel %vm1444_vm3, %v1604_v23, %v1613_v35 }
 0x1c8   : > { %v2137_v2 = vadd.f32 %v2043_v49, %v1870_v60  ;;  %v2642_v55 = vpop.f32.mrf.mxu1  ;;  %v2474_v60 = vrot.slane %v2472_v13, 1  ;;  %v4055_v49 = vld [vmem:[%s11526_s5 + $0x30] sm:$0xff]  ;;  %v1619_v13 = vshll.u32 %v8482_v31, 16 }
 0x1c9   : > { %7662 = vmatmul.msk.bf16.gmra.mxu2 %vm610_vm1, %v1022_v7  ;;  %v9491_v7 = vld [vmem:[%s8951_s12 + $0x9c] sm:$0xff] }
 0x1ca   : > { %v9471_v6 = vadd.f32 %v2640_v25, %v2137_v2  ;;  %7709 = vmatmul.msk.bf16.gmra.mxu0 %vm610_vm1, %v8643_v62  ;;  %v2475_v41 = vsel %vm421_vm2, %v2470_v24, %v2474_v60 }
 0x1cc   : > { %v1156_v28 = vpop.f32.mrf.mxu2 }
 0x1cd   : > { %v1247_v51 = vadd.f32 %v1156_v28, %v9264_v38  ;;  %v8832_v38 = vld [vmem:[%s8951_s12 + $0x90] sm:$0xff]  ;;  %v2476_v28 = vshrl.u32 %v9464_v37, 16 }
 0x1ce   : > { %v1783_v32 = vpop.f32.mrf.mxu3  ;;  %4127 = vperm.xlu0 %8821, %v4055_v49   ;;  %v1023_v2 = vrot.slane %v8832_v38, 1 }
 0x1cf   : > { %v2045_v25 = vpop.f32.mrf.mxu0  ;;  %v1872_v62 = vadd.f32 %v1781_v5, %v1247_v51  ;;  %v8645_v5 = vld [vmem:[%s8951_s12 + $0x8c] sm:$0xff]   ;;  %v2480_v51 = vshll.u32 %v9491_v7, 16  ;;  %v2478_v37 = vor.u32 %v2476_v28, %v2474_v60  ;;  %v9524_v28 = vld [vmem:[%s8951_s12 + $0xa4] sm:$0xff] }
 0x1d0   : > { %v2138_v18 = vadd.f32 %v2045_v25, %v1871_v4  ;;  %v2645_v54 = vpop.f32.mrf.mxu1  ;;  %v1024_v30 = vsel %vm987_vm4, %v1021_v10, %v1023_v2  ;;  %v4058_v10 = vld [vmem:[%s11526_s5 + $0x48] sm:$0xff] }
 0x1d1   : > { %v8483_v60 = vld [vmem:[%s8951_s12 + $0xa8] sm:$0xff]  }
 0x1d2   : > { %v9481_v17 = vadd.f32 %v2642_v55, %v2138_v18  ;;  %v1618_v18 = vrot.slane %v1616_v36, 3 }
 0x1d3   : > { %7826 = vmatmul.msk.bf16.gmra.mxu1 %vm610_vm1, %v2475_v41  ;;  %7687 = vmatmul.msk.bf16.gmra.mxu3 %vm610_vm1, %v1614_v53  ;;  %v1621_v41 = vrot.slane %v1619_v13, 4 }
 0x1d4   : > { %v1158_v23 = vpop.f32.mrf.mxu2 }
 0x1d5   : > { %v1248_v55 = vadd.f32 %v1158_v23, %v9271_v57  ;;  %v4051_v57 = vld [vmem:[%s11526_s5 + $0x10] sm:$0xff] }
 0x1d6   : > { %v1786_v19 = vpop.f32.mrf.mxu3  ;;  %4107 = vperm.xlu1 %8822, %v4051_v57   ;;  %4142 = vperm.xlu0 %8821, %v4058_v10  }
 0x1d7   : > { %v2048_v4 = vpop.f32.mrf.mxu0  ;;  %v1873_v25 = vadd.f32 %v1783_v32, %v1248_v55  ;;  %v2482_v32 = vrot.slane %v2480_v51, 1 }
 0x1d8   : > { %v2139_v56 = vadd.f32 %v2048_v4, %v1872_v62  ;;  %v2647_v24 = vpop.f32.mrf.mxu1  ;;  %v1622_v62 = vor.u32 %v1621_v41, %v1618_v18 }
 0x1d9   : > { %7663 = vmatmul.msk.bf16.gmra.mxu2 %vm610_vm1, %v1024_v30  ;;  %v2483_v23 = vsel %vm421_vm2, %v2478_v37, %v2482_v32  ;;  %v8833_v30 = vld [vmem:[%s8951_s12 + $0x98] sm:$0xff] }
 0x1da   : > { %v9498_v53 = vadd.f32 %v2645_v54, %v2139_v56  ;;  %7710 = vmatmul.msk.bf16.gmra.mxu0 %vm610_vm1, %v8645_v5  ;;  %v1623_v5 = vsel %vm1444_vm3, %v1613_v35, %v1622_v62  ;;  %v4052_v56 = vld [vmem:[%s11526_s5 + $0x18] sm:$0xff]  ;;  %v1025_v35 = vrot.slane %v8833_v30, 1 }
 0x1dc   : > { %v1161_v54 = vpop.f32.mrf.mxu2  ;;  %v1026_v37 = vsel %vm987_vm4, %v1023_v2, %v1025_v35  ;;  %v4064_v2 = vld [vmem:[%s11526_s5 + $0x78] sm:$0xff] }
 0x1dd   : > { %v1249_v31 = vadd.f32 %v1161_v54, %v9283_v61  ;;  %v4061_v61 = vld [vmem:[%s11526_s5 + $0x60] sm:$0xff] }
 0x1de   : > { %v1788_v38 = vpop.f32.mrf.mxu3  ;;  %4112 = vperm.xlu1 %8822, %v4052_v56   ;;  %4157 = vperm.xlu0 %8821, %v4061_v61  }
 0x1df   : > { %v2050_v49 = vpop.f32.mrf.mxu0  ;;  %v1874_v55 = vadd.f32 %v1786_v19, %v1249_v31  ;;  %v1625_v19 = vshrl.u32 %v8483_v60, 16  ;;  %v2484_v31 = vshrl.u32 %v9491_v7, 16 }
 0x1e0   : > { %v2140_v36 = vadd.f32 %v2050_v49, %v1873_v25  ;;  %v2650_v13 = vpop.f32.mrf.mxu1  ;;  %v8647_v25 = vld [vmem:[%s8951_s12 + $0x94] sm:$0xff]   ;;  %v2488_v49 = vshll.u32 %v9524_v28, 16 }
 0x1e1   : > { %v2486_v7 = vor.u32 %v2484_v31, %v2482_v32  ;;  %v8484_v32 = vld [vmem:[%s8951_s12 + $0xb0] sm:$0xff]  }
 0x1e2   : > { %v9511_v4 = vadd.f32 %v2647_v24, %v2140_v36  ;;  %v1628_v24 = vshll.u32 %v8483_v60, 16  ;;  %v1637_v31 = vshll.u32 %v8484_v32, 16 }
 0x1e3   : > { %7827 = vmatmul.msk.bf16.gmra.mxu1 %vm610_vm1, %v2483_v23  ;;  %7688 = vmatmul.msk.bf16.gmra.mxu3 %vm610_vm1, %v1623_v5  ;;  %v1627_v23 = vrot.slane %v1625_v19, 3 }
 0x1e4   : > { %v1163_v51 = vpop.f32.mrf.mxu2  ;;  %v1630_v5 = vrot.slane %v1628_v24, 4 }
 0x1e5   : > { %v1250_v18 = vadd.f32 %v1163_v51, %v9290_v42  ;;  %v4056_v42 = vld [vmem:[%s11526_s5 + $0x38] sm:$0xff] }
 0x1e6   : > { %v1791_v57 = vpop.f32.mrf.mxu3  ;;  %4132 = vperm.xlu1 %8822, %v4056_v42   ;;  %4172 = vperm.xlu0 %8821, %v4064_v2  }
 0x1e7   : > { %v2053_v41 = vpop.f32.mrf.mxu0  ;;  %v1875_v36 = vadd.f32 %v1788_v38, %v1250_v18  ;;  %v2490_v38 = vrot.slane %v2488_v49, 1 }
 0x1e8   : > { %v2141_v10 = vadd.f32 %v2053_v41, %v1874_v55  ;;  %v2652_v54 = vpop.f32.mrf.mxu1  ;;  %v1631_v55 = vor.u32 %v1630_v5, %v1627_v23 }
 0x1e9   : > { %7664 = vmatmul.msk.bf16.gmra.mxu2 %vm610_vm1, %v1026_v37  ;;  %v2491_v51 = vsel %vm421_vm2, %v2486_v7, %v2490_v38  ;;  %v9556_v37 = vld [vmem:[%s8951_s12 + $0xa0] sm:$0xff] }
 0x1ea   : > { %v9531_v56 = vadd.f32 %v2650_v13, %v2141_v10  ;;  %7711 = vmatmul.msk.bf16.gmra.mxu0 %vm610_vm1, %v8647_v25  ;;  %v1632_v25 = vsel %vm1444_vm3, %v1622_v62, %v1631_v55  ;;  %v4059_v10 = vld [vmem:[%s11526_s5 + $0x50] sm:$0xff]  ;;  %v1027_v62 = vrot.slane %v9556_v37, 1 }
 0x1ec   : > { %v1166_v13 = vpop.f32.mrf.mxu2  ;;  %v1028_v7 = vsel %vm987_vm4, %v1025_v35, %v1027_v62  ;;  %v4062_v35 = vld [vmem:[%s11526_s5 + $0x68] sm:$0xff] }
 0x1ed   : > { %v1251_v60 = vadd.f32 %v1166_v13, %v9302_v16  ;;  %v4067_v16 = vld [vmem:[%s11526_s5 + $0x90] sm:$0xff] }
 0x1ee   : > { %v1793_v30 = vpop.f32.mrf.mxu3  ;;  %4147 = vperm.xlu1 %8822, %v4059_v10   ;;  %4187 = vperm.xlu0 %8821, %v4067_v16  }
 0x1ef   : > { %v2055_v61 = vpop.f32.mrf.mxu0  ;;  %v1876_v18 = vadd.f32 %v1791_v57, %v1251_v60  ;;  %v9560_v57 = vld [vmem:[%s8951_s12 + $0xac] sm:$0xff]  ;;  %v2492_v60 = vshrl.u32 %v9524_v28, 16 }
 0x1f0   : > { %v2142_v19 = vadd.f32 %v2055_v61, %v1875_v36  ;;  %v2655_v24 = vpop.f32.mrf.mxu1  ;;  %v8649_v36 = vld [vmem:[%s8951_s12 + $0x9c] sm:$0xff]   ;;  %v2496_v61 = vshll.u32 %v9560_v57, 16  ;;  %v4070_v28 = vld [vmem:[%s11526_s5 + $0xa8] sm:$0xff] }
 0x1f2   : > { %v9544_v41 = vadd.f32 %v2652_v54, %v2142_v19  ;;  %v1634_v54 = vshrl.u32 %v8484_v32, 16 }
 0x1f3   : > { %7828 = vmatmul.msk.bf16.gmra.mxu1 %vm610_vm1, %v2491_v51  ;;  %7689 = vmatmul.msk.bf16.gmra.mxu3 %vm610_vm1, %v1632_v25  ;;  %v1639_v25 = vrot.slane %v1637_v31, 4 }
 0x1f4   : > { %v1168_v49 = vpop.f32.mrf.mxu2  ;;  %v1636_v51 = vrot.slane %v1634_v54, 3 }
 0x1f5   : > { %v1252_v23 = vadd.f32 %v1168_v49, %v9309_v63  ;;  %v8265_v63 = vld [vmem:[%s11524_s3 + $0x10] sm:$0xff] }
 0x1f6   : > { %v1796_v42 = vpop.f32.mrf.mxu3  ;;  %4162 = vperm.xlu1 %8822, %v4062_v35   ;;  %4709 = vmatpush.bf16.msra.mxu1 %v8265_v63 }
 0x1f7   : > { %v2058_v5 = vpop.f32.mrf.mxu0  ;;  %v1877_v19 = vadd.f32 %v1793_v30, %v1252_v23  ;;  %v2494_v30 = vor.u32 %v2492_v60, %v2490_v38  ;;  %4202 = vperm.xlu0 %8821, %v4070_v28   ;;  %v4073_v60 = vld [vmem:[%s11526_s5 + $0xc0] sm:$0xff] }
 0x1f8   : > { %v2143_v2 = vadd.f32 %v2058_v5, %v1876_v18  ;;  %v2657_v13 = vpop.f32.mrf.mxu1  ;;  %v1640_v18 = vor.u32 %v1639_v25, %v1636_v51  ;;  %v8651_v25 = vld [vmem:[%s8951_s12 + $0xa4] sm:$0xff]  }
 0x1f9   : > { %7665 = vmatmul.msk.bf16.gmra.mxu2 %vm610_vm1, %v1028_v7  ;;  %v4065_v7 = vld [vmem:[%s11526_s5 + $0x80] sm:$0xff] }
 0x1fa   : > { %v9567_v10 = vadd.f32 %v2655_v24, %v2143_v2  ;;  %7712 = vmatmul.msk.bf16.gmra.mxu0 %vm610_vm1, %v8649_v36  ;;  %v2498_v24 = vrot.slane %v2496_v61, 1  ;;  %v1641_v23 = vsel %vm1444_vm3, %v1631_v55, %v1640_v18  ;;  %v9584_v2 = vld [vmem:[%s8951_s12 + $0xb8] sm:$0xff]   ;;  %v9600_v55 = vld [vmem:[%s8951_s12 + $0xa8] sm:$0xff] }
 0x1fb   : > { %v1643_v61 = vshrl.u32 %v9584_v2, 16 }
 0x1fc   : > { %v1171_v32 = vpop.f32.mrf.mxu2  ;;  %v2499_v36 = vsel %vm421_vm2, %v2494_v30, %v2498_v24 }
 0x1fd   : > { %v1253_v16 = vadd.f32 %v1171_v32, %v9324_v39  ;;  %v4053_v39 = vld [vmem:[%s11526_s5 + $0x20] sm:$0xff] }
 0x1fe   : > { %v1798_v54 = vpop.f32.mrf.mxu3  ;;  %4117 = vperm.xlu2 %8823, %v4053_v39   ;;  %4177 = vperm.xlu1 %8822, %v4065_v7   ;;  %v1323_v7 = vld [vmem:[%s8951_s12 + $0xc0] sm:$0xf] }
 0x1ff   : > { %v2060_v37 = vpop.f32.mrf.mxu0  ;;  %v1878_v5 = vadd.f32 %v1796_v42, %v1253_v16  ;;  %v1029_v42 = vrot.slane %v9600_v55, 1  ;;  %4217 = vperm.xlu0 %8821, %v4073_v60   ;;  %v4060_v55 = vld [vmem:[%s11526_s5 + $0x58] sm:$0xff] }
 0x200   : > { %v2144_v31 = vadd.f32 %v2060_v37, %v1877_v19  ;;  %v2660_v49 = vpop.f32.mrf.mxu1  ;;  %v1646_v19 = vshll.u32 %v9584_v2, 16  ;;  %v2500_v37 = vshrl.u32 %v9560_v57, 16  ;;  %v4076_v57 = vld [vmem:[%s11526_s5 + $0xd8] sm:$0xff] }
 0x201   : > { %v1030_v32 = vsel %vm987_vm4, %v1027_v62, %v1029_v42  ;;  %v4068_v62 = vld [vmem:[%s11526_s5 + $0x98] sm:$0xff] }
 0x202   : > { %v9586_v38 = vadd.f32 %v2657_v13, %v2144_v31  ;;  %v9604_v13 = vld [vmem:[%s8951_s12 + $0xb4] sm:$0xff]  ;;  %v1648_v39 = vrot.slane %v1646_v19, 4 }
 0x203   : > { %7829 = vmatmul.msk.bf16.gmra.mxu1 %vm610_vm1, %v2499_v36  ;;  %7690 = vmatmul.msk.bf16.gmra.mxu3 %vm610_vm1, %v1641_v23  ;;  %v2504_v31 = vshll.u32 %v9604_v13, 16  ;;  %v1645_v23 = vrot.slane %v1643_v61, 3  ;;  %v9633_v61 = vunpack.c.l.b16 %v1323_v7 }
 0x204   : > { %v1173_v51 = vpop.f32.mrf.mxu2 }
 0x205   : > { %v1254_v63 = vadd.f32 %v1173_v51, %v9330_v27  ;;  %v4054_v27 = vld [vmem:[%s11526_s5 + $0x28] sm:$0xff] }
 0x206   : > { %v1801_v28 = vpop.f32.mrf.mxu3  ;;  %4122 = vperm.xlu2 %8823, %v4054_v27   ;;  %4192 = vperm.xlu1 %8822, %v4068_v62  }
 0x207   : > { %v2063_v35 = vpop.f32.mrf.mxu0  ;;  %v1879_v36 = vadd.f32 %v1798_v54, %v1254_v63  ;;  %v2502_v54 = vor.u32 %v2500_v37, %v2498_v24  ;;  %4232 = vperm.xlu0 %8821, %v4076_v57   ;;  %v8653_v57 = vld [vmem:[%s8951_s12 + $0xac] sm:$0xff]  }
 0x208   : > { %v2145_v30 = vadd.f32 %v2063_v35, %v1878_v5  ;;  %v9613_v16 = vpop.f32.mrf.mxu1  ;;  %v9631_v5 = vor.u32 %v1648_v39, %v1645_v23  ;;  %v4079_v23 = vld [vmem:[%s11526_s5 + $0xf0] sm:$0xff]  ;;  %v9659_v39 = vld [vmem:[%s8951_s12 + $0xbc] sm:$0xff] }
 0x209   : > { %11568 = vst [vmem:[#allocation13_spill] sm:$0xff] %v9613_v16  ;;  %7666 = vmatmul.msk.bf16.gmra.mxu2 %vm610_vm1, %v1030_v32 }
 0x20a   : > { %v9618_v60 = vadd.f32 %v2660_v49, %v2145_v30  ;;  %7713 = vmatmul.msk.bf16.gmra.mxu0 %vm610_vm1, %v8651_v25  ;;  %v2506_v49 = vrot.slane %v2504_v31, 1  ;;  %v1650_v24 = vsel %vm1444_vm3, %v1640_v18, %v9631_v5  ;;  %v1443_v31 = vpack.c.b16 %v9633_v61, %v9633_v61  ;;  %v9655_v18 = vld [vmem:[%s8951_s12 + $0xb0] sm:$0xff] }
 0x20c   : > { %11569 = vst [vmem:[#allocation14_spill] sm:$0xff] %v9618_v60  ;;  %v1176_v19 = vpop.f32.mrf.mxu2  ;;  %v2507_v32 = vsel %vm421_vm2, %v2502_v54, %v2506_v49  ;;  %v1652_v7 = vshrl.u32 %v1443_v31, 16  ;;  %v1655_v27 = vshll.u32 %v1443_v31, 16  ;;  %v2512_v31 = vshll.u32 %v9659_v39, 16 }
 0x20d   : > { %v1255_v51 = vadd.f32 %v1176_v19, %v9083_v15  ;;  %v4057_v15 = vld [vmem:[%s11526_s5 + $0x40] sm:$0xff] }
 0x20e   : > { %v1803_v63 = vpop.f32.mrf.mxu3  ;;  %4137 = vperm.xlu2 %8823, %v4057_v15   ;;  %v2508_v15 = vshrl.u32 %v9604_v13, 16  ;;  %v4082_v13 = vld [vmem:[%s11526_s5 + $0x108] sm:$0xff] }
 0x20f   : > { %v2065_v25 = vpop.f32.mrf.mxu0  ;;  %v1880_v37 = vadd.f32 %v1801_v28, %v1255_v51  ;;  %v11528_v28 = vrot.slane %v9655_v18, 1  ;;  %4247 = vperm.xlu0 %8821, %v4079_v23   ;;  %v1654_v23 = vrot.slane %v1652_v7, 3  ;;  %v2215_v7 = vld [vmem:[%s8951_s12 + $0xc4] sm:$0x1] }
 0x210   : > { %v9636_v35 = vadd.f32 %v2065_v25, %v1879_v36  ;;  %v2665_v30 = vpop.f32.mrf.mxu1  ;;  %v4071_v36 = vld [vmem:[%s11526_s5 + $0xb0] sm:$0xff] }
 0x211   : > { %4207 = vperm.xlu1 %8822, %v4071_v36  }
 0x212   : > { %11570 = vst [vmem:[#allocation15_spill] sm:$0xff] %v9636_v35 }
 0x213   : > { %7830 = vmatmul.msk.bf16.gmra.mxu1 %vm610_vm1, %v2507_v32  ;;  %7691 = vmatmul.msk.bf16.gmra.mxu3 %vm610_vm1, %v1650_v24  ;;  %v1032_v32 = vsel %vm987_vm4, %v1029_v42, %v11528_v28  ;;  %v4074_v42 = vld [vmem:[%s11526_s5 + $0xc8] sm:$0xff] }
 0x214   : > { %v1178_v62 = vpop.f32.mrf.mxu2 }
 0x215   : > { %v1256_v54 = vadd.f32 %v1178_v62, %v9093_v33  ;;  %v1657_v33 = vrot.slane %v1655_v27, 4 }
 0x216   : > { %v1806_v51 = vpop.f32.mrf.mxu3  ;;  %4152 = vperm.xlu2 %8823, %v4060_v55   ;;  %v9693_v55 = vld [vmem:[%s8951_s12 + $0x1c] sm:$0xff]  }
 0x217   : > { %v2068_v19 = vpop.f32.mrf.mxu0  ;;  %v1881_v36 = vadd.f32 %v1803_v63, %v1256_v54  ;;  %v2510_v63 = vor.u32 %v2508_v15, %v2506_v49  ;;  %4262 = vperm.xlu0 %8821, %v4082_v13   ;;  %v8767_v54 = vld [vmem:[%s8951_s12 + $0x14] sm:$0xf0]   ;;  %v2311_v49 = vunpack.c.l.b16 %v2215_v7 }
 0x218   : > { %v2147_v25 = vadd.f32 %v2068_v19, %v1880_v37  ;;  %v9668_v24 = vpop.f32.mrf.mxu1  ;;  %v1658_v37 = vor.u32 %v1657_v33, %v1654_v23  ;;  %v4085_v33 = vld [vmem:[%s11526_s5 + $0x120] sm:$0xff] }
 0x219   : > { %11571 = vst [vmem:[#allocation16_spill] sm:$0xff] %v9668_v24  ;;  %7667 = vmatmul.msk.bf16.gmra.mxu2 %vm610_vm1, %v1032_v32  ;;  %4222 = vperm.xlu1 %8822, %v4074_v42   ;;  %v1033_v42 = vrot.slane %v9108_v45, 1 }
 0x21a   : > { %v9672_v62 = vadd.f32 %v2665_v30, %v2147_v25  ;;  %7714 = vmatmul.msk.bf16.gmra.mxu0 %vm610_vm1, %v8653_v57  ;;  %v2514_v30 = vrot.slane %v2512_v31, 1  ;;  %v8657_v57 = vld [vmem:[%s8951_s12 + $0x14] sm:$0x8]  ;;  %v1659_v15 = vsel %vm1444_vm3, %v9631_v5, %v1658_v37  ;;  %v3238_v5 = vshrl.u32 %v9693_v55, 16 }
 0x21b   : > { %v9697_v23 = vor.u32 %v8767_v54, %v8657_v57  ;;  %v3241_v37 = vshll.u32 %v9693_v55, 16 }
 0x21c   : > { %11572 = vst [vmem:[#allocation17_spill] sm:$0xff] %v9672_v62  ;;  %v1181_v27 = vpop.f32.mrf.mxu2  ;;  %v2515_v32 = vsel %vm421_vm2, %v2510_v63, %v2514_v30 }
 0x21d   : > { %v1257_v19 = vadd.f32 %v1181_v27, %v9111_v50  ;;  %v4063_v50 = vld [vmem:[%s11526_s5 + $0x70] sm:$0xff]  ;;  %v3230_v13 = vshrl.u32 %v9697_v23, 16  ;;  %v3233_v63 = vshll.u32 %v9697_v23, 16  ;;  %v3243_v35 = vrot.slane %v3241_v37, 4 }
 0x21e   : > { %v1808_v28 = vpop.f32.mrf.mxu3  ;;  %4167 = vperm.xlu2 %8823, %v4063_v50   ;;  %v8654_v27 = vld [vmem:[%s8951_s12 + $0xb4] sm:$0xff]   ;;  %v2516_v50 = vshrl.u32 %v9659_v39, 16 }
 0x21f   : > { %v2070_v25 = vpop.f32.mrf.mxu0  ;;  %v1882_v31 = vadd.f32 %v1806_v51, %v1257_v19  ;;  %v2335_v51 = vpack.c.b16 %v2311_v49, %v2311_v49  ;;  %4277 = vperm.xlu0 %8821, %v4085_v33   ;;  %v11574_v19 = vrot.slane %v9655_v18, 1  ;;  %v3232_v16 = vrot.slane %v3230_v13, 3  ;;  %v4080_v18 = vld [vmem:[%s11526_s5 + $0xf8] sm:$0xff] }
 0x220   : > { %v9689_v24 = vadd.f32 %v2070_v25, %v1881_v36  ;;  %v2670_v62 = vpop.f32.mrf.mxu1  ;;  %v4077_v36 = vld [vmem:[%s11526_s5 + $0xe0] sm:$0xff]  ;;  %v3235_v33 = vrot.slane %v3233_v63, 4  ;;  %v4088_v39 = vld [vmem:[%s11526_s5 + $0x138] sm:$0xff] }
 0x221   : > { %4237 = vperm.xlu1 %8822, %v4077_v36   ;;  %v1034_v25 = vsel %vm987_vm4, %v11574_v19, %v1033_v42  ;;  %v2520_v36 = vshll.u32 %v2335_v51, 16  ;;  %v9742_v19 = vld [vmem:[%s8951_s12 + $0x24] sm:$0xff]  }
 0x222   : > { %11573 = vst [vmem:[#allocation18_spill] sm:$0xff] %v9689_v24 }
 0x223   : > { %7831 = vmatmul.msk.bf16.gmra.mxu1 %vm610_vm1, %v2515_v32  ;;  %7692 = vmatmul.msk.bf16.gmra.mxu3 %vm610_vm1, %v1659_v15  ;;  %v3240_v15 = vrot.slane %v3238_v5, 3 }
 0x224   : > { %v1183_v7 = vpop.f32.mrf.mxu2 }
 0x225   : > { %v1258_v45 = vadd.f32 %v1183_v7, %v9136_v20  ;;  %v4066_v20 = vld [vmem:[%s11526_s5 + $0x88] sm:$0xff]  ;;  %v3244_v42 = vor.u32 %v3243_v35, %v3240_v15  ;;  %v4091_v35 = vld [vmem:[%s11526_s5 + $0x150] sm:$0xff] }
 0x226   : > { %v1811_v54 = vpop.f32.mrf.mxu3  ;;  %4182 = vperm.xlu2 %8823, %v4066_v20  }
 0x227   : > { %v2073_v57 = vpop.f32.mrf.mxu0  ;;  %v1883_v24 = vadd.f32 %v1808_v28, %v1258_v45  ;;  %v2518_v28 = vor.u32 %v2516_v50, %v2514_v30  ;;  %4292 = vperm.xlu0 %8821, %v4088_v39   ;;  %v8372_v30 = vunpack.c.h.b16 %v9584_v2  ;;  %v2935_v2 = vrot.slane %v9693_v55, 3 }
 0x228   : > { %v2149_v32 = vadd.f32 %v2073_v57, %v1882_v31  ;;  %v9720_v49 = vpop.f32.mrf.mxu1  ;;  %v3236_v31 = vor.u32 %v3235_v33, %v3232_v16  ;;  %v4069_v16 = vld [vmem:[%s11526_s5 + $0xa0] sm:$0xff] }
 0x229   : > { %7668 = vmatmul.msk.bf16.gmra.mxu2 %vm610_vm1, %v1034_v25  ;;  %4252 = vperm.xlu1 %8822, %v4080_v18   ;;  %v3250_v25 = vshll.u32 %v9742_v19, 16  ;;  %v1926_v15 = vpack.c.b16 %v9633_v61, %v8372_v30  ;;  %v4072_v61 = vld [vmem:[%s11526_s5 + $0xb8] sm:$0xff] }
 0x22a   : > { %v9723_v60 = vadd.f32 %v2670_v62, %v2149_v32  ;;  %7715 = vmatmul.msk.bf16.gmra.mxu0 %vm610_vm1, %v8654_v27  ;;  %v2522_v62 = vrot.slane %v2520_v36, 1  ;;  %v3245_v45 = vsel %vm1444_vm3, %v3236_v31, %v3244_v42  ;;  %v4094_v31 = vld [vmem:[%s11526_s5 + $0x168] sm:$0xff] }
 0x22c   : > { %v1186_v5 = vpop.f32.mrf.mxu2  ;;  %v2523_v27 = vsel %vm421_vm2, %v2518_v28, %v2522_v62  ;;  %v3252_v28 = vrot.slane %v3250_v25, 4 }
 0x22d   : > { %v1259_v51 = vadd.f32 %v1186_v5, %v9150_v48  ;;  %v4083_v48 = vld [vmem:[%s11526_s5 + $0x110] sm:$0xff] }
 0x22e   : > { %v1813_v63 = vpop.f32.mrf.mxu3  ;;  %4197 = vperm.xlu2 %8823, %v4069_v16   ;;  %v9783_v16 = vld [vmem:[%s8951_s12 + $0x2c] sm:$0xff]  }
 0x22f   : > { %v2075_v13 = vpop.f32.mrf.mxu0  ;;  %v1884_v57 = vadd.f32 %v1811_v54, %v1259_v51  ;;  %v3247_v54 = vshrl.u32 %v9742_v19, 16  ;;  %4307 = vperm.xlu0 %8821, %v4091_v35   ;;  %v4089_v35 = vld [vmem:[%s11526_s5 + $0x140] sm:$0xff] }
 0x230   : > { %v9737_v37 = vadd.f32 %v2075_v13, %v1883_v24  ;;  %v2675_v7 = vpop.f32.mrf.mxu1  ;;  %v2934_v24 = vrot.slane %v9697_v23, 3 }
 0x231   : > { %4267 = vperm.xlu1 %8822, %v4083_v48   ;;  %v3249_v39 = vrot.slane %v3247_v54, 3  ;;  %v4075_v48 = vld [vmem:[%s11526_s5 + $0xd0] sm:$0xff] }
 0x232   : > { %v2936_v18 = vsel %vm2933_vm5, %v2934_v24, %v2935_v2  ;;  %v3256_v24 = vshrl.u32 %v9783_v16, 16 }
 0x233   : > { %7832 = vmatmul.msk.bf16.gmra.mxu1 %vm610_vm1, %v2523_v27  ;;  %7858 = vmatmul.msk.bf16.vlgmr.msra.gmra.mxu3 %vm610_vm1, %v3245_v45  ;;  %v3253_v5 = vor.u32 %v3252_v28, %v3249_v39  ;;  %v4092_v28 = vld [vmem:[%s11526_s5 + $0x158] sm:$0xff] }
 0x234   : > { %v1188_v32 = vpop.f32.mrf.mxu2 }
 0x235   : > { %v1260_v50 = vadd.f32 %v1188_v32, %v9163_v14  ;;  %v4086_v14 = vld [vmem:[%s11526_s5 + $0x128] sm:$0xff] }
 0x236   : > { %v1816_v33 = vpop.f32.mrf.mxu3  ;;  %4212 = vperm.xlu2 %8823, %v4072_v61  }
 0x237   : > { %v2078_v36 = vpop.f32.mrf.mxu0  ;;  %v1885_v55 = vadd.f32 %v1813_v63, %v1260_v50  ;;  %4322 = vperm.xlu0 %8821, %v4094_v31   ;;  %v8591_v50 = vld [vmem:[%s8951_s12 + $0x18] sm:$0xff]  }
 0x238   : > { %v2151_v20 = vadd.f32 %v2078_v36, %v1884_v57  ;;  %v9763_v23 = vpop.f32.mrf.mxu1  ;;  %v3254_v57 = vsel %vm1444_vm3, %v3244_v42, %v3253_v5  ;;  %v3259_v42 = vshll.u32 %v9783_v16, 16 }
 0x239   : > { %7834 = vmatmul.msk.bf16.vlgmr.msra.gmra.mxu2 %vm610_vm1, %v2936_v18  ;;  %4282 = vperm.xlu1 %8822, %v4086_v14  }
 0x23a   : > { %v9765_v62 = vadd.f32 %v2675_v7, %v2151_v20  ;;  %7716 = vmatmul.msk.bf16.gmra.mxu0 %vm610_vm1, %v1926_v15  ;;  %v3261_v39 = vrot.slane %v3259_v42, 4 }
 0x23c   : > { %v1191_v51 = vpop.f32.mrf.mxu2 }
 0x23d   : > { %v1261_v13 = vadd.f32 %v1191_v51, %v9172_v34  ;;  %v2937_v34 = vrot.slane %v9742_v19, 3 }
 0x23e   : > { %v1818_v7 = vpop.f32.mrf.mxu3  ;;  %4227 = vperm.xlu2 %8823, %v4075_v48  }
 0x23f   : > { %v2080_v63 = vpop.f32.mrf.mxu0  ;;  %v1886_v30 = vadd.f32 %v1816_v33, %v1261_v13  ;;  %v2938_v33 = vsel %vm2933_vm5, %v2935_v2, %v2937_v34 }
 0x240   : > { %v9779_v27 = vadd.f32 %v2080_v63, %v1885_v55  ;;  %v2680_v45 = vpop.f32.mrf.mxu1  ;;  %v3258_v55 = vrot.slane %v3256_v24, 3 }
 0x241   : > { %4297 = vperm.xlu1 %8822, %v4089_v35  }
 0x242   : > { %v3262_v2 = vor.u32 %v3261_v39, %v3258_v55 }
 0x243   : > { %7859 = vmatmul.msk.bf16.gmra.mxu3 %vm610_vm1, %v3254_v57  ;;  %v9815_v57 = vld [vmem:[%s8951_s12 + $0x34] sm:$0xff]  }
 0x244   : > { %v1193_v54 = vpop.f32.mrf.mxu2  ;;  %v3265_v48 = vshrl.u32 %v9815_v57, 16  ;;  %v3268_v35 = vshll.u32 %v9815_v57, 16 }
 0x245   : > { %v1262_v25 = vadd.f32 %v1193_v54, %v9186_v3  ;;  %v4078_v3 = vld [vmem:[%s11526_s5 + $0xe8] sm:$0xff] }
 0x246   : > { %v1821_v15 = vpop.f32.mrf.mxu3  ;;  %4242 = vperm.xlu2 %8823, %v4078_v3  }
 0x247   : > { %v2083_v32 = vpop.f32.mrf.mxu0  ;;  %v1887_v18 = vadd.f32 %v1818_v7, %v1262_v25  ;;  %v3263_v7 = vsel %vm1444_vm3, %v3253_v5, %v3262_v2  ;;  %v8592_v25 = vld [vmem:[%s8951_s12 + $0x20] sm:$0xff]  }
 0x248   : > { %v2153_v36 = vadd.f32 %v2083_v32, %v1886_v30  ;;  %v9798_v20 = vpop.f32.mrf.mxu1  ;;  %v4081_v30 = vld [vmem:[%s11526_s5 + $0x100] sm:$0xff] }
 0x249   : > { %7835 = vmatmul.msk.bf16.gmra.mxu2 %vm610_vm1, %v2938_v33  ;;  %4312 = vperm.xlu1 %8822, %v4092_v28   ;;  %v3267_v33 = vrot.slane %v3265_v48, 3 }
 0x24a   : > { %v9800_v19 = vadd.f32 %v2680_v45, %v2153_v36  ;;  %7882 = vmatmul.msk.bf16.vlgmr.msra.gmra.mxu0 %vm610_vm1, %v8591_v50 }
 0x24c   : > { %v1196_v61 = vpop.f32.mrf.mxu2 }
 0x24d   : > { %v1263_v14 = vadd.f32 %v1196_v61, %v9193_v21  ;;  %v2939_v21 = vrot.slane %v9783_v16, 3 }
 0x24e   : > { %v1823_v51 = vpop.f32.mrf.mxu3  ;;  %4257 = vperm.xlu2 %8823, %v4081_v30  }
 0x24f   : > { %v2085_v31 = vpop.f32.mrf.mxu0  ;;  %v1888_v45 = vadd.f32 %v1821_v15, %v1263_v14  ;;  %v2940_v15 = vsel %vm2933_vm5, %v2937_v34, %v2939_v21 }
 0x250   : > { %v9811_v13 = vadd.f32 %v2085_v31, %v1887_v18  ;;  %v2685_v63 = vpop.f32.mrf.mxu1  ;;  %v3270_v18 = vrot.slane %v3268_v35, 4 }
 0x252   : > { %v3271_v55 = vor.u32 %v3270_v18, %v3267_v33 }
 0x253   : > { %7860 = vmatmul.msk.bf16.gmra.mxu3 %vm610_vm1, %v3263_v7  ;;  %v4087_v7 = vld [vmem:[%s11526_s5 + $0x130] sm:$0xff] }
 0x254   : > { %v1198_v24 = vpop.f32.mrf.mxu2  ;;  %v3272_v31 = vsel %vm1444_vm3, %v3262_v2, %v3271_v55 }
 0x255   : > { %v1264_v42 = vadd.f32 %v1198_v24, %v9205_v46  ;;  %v4084_v46 = vld [vmem:[%s11526_s5 + $0x118] sm:$0xff] }
 0x256   : > { %v1826_v54 = vpop.f32.mrf.mxu3  ;;  %4272 = vperm.xlu2 %8823, %v4084_v46  }
 0x257   : > { %v2088_v5 = vpop.f32.mrf.mxu0  ;;  %v1889_v36 = vadd.f32 %v1823_v51, %v1264_v42  ;;  %v8593_v42 = vld [vmem:[%s8951_s12 + $0x28] sm:$0xff]  }
 0x258   : > { %v2155_v32 = vadd.f32 %v2088_v5, %v1888_v45  ;;  %v9827_v50 = vpop.f32.mrf.mxu1 }
 0x259   : > { %7836 = vmatmul.msk.bf16.gmra.mxu2 %vm610_vm1, %v2940_v15 }
 0x25a   : > { %v9829_v16 = vadd.f32 %v2685_v63, %v2155_v32  ;;  %7883 = vmatmul.msk.bf16.gmra.mxu0 %vm610_vm1, %v8592_v25  ;;  %v9841_v63 = vld [vmem:[%s8951_s12 + $0x3c] sm:$0xff]  }
 0x25b   : > { %v3274_v45 = vshrl.u32 %v9841_v63, 16  ;;  %v3277_v30 = vshll.u32 %v9841_v63, 16 }
 0x25c   : > { %v1201_v39 = vpop.f32.mrf.mxu2 }
 0x25d   : > { %v1265_v34 = vadd.f32 %v1201_v39, %v9212_v11  ;;  %v2941_v11 = vrot.slane %v9815_v57, 3  ;;  %v3276_v15 = vrot.slane %v3274_v45, 3  ;;  %v2943_v45 = vrot.slane %v9841_v63, 3 }
 0x25e   : > { %v1828_v28 = vpop.f32.mrf.mxu3  ;;  %4287 = vperm.xlu2 %8823, %v4087_v7   ;;  %v4093_v7 = vld [vmem:[%s11526_s5 + $0x160] sm:$0xff] }
 0x25f   : > { %v2090_v3 = vpop.f32.mrf.mxu0  ;;  %v1890_v51 = vadd.f32 %v1826_v54, %v1265_v34  ;;  %v2942_v54 = vsel %vm2933_vm5, %v2939_v21, %v2941_v11  ;;  %v11575_v21 = vld [vmem:[#allocation3_spill] sm:$0xff] }
 0x260   : > { %v9837_v61 = vadd.f32 %v2090_v3, %v1889_v36  ;;  %v2690_v14 = vpop.f32.mrf.mxu1  ;;  %v3279_v36 = vrot.slane %v3277_v30, 4 }
 0x262   : > { %v3280_v33 = vor.u32 %v3279_v36, %v3276_v15 }
 0x263   : > { %7861 = vmatmul.msk.bf16.gmra.mxu3 %vm610_vm1, %v3272_v31 }
 0x264   : > { %v1203_v48 = vpop.f32.mrf.mxu2 }
 0x265   : > { %v1266_v35 = vadd.f32 %v1203_v48, %v9224_v22  ;;  %v4090_v22 = vld [vmem:[%s11526_s5 + $0x148] sm:$0xff] }
 0x266   : > { %v1831_v24 = vpop.f32.mrf.mxu3  ;;  %4302 = vperm.xlu2 %8823, %v4090_v22  }
 0x267   : > { %v2093_v2 = vpop.f32.mrf.mxu0  ;;  %v1891_v32 = vadd.f32 %v1828_v28, %v1266_v35 }
 0x268   : > { %v2157_v5 = vadd.f32 %v2093_v2, %v1890_v51  ;;  %v9853_v25 = vpop.f32.mrf.mxu1  ;;  %v9867_v51 = vld [vmem:[%s8951_s12 + $0x44] sm:$0xff]  }
 0x269   : > { %7837 = vmatmul.msk.bf16.gmra.mxu2 %vm610_vm1, %v2942_v54  ;;  %v3283_v30 = vshrl.u32 %v9867_v51, 16  ;;  %v3286_v48 = vshll.u32 %v9867_v51, 16  ;;  %v11576_v2 = vld [vmem:[#allocation4_spill] sm:$0xff] }
 0x26a   : > { %v9855_v57 = vadd.f32 %v2690_v14, %v2157_v5  ;;  %7884 = vmatmul.msk.bf16.gmra.mxu0 %vm610_vm1, %v8593_v42  ;;  %v3281_v14 = vsel %vm1444_vm3, %v3271_v55, %v3280_v33  ;;  %v8594_v5 = vld [vmem:[%s8951_s12 + $0x30] sm:$0xff]  }
 0x26b   : > { %v3285_v22 = vrot.slane %v3283_v30, 3 }
 0x26c   : > { %v1206_v18 = vpop.f32.mrf.mxu2 }
 0x26d   : > { %v1267_v46 = vadd.f32 %v1206_v18, %v11575_v21  ;;  %v3288_v18 = vrot.slane %v3286_v48, 4  ;;  %v9890_v48 = vld [vmem:[%s8951_s12 + $0x4c] sm:$0xff]  }
 0x26e   : > { %v1833_v34 = vpop.f32.mrf.mxu3  ;;  %4317 = vperm.xlu2 %8823, %v4093_v7  }
 0x26f   : > { %v2095_v39 = vpop.f32.mrf.mxu0  ;;  %v1892_v31 = vadd.f32 %v1831_v24, %v1267_v46  ;;  %v3289_v21 = vor.u32 %v3288_v18, %v3285_v22  ;;  %v8595_v22 = vld [vmem:[%s8951_s12 + $0x38] sm:$0xff]  }
 0x270   : > { %v9863_v3 = vadd.f32 %v2095_v39, %v1891_v32  ;;  %v2695_v28 = vpop.f32.mrf.mxu1  ;;  %v2944_v32 = vsel %vm2933_vm5, %v2941_v11, %v2943_v45  ;;  %v11578_v39 = vld [vmem:[#allocation5_spill] sm:$0xff] }
 0x273   : > { %7862 = vmatmul.msk.bf16.gmra.mxu3 %vm610_vm1, %v3281_v14 }
 0x274   : > { %v1208_v35 = vpop.f32.mrf.mxu2 }
 0x275   : > { %v1268_v42 = vadd.f32 %v1208_v35, %v11576_v2  ;;  %v3292_v2 = vshrl.u32 %v9890_v48, 16 }
 0x276   : > { %v1836_v24 = vpop.f32.mrf.mxu3 }
 0x277   : > { %v2098_v55 = vpop.f32.mrf.mxu0  ;;  %v1893_v36 = vadd.f32 %v1833_v34, %v1268_v42  ;;  %v3290_v34 = vsel %vm1444_vm3, %v3280_v33, %v3289_v21  ;;  %v3295_v42 = vshll.u32 %v9890_v48, 16 }
 0x278   : > { %v2159_v54 = vadd.f32 %v2098_v55, %v1892_v31  ;;  %v9879_v15 = vpop.f32.mrf.mxu1 }
 0x279   : > { %11577 = vst [vmem:[#allocation3_spill] sm:$0xff] %v9879_v15  ;;  %7838 = vmatmul.msk.bf16.gmra.mxu2 %vm610_vm1, %v2944_v32 }
 0x27a   : > { %v9881_v63 = vadd.f32 %v2695_v28, %v2159_v54  ;;  %7885 = vmatmul.msk.bf16.gmra.mxu0 %vm610_vm1, %v8594_v5  ;;  %v2945_v28 = vrot.slane %v9867_v51, 3  ;;  %v11579_v5 = vld [vmem:[#allocation6_spill] sm:$0xff] }
 0x27c   : > { %v1211_v46 = vpop.f32.mrf.mxu2  ;;  %v2946_v33 = vsel %vm2933_vm5, %v2943_v45, %v2945_v28 }
 0x27d   : > { %v1269_v14 = vadd.f32 %v1211_v46, %v11578_v39  ;;  %v3294_v39 = vrot.slane %v3292_v2, 3 }
 0x27e   : > { %v1838_v7 = vpop.f32.mrf.mxu3 }
 0x27f   : > { %v2100_v31 = vpop.f32.mrf.mxu0  ;;  %v1894_v30 = vadd.f32 %v1836_v24, %v1269_v14  ;;  %v3297_v14 = vrot.slane %v3295_v42, 4  ;;  %v9910_v42 = vld [vmem:[%s8951_s12 + $0x54] sm:$0xff]  }
 0x280   : > { %v9886_v11 = vadd.f32 %v2100_v31, %v1893_v36  ;;  %v2700_v35 = vpop.f32.mrf.mxu1 }
 0x281   : > { %v3298_v31 = vor.u32 %v3297_v14, %v3294_v39 }
 0x283   : > { %7863 = vmatmul.msk.bf16.gmra.mxu3 %vm610_vm1, %v3290_v34 }
 0x284   : > { %v1213_v55 = vpop.f32.mrf.mxu2 }
 0x285   : > { %v1270_v54 = vadd.f32 %v1213_v55, %v11579_v5  ;;  %v11582_v55 = vld [vmem:[#allocation7_spill] sm:$0xff] }
 0x286   : > { %v1841_v36 = vpop.f32.mrf.mxu3 }
 0x287   : > { %v2103_v32 = vpop.f32.mrf.mxu0  ;;  %v1895_v46 = vadd.f32 %v1838_v7, %v1270_v54  ;;  %v3299_v7 = vsel %vm1444_vm3, %v3289_v21, %v3298_v31  ;;  %v3301_v54 = vshrl.u32 %v9910_v42, 16 }
 0x288   : > { %v2161_v18 = vadd.f32 %v2103_v32, %v1894_v30  ;;  %v9899_v24 = vpop.f32.mrf.mxu1 }
 0x289   : > { %11580 = vst [vmem:[#allocation4_spill] sm:$0xff] %v9899_v24  ;;  %7839 = vmatmul.msk.bf16.gmra.mxu2 %vm610_vm1, %v2946_v33  ;;  %v11584_v33 = vld [vmem:[#allocation8_spill] sm:$0xff] }
 0x28a   : > { %v9901_v51 = vadd.f32 %v2700_v35, %v2161_v18  ;;  %7886 = vmatmul.msk.bf16.gmra.mxu0 %vm610_vm1, %v8595_v22  ;;  %v2947_v35 = vrot.slane %v9890_v48, 3  ;;  %v3304_v22 = vshll.u32 %v9910_v42, 16 }
 0x28c   : > { %11581 = vst [vmem:[#allocation5_spill] sm:$0xff] %v9901_v51  ;;  %v1216_v34 = vpop.f32.mrf.mxu2  ;;  %v2948_v21 = vsel %vm2933_vm5, %v2945_v28, %v2947_v35 }
 0x28d   : > { %v1271_v5 = vadd.f32 %v1216_v34, %v11582_v55  ;;  %v8596_v34 = vld [vmem:[%s8951_s12 + $0x40] sm:$0xff]  }
 0x28e   : > { %v1843_v32 = vpop.f32.mrf.mxu3 }
 0x28f   : > { %v2105_v30 = vpop.f32.mrf.mxu0  ;;  %v1896_v2 = vadd.f32 %v1841_v36, %v1271_v5 }
 0x290   : > { %v9906_v45 = vadd.f32 %v2105_v30, %v1895_v46  ;;  %v2705_v24 = vpop.f32.mrf.mxu1  ;;  %v3303_v30 = vrot.slane %v3301_v54, 3  ;;  %v9930_v54 = vld [vmem:[%s8951_s12 + $0x5c] sm:$0xff]  }
 0x292   : > { %11583 = vst [vmem:[#allocation6_spill] sm:$0xff] %v9906_v45 }
 0x293   : > { %7864 = vmatmul.msk.bf16.gmra.mxu3 %vm610_vm1, %v3299_v7  ;;  %v3306_v7 = vrot.slane %v3304_v22, 4 }
 0x294   : > { %v1218_v18 = vpop.f32.mrf.mxu2 }
 0x295   : > { %v1272_v39 = vadd.f32 %v1218_v18, %v11584_v33  ;;  %v3307_v45 = vor.u32 %v3306_v7, %v3303_v30  ;;  %v11585_v33 = vld [vmem:[#allocation9_spill] sm:$0xff] }
 0x296   : > { %v1846_v46 = vpop.f32.mrf.mxu3  ;;  %v8597_v30 = vld [vmem:[%s8951_s12 + $0x48] sm:$0xff]  }
 0x297   : > { %v2108_v14 = vpop.f32.mrf.mxu0  ;;  %v1897_v5 = vadd.f32 %v1843_v32, %v1272_v39  ;;  %v3313_v39 = vshll.u32 %v9930_v54, 16 }
 0x298   : > { %v2163_v55 = vadd.f32 %v2108_v14, %v1896_v2  ;;  %v9919_v36 = vpop.f32.mrf.mxu1  ;;  %v3308_v14 = vsel %vm1444_vm3, %v3298_v31, %v3307_v45  ;;  %v3310_v31 = vshrl.u32 %v9930_v54, 16 }
 0x299   : > { %7840 = vmatmul.msk.bf16.gmra.mxu2 %vm610_vm1, %v2948_v21 }
 0x29a   : > { %v9921_v48 = vadd.f32 %v2705_v24, %v2163_v55  ;;  %7887 = vmatmul.msk.bf16.gmra.mxu0 %vm610_vm1, %v8596_v34  ;;  %v8881_v24 = vmov 0.0   ;;  %v11586_v34 = vld [vmem:[#allocation10_spill] sm:$0xff] }
 0x29b   : > { %4375 = vst.msk [vmem:[#allocation2 + $0x18] sm:$0xff] %vm4371_vm6, %v8881_v24 }
 0x29c   : > { %v1221_v18 = vpop.f32.mrf.mxu2  ;;  %4372 = vst.msk [vmem:[#allocation2] sm:$0xff] %vm4371_vm6, %v8881_v24 }
 0x29d   : > { %v1273_v51 = vadd.f32 %v1221_v18, %v11585_v33  ;;  %4373 = vst.msk [vmem:[#allocation2 + $0x8] sm:$0xff] %vm4371_vm6, %v8881_v24 }
 0x29e   : > { %v1848_v2 = vpop.f32.mrf.mxu3  ;;  %4374 = vst.msk [vmem:[#allocation2 + $0x10] sm:$0xff] %vm4371_vm6, %v8881_v24 }
 0x29f   : > { %v2110_v15 = vpop.f32.mrf.mxu0  ;;  %v1898_v32 = vadd.f32 %v1846_v46, %v1273_v51  ;;  %v8264_v51 = vld [vmem:[%s11524_s3 + $0x8] sm:$0xff]  ;;  %4376 = vst.msk [vmem:[#allocation2 + $0x20] sm:$0xff] %vm4371_vm6, %v8881_v24 }
 0x2a0   : > { %v9926_v28 = vadd.f32 %v2110_v15, %v1897_v5  ;;  %v2710_v22 = vpop.f32.mrf.mxu1  ;;  %v2949_v15 = vrot.slane %v9910_v42, 3  ;;  %4913 = vmatpush.bf16.msrb.mxu2 %v8264_v51  ;;  %4377 = vst.msk [vmem:[#allocation2 + $0x28] sm:$0xff] %vm4371_vm6, %v8881_v24  ;;  %v3315_v51 = vrot.slane %v3313_v39, 4  ;;  %v8272_v42 = vld [vmem:[%s11524_s3 + $0x48] sm:$0xff] }
 0x2a1   : > { %4378 = vst.msk [vmem:[#allocation2 + $0x30] sm:$0xff] %vm4371_vm6, %v8881_v24  ;;  %5842 = vmatpush.bf16.msrb.mxu1 %v8272_v42 }
 0x2a2   : > { %v2950_v18 = vsel %vm2933_vm5, %v2947_v35, %v2949_v15  ;;  %4379 = vst.msk [vmem:[#allocation2 + $0x38] sm:$0xff] %vm4371_vm6, %v8881_v24 }
 0x2a3   : > { %7865 = vmatmul.msk.bf16.gmra.mxu3 %vm610_vm1, %v3308_v14  ;;  %v3312_v14 = vrot.slane %v3310_v31, 3  ;;  %4380 = vst.msk [vmem:[#allocation2 + $0x40] sm:$0xff] %vm4371_vm6, %v8881_v24 }
 0x2a4   : > { %v1223_v46 = vpop.f32.mrf.mxu2  ;;  %4381 = vst.msk [vmem:[#allocation2 + $0x48] sm:$0xff] %vm4371_vm6, %v8881_v24 }
 0x2a5   : > { %v1274_v55 = vadd.f32 %v1223_v46, %v11586_v34  ;;  %4382 = vst.msk [vmem:[#allocation2 + $0x50] sm:$0xff] %vm4371_vm6, %v8881_v24  ;;  %v4548_v35 = vld [vmem:[#allocation2 + $0x9] sm:$0xff]  ;;  %v3316_v31 = vor.u32 %v3315_v51, %v3312_v14  ;;  %v11589_v34 = vld [vmem:[#allocation11_spill] sm:$0xff] }
 0x2a6   : > { %v1851_v5 = vpop.f32.mrf.mxu3  ;;  %4383 = vst.msk [vmem:[#allocation2 + $0x58] sm:$0xff] %vm4371_vm6, %v8881_v24  ;;  %v9988_v51 = vld [vmem:[%s8951_s12 + $0x64] sm:$0xff]  }
 0x2a7   : > { %v2113_v21 = vpop.f32.mrf.mxu0  ;;  %v1899_v33 = vadd.f32 %v1848_v2, %v1274_v55  ;;  %4384 = vst.msk [vmem:[#allocation2 + $0x60] sm:$0xff] %vm4371_vm6, %v8881_v24 }
 0x2a8   : > { %v2165_v7 = vadd.f32 %v2113_v21, %v1898_v32  ;;  %v4547_v32 = vld [vmem:[#allocation2 + $0x1] sm:$0xff]  ;;  %v9970_v2 = vpop.f32.mrf.mxu1  ;;  %4385 = vst.msk [vmem:[#allocation2 + $0x68] sm:$0xff] %vm4371_vm6, %v8881_v24 }
 0x2a9   : > { %7841 = vmatmul.msk.bf16.gmra.mxu2 %vm610_vm1, %v2950_v18  ;;  %11588 = vst [vmem:[#allocation8_spill] sm:$0xff] %v9970_v2  ;;  %v3317_v18 = vsel %vm1444_vm3, %v3307_v45, %v3316_v31  ;;  %v3319_v45 = vshrl.u32 %v9988_v51, 16 }
 0x2aa   : > { %v9962_v46 = vadd.f32 %v2710_v22, %v2165_v7  ;;  %7888 = vmatmul.msk.bf16.gmra.mxu0 %vm610_vm1, %v8597_v30  ;;  %v4593_v22 = vpack.c.bf16 %v4548_v35, %v4547_v32  ;;  %4386 = vst.msk [vmem:[#allocation2 + $0x70] sm:$0xff] %vm4371_vm6, %v8881_v24 }
 0x2ab   : > { %4387 = vst.msk [vmem:[#allocation2 + $0x78] sm:$0xff] %vm4371_vm6, %v8881_v24 }
 0x2ac   : > { %11587 = vst [vmem:[#allocation7_spill] sm:$0xff] %v9962_v46  ;;  %v1226_v39 = vpop.f32.mrf.mxu2  ;;  %7917 = vmatmul.msk.bf16.vlgmr.msra.gmra.mxu1 %vm4371_vm6, %v4593_v22  ;;  %v11591_v22 = vld [vmem:[#allocation12_spill] sm:$0xff] }
 0x2ad   : > { %v1275_v55 = vadd.f32 %v1226_v39, %v11589_v34  ;;  %4388 = vst.msk [vmem:[#allocation2 + $0x80] sm:$0xff] %vm4371_vm6, %v8881_v24 }
 0x2ae   : > { %v1853_v30 = vpop.f32.mrf.mxu3  ;;  %4389 = vst.msk [vmem:[#allocation2 + $0x88] sm:$0xff] %vm4371_vm6, %v8881_v24 }
 0x2af   : > { %v2115_v21 = vpop.f32.mrf.mxu0  ;;  %v1900_v14 = vadd.f32 %v1851_v5, %v1275_v55  ;;  %4390 = vst.msk [vmem:[#allocation2 + $0x90] sm:$0xff] %vm4371_vm6, %v8881_v24  ;;  %v3322_v5 = vshll.u32 %v9988_v51, 16 }
 0x2b0   : > { %v9982_v7 = vadd.f32 %v2115_v21, %v1899_v33  ;;  %v2951_v33 = vrot.slane %v9930_v54, 3  ;;  %4391 = vst.msk [vmem:[#allocation2 + $0x98] sm:$0xff] %vm4371_vm6, %v8881_v24  ;;  %v2715_v35 = vpop.f32.mrf.mxu1  ;;  %v8598_v21 = vld [vmem:[%s8951_s12 + $0x50] sm:$0xff]  }
 0x2b1   : > { %4392 = vst.msk [vmem:[#allocation2 + $0xa0] sm:$0xff] %vm4371_vm6, %v8881_v24  ;;  %v3324_v46 = vrot.slane %v3322_v5, 4 }
 0x2b2   : > { %11590 = vst [vmem:[#allocation9_spill] sm:$0xff] %v9982_v7  ;;  %v2952_v2 = vsel %vm2933_vm5, %v2949_v15, %v2951_v33  ;;  %v3321_v7 = vrot.slane %v3319_v45, 3 }
 0x2b3   : > { %7866 = vmatmul.msk.bf16.gmra.mxu3 %vm610_vm1, %v3317_v18  ;;  %4393 = vst.msk [vmem:[#allocation2 + $0xa8] sm:$0xff] %vm4371_vm6, %v8881_v24 }
 0x2b4   : > { %v1228_v32 = vpop.f32.mrf.mxu2  ;;  %4394 = vst.msk [vmem:[#allocation2 + $0xb0] sm:$0xff] %vm4371_vm6, %v8881_v24 }
 0x2b5   : > { %v1276_v39 = vadd.f32 %v1228_v32, %v11591_v22  ;;  %4395 = vst.msk [vmem:[#allocation2 + $0xb8] sm:$0xff] %vm4371_vm6, %v8881_v24  ;;  %v8268_v32 = vld [vmem:[%s11524_s3 + $0x28] sm:$0xff] }
 0x2b6   : > { %v3525_v55 = vpop.f32.mrf.mxu3  ;;  %4396 = vst.msk [vmem:[#allocation2 + $0xc0] sm:$0xff] %vm4371_vm6, %v8881_v24  ;;  %5192 = vmatpush.bf16.msrb.mxu3 %v8268_v32  ;;  %v10070_v32 = vld [vmem:[%s11523_s2] ss:$0 sm:$0xff] }
 0x2b7   : > { %v2118_v34 = vpop.f32.mrf.mxu0  ;;  %v1901_v22 = vadd.f32 %v1853_v30, %v1276_v39  ;;  %4397 = vst.msk [vmem:[#allocation2 + $0xc8] sm:$0xff] %vm4371_vm6, %v8881_v24  ;;  %v3325_v30 = vor.u32 %v3324_v46, %v3321_v7  ;;  %v10052_v46 = vld [vmem:[%s8951_s12 + $0x6c] sm:$0xff]  }
 0x2b8   : > { %v2167_v18 = vadd.f32 %v2118_v34, %v1900_v14  ;;  %v8270_v14 = vld [vmem:[%s11524_s3 + $0x38] sm:$0xff]  ;;  %4398 = vst.msk [vmem:[#allocation2 + $0xd0] sm:$0xff] %vm4371_vm6, %v8881_v24  ;;  %v3328_v34 = vshrl.u32 %v10052_v46, 16 }
 0x2b9   : > { %7842 = vmatmul.msk.bf16.gmra.mxu2 %vm610_vm1, %v2952_v2  ;;  %5517 = vmatpush.bf16.msrb.mxu0 %v8270_v14  ;;  %4399 = vst.msk [vmem:[#allocation2 + $0xd8] sm:$0xff] %vm4371_vm6, %v8881_v24  ;;  %v3326_v39 = vsel %vm1444_vm3, %v3316_v31, %v3325_v30  ;;  %v2953_v31 = vrot.slane %v9988_v51, 3  ;;  %v8599_v14 = vld [vmem:[%s8951_s12 + $0x58] sm:$0xff]  }
 0x2ba   : > { %v10028_v15 = vadd.f32 %v2715_v35, %v2167_v18  ;;  %7889 = vmatmul.msk.bf16.gmra.mxu0 %vm610_vm1, %v8598_v21  ;;  %4400 = vst.msk [vmem:[#allocation2 + $0xe0] sm:$0xff] %vm4371_vm6, %v8881_v24 }
 0x2bb   : > { %4401 = vst.msk [vmem:[#allocation2 + $0xe8] sm:$0xff] %vm4371_vm6, %v8881_v24 }
 0x2bc   : > { %11592 = vst [vmem:[#allocation10_spill] sm:$0xff] %v10028_v15  ;;  %v3062_v45 = vpop.f32.mrf.mxu2 }
 0x2bd   : > { %4402 = vst.msk [vmem:[#allocation2 + $0xf0] sm:$0xff] %vm4371_vm6, %v8881_v24  ;;  %v3177_v7 = vadd.f32 %v3062_v45, %v9342_v40  ;;  %v3331_v40 = vshll.u32 %v10052_v46, 16  ;;  %v3330_v45 = vrot.slane %v3328_v34, 3 }
 0x2be   : > { %v3527_v35 = vpop.f32.mrf.mxu3  ;;  %4403 = vst.msk [vmem:[#allocation2 + $0xf8] sm:$0xff] %vm4371_vm6, %v8881_v24 }
 0x2bf   : > { %v2120_v5 = vpop.f32.mrf.mxu0  ;;  %4404 = vst.msk [vmem:[#allocation2 + $0x100] sm:$0xff] %vm4371_vm6, %v8881_v24  ;;  %v3640_v18 = vadd.f32 %v3525_v55, %v3177_v7  ;;  %v2954_v55 = vsel %vm2933_vm5, %v2951_v33, %v2953_v31 }
 0x2c0   : > { %v10044_v2 = vadd.f32 %v2120_v5, %v1901_v22  ;;  %4405 = vst.msk [vmem:[#allocation2 + $0x108] sm:$0xff] %vm4371_vm6, %v8881_v24  ;;  %v3333_v5 = vrot.slane %v3331_v40, 4 }
 0x2c1   : > { %4406 = vst.msk [vmem:[#allocation2 + $0x110] sm:$0xff] %vm4371_vm6, %v8881_v24 }
 0x2c2   : > { %11593 = vst [vmem:[#allocation11_spill] sm:$0xff] %v10044_v2 }
 0x2c3   : > { %7867 = vmatmul.msk.bf16.gmra.mxu3 %vm610_vm1, %v3326_v39  ;;  %4407 = vst.msk [vmem:[#allocation2 + $0x118] sm:$0xff] %vm4371_vm6, %v8881_v24 }
 0x2c4   : > { %4408 = vst.msk [vmem:[#allocation2 + $0x120] sm:$0xff] %vm4371_vm6, %v8881_v24  ;;  %v3064_v21 = vpop.f32.mrf.mxu2 }
 0x2c5   : > { %4409 = vst.msk [vmem:[#allocation2 + $0x128] sm:$0xff] %vm4371_vm6, %v8881_v24  ;;  %v3178_v39 = vadd.f32 %v3064_v21, %v9349_v12  ;;  %v3334_v12 = vor.u32 %v3333_v5, %v3330_v45 }
 0x2c6   : > { %4410 = vst.msk [vmem:[#allocation2 + $0x130] sm:$0xff] %vm4371_vm6, %v8881_v24  ;;  %v3530_v51 = vpop.f32.mrf.mxu3 }
 0x2c7   : > { %v3792_v22 = vpop.f32.mrf.mxu0  ;;  %4411 = vst.msk [vmem:[#allocation2 + $0x138] sm:$0xff] %vm4371_vm6, %v8881_v24  ;;  %v3641_v40 = vadd.f32 %v3527_v35, %v3178_v39 }
 0x2c8   : > { %v3907_v42 = vadd.f32 %v3792_v22, %v3640_v18  ;;  %4412 = vst.msk [vmem:[#allocation2 + $0x140] sm:$0xff] %vm4371_vm6, %v8881_v24  ;;  %v4098_v18 = vpop.permute.xlu0 %4097 }
 0x2c9   : > { %4413 = vst.msk [vmem:[#allocation2 + $0x148] sm:$0xff] %vm4371_vm6, %v8881_v24  ;;  %7843 = vmatmul.msk.bf16.gmra.mxu2 %vm610_vm1, %v2954_v55  ;;  %v10105_v55 = vld [vmem:[%s8951_s12 + $0x74] sm:$0xff]  }
 0x2ca   : > { %v3957_v7 = vadd.f32 %v10070_v32, %v3907_v42  ;;  %7890 = vmatmul.msk.bf16.gmra.mxu0 %vm610_vm1, %v8599_v14  ;;  %4414 = vst.msk [vmem:[#allocation2 + $0x150] sm:$0xff] %vm4371_vm6, %v8881_v24  ;;  %v3335_v42 = vsel %vm1444_vm3, %v3325_v30, %v3334_v12  ;;  %v2955_v30 = vrot.slane %v10052_v46, 3 }
 0x2cb   : > { %4415 = vst.msk [vmem:[#allocation2 + $0x158] sm:$0xff] %vm4371_vm6, %v8881_v24 }
 0x2cc   : > { %v4003_v54 = vmax.f32 %v3957_v7, 0.0  ;;  %4416 = vst.msk [vmem:[#allocation2 + $0x160] sm:$0xff] %vm4371_vm6, %v8881_v24  ;;  %v3067_v34 = vpop.f32.mrf.mxu2  ;;  %v3340_v7 = vshll.u32 %v10105_v55, 16 }
 0x2cd   : > { %4417 = vst.msk [vmem:[#allocation2 + $0x168] sm:$0xff] %vm4371_vm6, %v8881_v24  ;;  %v3179_v35 = vadd.f32 %v3067_v34, %v9359_v52  ;;  %v3337_v52 = vshrl.u32 %v10105_v55, 16 }
 0x2ce   : > { %v4325_v33 = vmul.f32 %v4098_v18, %v4003_v54  ;;  %4418 = vst.msk [vmem:[#allocation2 + $0x170] sm:$0xff] %vm4371_vm6, %v8881_v24  ;;  %v3532_v22 = vpop.f32.mrf.mxu3 }
 0x2cf   : > { %v3794_v21 = vpop.f32.mrf.mxu0  ;;  %4419 = vst.msk [vmem:[#allocation2 + $0x178] sm:$0xff] %vm4371_vm6, %v8881_v24  ;;  %v3339_v46 = vrot.slane %v3337_v52, 3 }
 0x2d0   : > { %4428 = vst.msk [vmem:[#allocation2 + $0x18] sm:$0xff] %vm4371_vm6, %v4325_v33  ;;  %v3908_v14 = vadd.f32 %v3794_v21, %v3641_v40  ;;  %v4103_v39 = vpop.permute.xlu0 %4102  ;;  %v3642_v33 = vadd.f32 %v3530_v51, %v3179_v35  ;;  %v8600_v21 = vld [vmem:[%s8951_s12 + $0x60] sm:$0xff]  }
 0x2d1   : > { %4420 = vst.msk [vmem:[#allocation2 + $0x180] sm:$0xff] %vm4371_vm6, %v8881_v24 }
 0x2d2   : > { %v3958_v45 = vadd.f32 %v10070_v32, %v3908_v14  ;;  %4421 = vst.msk [vmem:[#allocation2 + $0x188] sm:$0xff] %vm4371_vm6, %v8881_v24 }
 0x2d3   : > { %4422 = vst.msk [vmem:[#allocation2 + $0x190] sm:$0xff] %vm4371_vm6, %v8881_v24  ;;  %7868 = vmatmul.msk.bf16.gmra.mxu3 %vm610_vm1, %v3335_v42  ;;  %v3342_v42 = vrot.slane %v3340_v7, 4 }
 0x2d4   : > { %v4004_v5 = vmax.f32 %v3958_v45, 0.0  ;;  %4423 = vst.msk [vmem:[#allocation2 + $0x198] sm:$0xff] %vm4371_vm6, %v8881_v24  ;;  %v3069_v54 = vpop.f32.mrf.mxu2  ;;  %v2956_v45 = vsel %vm2933_vm5, %v2953_v31, %v2955_v30 }
 0x2d5   : > { %v3180_v2 = vadd.f32 %v3069_v54, %v9366_v47  ;;  %v3343_v35 = vor.u32 %v3342_v42, %v3339_v46 }
 0x2d6   : > { %v4326_v18 = vmul.f32 %v4103_v39, %v4004_v5  ;;  %v3535_v40 = vpop.f32.mrf.mxu3  ;;  %v4108_v5 = vpop.permute.xlu1 %4107 }
 0x2d7   : > { %v3797_v34 = vpop.f32.mrf.mxu0  ;;  %v4549_v7 = vld [vmem:[#allocation2 + $0x11] sm:$0xff]  ;;  %v3344_v54 = vsel %vm1444_vm3, %v3334_v12, %v3343_v35  ;;  %v2957_v12 = vrot.slane %v10105_v55, 3 }
 0x2d8   : > { %v3909_v14 = vadd.f32 %v3797_v34, %v3642_v33  ;;  %4429 = vst.msk [vmem:[#allocation2 + $0x20] sm:$0xff] %vm4371_vm6, %v4326_v18  ;;  %v3643_v34 = vadd.f32 %v3532_v22, %v3180_v2  ;;  %v4118_v22 = vpop.permute.xlu2 %4117 }
 0x2d9   : > { %7844 = vmatmul.msk.bf16.gmra.mxu2 %vm610_vm1, %v2956_v45 }
 0x2da   : > { %v3959_v24 = vadd.f32 %v10070_v32, %v3909_v14  ;;  %7891 = vmatmul.msk.bf16.gmra.mxu0 %vm610_vm1, %v8600_v21  ;;  %v10131_v21 = vld [vmem:[%s8951_s12 + $0x7c] sm:$0xff]  }
 0x2db   : > { %v10133_v14 = vld [vmem:[#allocation2 + $0x18] sm:$0xff] }
 0x2dc   : > { %v4005_v51 = vmax.f32 %v3959_v24, 0.0  ;;  %v3072_v33 = vpop.f32.mrf.mxu2 }
 0x2dd   : > { %v3181_v46 = vadd.f32 %v3072_v33, %v9376_v0 }
 0x2de   : > { %v4327_v39 = vmul.f32 %v4108_v5, %v4005_v51  ;;  %v3537_v15 = vpop.f32.mrf.mxu3  ;;  %v4113_v24 = vpop.permute.xlu1 %4112  ;;  %v3346_v5 = vshrl.u32 %v10131_v21, 16  ;;  %v3349_v51 = vshll.u32 %v10131_v21, 16 }
 0x2df   : > { %v3799_v31 = vpop.f32.mrf.mxu0  ;;  %v4550_v47 = vld [vmem:[#allocation2 + $0x19] sm:$0xff]  ;;  %v3644_v0 = vadd.f32 %v3535_v40, %v3181_v46 }
 0x2e0   : > { %4430 = vst.msk [vmem:[#allocation2 + $0x28] sm:$0xff] %vm4371_vm6, %v4327_v39  ;;  %v3910_v52 = vadd.f32 %v3799_v31, %v3643_v34  ;;  %v4594_v18 = vpack.c.bf16 %v4550_v47, %v4549_v7  ;;  %v10135_v45 = vld [vmem:[#allocation2 + $0x20] sm:$0xff]  ;;  %v2958_v47 = vsel %vm2933_vm5, %v2955_v30, %v2957_v12 }
 0x2e2   : > { %v3960_v2 = vadd.f32 %v10070_v32, %v3910_v52  ;;  %7918 = vmatmul.msk.bf16.gmra.mxu1 %vm4371_vm6, %v4594_v18  ;;  %v8601_v52 = vld [vmem:[%s8951_s12 + $0x68] sm:$0xff]   ;;  %v3348_v18 = vrot.slane %v3346_v5, 3 }
 0x2e3   : > { %7869 = vmatmul.msk.bf16.gmra.mxu3 %vm610_vm1, %v3344_v54  ;;  %v3351_v54 = vrot.slane %v3349_v51, 4 }
 0x2e4   : > { %v4006_v42 = vmax.f32 %v3960_v2, 0.0  ;;  %v3074_v34 = vpop.f32.mrf.mxu2 }
 0x2e5   : > { %v3182_v55 = vadd.f32 %v3074_v34, %v9383_v26  ;;  %v3352_v46 = vor.u32 %v3351_v54, %v3348_v18 }
 0x2e6   : > { %v4328_v39 = vmul.f32 %v4113_v24, %v4006_v42  ;;  %v3540_v31 = vpop.f32.mrf.mxu3 }
 0x2e7   : > { %v3802_v33 = vpop.f32.mrf.mxu0  ;;  %v4551_v30 = vld [vmem:[#allocation2 + $0x21] sm:$0xff] }
 0x2e8   : > { %4431 = vst.msk [vmem:[#allocation2 + $0x30] sm:$0xff] %vm4371_vm6, %v4328_v39  ;;  %v3911_v7 = vadd.f32 %v3802_v33, %v3644_v0  ;;  %v3645_v39 = vadd.f32 %v3537_v15, %v3182_v55  ;;  %v10154_v34 = vld [vmem:[#allocation2 + $0x28] sm:$0xff]  ;;  %v2959_v55 = vrot.slane %v10131_v21, 3 }
 0x2e9   : > { %7845 = vmatmul.msk.bf16.gmra.mxu2 %vm610_vm1, %v2958_v47  ;;  %v10160_v47 = vld [vmem:[%s8951_s12 + $0x84] sm:$0xff]  }
 0x2ea   : > { %v3961_v2 = vadd.f32 %v10070_v32, %v3911_v7  ;;  %7892 = vmatmul.msk.bf16.gmra.mxu0 %vm610_vm1, %v8601_v52  ;;  %v3353_v7 = vsel %vm1444_vm3, %v3343_v35, %v3352_v46  ;;  %v3355_v35 = vshrl.u32 %v10160_v47, 16 }
 0x2ec   : > { %v4007_v40 = vmax.f32 %v3961_v2, 0.0  ;;  %v3077_v24 = vpop.f32.mrf.mxu2  ;;  %v4123_v2 = vpop.permute.xlu2 %4122 }
 0x2ee   : > { %v4329_v42 = vmul.f32 %v4118_v22, %v4007_v40  ;;  %v3542_v33 = vpop.f32.mrf.mxu3  ;;  %v3183_v22 = vadd.f32 %v3077_v24, %v9393_v1  ;;  %v3358_v40 = vshll.u32 %v10160_v47, 16  ;;  %v8602_v1 = vld [vmem:[%s8951_s12 + $0x70] sm:$0xff]  }
 0x2ef   : > { %v3804_v0 = vpop.f32.mrf.mxu0  ;;  %v4552_v5 = vld [vmem:[#allocation2 + $0x29] sm:$0xff] }
 0x2f0   : > { %4432 = vst.msk [vmem:[#allocation2 + $0x38] sm:$0xff] %vm4371_vm6, %v4329_v42  ;;  %v3912_v26 = vadd.f32 %v3804_v0, %v3645_v39  ;;  %v4595_v51 = vpack.c.bf16 %v4552_v5, %v4551_v30  ;;  %v10156_v52 = vld [vmem:[#allocation2 + $0x30] sm:$0xff]  ;;  %v3646_v0 = vadd.f32 %v3540_v31, %v3183_v22  ;;  %v4128_v31 = vpop.permute.xlu0 %4127 }
 0x2f2   : > { %v3962_v18 = vadd.f32 %v10070_v32, %v3912_v26  ;;  %7919 = vmatmul.msk.bf16.gmra.mxu1 %vm4371_vm6, %v4595_v51  ;;  %v2960_v26 = vsel %vm2933_vm5, %v2957_v12, %v2959_v55  ;;  %v3357_v51 = vrot.slane %v3355_v35, 3 }
 0x2f3   : > { %7870 = vmatmul.msk.bf16.gmra.mxu3 %vm610_vm1, %v3353_v7  ;;  %v3360_v7 = vrot.slane %v3358_v40, 4 }
 0x2f4   : > { %v4008_v54 = vmax.f32 %v3962_v18, 0.0  ;;  %v3079_v39 = vpop.f32.mrf.mxu2 }
 0x2f5   : > { %v3184_v21 = vadd.f32 %v3079_v39, %v9400_v43  ;;  %v3361_v22 = vor.u32 %v3360_v7, %v3357_v51 }
 0x2f6   : > { %v4330_v42 = vmul.f32 %v4123_v2, %v4008_v54  ;;  %v3545_v5 = vpop.f32.mrf.mxu3 }
 0x2f7   : > { %v3807_v30 = vpop.f32.mrf.mxu0  ;;  %v4553_v12 = vld [vmem:[#allocation2 + $0x31] sm:$0xff] }
 0x2f8   : > { %4433 = vst.msk [vmem:[#allocation2 + $0x40] sm:$0xff] %vm4371_vm6, %v4330_v42  ;;  %v3913_v24 = vadd.f32 %v3807_v30, %v3646_v0  ;;  %v3647_v42 = vadd.f32 %v3542_v33, %v3184_v21  ;;  %v10179_v39 = vld [vmem:[#allocation2 + $0x38] sm:$0xff] }
 0x2f9   : > { %7846 = vmatmul.msk.bf16.gmra.mxu2 %vm610_vm1, %v2960_v26  ;;  %v10185_v26 = vld [vmem:[%s8951_s12 + $0x8c] sm:$0xff]  }
 0x2fa   : > { %v3963_v18 = vadd.f32 %v10070_v32, %v3913_v24  ;;  %7893 = vmatmul.msk.bf16.gmra.mxu0 %vm610_vm1, %v8602_v1  ;;  %v3362_v24 = vsel %vm1444_vm3, %v3352_v46, %v3361_v22  ;;  %v3364_v46 = vshrl.u32 %v10185_v26, 16 }
 0x2fc   : > { %v4009_v54 = vmax.f32 %v3963_v18, 0.0  ;;  %v3082_v15 = vpop.f32.mrf.mxu2  ;;  %v2961_v18 = vrot.slane %v10160_v47, 3 }
 0x2fd   : > { %v3185_v51 = vadd.f32 %v3082_v15, %v9410_v58  ;;  %v8603_v58 = vld [vmem:[%s8951_s12 + $0x78] sm:$0xff]  }
 0x2fe   : > { %v4331_v2 = vmul.f32 %v4128_v31, %v4009_v54  ;;  %v3547_v30 = vpop.f32.mrf.mxu3  ;;  %v4133_v54 = vpop.permute.xlu1 %4132  ;;  %v3367_v31 = vshll.u32 %v10185_v26, 16 }
 0x2ff   : > { %v3809_v0 = vpop.f32.mrf.mxu0  ;;  %v4554_v35 = vld [vmem:[#allocation2 + $0x39] sm:$0xff] }
 0x300   : > { %4434 = vst.msk [vmem:[#allocation2 + $0x48] sm:$0xff] %vm4371_vm6, %v4331_v2  ;;  %v3914_v43 = vadd.f32 %v3809_v0, %v3647_v42  ;;  %v4596_v40 = vpack.c.bf16 %v4554_v35, %v4553_v12  ;;  %v10181_v1 = vld [vmem:[#allocation2 + $0x40] sm:$0xff]  ;;  %v3648_v0 = vadd.f32 %v3545_v5, %v3185_v51  ;;  %v4138_v5 = vpop.permute.xlu2 %4137 }
 0x302   : > { %v3964_v7 = vadd.f32 %v10070_v32, %v3914_v43  ;;  %7920 = vmatmul.msk.bf16.gmra.mxu1 %vm4371_vm6, %v4596_v40  ;;  %v2962_v43 = vsel %vm2933_vm5, %v2959_v55, %v2961_v18  ;;  %v3366_v40 = vrot.slane %v3364_v46, 3 }
 0x303   : > { %7871 = vmatmul.msk.bf16.gmra.mxu3 %vm610_vm1, %v3362_v24  ;;  %v3369_v24 = vrot.slane %v3367_v31, 4 }
 0x304   : > { %v4010_v21 = vmax.f32 %v3964_v7, 0.0  ;;  %v3084_v42 = vpop.f32.mrf.mxu2 }
 0x305   : > { %v3186_v47 = vadd.f32 %v3084_v42, %v9417_v59  ;;  %v3370_v51 = vor.u32 %v3369_v24, %v3366_v40 }
 0x306   : > { %v4332_v2 = vmul.f32 %v4133_v54, %v4010_v21  ;;  %v3550_v35 = vpop.f32.mrf.mxu3 }
 0x307   : > { %v3812_v12 = vpop.f32.mrf.mxu0  ;;  %v4555_v55 = vld [vmem:[#allocation2 + $0x41] sm:$0xff] }
 0x308   : > { %4435 = vst.msk [vmem:[#allocation2 + $0x50] sm:$0xff] %vm4371_vm6, %v4332_v2  ;;  %v3915_v15 = vadd.f32 %v3812_v12, %v3648_v0  ;;  %v3649_v2 = vadd.f32 %v3547_v30, %v3186_v47  ;;  %v10204_v42 = vld [vmem:[#allocation2 + $0x48] sm:$0xff] }
 0x309   : > { %7847 = vmatmul.msk.bf16.gmra.mxu2 %vm610_vm1, %v2962_v43  ;;  %11594 = vst [vmem:[#allocation12_spill] sm:$0xff] %v10204_v42  ;;  %v10210_v43 = vld [vmem:[%s8951_s12 + $0x94] sm:$0xff]   ;;  %v2812_v42 = vld [vmem:[%s8951_s12 + $0xcc] sm:$0x7] }
 0x30a   : > { %v3965_v7 = vadd.f32 %v10070_v32, %v3915_v15  ;;  %7894 = vmatmul.msk.bf16.gmra.mxu0 %vm610_vm1, %v8603_v58  ;;  %v3371_v15 = vsel %vm1444_vm3, %v3361_v22, %v3370_v51  ;;  %v3373_v22 = vshrl.u32 %v10210_v43, 16 }
 0x30c   : > { %v4011_v21 = vmax.f32 %v3965_v7, 0.0  ;;  %v3087_v33 = vpop.f32.mrf.mxu2  ;;  %v2963_v7 = vrot.slane %v10185_v26, 3 }
 0x30d   : > { %v3187_v40 = vadd.f32 %v3087_v33, %v9427_v29  ;;  %v8604_v29 = vld [vmem:[%s8951_s12 + $0x80] sm:$0xff]  }
 0x30e   : > { %v4333_v54 = vmul.f32 %v4138_v5, %v4011_v21  ;;  %v3552_v12 = vpop.f32.mrf.mxu3  ;;  %v4143_v21 = vpop.permute.xlu0 %4142  ;;  %v3376_v5 = vshll.u32 %v10210_v43, 16 }
 0x30f   : > { %v3814_v0 = vpop.f32.mrf.mxu0  ;;  %v4556_v46 = vld [vmem:[#allocation2 + $0x49] sm:$0xff] }
 0x310   : > { %4436 = vst.msk [vmem:[#allocation2 + $0x58] sm:$0xff] %vm4371_vm6, %v4333_v54  ;;  %v3916_v59 = vadd.f32 %v3814_v0, %v3649_v2  ;;  %v4597_v31 = vpack.c.bf16 %v4556_v46, %v4555_v55  ;;  %v10206_v58 = vld [vmem:[#allocation2 + $0x50] sm:$0xff]  ;;  %v3650_v0 = vadd.f32 %v3550_v35, %v3187_v40  ;;  %v4148_v35 = vpop.permute.xlu1 %4147 }
 0x311   : > { %11595 = vst [vmem:[#allocation19_spill] sm:$0xff] %v10206_v58 }
 0x312   : > { %v3966_v24 = vadd.f32 %v10070_v32, %v3916_v59  ;;  %7921 = vmatmul.msk.bf16.gmra.mxu1 %vm4371_vm6, %v4597_v31  ;;  %v2964_v59 = vsel %vm2933_vm5, %v2961_v18, %v2963_v7  ;;  %v3375_v31 = vrot.slane %v3373_v22, 3 }
 0x313   : > { %7872 = vmatmul.msk.bf16.gmra.mxu3 %vm610_vm1, %v3371_v15  ;;  %v3378_v15 = vrot.slane %v3376_v5, 4 }
 0x314   : > { %v4012_v47 = vmax.f32 %v3966_v24, 0.0  ;;  %v3089_v2 = vpop.f32.mrf.mxu2 }
 0x315   : > { %v3188_v26 = vadd.f32 %v3089_v2, %v9434_v9  ;;  %v3379_v40 = vor.u32 %v3378_v15, %v3375_v31 }
 0x316   : > { %v4334_v54 = vmul.f32 %v4143_v21, %v4012_v47  ;;  %v3555_v46 = vpop.f32.mrf.mxu3 }
 0x317   : > { %v3817_v55 = vpop.f32.mrf.mxu0  ;;  %v4557_v18 = vld [vmem:[#allocation2 + $0x51] sm:$0xff] }
 0x318   : > { %4437 = vst.msk [vmem:[#allocation2 + $0x60] sm:$0xff] %vm4371_vm6, %v4334_v54  ;;  %v3917_v33 = vadd.f32 %v3817_v55, %v3650_v0  ;;  %v3651_v54 = vadd.f32 %v3552_v12, %v3188_v26  ;;  %v10229_v2 = vld [vmem:[#allocation2 + $0x58] sm:$0xff] }
 0x319   : > { %7848 = vmatmul.msk.bf16.gmra.mxu2 %vm610_vm1, %v2964_v59  ;;  %11596 = vst [vmem:[#allocation20_spill] sm:$0xff] %v10229_v2  ;;  %v10235_v59 = vld [vmem:[%s8951_s12 + $0x9c] sm:$0xff]  }
 0x31a   : > { %v3967_v24 = vadd.f32 %v10070_v32, %v3917_v33  ;;  %7895 = vmatmul.msk.bf16.gmra.mxu0 %vm610_vm1, %v8604_v29  ;;  %v3380_v33 = vsel %vm1444_vm3, %v3370_v51, %v3379_v40  ;;  %v3382_v51 = vshrl.u32 %v10235_v59, 16 }
 0x31c   : > { %v4013_v47 = vmax.f32 %v3967_v24, 0.0  ;;  %v3092_v30 = vpop.f32.mrf.mxu2  ;;  %v2965_v24 = vrot.slane %v10210_v43, 3 }
 0x31d   : > { %v3189_v31 = vadd.f32 %v3092_v30, %v9447_v8  ;;  %v8605_v8 = vld [vmem:[%s8951_s12 + $0x88] sm:$0xff]  }
 0x31e   : > { %v4335_v21 = vmul.f32 %v4148_v35, %v4013_v47  ;;  %v3557_v55 = vpop.f32.mrf.mxu3  ;;  %v4153_v47 = vpop.permute.xlu2 %4152  ;;  %v3385_v35 = vshll.u32 %v10235_v59, 16 }
 0x31f   : > { %v3819_v0 = vpop.f32.mrf.mxu0  ;;  %v4558_v22 = vld [vmem:[#allocation2 + $0x59] sm:$0xff] }
 0x320   : > { %4438 = vst.msk [vmem:[#allocation2 + $0x68] sm:$0xff] %vm4371_vm6, %v4335_v21  ;;  %v3918_v9 = vadd.f32 %v3819_v0, %v3651_v54  ;;  %v4598_v5 = vpack.c.bf16 %v4558_v22, %v4557_v18  ;;  %v10231_v29 = vld [vmem:[#allocation2 + $0x60] sm:$0xff]  ;;  %v3652_v0 = vadd.f32 %v3555_v46, %v3189_v31  ;;  %v4158_v46 = vpop.permute.xlu0 %4157 }
 0x321   : > { %11597 = vst [vmem:[#allocation21_spill] sm:$0xff] %v10231_v29 }
 0x322   : > { %v3968_v15 = vadd.f32 %v10070_v32, %v3918_v9  ;;  %7922 = vmatmul.msk.bf16.gmra.mxu1 %vm4371_vm6, %v4598_v5  ;;  %v2966_v9 = vsel %vm2933_vm5, %v2963_v7, %v2965_v24  ;;  %v3384_v5 = vrot.slane %v3382_v51, 3 }
 0x323   : > { %7873 = vmatmul.msk.bf16.gmra.mxu3 %vm610_vm1, %v3380_v33  ;;  %v3387_v33 = vrot.slane %v3385_v35, 4 }
 0x324   : > { %v4014_v26 = vmax.f32 %v3968_v15, 0.0  ;;  %v3094_v54 = vpop.f32.mrf.mxu2 }
 0x325   : > { %v3190_v43 = vadd.f32 %v3094_v54, %v9454_v44  ;;  %v3388_v31 = vor.u32 %v3387_v33, %v3384_v5 }
 0x326   : > { %v4336_v21 = vmul.f32 %v4153_v47, %v4014_v26  ;;  %v3560_v22 = vpop.f32.mrf.mxu3 }
 0x327   : > { %v3822_v18 = vpop.f32.mrf.mxu0  ;;  %v4559_v7 = vld [vmem:[#allocation2 + $0x61] sm:$0xff] }
 0x328   : > { %4439 = vst.msk [vmem:[#allocation2 + $0x70] sm:$0xff] %vm4371_vm6, %v4336_v21  ;;  %v3919_v30 = vadd.f32 %v3822_v18, %v3652_v0  ;;  %v3653_v21 = vadd.f32 %v3557_v55, %v3190_v43  ;;  %v10254_v54 = vld [vmem:[#allocation2 + $0x68] sm:$0xff] }
 0x329   : > { %7849 = vmatmul.msk.bf16.gmra.mxu2 %vm610_vm1, %v2966_v9  ;;  %11598 = vst [vmem:[#allocation22_spill] sm:$0xff] %v10254_v54  ;;  %v10260_v9 = vld [vmem:[%s8951_s12 + $0xa4] sm:$0xff]  }
 0x32a   : > { %v3969_v15 = vadd.f32 %v10070_v32, %v3919_v30  ;;  %7896 = vmatmul.msk.bf16.gmra.mxu0 %vm610_vm1, %v8605_v8  ;;  %v3389_v30 = vsel %vm1444_vm3, %v3379_v40, %v3388_v31  ;;  %v3391_v40 = vshrl.u32 %v10260_v9, 16 }
 0x32c   : > { %v4015_v26 = vmax.f32 %v3969_v15, 0.0  ;;  %v3097_v12 = vpop.f32.mrf.mxu2  ;;  %v2967_v15 = vrot.slane %v10235_v59, 3 }
 0x32d   : > { %v3191_v5 = vadd.f32 %v3097_v12, %v9471_v6  ;;  %v8606_v6 = vld [vmem:[%s8951_s12 + $0x90] sm:$0xff]  }
 0x32e   : > { %v4337_v47 = vmul.f32 %v4158_v46, %v4015_v26  ;;  %v3562_v18 = vpop.f32.mrf.mxu3  ;;  %v4163_v26 = vpop.permute.xlu1 %4162  ;;  %v3394_v46 = vshll.u32 %v10260_v9, 16 }
 0x32f   : > { %v3824_v0 = vpop.f32.mrf.mxu0  ;;  %v4560_v51 = vld [vmem:[#allocation2 + $0x69] sm:$0xff] }
 0x330   : > { %4440 = vst.msk [vmem:[#allocation2 + $0x78] sm:$0xff] %vm4371_vm6, %v4337_v47  ;;  %v3920_v44 = vadd.f32 %v3824_v0, %v3653_v21  ;;  %v4599_v35 = vpack.c.bf16 %v4560_v51, %v4559_v7  ;;  %v10256_v8 = vld [vmem:[#allocation2 + $0x70] sm:$0xff]  ;;  %v3654_v0 = vadd.f32 %v3560_v22, %v3191_v5  ;;  %v4168_v22 = vpop.permute.xlu2 %4167 }
 0x331   : > { %11599 = vst [vmem:[#allocation23_spill] sm:$0xff] %v10256_v8 }
 0x332   : > { %v3970_v33 = vadd.f32 %v10070_v32, %v3920_v44  ;;  %7923 = vmatmul.msk.bf16.gmra.mxu1 %vm4371_vm6, %v4599_v35  ;;  %v2968_v44 = vsel %vm2933_vm5, %v2965_v24, %v2967_v15  ;;  %v3393_v35 = vrot.slane %v3391_v40, 3 }
 0x333   : > { %7874 = vmatmul.msk.bf16.gmra.mxu3 %vm610_vm1, %v3389_v30  ;;  %v3396_v30 = vrot.slane %v3394_v46, 4 }
 0x334   : > { %v4016_v43 = vmax.f32 %v3970_v33, 0.0  ;;  %v3099_v21 = vpop.f32.mrf.mxu2 }
 0x335   : > { %v3192_v59 = vadd.f32 %v3099_v21, %v9481_v17  ;;  %v3397_v5 = vor.u32 %v3396_v30, %v3393_v35 }
 0x336   : > { %v4338_v47 = vmul.f32 %v4163_v26, %v4016_v43  ;;  %v3565_v51 = vpop.f32.mrf.mxu3 }
 0x337   : > { %v3827_v7 = vpop.f32.mrf.mxu0  ;;  %v4561_v24 = vld [vmem:[#allocation2 + $0x71] sm:$0xff] }
 0x338   : > { %4441 = vst.msk [vmem:[#allocation2 + $0x80] sm:$0xff] %vm4371_vm6, %v4338_v47  ;;  %v3921_v12 = vadd.f32 %v3827_v7, %v3654_v0  ;;  %v3655_v47 = vadd.f32 %v3562_v18, %v3192_v59  ;;  %v10279_v21 = vld [vmem:[#allocation2 + $0x78] sm:$0xff] }
 0x339   : > { %7850 = vmatmul.msk.bf16.gmra.mxu2 %vm610_vm1, %v2968_v44  ;;  %11600 = vst [vmem:[#allocation24_spill] sm:$0xff] %v10279_v21  ;;  %v10285_v44 = vld [vmem:[%s8951_s12 + $0xac] sm:$0xff]  }
 0x33a   : > { %v3971_v33 = vadd.f32 %v10070_v32, %v3921_v12  ;;  %7897 = vmatmul.msk.bf16.gmra.mxu0 %vm610_vm1, %v8606_v6  ;;  %v3398_v12 = vsel %vm1444_vm3, %v3388_v31, %v3397_v5  ;;  %v3400_v31 = vshrl.u32 %v10285_v44, 16 }
 0x33c   : > { %v4017_v43 = vmax.f32 %v3971_v33, 0.0  ;;  %v3102_v55 = vpop.f32.mrf.mxu2  ;;  %v2969_v33 = vrot.slane %v10260_v9, 3 }
 0x33d   : > { %v3193_v18 = vadd.f32 %v3102_v55, %v9498_v53 }
 0x33e   : > { %v4339_v26 = vmul.f32 %v4168_v22, %v4017_v43  ;;  %v3567_v7 = vpop.f32.mrf.mxu3  ;;  %v4173_v43 = vpop.permute.xlu0 %4172  ;;  %v3403_v22 = vshll.u32 %v10285_v44, 16 }
 0x33f   : > { %v3829_v0 = vpop.f32.mrf.mxu0  ;;  %v4562_v40 = vld [vmem:[#allocation2 + $0x79] sm:$0xff] }
 0x340   : > { %4442 = vst.msk [vmem:[#allocation2 + $0x88] sm:$0xff] %vm4371_vm6, %v4339_v26  ;;  %v3922_v17 = vadd.f32 %v3829_v0, %v3655_v47  ;;  %v4600_v46 = vpack.c.bf16 %v4562_v40, %v4561_v24  ;;  %v10281_v6 = vld [vmem:[#allocation2 + $0x80] sm:$0xff]  ;;  %v10296_v26 = vpop.f32.mrf.mxu1  ;;  %v3656_v24 = vadd.f32 %v3565_v51, %v3193_v18  ;;  %v8607_v40 = vld [vmem:[%s8951_s12 + $0x98] sm:$0xff]   ;;  %v3405_v9 = vrot.slane %v3403_v22, 4  ;;  %v4178_v51 = vpop.permute.xlu1 %4177 }
 0x341   : > { %11601 = vst [vmem:[#allocation25_spill] sm:$0xff] %v10281_v6 }
 0x342   : > { %v3972_v30 = vadd.f32 %v10070_v32, %v3922_v17  ;;  %7924 = vmatmul.msk.bf16.gmra.mxu1 %vm4371_vm6, %v4600_v46  ;;  %v2970_v46 = vsel %vm2933_vm5, %v2967_v15, %v2969_v33 }
 0x343   : > { %7875 = vmatmul.msk.bf16.gmra.mxu3 %vm610_vm1, %v3398_v12  ;;  %v3402_v12 = vrot.slane %v3400_v31, 3 }
 0x344   : > { %v4018_v59 = vmax.f32 %v3972_v30, 0.0  ;;  %v3104_v0 = vpop.f32.mrf.mxu2 }
 0x345   : > { %v3194_v30 = vadd.f32 %v3104_v0, %v9511_v4  ;;  %v3406_v18 = vor.u32 %v3405_v9, %v3402_v12 }
 0x346   : > { %v4340_v47 = vmul.f32 %v4173_v43, %v4018_v59  ;;  %v3570_v55 = vpop.f32.mrf.mxu3 }
 0x347   : > { %v3832_v53 = vpop.f32.mrf.mxu0  ;;  %v4563_v22 = vld [vmem:[#allocation2 + $0x81] sm:$0xff] }
 0x348   : > { %4443 = vst.msk [vmem:[#allocation2 + $0x90] sm:$0xff] %vm4371_vm6, %v4340_v47  ;;  %v3923_v17 = vadd.f32 %v3832_v53, %v3656_v24  ;;  %v10305_v21 = vpop.f32.mrf.mxu1  ;;  %v3657_v24 = vadd.f32 %v3567_v7, %v3194_v30 }
 0x349   : > { %7851 = vmatmul.msk.bf16.gmra.mxu2 %vm610_vm1, %v2970_v46  ;;  %v10314_v46 = vld [vmem:[%s8951_s12 + $0xb4] sm:$0xff]  }
 0x34a   : > { %v3973_v35 = vadd.f32 %v10070_v32, %v3923_v17  ;;  %7898 = vmatmul.msk.bf16.gmra.mxu0 %vm610_vm1, %v8607_v40  ;;  %v10308_v40 = vld [vmem:[#allocation2 + $0x88] sm:$0xff] }
 0x34b   : > { %11602 = vst [vmem:[#allocation26_spill] sm:$0xff] %v10308_v40 }
 0x34c   : > { %v4019_v59 = vmax.f32 %v3973_v35, 0.0  ;;  %v3107_v47 = vpop.f32.mrf.mxu2  ;;  %v3407_v35 = vsel %vm1444_vm3, %v3397_v5, %v3406_v18  ;;  %v3409_v5 = vshrl.u32 %v10314_v46, 16 }
 0x34d   : > { %v3195_v12 = vadd.f32 %v3107_v47, %v9531_v56  ;;  %v8608_v56 = vld [vmem:[%s8951_s12 + $0xa0] sm:$0xff]  }
 0x34e   : > { %v4341_v43 = vmul.f32 %v4178_v51, %v4019_v59  ;;  %v3572_v31 = vpop.f32.mrf.mxu3  ;;  %v2971_v59 = vrot.slane %v10285_v44, 3  ;;  %v4183_v51 = vpop.permute.xlu2 %4182 }
 0x34f   : > { %v3834_v15 = vpop.f32.mrf.mxu0  ;;  %v4564_v53 = vld [vmem:[#allocation2 + $0x89] sm:$0xff] }
 0x350   : > { %4444 = vst.msk [vmem:[#allocation2 + $0x98] sm:$0xff] %vm4371_vm6, %v4341_v43  ;;  %v3924_v4 = vadd.f32 %v3834_v15, %v3657_v24  ;;  %v4601_v0 = vpack.c.bf16 %v4564_v53, %v4563_v22  ;;  %v10310_v17 = vld [vmem:[#allocation2 + $0x90] sm:$0xff]  ;;  %v3412_v43 = vshll.u32 %v10314_v46, 16  ;;  %v3658_v22 = vadd.f32 %v3570_v55, %v3195_v12  ;;  %v10327_v47 = vpop.f32.mrf.mxu1  ;;  %v4188_v12 = vpop.permute.xlu0 %4187 }
 0x351   : > { %11603 = vst [vmem:[#allocation27_spill] sm:$0xff] %v10310_v17 }
 0x352   : > { %v3974_v9 = vadd.f32 %v10070_v32, %v3924_v4  ;;  %7925 = vmatmul.msk.bf16.gmra.mxu1 %vm4371_vm6, %v4601_v0  ;;  %v2972_v0 = vsel %vm2933_vm5, %v2969_v33, %v2971_v59  ;;  %v3414_v44 = vrot.slane %v3412_v43, 4 }
 0x353   : > { %7876 = vmatmul.msk.bf16.gmra.mxu3 %vm610_vm1, %v3407_v35  ;;  %v3411_v35 = vrot.slane %v3409_v5, 3 }
 0x354   : > { %v4020_v30 = vmax.f32 %v3974_v9, 0.0  ;;  %v3109_v15 = vpop.f32.mrf.mxu2 }
 0x355   : > { %v3196_v9 = vadd.f32 %v3109_v15, %v9544_v41 }
 0x356   : > { %v4342_v24 = vmul.f32 %v4183_v51, %v4020_v30  ;;  %v3575_v7 = vpop.f32.mrf.mxu3  ;;  %v10334_v30 = vor.u32 %v3414_v44, %v3411_v35  ;;  %v10349_v35 = vld [vmem:[%s8951_s12 + $0xbc] sm:$0xff]  }
 0x357   : > { %v3837_v53 = vpop.f32.mrf.mxu0  ;;  %v4565_v5 = vld [vmem:[#allocation2 + $0x91] sm:$0xff] }
 0x358   : > { %4445 = vst.msk [vmem:[#allocation2 + $0xa0] sm:$0xff] %vm4371_vm6, %v4342_v24  ;;  %v3925_v4 = vadd.f32 %v3837_v53, %v3658_v22  ;;  %v3659_v22 = vadd.f32 %v3572_v31, %v3196_v9  ;;  %v3416_v31 = vsel %vm1444_vm3, %v3406_v18, %v10334_v30  ;;  %v3418_v18 = vshrl.u32 %v10349_v35, 16 }
 0x359   : > { %7852 = vmatmul.msk.bf16.gmra.mxu2 %vm610_vm1, %v2972_v0 }
 0x35a   : > { %v3975_v40 = vadd.f32 %v10070_v32, %v3925_v4  ;;  %7899 = vmatmul.msk.bf16.gmra.mxu0 %vm610_vm1, %v8608_v56  ;;  %v10342_v4 = vld [vmem:[#allocation2 + $0x98] sm:$0xff] }
 0x35b   : > { %11604 = vst [vmem:[#allocation28_spill] sm:$0xff] %v10342_v4  ;;  %v8875_v4 = vld [vmem:[%s8951_s12 + $0xc4] sm:$0xf0]  }
 0x35c   : > { %v4021_v55 = vmax.f32 %v3975_v40, 0.0  ;;  %v3112_v24 = vpop.f32.mrf.mxu2  ;;  %v8263_v40 = vld [vmem:[%s11524_s3] sm:$0xff] }
 0x35d   : > { %v3197_v9 = vadd.f32 %v3112_v24, %v9567_v10  ;;  %4914 = vmatpush.bf16.msrb.mxu2 %v8263_v40 }
 0x35e   : > { %v4343_v51 = vmul.f32 %v4188_v12, %v4021_v55  ;;  %v3577_v33 = vpop.f32.mrf.mxu3 }
 0x35f   : > { %v3839_v53 = vpop.f32.mrf.mxu0  ;;  %v4566_v43 = vld [vmem:[#allocation2 + $0x99] sm:$0xff]  ;;  %v10337_v15 = vpop.f32.mrf.mxu1  ;;  %v3660_v44 = vadd.f32 %v3575_v7, %v3197_v9  ;;  %v3420_v7 = vrot.slane %v3418_v18, 3 }
 0x360   : > { %4446 = vst.msk [vmem:[#allocation2 + $0xa8] sm:$0xff] %vm4371_vm6, %v4343_v51  ;;  %v3926_v41 = vadd.f32 %v3839_v53, %v3659_v22  ;;  %v4602_v56 = vpack.c.bf16 %v4566_v43, %v4565_v5  ;;  %v10344_v0 = vld [vmem:[#allocation2 + $0xa0] sm:$0xff]  ;;  %v11532_v51 = vrot.slane %v10314_v46, 3  ;;  %v4193_v22 = vpop.permute.xlu1 %4192  ;;  %v3421_v53 = vshll.u32 %v10349_v35, 16 }
 0x361   : > { %11605 = vst [vmem:[#allocation29_spill] sm:$0xff] %v10344_v0 }
 0x362   : > { %v3976_v55 = vadd.f32 %v10070_v32, %v3926_v41  ;;  %7926 = vmatmul.msk.bf16.gmra.mxu1 %vm4371_vm6, %v4602_v56  ;;  %v8609_v41 = vld [vmem:[%s8951_s12 + $0xa8] sm:$0xff]   ;;  %v3423_v9 = vrot.slane %v3421_v53, 4 }
 0x363   : > { %7877 = vmatmul.msk.bf16.gmra.mxu3 %vm610_vm1, %v3416_v31  ;;  %v2974_v31 = vsel %vm2933_vm5, %v2971_v59, %v11532_v51  ;;  %v4198_v51 = vpop.permute.xlu2 %4197 }
 0x364   : > { %v4022_v12 = vmax.f32 %v3976_v55, 0.0  ;;  %v3114_v43 = vpop.f32.mrf.mxu2  ;;  %v8267_v55 = vld [vmem:[%s11524_s3 + $0x20] sm:$0xff]  ;;  %v10382_v0 = vor.u32 %v3423_v9, %v3420_v7 }
 0x365   : > { %5193 = vmatpush.bf16.msrb.mxu3 %v8267_v55 }
 0x366   : > { %v4344_v5 = vmul.f32 %v4193_v22, %v4022_v12  ;;  %v3580_v24 = vpop.f32.mrf.mxu3  ;;  %v3198_v12 = vadd.f32 %v3114_v43, %v9586_v38  ;;  %v3425_v7 = vsel %vm1444_vm3, %v10334_v30, %v10382_v0  ;;  %v4203_v30 = vpop.permute.xlu0 %4202 }
 0x367   : > { %v3842_v10 = vpop.f32.mrf.mxu0  ;;  %v10362_v40 = vpop.f32.mrf.mxu1  ;;  %v4567_v17 = vld [vmem:[#allocation2 + $0xa1] sm:$0xff] }
 0x368   : > { %4447 = vst.msk [vmem:[#allocation2 + $0xb0] sm:$0xff] %vm4371_vm6, %v4344_v5  ;;  %v3927_v56 = vadd.f32 %v3842_v10, %v3660_v44  ;;  %v10374_v44 = vld [vmem:[%s8951_s12 + $0xc0] sm:$0xff]   ;;  %v10378_v10 = vld [vmem:[%s8951_s12 + $0xc8] sm:$0xff]   ;;  %v3661_v38 = vadd.f32 %v3577_v33, %v3198_v12 }
 0x369   : > { %v8874_v5 = vld [vmem:[%s8951_s12 + $0xc4] sm:$0xf]  ;;  %7853 = vmatmul.msk.bf16.gmra.mxu2 %vm610_vm1, %v2974_v31  ;;  %v10384_v55 = vld [vmem:[#allocation2 + $0xa8] sm:$0xff]  ;;  %v8269_v31 = vld [vmem:[%s11524_s3 + $0x30] sm:$0xff] }
 0x36a   : > { %v3977_v22 = vadd.f32 %v10070_v32, %v3927_v56  ;;  %7900 = vmatmul.msk.bf16.gmra.mxu0 %vm610_vm1, %v8609_v41  ;;  %11606 = vst [vmem:[#allocation30_spill] sm:$0xff] %v10384_v55  ;;  %v8271_v33 = vld [vmem:[%s11524_s3 + $0x40] sm:$0xff]  ;;  %v10400_v9 = vor.u32 %v8875_v4, %v8874_v5 }
 0x36b   : > { %5518 = vmatpush.bf16.msrb.mxu0 %v8269_v31  ;;  %5843 = vmatpush.bf16.msrb.mxu1 %v8271_v33  ;;  %v11609_v31 = vld [vmem:[#allocation15_spill] sm:$0xff]  ;;  %v11610_v33 = vld [vmem:[#allocation13_spill] sm:$0xff] }
 0x36c   : > { %v4023_v59 = vmax.f32 %v3977_v22, 0.0  ;;  %v3117_v53 = vpop.f32.mrf.mxu2  ;;  %v3427_v4 = vshrl.u32 %v10400_v9, 16  ;;  %v3430_v5 = vshll.u32 %v10400_v9, 16  ;;  %v2743_v55 = vadd.f32 %v11610_v33, %v11609_v31 }
 0x36e   : > { %v4345_v18 = vmul.f32 %v4198_v51, %v4023_v59  ;;  %v3582_v56 = vpop.f32.mrf.mxu3  ;;  %v3432_v2 = vrot.slane %v3430_v5, 4 }
 0x36f   : > { %v3844_v43 = vpop.f32.mrf.mxu0  ;;  %v4568_v41 = vld [vmem:[#allocation2 + $0xa9] sm:$0xff]  ;;  %v10387_v54 = vpop.f32.mrf.mxu1 }
 0x370   : > { %4448 = vst.msk [vmem:[#allocation2 + $0xb8] sm:$0xff] %vm4371_vm6, %v4345_v18  ;;  %v3928_v6 = vadd.f32 %v3844_v43, %v3661_v38  ;;  %v4603_v8 = vpack.c.bf16 %v4568_v41, %v4567_v17  ;;  %v10395_v51 = vld [vmem:[#allocation2 + $0xb0] sm:$0xff]  ;;  %v2975_v38 = vrot.slane %v10349_v35, 3  ;;  %v11611_v35 = vrot.slane %v10314_v46, 3 }
 0x371   : > { %11607 = vst [vmem:[#allocation31_spill] sm:$0xff] %v10395_v51  ;;  %v11608_v17 = vld [vmem:[#allocation14_spill] sm:$0xff]  ;;  %v3429_v51 = vrot.slane %v3427_v4, 3 }
 0x372   : > { %v3199_v22 = vadd.f32 %v3117_v53, %v11608_v17  ;;  %v3978_v59 = vadd.f32 %v10070_v32, %v3928_v6  ;;  %7927 = vmatmul.msk.bf16.gmra.mxu1 %vm4371_vm6, %v4603_v8  ;;  %v8610_v6 = vld [vmem:[%s8951_s12 + $0xb0] sm:$0xff]  }
 0x373   : > { %7878 = vmatmul.msk.bf16.gmra.mxu3 %vm610_vm1, %v3425_v7  ;;  %v10423_v31 = vor.u32 %v3432_v2, %v3429_v51 }
 0x374   : > { %v4024_v18 = vmax.f32 %v3978_v59, 0.0  ;;  %v3119_v41 = vpop.f32.mrf.mxu2  ;;  %v3662_v53 = vadd.f32 %v3580_v24, %v3199_v22  ;;  %v2976_v59 = vsel %vm2933_vm5, %v11611_v35, %v2975_v38 }
 0x375   : > { %v3434_v2 = vsel %vm1444_vm3, %v10382_v0, %v10423_v31  ;;  %v2977_v0 = vrot.slane %v10400_v9, 3 }
 0x376   : > { %v4346_v43 = vmul.f32 %v4203_v30, %v4024_v18  ;;  %v3585_v12 = vpop.f32.mrf.mxu3  ;;  %v3200_v18 = vadd.f32 %v3119_v41, %v2743_v55  ;;  %v4208_v30 = vpop.permute.xlu1 %4207 }
 0x377   : > { %v3847_v17 = vpop.f32.mrf.mxu0  ;;  %v10415_v7 = vpop.f32.mrf.mxu1  ;;  %v4569_v4 = vld [vmem:[#allocation2 + $0xb1] sm:$0xff]  ;;  %v2978_v9 = vsel %vm2933_vm5, %v2975_v38, %v2977_v0 }
 0x378   : > { %4449 = vst.msk [vmem:[#allocation2 + $0xc0] sm:$0xff] %vm4371_vm6, %v4346_v43  ;;  %v3929_v8 = vadd.f32 %v3847_v17, %v3662_v53  ;;  %v3227_v43 = vunpack.c.h.b16 %v10378_v10  ;;  %v3663_v46 = vadd.f32 %v3582_v56, %v3200_v18  ;;  %v8611_v56 = vld [vmem:[%s8951_s12 + $0xb8] sm:$0xff]  }
 0x379   : > { %7854 = vmatmul.msk.bf16.gmra.mxu2 %vm610_vm1, %v2976_v59  ;;  %v11614_v59 = vld [vmem:[#allocation17_spill] sm:$0xff] }
 0x37a   : > { %v3979_v24 = vadd.f32 %v10070_v32, %v3929_v8  ;;  %7901 = vmatmul.msk.bf16.gmra.mxu0 %vm610_vm1, %v8610_v6  ;;  %v10429_v6 = vld [vmem:[#allocation2 + $0xb8] sm:$0xff]  ;;  %v3228_v51 = vpack.c.b16 %v3227_v43, %v3227_v43  ;;  %v4213_v43 = vpop.permute.xlu2 %4212 }
 0x37b   : > { %11612 = vst [vmem:[#allocation14_spill] sm:$0xff] %v10429_v6  ;;  %v11615_v6 = vld [vmem:[#allocation18_spill] sm:$0xff] }
 0x37c   : > { %v4025_v22 = vmax.f32 %v3979_v24, 0.0  ;;  %v3122_v17 = vpop.f32.mrf.mxu2  ;;  %v10442_v24 = vld [vmem:[%s11523_s2] ss:$0 sm:$0xff] }
 0x37d   : > { %v3201_v18 = vadd.f32 %v3122_v17, %v11614_v59 }
 0x37e   : > { %v4347_v53 = vmul.f32 %v4208_v30, %v4025_v22  ;;  %v3587_v35 = vpop.f32.mrf.mxu3 }
 0x37f   : > { %v3849_v33 = vpop.f32.mrf.mxu0  ;;  %v4570_v5 = vld [vmem:[#allocation2 + $0xb9] sm:$0xff]  ;;  %v10427_v55 = vpop.f32.mrf.mxu1 }
 0x380   : > { %4450 = vst.msk [vmem:[#allocation2 + $0xc8] sm:$0xff] %vm4371_vm6, %v4347_v53  ;;  %v3930_v32 = vadd.f32 %v3849_v33, %v3663_v46  ;;  %v4604_v41 = vpack.c.bf16 %v4570_v5, %v4569_v4  ;;  %v10431_v8 = vld [vmem:[#allocation2 + $0xc0] sm:$0xff]  ;;  %v3436_v53 = vshrl.u32 %v3228_v51, 16  ;;  %v3439_v46 = vshll.u32 %v3228_v51, 16 }
 0x381   : > { %11613 = vst [vmem:[#allocation15_spill] sm:$0xff] %v10431_v8  ;;  %v3664_v4 = vadd.f32 %v3585_v12, %v3201_v18  ;;  %v11616_v8 = vld [vmem:[#allocation16_spill] sm:$0xff]  ;;  %v2908_v18 = vunpack.c.l.b16 %v2812_v42 }
 0x382   : > { %v3980_v22 = vadd.f32 %v10442_v24, %v3930_v32  ;;  %7928 = vmatmul.msk.bf16.gmra.mxu1 %vm4371_vm6, %v4604_v41  ;;  %v2745_v32 = vadd.f32 %v11616_v8, %v11615_v6  ;;  %v3441_v29 = vrot.slane %v3439_v46, 4  ;;  %v4218_v6 = vpop.permute.xlu0 %4217 }
 0x383   : > { %7879 = vmatmul.msk.bf16.gmra.mxu3 %vm610_vm1, %v3434_v2  ;;  %v3438_v2 = vrot.slane %v3436_v53, 3 }
 0x384   : > { %v4026_v30 = vmax.f32 %v3980_v22, 0.0  ;;  %v3124_v17 = vpop.f32.mrf.mxu2 }
 0x385   : > { %v3202_v51 = vadd.f32 %v3124_v17, %v2745_v32  ;;  %v3442_v8 = vor.u32 %v3441_v29, %v3438_v2  ;;  %v5362_v29 = vld [vmem:[#allocation2 + $0x47] sm:$0xff] }
 0x386   : > { %v4348_v33 = vmul.f32 %v4213_v43, %v4026_v30  ;;  %v3590_v59 = vpop.f32.mrf.mxu3 }
 0x387   : > { %v3852_v5 = vpop.f32.mrf.mxu0  ;;  %v10452_v22 = vpop.f32.mrf.mxu1  ;;  %v4571_v38 = vld [vmem:[#allocation2 + $0xc1] sm:$0xff]  ;;  %v3443_v42 = vsel %vm1444_vm3, %v10423_v31, %v3442_v8  ;;  %v2747_v31 = vadd.f32 %v9720_v49, %v9737_v37 }
 0x388   : > { %4451 = vst.msk [vmem:[#allocation2 + $0xd0] sm:$0xff] %vm4371_vm6, %v4348_v33  ;;  %v3931_v41 = vadd.f32 %v3852_v5, %v3664_v4  ;;  %v3665_v4 = vadd.f32 %v3587_v35, %v3202_v51 }
 0x389   : > { %7855 = vmatmul.msk.bf16.gmra.mxu2 %vm610_vm1, %v2978_v9 }
 0x38a   : > { %v3981_v30 = vadd.f32 %v10442_v24, %v3931_v41  ;;  %7902 = vmatmul.msk.bf16.gmra.mxu0 %vm610_vm1, %v8611_v56  ;;  %v2932_v56 = vpack.c.b16 %v2908_v18, %v2908_v18  ;;  %v10462_v41 = vld [vmem:[#allocation2 + $0xc8] sm:$0xff] }
 0x38b   : > { %11617 = vst [vmem:[#allocation13_spill] sm:$0xff] %v10462_v41  ;;  %v5364_v41 = vld [vmem:[#allocation2 + $0x57] sm:$0xff] }
 0x38c   : > { %v4027_v12 = vmax.f32 %v3981_v30, 0.0  ;;  %v3127_v33 = vpop.f32.mrf.mxu2  ;;  %v2979_v30 = vrot.slane %v2932_v56, 3  ;;  %v5032_v56 = vld [vmem:[#allocation2 + $0xa] sm:$0xff] }
 0x38d   : > { %v3203_v35 = vadd.f32 %v3127_v33, %v9723_v60 }
 0x38e   : > { %v4349_v43 = vmul.f32 %v4218_v6, %v4027_v12  ;;  %v3592_v58 = vpop.f32.mrf.mxu3  ;;  %v4223_v12 = vpop.permute.xlu1 %4222  ;;  %v2980_v33 = vsel %vm2933_vm5, %v2977_v0, %v2979_v30 }
 0x38f   : > { %v3854_v5 = vpop.f32.mrf.mxu0  ;;  %v4572_v53 = vld [vmem:[#allocation2 + $0xc9] sm:$0xff]  ;;  %v10460_v17 = vpop.f32.mrf.mxu1 }
 0x390   : > { %4452 = vst.msk [vmem:[#allocation2 + $0xd8] sm:$0xff] %vm4371_vm6, %v4349_v43  ;;  %v3932_v46 = vadd.f32 %v3854_v5, %v3665_v4  ;;  %v4605_v32 = vpack.c.bf16 %v4572_v53, %v4571_v38  ;;  %v10464_v9 = vld [vmem:[#allocation2 + $0xd0] sm:$0xff]  ;;  %v3666_v43 = vadd.f32 %v3590_v59, %v3203_v35 }
 0x391   : > { %11618 = vst [vmem:[#allocation17_spill] sm:$0xff] %v10464_v9  ;;  %v11624_v9 = vld [vmem:[#allocation6_spill] sm:$0xff] }
 0x392   : > { %v3982_v2 = vadd.f32 %v10442_v24, %v3932_v46  ;;  %7929 = vmatmul.msk.bf16.gmra.mxu1 %vm4371_vm6, %v4605_v32  ;;  %v4228_v46 = vpop.permute.xlu2 %4227  ;;  %v5031_v32 = vld [vmem:[#allocation2 + $0x2] sm:$0xff] }
 0x393   : > { %7880 = vmatmul.msk.bf16.gmra.mxu3 %vm610_vm1, %v3443_v42 }
 0x394   : > { %v4028_v51 = vmax.f32 %v3982_v2, 0.0  ;;  %v3129_v6 = vpop.f32.mrf.mxu2 }
 0x395   : > { %v3204_v38 = vadd.f32 %v3129_v6, %v2747_v31 }
 0x396   : > { %v4350_v18 = vmul.f32 %v4223_v12, %v4028_v51  ;;  %v3595_v5 = vpop.f32.mrf.mxu3 }
 0x397   : > { %v3857_v4 = vpop.f32.mrf.mxu0  ;;  %v10477_v8 = vpop.f32.mrf.mxu1  ;;  %v3667_v42 = vadd.f32 %v3592_v58, %v3204_v38  ;;  %v4573_v51 = vld [vmem:[#allocation2 + $0xd1] sm:$0xff]  ;;  %v4475_v38 = vld [vmem:[#allocation2 + $0x8] sm:$0xff] }
 0x398   : > { %4453 = vst.msk [vmem:[#allocation2 + $0xe0] sm:$0xff] %vm4371_vm6, %v4350_v18  ;;  %v3933_v60 = vadd.f32 %v3857_v4, %v3666_v43  ;;  %v10487_v6 = vld [vmem:[#allocation2 + $0xd8] sm:$0xff] }
 0x399   : > { %7856 = vmatmul.msk.bf16.gmra.mxu2 %vm610_vm1, %v2980_v33  ;;  %v4474_v33 = vld [vmem:[#allocation2] sm:$0xff]  ;;  %v5360_v4 = vld [vmem:[#allocation2 + $0x37] sm:$0xff] }
 0x39a   : > { %v3983_v53 = vadd.f32 %v10442_v24, %v3933_v60  ;;  %7903 = vmatmul.msk.bf16.gmra.mxu0 %vm610_vm1, %v10374_v44  ;;  %v5077_v44 = vpack.c.bf16 %v5032_v56, %v5031_v32 }
 0x39c   : > { %v4029_v59 = vmax.f32 %v3983_v53, 0.0  ;;  %v3132_v37 = vpop.f32.mrf.mxu2  ;;  %v4233_v53 = vpop.permute.xlu0 %4232 }
 0x39d   : > { %v3205_v58 = vadd.f32 %v3132_v37, %v9765_v62 }
 0x39e   : > { %v4351_v49 = vmul.f32 %v4228_v46, %v4029_v59  ;;  %v3597_v2 = vpop.f32.mrf.mxu3 }
 0x39f   : > { %v3859_v35 = vpop.f32.mrf.mxu0  ;;  %v4574_v12 = vld [vmem:[#allocation2 + $0xd9] sm:$0xff]  ;;  %v10485_v30 = vpop.f32.mrf.mxu1  ;;  %v3668_v32 = vadd.f32 %v3595_v5, %v3205_v58 }
 0x3a0   : > { %4454 = vst.msk [vmem:[#allocation2 + $0xe8] sm:$0xff] %vm4371_vm6, %v4351_v49  ;;  %v3934_v0 = vadd.f32 %v3859_v35, %v3667_v42  ;;  %v4606_v18 = vpack.c.bf16 %v4574_v12, %v4573_v51  ;;  %v10489_v43 = vld [vmem:[#allocation2 + $0xe0] sm:$0xff]  ;;  %v4520_v42 = vpack.c.bf16 %v4475_v38, %v4474_v33  ;;  %v2749_v35 = vadd.f32 %v9763_v23, %v9779_v27 }
 0x3a1   : > { %11619 = vst [vmem:[#allocation18_spill] sm:$0xff] %v10489_v43  ;;  %v5034_v33 = vld [vmem:[#allocation2 + $0x1a] sm:$0xff] }
 0x3a2   : > { %v3984_v31 = vadd.f32 %v10442_v24, %v3934_v0  ;;  %7930 = vmatmul.msk.bf16.gmra.mxu1 %vm4371_vm6, %v4606_v18  ;;  %v4238_v0 = vpop.permute.xlu1 %4237 }
 0x3a3   : > { %7983 = vmatmul.msk.bf16.vlgmr.msrb.gmra.mxu3 %vm4371_vm6, %v5077_v44 }
 0x3a4   : > { %v4030_v60 = vmax.f32 %v3984_v31, 0.0  ;;  %v3134_v46 = vpop.f32.mrf.mxu2 }
 0x3a5   : > { %v3206_v51 = vadd.f32 %v3134_v46, %v2749_v35 }
 0x3a6   : > { %v4352_v59 = vmul.f32 %v4233_v53, %v4030_v60  ;;  %v3600_v49 = vpop.f32.mrf.mxu3 }
 0x3a7   : > { %v3862_v56 = vpop.f32.mrf.mxu0  ;;  %v10500_v37 = vpop.f32.mrf.mxu1  ;;  %v3669_v58 = vadd.f32 %v3597_v2, %v3206_v51  ;;  %v4575_v27 = vld [vmem:[#allocation2 + $0xe1] sm:$0xff] }
 0x3a8   : > { %4455 = vst.msk [vmem:[#allocation2 + $0xf0] sm:$0xff] %vm4371_vm6, %v4352_v59  ;;  %v3935_v62 = vadd.f32 %v3862_v56, %v3668_v32  ;;  %v10509_v46 = vld [vmem:[#allocation2 + $0xe8] sm:$0xff]  ;;  %v5033_v32 = vld [vmem:[#allocation2 + $0x12] sm:$0xff]  ;;  %v4243_v51 = vpop.permute.xlu2 %4242 }
 0x3a9   : > { %7948 = vmatmul.msk.bf16.vlgmr.msrb.gmra.mxu2 %vm4371_vm6, %v4520_v42  ;;  %v5078_v35 = vpack.c.bf16 %v5034_v33, %v5033_v32  ;;  %v5036_v56 = vld [vmem:[#allocation2 + $0x2a] sm:$0xff] }
 0x3aa   : > { %v3985_v12 = vadd.f32 %v10442_v24, %v3935_v62  ;;  %7904 = vmatmul.msk.bf16.gmra.mxu0 %vm610_vm1, %v10378_v10 }
 0x3ac   : > { %v4031_v5 = vmax.f32 %v3985_v12, 0.0  ;;  %v3137_v44 = vpop.f32.mrf.mxu2  ;;  %v5357_v12 = vld [vmem:[#allocation2 + $0x1f] sm:$0xff] }
 0x3ad   : > { %v3207_v2 = vadd.f32 %v3137_v44, %v9800_v19  ;;  %v2751_v19 = vadd.f32 %v9798_v20, %v9811_v13 }
 0x3ae   : > { %v4353_v18 = vmul.f32 %v4238_v0, %v4031_v5  ;;  %v3602_v23 = vpop.f32.mrf.mxu3 }
 0x3af   : > { %v3864_v31 = vpop.f32.mrf.mxu0  ;;  %v4576_v60 = vld [vmem:[#allocation2 + $0xe9] sm:$0xff]  ;;  %v10507_v53 = vpop.f32.mrf.mxu1 }
 0x3b0   : > { %4456 = vst.msk [vmem:[#allocation2 + $0xf8] sm:$0xff] %vm4371_vm6, %v4353_v18  ;;  %v3936_v38 = vadd.f32 %v3864_v31, %v3669_v58  ;;  %v4607_v59 = vpack.c.bf16 %v4576_v60, %v4575_v27  ;;  %v10511_v10 = vld [vmem:[#allocation2 + $0xf0] sm:$0xff]  ;;  %v3670_v18 = vadd.f32 %v3600_v49, %v3207_v2  ;;  %v4248_v2 = vpop.permute.xlu0 %4247 }
 0x3b1   : > { %11620 = vst [vmem:[#allocation16_spill] sm:$0xff] %v10511_v10  ;;  %v4476_v58 = vld [vmem:[#allocation2 + $0x10] sm:$0xff] }
 0x3b2   : > { %v3986_v42 = vadd.f32 %v10442_v24, %v3936_v38  ;;  %7931 = vmatmul.msk.bf16.gmra.mxu1 %vm4371_vm6, %v4607_v59  ;;  %v5356_v60 = vld [vmem:[#allocation2 + $0x17] sm:$0xff] }
 0x3b3   : > { %7984 = vmatmul.msk.bf16.gmra.mxu3 %vm4371_vm6, %v5078_v35  ;;  %v5402_v38 = vpack.c.bf16 %v5357_v12, %v5356_v60  ;;  %v8838_v59 = vld [vmem:[#allocation2 + $0x18] sm:$0xff] }
 0x3b4   : > { %v4032_v62 = vmax.f32 %v3986_v42, 0.0  ;;  %v3139_v0 = vpop.f32.mrf.mxu2  ;;  %v4521_v32 = vpack.c.bf16 %v8838_v59, %v4476_v58 }
 0x3b5   : > { %v3208_v42 = vadd.f32 %v3139_v0, %v2751_v19 }
 0x3b6   : > { %v4354_v5 = vmul.f32 %v4243_v51, %v4032_v62  ;;  %v3605_v27 = vpop.f32.mrf.mxu3 }
 0x3b7   : > { %v3867_v31 = vpop.f32.mrf.mxu0  ;;  %v10522_v33 = vpop.f32.mrf.mxu1  ;;  %v3671_v20 = vadd.f32 %v3602_v23, %v3208_v42  ;;  %v10530_v60 = vld [vmem:[#allocation2 + $0xf8] sm:$0xff] }
 0x3b8   : > { %4457 = vst.msk [vmem:[#allocation2 + $0x100] sm:$0xff] %vm4371_vm6, %v4354_v5  ;;  %v3937_v44 = vadd.f32 %v3867_v31, %v3670_v18  ;;  %v4577_v18 = vld [vmem:[#allocation2 + $0xf1] sm:$0xff] }
 0x3b9   : > { %7949 = vmatmul.msk.bf16.gmra.mxu2 %vm4371_vm6, %v4521_v32 }
 0x3ba   : > { %v3987_v35 = vadd.f32 %v10442_v24, %v3937_v44  ;;  %8018 = vmatmul.msk.bf16.vlgmr.msrb.gmra.mxu0 %vm4371_vm6, %v5402_v38  ;;  %v5035_v44 = vld [vmem:[#allocation2 + $0x22] sm:$0xff]  ;;  %v2753_v38 = vadd.f32 %v9827_v50, %v9837_v61 }
 0x3bb   : > { %v5079_v32 = vpack.c.bf16 %v5036_v56, %v5035_v44 }
 0x3bc   : > { %v4033_v49 = vmax.f32 %v3987_v35, 0.0  ;;  %v3142_v51 = vpop.f32.mrf.mxu2  ;;  %v4253_v35 = vpop.permute.xlu1 %4252 }
 0x3bd   : > { %v3209_v23 = vadd.f32 %v3142_v51, %v9829_v16 }
 0x3be   : > { %v4355_v62 = vmul.f32 %v4248_v2, %v4033_v49  ;;  %v3607_v5 = vpop.f32.mrf.mxu3  ;;  %v5359_v49 = vld [vmem:[#allocation2 + $0x2f] sm:$0xff] }
 0x3bf   : > { %v3869_v13 = vpop.f32.mrf.mxu0  ;;  %v4578_v31 = vld [vmem:[#allocation2 + $0xf9] sm:$0xff]  ;;  %v10528_v0 = vpop.f32.mrf.mxu1 }
 0x3c0   : > { %4458 = vst.msk [vmem:[#allocation2 + $0x108] sm:$0xff] %vm4371_vm6, %v4355_v62  ;;  %v3938_v12 = vadd.f32 %v3869_v13, %v3671_v20  ;;  %v4608_v58 = vpack.c.bf16 %v4578_v31, %v4577_v18  ;;  %v10532_v19 = vld [vmem:[#allocation2 + $0x100] sm:$0xff]  ;;  %v3672_v20 = vadd.f32 %v3605_v27, %v3209_v23  ;;  %v4258_v23 = vpop.permute.xlu2 %4257 }
 0x3c1   : > { %v5358_v31 = vld [vmem:[#allocation2 + $0x27] sm:$0xff] }
 0x3c2   : > { %v3988_v59 = vadd.f32 %v10442_v24, %v3938_v12  ;;  %7932 = vmatmul.msk.bf16.gmra.mxu1 %vm4371_vm6, %v4608_v58  ;;  %v5403_v51 = vpack.c.bf16 %v5359_v49, %v5358_v31  ;;  %v8839_v12 = vld [vmem:[#allocation2 + $0x20] sm:$0xff]  ;;  %v8840_v58 = vld [vmem:[#allocation2 + $0x28] sm:$0xff] }
 0x3c3   : > { %7985 = vmatmul.msk.bf16.gmra.mxu3 %vm4371_vm6, %v5079_v32  ;;  %v4522_v44 = vpack.c.bf16 %v8840_v58, %v8839_v12  ;;  %v5038_v49 = vld [vmem:[#allocation2 + $0x3a] sm:$0xff]  ;;  %v5037_v12 = vld [vmem:[#allocation2 + $0x32] sm:$0xff]  ;;  %v2755_v58 = vadd.f32 %v9853_v25, %v9863_v3 }
 0x3c4   : > { %v4034_v42 = vmax.f32 %v3988_v59, 0.0  ;;  %v3144_v62 = vpop.f32.mrf.mxu2 }
 0x3c5   : > { %v3210_v59 = vadd.f32 %v3144_v62, %v2753_v38 }
 0x3c6   : > { %v4356_v2 = vmul.f32 %v4253_v35, %v4034_v42  ;;  %v3610_v18 = vpop.f32.mrf.mxu3 }
 0x3c7   : > { %v3872_v13 = vpop.f32.mrf.mxu0  ;;  %v10543_v56 = vpop.f32.mrf.mxu1  ;;  %v3673_v61 = vadd.f32 %v3607_v5, %v3210_v59  ;;  %v5080_v59 = vpack.c.bf16 %v5038_v49, %v5037_v12 }
 0x3c8   : > { %4459 = vst.msk [vmem:[#allocation2 + $0x110] sm:$0xff] %vm4371_vm6, %v4356_v2  ;;  %v3939_v16 = vadd.f32 %v3872_v13, %v3672_v20  ;;  %v4579_v20 = vld [vmem:[#allocation2 + $0x101] sm:$0xff] }
 0x3c9   : > { %7950 = vmatmul.msk.bf16.gmra.mxu2 %vm4371_vm6, %v4522_v44 }
 0x3ca   : > { %v3989_v32 = vadd.f32 %v10442_v24, %v3939_v16  ;;  %8019 = vmatmul.msk.bf16.gmra.mxu0 %vm4371_vm6, %v5403_v51  ;;  %v10551_v16 = vld [vmem:[#allocation2 + $0x108] sm:$0xff] }
 0x3cc   : > { %v4035_v27 = vmax.f32 %v3989_v32, 0.0  ;;  %v3147_v50 = vpop.f32.mrf.mxu2 }
 0x3cd   : > { %v3211_v5 = vadd.f32 %v3147_v50, %v9855_v57 }
 0x3ce   : > { %v4357_v42 = vmul.f32 %v4258_v23, %v4035_v27  ;;  %v3612_v2 = vpop.f32.mrf.mxu3  ;;  %v4263_v27 = vpop.permute.xlu0 %4262  ;;  %v5361_v23 = vld [vmem:[#allocation2 + $0x3f] sm:$0xff] }
 0x3cf   : > { %v3874_v35 = vpop.f32.mrf.mxu0  ;;  %v4580_v13 = vld [vmem:[#allocation2 + $0x109] sm:$0xff]  ;;  %v10549_v38 = vpop.f32.mrf.mxu1  ;;  %v5404_v49 = vpack.c.bf16 %v5361_v23, %v5360_v4 }
 0x3d0   : > { %4460 = vst.msk [vmem:[#allocation2 + $0x118] sm:$0xff] %vm4371_vm6, %v4357_v42  ;;  %v3940_v31 = vadd.f32 %v3874_v35, %v3673_v61  ;;  %v4609_v62 = vpack.c.bf16 %v4580_v13, %v4579_v20  ;;  %v10553_v51 = vld [vmem:[#allocation2 + $0x110] sm:$0xff]  ;;  %v3674_v35 = vadd.f32 %v3610_v18, %v3211_v5  ;;  %v4268_v5 = vpop.permute.xlu1 %4267 }
 0x3d1   : > { %v5040_v4 = vld [vmem:[#allocation2 + $0x4a] sm:$0xff] }
 0x3d2   : > { %v3990_v44 = vadd.f32 %v10442_v24, %v3940_v31  ;;  %7933 = vmatmul.msk.bf16.gmra.mxu1 %vm4371_vm6, %v4609_v62  ;;  %v8841_v31 = vld [vmem:[#allocation2 + $0x30] sm:$0xff]  ;;  %v8842_v62 = vld [vmem:[#allocation2 + $0x38] sm:$0xff] }
 0x3d3   : > { %7986 = vmatmul.msk.bf16.gmra.mxu3 %vm4371_vm6, %v5080_v59  ;;  %v4523_v12 = vpack.c.bf16 %v8842_v62, %v8841_v31  ;;  %v5039_v31 = vld [vmem:[#allocation2 + $0x42] sm:$0xff]  ;;  %v11621_v62 = vld [vmem:[#allocation3_spill] sm:$0xff] }
 0x3d4   : > { %v4036_v32 = vmax.f32 %v3990_v44, 0.0  ;;  %v3149_v61 = vpop.f32.mrf.mxu2  ;;  %v2757_v10 = vadd.f32 %v11621_v62, %v9886_v11 }
 0x3d5   : > { %v3212_v44 = vadd.f32 %v3149_v61, %v2755_v58 }
 0x3d6   : > { %v4358_v42 = vmul.f32 %v4263_v27, %v4036_v32  ;;  %v3615_v13 = vpop.f32.mrf.mxu3 }
 0x3d7   : > { %v3877_v20 = vpop.f32.mrf.mxu0  ;;  %v10564_v50 = vpop.f32.mrf.mxu1  ;;  %v3675_v3 = vadd.f32 %v3612_v2, %v3212_v44  ;;  %v5081_v44 = vpack.c.bf16 %v5040_v4, %v5039_v31 }
 0x3d8   : > { %4461 = vst.msk [vmem:[#allocation2 + $0x120] sm:$0xff] %vm4371_vm6, %v4358_v42  ;;  %v3941_v57 = vadd.f32 %v3877_v20, %v3674_v35  ;;  %v4581_v35 = vld [vmem:[#allocation2 + $0x111] sm:$0xff] }
 0x3d9   : > { %7951 = vmatmul.msk.bf16.gmra.mxu2 %vm4371_vm6, %v4523_v12 }
 0x3da   : > { %v3991_v59 = vadd.f32 %v10442_v24, %v3941_v57  ;;  %8020 = vmatmul.msk.bf16.gmra.mxu0 %vm4371_vm6, %v5404_v49  ;;  %v10572_v57 = vld [vmem:[#allocation2 + $0x118] sm:$0xff] }
 0x3dc   : > { %v4037_v18 = vmax.f32 %v3991_v59, 0.0  ;;  %v3152_v25 = vpop.f32.mrf.mxu2 }
 0x3dd   : > { %v3213_v2 = vadd.f32 %v3152_v25, %v9881_v63 }
 0x3de   : > { %v4359_v32 = vmul.f32 %v4268_v5, %v4037_v18  ;;  %v3617_v42 = vpop.f32.mrf.mxu3  ;;  %v4273_v18 = vpop.permute.xlu2 %4272  ;;  %v5363_v5 = vld [vmem:[#allocation2 + $0x4f] sm:$0xff] }
 0x3df   : > { %v3879_v27 = vpop.f32.mrf.mxu0  ;;  %v4582_v20 = vld [vmem:[#allocation2 + $0x119] sm:$0xff]  ;;  %v10570_v58 = vpop.f32.mrf.mxu1  ;;  %v5405_v4 = vpack.c.bf16 %v5363_v5, %v5362_v29 }
 0x3e0   : > { %4462 = vst.msk [vmem:[#allocation2 + $0x128] sm:$0xff] %vm4371_vm6, %v4359_v32  ;;  %v3942_v23 = vadd.f32 %v3879_v27, %v3675_v3  ;;  %v4610_v61 = vpack.c.bf16 %v4582_v20, %v4581_v35  ;;  %v10574_v49 = vld [vmem:[#allocation2 + $0x120] sm:$0xff]  ;;  %v3676_v27 = vadd.f32 %v3615_v13, %v3213_v2  ;;  %v4278_v2 = vpop.permute.xlu0 %4277 }
 0x3e1   : > { %v5042_v29 = vld [vmem:[#allocation2 + $0x5a] sm:$0xff] }
 0x3e2   : > { %v3992_v12 = vadd.f32 %v10442_v24, %v3942_v23  ;;  %7934 = vmatmul.msk.bf16.gmra.mxu1 %vm4371_vm6, %v4610_v61  ;;  %v8843_v23 = vld [vmem:[#allocation2 + $0x40] sm:$0xff]  ;;  %v8844_v61 = vld [vmem:[#allocation2 + $0x48] sm:$0xff] }
 0x3e3   : > { %7987 = vmatmul.msk.bf16.gmra.mxu3 %vm4371_vm6, %v5081_v44  ;;  %v4524_v31 = vpack.c.bf16 %v8844_v61, %v8843_v23  ;;  %v5041_v23 = vld [vmem:[#allocation2 + $0x52] sm:$0xff]  ;;  %v11625_v61 = vld [vmem:[#allocation4_spill] sm:$0xff] }
 0x3e4   : > { %v4038_v59 = vmax.f32 %v3992_v12, 0.0  ;;  %v3154_v3 = vpop.f32.mrf.mxu2 }
 0x3e5   : > { %v3214_v12 = vadd.f32 %v3154_v3, %v2757_v10 }
 0x3e6   : > { %v4360_v32 = vmul.f32 %v4273_v18, %v4038_v59  ;;  %v3620_v20 = vpop.f32.mrf.mxu3 }
 0x3e7   : > { %v3882_v35 = vpop.f32.mrf.mxu0  ;;  %v10585_v25 = vpop.f32.mrf.mxu1  ;;  %v3677_v62 = vadd.f32 %v3617_v42, %v3214_v12  ;;  %v11623_v42 = vld [vmem:[#allocation5_spill] sm:$0xff] }
 0x3e8   : > { %4463 = vst.msk [vmem:[#allocation2 + $0x130] sm:$0xff] %vm4371_vm6, %v4360_v32  ;;  %v3943_v63 = vadd.f32 %v3882_v35, %v3676_v27  ;;  %v4583_v27 = vld [vmem:[#allocation2 + $0x121] sm:$0xff] }
 0x3e9   : > { %7952 = vmatmul.msk.bf16.gmra.mxu2 %vm4371_vm6, %v4524_v31 }
 0x3ea   : > { %v3993_v44 = vadd.f32 %v10442_v24, %v3943_v63  ;;  %8021 = vmatmul.msk.bf16.gmra.mxu0 %vm4371_vm6, %v5405_v4  ;;  %v10593_v63 = vld [vmem:[#allocation2 + $0x128] sm:$0xff] }
 0x3ec   : > { %v4039_v13 = vmax.f32 %v3993_v44, 0.0  ;;  %v3157_v11 = vpop.f32.mrf.mxu2  ;;  %v5082_v44 = vpack.c.bf16 %v5042_v29, %v5041_v23  ;;  %v8846_v23 = vld [vmem:[#allocation2 + $0x58] sm:$0xff] }
 0x3ed   : > { %v3215_v31 = vadd.f32 %v3157_v11, %v11623_v42 }
 0x3ee   : > { %v4361_v59 = vmul.f32 %v4278_v2, %v4039_v13  ;;  %v3622_v32 = vpop.f32.mrf.mxu3  ;;  %v4283_v2 = vpop.permute.xlu1 %4282 }
 0x3ef   : > { %v3884_v18 = vpop.f32.mrf.mxu0  ;;  %v4584_v35 = vld [vmem:[#allocation2 + $0x129] sm:$0xff]  ;;  %v10591_v10 = vpop.f32.mrf.mxu1 }
 0x3f0   : > { %4464 = vst.msk [vmem:[#allocation2 + $0x138] sm:$0xff] %vm4371_vm6, %v4361_v59  ;;  %v3944_v5 = vadd.f32 %v3884_v18, %v3677_v62  ;;  %v4611_v3 = vpack.c.bf16 %v4584_v35, %v4583_v27  ;;  %v10595_v4 = vld [vmem:[#allocation2 + $0x130] sm:$0xff]  ;;  %v5365_v59 = vld [vmem:[#allocation2 + $0x5f] sm:$0xff]  ;;  %v3678_v27 = vadd.f32 %v3620_v20, %v3215_v31  ;;  %v4288_v31 = vpop.permute.xlu2 %4287 }
 0x3f1   : > { %11622 = vst [vmem:[#allocation3_spill] sm:$0xff] %v10595_v4  ;;  %v2759_v4 = vadd.f32 %v11625_v61, %v11624_v9 }
 0x3f2   : > { %v3994_v12 = vadd.f32 %v10442_v24, %v3944_v5  ;;  %7935 = vmatmul.msk.bf16.gmra.mxu1 %vm4371_vm6, %v4611_v3  ;;  %v5406_v5 = vpack.c.bf16 %v5365_v59, %v5364_v41  ;;  %v8845_v3 = vld [vmem:[#allocation2 + $0x50] sm:$0xff] }
 0x3f3   : > { %7988 = vmatmul.msk.bf16.gmra.mxu3 %vm4371_vm6, %v5082_v44  ;;  %v4525_v42 = vpack.c.bf16 %v8846_v23, %v8845_v3  ;;  %v5044_v41 = vld [vmem:[#allocation2 + $0x6a] sm:$0xff]  ;;  %v5043_v3 = vld [vmem:[#allocation2 + $0x62] sm:$0xff]  ;;  %v2761_v23 = vadd.f32 %v9919_v36, %v9926_v28 }
 0x3f4   : > { %v4040_v13 = vmax.f32 %v3994_v12, 0.0  ;;  %v3159_v18 = vpop.f32.mrf.mxu2 }
 0x3f5   : > { %v3216_v12 = vadd.f32 %v3159_v18, %v2759_v4 }
 0x3f6   : > { %v4362_v62 = vmul.f32 %v4283_v2, %v4040_v13  ;;  %v3625_v43 = vpop.f32.mrf.mxu3 }
 0x3f7   : > { %v3887_v35 = vpop.f32.mrf.mxu0  ;;  %v10606_v29 = vpop.f32.mrf.mxu1  ;;  %v3679_v61 = vadd.f32 %v3622_v32, %v3216_v12  ;;  %v5083_v12 = vpack.c.bf16 %v5044_v41, %v5043_v3 }
 0x3f8   : > { %4465 = vst.msk [vmem:[#allocation2 + $0x140] sm:$0xff] %vm4371_vm6, %v4362_v62  ;;  %v3945_v11 = vadd.f32 %v3887_v35, %v3678_v27  ;;  %v4585_v27 = vld [vmem:[#allocation2 + $0x131] sm:$0xff] }
 0x3f9   : > { %7953 = vmatmul.msk.bf16.gmra.mxu2 %vm4371_vm6, %v4525_v42 }
 0x3fa   : > { %v3995_v44 = vadd.f32 %v10442_v24, %v3945_v11  ;;  %8022 = vmatmul.msk.bf16.gmra.mxu0 %vm4371_vm6, %v5406_v5  ;;  %v10614_v11 = vld [vmem:[#allocation2 + $0x138] sm:$0xff] }
 0x3fc   : > { %v4041_v20 = vmax.f32 %v3995_v44, 0.0  ;;  %v3162_v9 = vpop.f32.mrf.mxu2 }
 0x3fd   : > { %v3217_v32 = vadd.f32 %v3162_v9, %v9921_v48 }
 0x3fe   : > { %v4363_v13 = vmul.f32 %v4288_v31, %v4041_v20  ;;  %v3627_v62 = vpop.f32.mrf.mxu3  ;;  %v4293_v20 = vpop.permute.xlu0 %4292  ;;  %v5367_v31 = vld [vmem:[#allocation2 + $0x6f] sm:$0xff] }
 0x3ff   : > { %v3889_v2 = vpop.f32.mrf.mxu0  ;;  %v4586_v35 = vld [vmem:[#allocation2 + $0x139] sm:$0xff]  ;;  %v10612_v4 = vpop.f32.mrf.mxu1 }
 0x400   : > { %4466 = vst.msk [vmem:[#allocation2 + $0x148] sm:$0xff] %vm4371_vm6, %v4363_v13  ;;  %v3946_v59 = vadd.f32 %v3889_v2, %v3679_v61  ;;  %v4612_v18 = vpack.c.bf16 %v4586_v35, %v4585_v27  ;;  %v10616_v5 = vld [vmem:[#allocation2 + $0x140] sm:$0xff]  ;;  %v3680_v2 = vadd.f32 %v3625_v43, %v3217_v32  ;;  %v4298_v32 = vpop.permute.xlu1 %4297 }
 0x401   : > { %11626 = vst [vmem:[#allocation5_spill] sm:$0xff] %v10612_v4  ;;  %v5366_v4 = vld [vmem:[#allocation2 + $0x67] sm:$0xff] }
 0x402   : > { %11627 = vst [vmem:[#allocation6_spill] sm:$0xff] %v10616_v5  ;;  %v3996_v42 = vadd.f32 %v10442_v24, %v3946_v59  ;;  %7936 = vmatmul.msk.bf16.gmra.mxu1 %vm4371_vm6, %v4612_v18  ;;  %v5407_v41 = vpack.c.bf16 %v5367_v31, %v5366_v4  ;;  %v8847_v59 = vld [vmem:[#allocation2 + $0x60] sm:$0xff]  ;;  %v8848_v18 = vld [vmem:[#allocation2 + $0x68] sm:$0xff]  ;;  %v5368_v5 = vld [vmem:[#allocation2 + $0x77] sm:$0xff] }
 0x403   : > { %7989 = vmatmul.msk.bf16.gmra.mxu3 %vm4371_vm6, %v5083_v12  ;;  %v4526_v3 = vpack.c.bf16 %v8848_v18, %v8847_v59  ;;  %v5046_v4 = vld [vmem:[#allocation2 + $0x7a] sm:$0xff]  ;;  %v5045_v59 = vld [vmem:[#allocation2 + $0x72] sm:$0xff] }
 0x404   : > { %v4042_v44 = vmax.f32 %v3996_v42, 0.0  ;;  %v3164_v61 = vpop.f32.mrf.mxu2  ;;  %v11633_v18 = vld [vmem:[#allocation8_spill] sm:$0xff] }
 0x405   : > { %v3218_v42 = vadd.f32 %v3164_v61, %v2761_v23 }
 0x406   : > { %v4364_v13 = vmul.f32 %v4293_v20, %v4042_v44  ;;  %v3630_v35 = vpop.f32.mrf.mxu3 }
 0x407   : > { %v3892_v27 = vpop.f32.mrf.mxu0  ;;  %v10627_v9 = vpop.f32.mrf.mxu1  ;;  %v3681_v28 = vadd.f32 %v3627_v62, %v3218_v42  ;;  %v11631_v62 = vld [vmem:[#allocation7_spill] sm:$0xff] }
 0x408   : > { %4467 = vst.msk [vmem:[#allocation2 + $0x150] sm:$0xff] %vm4371_vm6, %v4364_v13  ;;  %v3947_v48 = vadd.f32 %v3892_v27, %v3680_v2  ;;  %v4587_v2 = vld [vmem:[#allocation2 + $0x141] sm:$0xff] }
 0x409   : > { %11628 = vst [vmem:[#allocation4_spill] sm:$0xff] %v10627_v9  ;;  %7954 = vmatmul.msk.bf16.gmra.mxu2 %vm4371_vm6, %v4526_v3  ;;  %v11632_v9 = vld [vmem:[#allocation9_spill] sm:$0xff] }
 0x40a   : > { %v3997_v12 = vadd.f32 %v10442_v24, %v3947_v48  ;;  %8023 = vmatmul.msk.bf16.gmra.mxu0 %vm4371_vm6, %v5407_v41  ;;  %v10635_v48 = vld [vmem:[#allocation2 + $0x148] sm:$0xff] }
 0x40c   : > { %v4043_v43 = vmax.f32 %v3997_v12, 0.0  ;;  %v3167_v36 = vpop.f32.mrf.mxu2  ;;  %v5084_v12 = vpack.c.bf16 %v5046_v4, %v5045_v59  ;;  %v8849_v59 = vld [vmem:[#allocation2 + $0x70] sm:$0xff] }
 0x40d   : > { %v3219_v3 = vadd.f32 %v3167_v36, %v11631_v62  ;;  %v8850_v62 = vld [vmem:[#allocation2 + $0x78] sm:$0xff] }
 0x40e   : > { %v4365_v44 = vmul.f32 %v4298_v32, %v4043_v43  ;;  %v3632_v13 = vpop.f32.mrf.mxu3  ;;  %v4303_v32 = vpop.permute.xlu2 %4302 }
 0x40f   : > { %v3894_v20 = vpop.f32.mrf.mxu0  ;;  %v4588_v27 = vld [vmem:[#allocation2 + $0x149] sm:$0xff]  ;;  %v10633_v23 = vpop.f32.mrf.mxu1 }
 0x410   : > { %4468 = vst.msk [vmem:[#allocation2 + $0x158] sm:$0xff] %vm4371_vm6, %v4365_v44  ;;  %v3948_v31 = vadd.f32 %v3894_v20, %v3681_v28  ;;  %v4613_v61 = vpack.c.bf16 %v4588_v27, %v4587_v2  ;;  %v10637_v41 = vld [vmem:[#allocation2 + $0x150] sm:$0xff]  ;;  %v5369_v44 = vld [vmem:[#allocation2 + $0x7f] sm:$0xff]  ;;  %v3682_v2 = vadd.f32 %v3630_v35, %v3219_v3  ;;  %v8276_v35 = vld [vmem:[%s11524_s3 + $0x68] sm:$0xff]  ;;  %v4527_v3 = vpack.c.bf16 %v8850_v62, %v8849_v59 }
 0x411   : > { %11629 = vst [vmem:[#allocation32_spill] sm:$0xff] %v10633_v23  ;;  %6492 = vmatpush.bf16.msra.mxu3 %v8276_v35  ;;  %v11637_v62 = vld [vmem:[#allocation10_spill] sm:$0xff]  ;;  %v8851_v59 = vld [vmem:[#allocation2 + $0x80] sm:$0xff] }
 0x412   : > { %11630 = vst [vmem:[#allocation33_spill] sm:$0xff] %v10637_v41  ;;  %v3998_v42 = vadd.f32 %v10442_v24, %v3948_v31  ;;  %7937 = vmatmul.msk.bf16.gmra.mxu1 %vm4371_vm6, %v4613_v61  ;;  %v2763_v41 = vadd.f32 %v11633_v18, %v11632_v9  ;;  %v5408_v31 = vpack.c.bf16 %v5369_v44, %v5368_v5  ;;  %v8274_v61 = vld [vmem:[%s11524_s3 + $0x58] sm:$0xff]  ;;  %v4308_v18 = vpop.permute.xlu0 %4307 }
 0x413   : > { %7990 = vmatmul.msk.bf16.gmra.mxu3 %vm4371_vm6, %v5084_v12  ;;  %6167 = vmatpush.bf16.msra.mxu2 %v8274_v61 }
 0x414   : > { %v4044_v43 = vmax.f32 %v3998_v42, 0.0  ;;  %v3169_v20 = vpop.f32.mrf.mxu2 }
 0x415   : > { %v3220_v42 = vadd.f32 %v3169_v20, %v2763_v41 }
 0x416   : > { %v4366_v28 = vmul.f32 %v4303_v32, %v4044_v43  ;;  %v3635_v23 = vpop.f32.mrf.mxu3 }
 0x417   : > { %v3897_v27 = vpop.f32.mrf.mxu0  ;;  %v10648_v4 = vpop.f32.mrf.mxu1  ;;  %v3683_v32 = vadd.f32 %v3632_v13, %v3220_v42  ;;  %v10665_v61 = vld [vmem:[#allocation2 + $0x158] sm:$0xff]  ;;  %v5047_v13 = vld [vmem:[#allocation2 + $0x82] sm:$0xff] }
 0x418   : > { %4469 = vst.msk [vmem:[#allocation2 + $0x160] sm:$0xff] %vm4371_vm6, %v4366_v28  ;;  %v3949_v36 = vadd.f32 %v3897_v27, %v3682_v2  ;;  %v4589_v2 = vld [vmem:[#allocation2 + $0x151] sm:$0xff] }
 0x419   : > { %11634 = vst [vmem:[#allocation7_spill] sm:$0xff] %v10648_v4  ;;  %7955 = vmatmul.msk.bf16.gmra.mxu2 %vm4371_vm6, %v4527_v3  ;;  %v5048_v4 = vld [vmem:[#allocation2 + $0x8a] sm:$0xff] }
 0x41a   : > { %v3999_v9 = vadd.f32 %v10442_v24, %v3949_v36  ;;  %8024 = vmatmul.msk.bf16.gmra.mxu0 %vm4371_vm6, %v5408_v31  ;;  %v8278_v31 = vld [vmem:[%s11524_s3 + $0x78] sm:$0xff] }
 0x41b   : > { %6817 = vmatpush.bf16.msra.mxu0 %v8278_v31 }
 0x41c   : > { %v4045_v5 = vmax.f32 %v3999_v9, 0.0  ;;  %v3172_v43 = vpop.f32.mrf.mxu2  ;;  %v5085_v9 = vpack.c.bf16 %v5048_v4, %v5047_v13  ;;  %v11638_v4 = vld [vmem:[#allocation11_spill] sm:$0xff] }
 0x41d   : > { %v3221_v3 = vadd.f32 %v3172_v43, %v11637_v62  ;;  %v2765_v31 = vadd.f32 %v10296_v26, %v11638_v4  ;;  %v5050_v4 = vld [vmem:[#allocation2 + $0x9a] sm:$0xff] }
 0x41e   : > { %v4367_v12 = vmul.f32 %v4308_v18, %v4045_v5  ;;  %v3637_v28 = vpop.f32.mrf.mxu3  ;;  %v8280_v5 = vld [vmem:[%s11524_s3 + $0x88] sm:$0xff] }
 0x41f   : > { %v3899_v44 = vpop.f32.mrf.mxu0  ;;  %v4590_v27 = vld [vmem:[#allocation2 + $0x159] sm:$0xff]  ;;  %v10660_v20 = vpop.f32.mrf.mxu1  ;;  %7142 = vmatpush.bf16.msra.mxu1 %v8280_v5 }
 0x420   : > { %4470 = vst.msk [vmem:[#allocation2 + $0x168] sm:$0xff] %vm4371_vm6, %v4367_v12  ;;  %v3950_v41 = vadd.f32 %v3899_v44, %v3683_v32  ;;  %v4614_v36 = vpack.c.bf16 %v4590_v27, %v4589_v2  ;;  %v10667_v35 = vld [vmem:[#allocation2 + $0x160] sm:$0xff]  ;;  %v4313_v12 = vpop.permute.xlu1 %4312  ;;  %v5371_v32 = vld [vmem:[#allocation2 + $0x8f] sm:$0xff]  ;;  %v3684_v27 = vadd.f32 %v3635_v23, %v3221_v3  ;;  %v4318_v3 = vpop.permute.xlu2 %4317 }
 0x421   : > { %11635 = vst [vmem:[#allocation9_spill] sm:$0xff] %v10660_v20 }
 0x422   : > { %11636 = vst [vmem:[#allocation8_spill] sm:$0xff] %v10667_v35  ;;  %v4000_v42 = vadd.f32 %v10442_v24, %v3950_v41  ;;  %7938 = vmatmul.msk.bf16.gmra.mxu1 %vm4371_vm6, %v4614_v36  ;;  %v5370_v41 = vld [vmem:[#allocation2 + $0x87] sm:$0xff] }
 0x423   : > { %7991 = vmatmul.msk.bf16.gmra.mxu3 %vm4371_vm6, %v5085_v9  ;;  %v8852_v9 = vld [vmem:[#allocation2 + $0x88] sm:$0xff] }
 0x424   : > { %v4046_v18 = vmax.f32 %v4000_v42, 0.0  ;;  %v3174_v2 = vpop.f32.mrf.mxu2  ;;  %v5409_v42 = vpack.c.bf16 %v5371_v32, %v5370_v41  ;;  %v4528_v35 = vpack.c.bf16 %v8852_v9, %v8851_v59 }
 0x425   : > { %v3222_v20 = vadd.f32 %v3174_v2, %v2765_v31 }
 0x426   : > { %v4368_v44 = vmul.f32 %v4313_v12, %v4046_v18  ;;  %v5195_v62 = vpop.f32.mrf.mxu3 }
 0x427   : > { %v3902_v43 = vpop.f32.mrf.mxu0  ;;  %v10681_v13 = vpop.f32.mrf.mxu1  ;;  %v3685_v26 = vadd.f32 %v3637_v28, %v3222_v20  ;;  %v4591_v32 = vld [vmem:[#allocation2 + $0x161] sm:$0xff] }
 0x428   : > { %4471 = vst.msk [vmem:[#allocation2 + $0x170] sm:$0xff] %vm4371_vm6, %v4368_v44  ;;  %v3951_v36 = vadd.f32 %v3902_v43, %v3684_v27  ;;  %v5373_v20 = vld [vmem:[#allocation2 + $0x9f] sm:$0xff] }
 0x429   : > { %7956 = vmatmul.msk.bf16.gmra.mxu2 %vm4371_vm6, %v4528_v35 }
 0x42a   : > { %v4001_v5 = vadd.f32 %v10442_v24, %v3951_v36  ;;  %8025 = vmatmul.msk.bf16.gmra.mxu0 %vm4371_vm6, %v5409_v42  ;;  %v5049_v36 = vld [vmem:[#allocation2 + $0x92] sm:$0xff] }
 0x42b   : > { %v5086_v9 = vpack.c.bf16 %v5050_v4, %v5049_v36 }
 0x42c   : > { %v4047_v23 = vmax.f32 %v4001_v5, 0.0  ;;  %v4916_v12 = vpop.f32.mrf.mxu2 }
 0x42d   : > { %v4917_v27 = vadd.f32 %v4916_v12, %v10305_v21  ;;  %v4323_v21 = vpop.permute.xlu0 %4322  ;;  %v5372_v12 = vld [vmem:[#allocation2 + $0x97] sm:$0xff] }
 0x42e   : > { %v4369_v18 = vmul.f32 %v4318_v3, %v4047_v23  ;;  %v5197_v43 = vpop.f32.mrf.mxu3 }
 0x42f   : > { %v3904_v44 = vpop.f32.mrf.mxu0  ;;  %v4592_v41 = vld [vmem:[#allocation2 + $0x169] sm:$0xff]  ;;  %v10688_v2 = vpop.f32.mrf.mxu1  ;;  %v5310_v35 = vadd.f32 %v5195_v62, %v4917_v27 }
 0x430   : > { %4472 = vst.msk [vmem:[#allocation2 + $0x178] sm:$0xff] %vm4371_vm6, %v4369_v18  ;;  %v3952_v59 = vadd.f32 %v3904_v44, %v3685_v26  ;;  %v4615_v31 = vpack.c.bf16 %v4592_v41, %v4591_v32  ;;  %v5410_v44 = vpack.c.bf16 %v5373_v20, %v5372_v12  ;;  %v8853_v27 = vld [vmem:[#allocation2 + $0x90] sm:$0xff]  ;;  %v8854_v32 = vld [vmem:[#allocation2 + $0x98] sm:$0xff]  ;;  %v5374_v12 = vld [vmem:[#allocation2 + $0xa7] sm:$0xff] }
 0x431   : > { %v4529_v41 = vpack.c.bf16 %v8854_v32, %v8853_v27  ;;  %v8855_v32 = vld [vmem:[#allocation2 + $0xa0] sm:$0xff] }
 0x432   : > { %v4002_v42 = vadd.f32 %v10442_v24, %v3952_v59  ;;  %7939 = vmatmul.msk.bf16.gmra.mxu1 %vm4371_vm6, %v4615_v31 }
 0x433   : > { %7992 = vmatmul.msk.bf16.gmra.mxu3 %vm4371_vm6, %v5086_v9 }
 0x434   : > { %v4048_v28 = vmax.f32 %v4002_v42, 0.0  ;;  %v4918_v23 = vpop.f32.mrf.mxu2  ;;  %v5052_v42 = vld [vmem:[#allocation2 + $0xaa] sm:$0xff] }
 0x435   : > { %v4919_v3 = vadd.f32 %v4918_v23, %v10327_v47 }
 0x436   : > { %v4370_v5 = vmul.f32 %v4323_v21, %v4048_v28  ;;  %v5200_v26 = vpop.f32.mrf.mxu3 }
 0x437   : > { %v5520_v18 = vpop.f32.mrf.mxu0  ;;  %v10695_v62 = vpop.f32.mrf.mxu1  ;;  %v5311_v4 = vadd.f32 %v5197_v43, %v4919_v3  ;;  %v11639_v43 = vpack.c.bf16 %v10135_v45, %v10133_v14 }
 0x438   : > { %4473 = vst.msk [vmem:[#allocation2 + $0x180] sm:$0xff] %vm4371_vm6, %v4370_v5  ;;  %v10697_v24 = vadd.f32 %v5520_v18, %v5310_v35  ;;  %v5051_v35 = vld [vmem:[#allocation2 + $0xa2] sm:$0xff]  ;;  %v5375_v5 = vld [vmem:[#allocation2 + $0xaf] sm:$0xff] }
 0x439   : > { %7957 = vmatmul.msk.bf16.gmra.mxu2 %vm4371_vm6, %v4529_v41  ;;  %v5087_v20 = vpack.c.bf16 %v5052_v42, %v5051_v35  ;;  %v8856_v41 = vld [vmem:[#allocation2 + $0xa8] sm:$0xff] }
 0x43a   : > { %8026 = vmatmul.msk.bf16.gmra.mxu0 %vm4371_vm6, %v5410_v44 }
 0x43c   : > { %v4921_v59 = vpop.f32.mrf.mxu2 }
 0x43d   : > { %v4922_v47 = vadd.f32 %v4921_v59, %v10337_v15 }
 0x43e   : > { %v5202_v36 = vpop.f32.mrf.mxu3 }
 0x43f   : > { %v5522_v31 = vpop.f32.mrf.mxu0  ;;  %v10702_v9 = vpop.f32.mrf.mxu1  ;;  %v5312_v21 = vadd.f32 %v5200_v26, %v4922_v47  ;;  %v5411_v26 = vpack.c.bf16 %v5375_v5, %v5374_v12  ;;  %v5377_v5 = vld [vmem:[#allocation2 + $0xbf] sm:$0xff]  ;;  %v5376_v12 = vld [vmem:[#allocation2 + $0xb7] sm:$0xff] }
 0x440   : > { %v10704_v28 = vadd.f32 %v5522_v31, %v5311_v4  ;;  %v4530_v4 = vpack.c.bf16 %v8856_v41, %v8855_v32  ;;  %v5054_v31 = vld [vmem:[#allocation2 + $0xba] sm:$0xff]  ;;  %v8857_v41 = vld [vmem:[#allocation2 + $0xb0] sm:$0xff] }
 0x442   : > { %8053 = vmatmul.msk.bf16.vlgmr.msrb.gmra.mxu1 %vm4371_vm6, %v11639_v43 }
 0x443   : > { %7993 = vmatmul.msk.bf16.gmra.mxu3 %vm4371_vm6, %v5087_v20 }
 0x444   : > { %v4923_v23 = vpop.f32.mrf.mxu2 }
 0x445   : > { %v4924_v15 = vadd.f32 %v4923_v23, %v10362_v40 }
 0x446   : > { %v5205_v18 = vpop.f32.mrf.mxu3 }
 0x447   : > { %v5525_v3 = vpop.f32.mrf.mxu0  ;;  %v10712_v44 = vpop.f32.mrf.mxu1  ;;  %v5313_v14 = vadd.f32 %v5202_v36, %v4924_v15  ;;  %v11640_v36 = vpack.c.bf16 %v10156_v52, %v10154_v34 }
 0x448   : > { %v10714_v27 = vadd.f32 %v5525_v3, %v5312_v21  ;;  %v5053_v21 = vld [vmem:[#allocation2 + $0xb2] sm:$0xff] }
 0x449   : > { %7958 = vmatmul.msk.bf16.gmra.mxu2 %vm4371_vm6, %v4530_v4  ;;  %v5088_v43 = vpack.c.bf16 %v5054_v31, %v5053_v21  ;;  %v8858_v4 = vld [vmem:[#allocation2 + $0xb8] sm:$0xff] }
 0x44a   : > { %8027 = vmatmul.msk.bf16.gmra.mxu0 %vm4371_vm6, %v5411_v26 }
 0x44c   : > { %v4926_v45 = vpop.f32.mrf.mxu2 }
 0x44d   : > { %v4927_v59 = vadd.f32 %v4926_v45, %v10387_v54 }
 0x44e   : > { %v5207_v47 = vpop.f32.mrf.mxu3 }
 0x44f   : > { %v5527_v40 = vpop.f32.mrf.mxu0  ;;  %v10719_v42 = vpop.f32.mrf.mxu1  ;;  %v5314_v20 = vadd.f32 %v5205_v18, %v4927_v59  ;;  %v5412_v18 = vpack.c.bf16 %v5377_v5, %v5376_v12  ;;  %v5379_v5 = vld [vmem:[#allocation2 + $0xcf] sm:$0xff]  ;;  %v5378_v12 = vld [vmem:[#allocation2 + $0xc7] sm:$0xff] }
 0x450   : > { %v10721_v35 = vadd.f32 %v5527_v40, %v5313_v14  ;;  %v4531_v14 = vpack.c.bf16 %v8858_v4, %v8857_v41  ;;  %v5056_v40 = vld [vmem:[#allocation2 + $0xca] sm:$0xff]  ;;  %v8859_v4 = vld [vmem:[#allocation2 + $0xc0] sm:$0xff] }
 0x452   : > { %8054 = vmatmul.msk.bf16.gmra.mxu1 %vm4371_vm6, %v11640_v36 }
 0x453   : > { %7994 = vmatmul.msk.bf16.gmra.mxu3 %vm4371_vm6, %v5088_v43 }
 0x454   : > { %v4928_v23 = vpop.f32.mrf.mxu2 }
 0x455   : > { %v4929_v54 = vadd.f32 %v4928_v23, %v10415_v7 }
 0x456   : > { %v5210_v3 = vpop.f32.mrf.mxu3 }
 0x457   : > { %v5530_v15 = vpop.f32.mrf.mxu0  ;;  %v10729_v26 = vpop.f32.mrf.mxu1  ;;  %v5315_v34 = vadd.f32 %v5207_v47, %v4929_v54  ;;  %v11641_v47 = vpack.c.bf16 %v10181_v1, %v10179_v39 }
 0x458   : > { %v10731_v32 = vadd.f32 %v5530_v15, %v5314_v20  ;;  %v5055_v20 = vld [vmem:[#allocation2 + $0xc2] sm:$0xff] }
 0x459   : > { %7959 = vmatmul.msk.bf16.gmra.mxu2 %vm4371_vm6, %v4531_v14  ;;  %v5089_v36 = vpack.c.bf16 %v5056_v40, %v5055_v20  ;;  %v8860_v14 = vld [vmem:[#allocation2 + $0xc8] sm:$0xff] }
 0x45a   : > { %8028 = vmatmul.msk.bf16.gmra.mxu0 %vm4371_vm6, %v5412_v18 }
 0x45c   : > { %v4931_v52 = vpop.f32.mrf.mxu2 }
 0x45d   : > { %v4932_v45 = vadd.f32 %v4931_v52, %v10427_v55 }
 0x45e   : > { %v5212_v59 = vpop.f32.mrf.mxu3 }
 0x45f   : > { %v5532_v7 = vpop.f32.mrf.mxu0  ;;  %v10736_v31 = vpop.f32.mrf.mxu1  ;;  %v5316_v43 = vadd.f32 %v5210_v3, %v4932_v45  ;;  %v5413_v3 = vpack.c.bf16 %v5379_v5, %v5378_v12  ;;  %v11642_v5 = vld [vmem:[#allocation19_spill] sm:$0xff] }
 0x460   : > { %v10738_v21 = vadd.f32 %v5532_v7, %v5315_v34  ;;  %v4532_v34 = vpack.c.bf16 %v8860_v14, %v8859_v4  ;;  %v5058_v7 = vld [vmem:[#allocation2 + $0xda] sm:$0xff] }
 0x461   : > { %v5380_v4 = vld [vmem:[#allocation2 + $0xd7] sm:$0xff] }
 0x462   : > { %8055 = vmatmul.msk.bf16.gmra.mxu1 %vm4371_vm6, %v11641_v47 }
 0x463   : > { %7995 = vmatmul.msk.bf16.gmra.mxu3 %vm4371_vm6, %v5089_v36 }
 0x464   : > { %v4933_v23 = vpop.f32.mrf.mxu2 }
 0x465   : > { %v4934_v55 = vadd.f32 %v4933_v23, %v10452_v22  ;;  %v11643_v23 = vld [vmem:[#allocation12_spill] sm:$0xff] }
 0x466   : > { %v5215_v15 = vpop.f32.mrf.mxu3 }
 0x467   : > { %v5535_v54 = vpop.f32.mrf.mxu0  ;;  %v10746_v18 = vpop.f32.mrf.mxu1  ;;  %v5317_v39 = vadd.f32 %v5212_v59, %v4934_v55  ;;  %v11644_v59 = vpack.c.bf16 %v11642_v5, %v11643_v23  ;;  %v5381_v55 = vld [vmem:[#allocation2 + $0xdf] sm:$0xff] }
 0x468   : > { %v10748_v41 = vadd.f32 %v5535_v54, %v5316_v43  ;;  %v5057_v43 = vld [vmem:[#allocation2 + $0xd2] sm:$0xff] }
 0x469   : > { %7960 = vmatmul.msk.bf16.gmra.mxu2 %vm4371_vm6, %v4532_v34  ;;  %v5090_v47 = vpack.c.bf16 %v5058_v7, %v5057_v43 }
 0x46a   : > { %8029 = vmatmul.msk.bf16.gmra.mxu0 %vm4371_vm6, %v5413_v3 }
 0x46c   : > { %v4936_v1 = vpop.f32.mrf.mxu2 }
 0x46d   : > { %v4937_v52 = vadd.f32 %v4936_v1, %v10460_v17 }
 0x46e   : > { %v5217_v45 = vpop.f32.mrf.mxu3 }
 0x46f   : > { %v5537_v22 = vpop.f32.mrf.mxu0  ;;  %v10753_v40 = vpop.f32.mrf.mxu1  ;;  %v5318_v36 = vadd.f32 %v5215_v15, %v4937_v52  ;;  %v5414_v15 = vpack.c.bf16 %v5381_v55, %v5380_v4 }
 0x470   : > { %v10755_v20 = vadd.f32 %v5537_v22, %v5317_v39  ;;  %v8861_v39 = vld [vmem:[#allocation2 + $0xd0] sm:$0xff] }
 0x471   : > { %v4533_v1 = vpack.c.bf16 %v10487_v6, %v8861_v39 }
 0x472   : > { %8056 = vmatmul.msk.bf16.gmra.mxu1 %vm4371_vm6, %v11644_v59 }
 0x473   : > { %7996 = vmatmul.msk.bf16.gmra.mxu3 %vm4371_vm6, %v5090_v47  ;;  %v5060_v47 = vld [vmem:[#allocation2 + $0xea] sm:$0xff] }
 0x474   : > { %v4938_v54 = vpop.f32.mrf.mxu2 }
 0x475   : > { %v4939_v17 = vadd.f32 %v4938_v54, %v10477_v8  ;;  %v11645_v54 = vld [vmem:[#allocation21_spill] sm:$0xff] }
 0x476   : > { %v5220_v3 = vpop.f32.mrf.mxu3 }
 0x477   : > { %v5540_v12 = vpop.f32.mrf.mxu0  ;;  %v10763_v14 = vpop.f32.mrf.mxu1  ;;  %v5319_v52 = vadd.f32 %v5217_v45, %v4939_v17  ;;  %v5383_v17 = vld [vmem:[#allocation2 + $0xef] sm:$0xff] }
 0x478   : > { %v10765_v34 = vadd.f32 %v5540_v12, %v5318_v36  ;;  %v5059_v36 = vld [vmem:[#allocation2 + $0xe2] sm:$0xff] }
 0x479   : > { %7961 = vmatmul.msk.bf16.gmra.mxu2 %vm4371_vm6, %v4533_v1  ;;  %v5091_v55 = vpack.c.bf16 %v5060_v47, %v5059_v36  ;;  %v11646_v12 = vld [vmem:[#allocation20_spill] sm:$0xff] }
 0x47a   : > { %8030 = vmatmul.msk.bf16.gmra.mxu0 %vm4371_vm6, %v5414_v15  ;;  %v11647_v45 = vpack.c.bf16 %v11645_v54, %v11646_v12  ;;  %v5382_v1 = vld [vmem:[#allocation2 + $0xe7] sm:$0xff]  ;;  %v5062_v12 = vld [vmem:[#allocation2 + $0xfa] sm:$0xff] }
 0x47c   : > { %v4941_v22 = vpop.f32.mrf.mxu2 }
 0x47d   : > { %v4942_v7 = vadd.f32 %v4941_v22, %v10485_v30 }
 0x47e   : > { %v5222_v43 = vpop.f32.mrf.mxu3 }
 0x47f   : > { %v5542_v8 = vpop.f32.mrf.mxu0  ;;  %v10771_v5 = vpop.f32.mrf.mxu1  ;;  %v5320_v59 = vadd.f32 %v5220_v3, %v4942_v7  ;;  %v5415_v3 = vpack.c.bf16 %v5383_v17, %v5382_v1  ;;  %v8862_v7 = vld [vmem:[#allocation2 + $0xe0] sm:$0xff]  ;;  %v11650_v1 = vld [vmem:[#allocation23_spill] sm:$0xff] }
 0x480   : > { %v10773_v23 = vadd.f32 %v5542_v8, %v5319_v52  ;;  %v4534_v8 = vpack.c.bf16 %v10509_v46, %v8862_v7  ;;  %v11651_v7 = vld [vmem:[#allocation22_spill] sm:$0xff] }
 0x482   : > { %8057 = vmatmul.msk.bf16.gmra.mxu1 %vm4371_vm6, %v11647_v45 }
 0x483   : > { %7997 = vmatmul.msk.bf16.gmra.mxu3 %vm4371_vm6, %v5091_v55 }
 0x484   : > { %v4943_v4 = vpop.f32.mrf.mxu2 }
 0x485   : > { %v4944_v30 = vadd.f32 %v4943_v4, %v10500_v37 }
 0x486   : > { %v5225_v39 = vpop.f32.mrf.mxu3 }
 0x487   : > { %v5545_v15 = vpop.f32.mrf.mxu0  ;;  %v10781_v22 = vpop.f32.mrf.mxu1  ;;  %v5321_v47 = vadd.f32 %v5222_v43, %v4944_v30  ;;  %v11652_v43 = vpack.c.bf16 %v11650_v1, %v11651_v7  ;;  %v5385_v30 = vld [vmem:[#allocation2 + $0xff] sm:$0xff]  ;;  %v5064_v7 = vld [vmem:[#allocation2 + $0x10a] sm:$0xff] }
 0x488   : > { %11648 = vst [vmem:[#allocation10_spill] sm:$0xff] %v10781_v22  ;;  %v10783_v52 = vadd.f32 %v5545_v15, %v5320_v59  ;;  %v5061_v59 = vld [vmem:[#allocation2 + $0xf2] sm:$0xff] }
 0x489   : > { %7962 = vmatmul.msk.bf16.gmra.mxu2 %vm4371_vm6, %v4534_v8  ;;  %v5092_v15 = vpack.c.bf16 %v5062_v12, %v5061_v59  ;;  %v5384_v22 = vld [vmem:[#allocation2 + $0xf7] sm:$0xff] }
 0x48a   : > { %8031 = vmatmul.msk.bf16.gmra.mxu0 %vm4371_vm6, %v5415_v3 }
 0x48c   : > { %v4946_v36 = vpop.f32.mrf.mxu2 }
 0x48d   : > { %v4947_v55 = vadd.f32 %v4946_v36, %v10507_v53 }
 0x48e   : > { %v5227_v54 = vpop.f32.mrf.mxu3 }
 0x48f   : > { %v5547_v37 = vpop.f32.mrf.mxu0  ;;  %v10789_v45 = vpop.f32.mrf.mxu1  ;;  %v5322_v17 = vadd.f32 %v5225_v39, %v4947_v55  ;;  %v5416_v39 = vpack.c.bf16 %v5385_v30, %v5384_v22  ;;  %v8863_v55 = vld [vmem:[#allocation2 + $0xf0] sm:$0xff] }
 0x490   : > { %11649 = vst [vmem:[#allocation11_spill] sm:$0xff] %v10789_v45  ;;  %v10791_v4 = vadd.f32 %v5547_v37, %v5321_v47  ;;  %v4535_v37 = vpack.c.bf16 %v10530_v60, %v8863_v55  ;;  %v11656_v55 = vld [vmem:[#allocation24_spill] sm:$0xff] }
 0x492   : > { %8058 = vmatmul.msk.bf16.gmra.mxu1 %vm4371_vm6, %v11652_v43 }
 0x493   : > { %7998 = vmatmul.msk.bf16.gmra.mxu3 %vm4371_vm6, %v5092_v15 }
 0x494   : > { %v4948_v3 = vpop.f32.mrf.mxu2 }
 0x495   : > { %v4949_v53 = vadd.f32 %v4948_v3, %v10522_v33 }
 0x496   : > { %v5230_v36 = vpop.f32.mrf.mxu3 }
 0x497   : > { %v5550_v8 = vpop.f32.mrf.mxu0  ;;  %v10799_v45 = vpop.f32.mrf.mxu1  ;;  %v5323_v12 = vadd.f32 %v5227_v54, %v4949_v53  ;;  %v5387_v53 = vld [vmem:[#allocation2 + $0x10f] sm:$0xff] }
 0x498   : > { %11653 = vst [vmem:[#allocation19_spill] sm:$0xff] %v10799_v45  ;;  %v10801_v47 = vadd.f32 %v5550_v8, %v5322_v17  ;;  %v5063_v17 = vld [vmem:[#allocation2 + $0x102] sm:$0xff] }
 0x499   : > { %7963 = vmatmul.msk.bf16.gmra.mxu2 %vm4371_vm6, %v4535_v37  ;;  %v5093_v30 = vpack.c.bf16 %v5064_v7, %v5063_v17  ;;  %v11655_v8 = vld [vmem:[#allocation25_spill] sm:$0xff] }
 0x49a   : > { %8032 = vmatmul.msk.bf16.gmra.mxu0 %vm4371_vm6, %v5416_v39  ;;  %v11657_v54 = vpack.c.bf16 %v11655_v8, %v11656_v55  ;;  %v5386_v45 = vld [vmem:[#allocation2 + $0x107] sm:$0xff]  ;;  %v5066_v8 = vld [vmem:[#allocation2 + $0x11a] sm:$0xff] }
 0x49c   : > { %v4951_v59 = vpop.f32.mrf.mxu2 }
 0x49d   : > { %v4952_v15 = vadd.f32 %v4951_v59, %v10528_v0 }
 0x49e   : > { %v5232_v1 = vpop.f32.mrf.mxu3 }
 0x49f   : > { %v5552_v33 = vpop.f32.mrf.mxu0  ;;  %v10807_v43 = vpop.f32.mrf.mxu1  ;;  %v5324_v22 = vadd.f32 %v5230_v36, %v4952_v15  ;;  %v5417_v36 = vpack.c.bf16 %v5387_v53, %v5386_v45  ;;  %v4536_v15 = vpack.c.bf16 %v10551_v16, %v10532_v19 }
 0x4a0   : > { %11654 = vst [vmem:[#allocation12_spill] sm:$0xff] %v10807_v43  ;;  %v10809_v3 = vadd.f32 %v5552_v33, %v5323_v12 }
 0x4a2   : > { %8059 = vmatmul.msk.bf16.gmra.mxu1 %vm4371_vm6, %v11657_v54 }
 0x4a3   : > { %7999 = vmatmul.msk.bf16.gmra.mxu3 %vm4371_vm6, %v5093_v30 }
 0x4a4   : > { %v4953_v39 = vpop.f32.mrf.mxu2 }
 0x4a5   : > { %v4954_v0 = vadd.f32 %v4953_v39, %v10543_v56  ;;  %v11660_v39 = vld [vmem:[#allocation27_spill] sm:$0xff] }
 0x4a6   : > { %v5235_v59 = vpop.f32.mrf.mxu3 }
 0x4a7   : > { %v5555_v37 = vpop.f32.mrf.mxu0  ;;  %v10817_v43 = vpop.f32.mrf.mxu1  ;;  %v5325_v33 = vadd.f32 %v5232_v1, %v4954_v0  ;;  %v5389_v0 = vld [vmem:[#allocation2 + $0x11f] sm:$0xff] }
 0x4a8   : > { %11658 = vst [vmem:[#allocation21_spill] sm:$0xff] %v10817_v43  ;;  %v10819_v12 = vadd.f32 %v5555_v37, %v5324_v22  ;;  %v5065_v22 = vld [vmem:[#allocation2 + $0x112] sm:$0xff] }
 0x4a9   : > { %7964 = vmatmul.msk.bf16.gmra.mxu2 %vm4371_vm6, %v4536_v15  ;;  %v5094_v53 = vpack.c.bf16 %v5066_v8, %v5065_v22  ;;  %v11661_v37 = vld [vmem:[#allocation26_spill] sm:$0xff] }
 0x4aa   : > { %8033 = vmatmul.msk.bf16.gmra.mxu0 %vm4371_vm6, %v5417_v36  ;;  %v11662_v1 = vpack.c.bf16 %v11660_v39, %v11661_v37  ;;  %v5388_v43 = vld [vmem:[#allocation2 + $0x117] sm:$0xff]  ;;  %v5068_v39 = vld [vmem:[#allocation2 + $0x12a] sm:$0xff] }
 0x4ac   : > { %v4956_v7 = vpop.f32.mrf.mxu2 }
 0x4ad   : > { %v4957_v17 = vadd.f32 %v4956_v7, %v10549_v38 }
 0x4ae   : > { %v5237_v30 = vpop.f32.mrf.mxu3 }
 0x4af   : > { %v5557_v56 = vpop.f32.mrf.mxu0  ;;  %v10826_v55 = vpop.f32.mrf.mxu1  ;;  %v5326_v45 = vadd.f32 %v5235_v59, %v4957_v17  ;;  %v5418_v59 = vpack.c.bf16 %v5389_v0, %v5388_v43  ;;  %v4537_v17 = vpack.c.bf16 %v10572_v57, %v10553_v51  ;;  %v5067_v43 = vld [vmem:[#allocation2 + $0x122] sm:$0xff] }
 0x4b0   : > { %11659 = vst [vmem:[#allocation20_spill] sm:$0xff] %v10826_v55  ;;  %v10828_v54 = vadd.f32 %v5557_v56, %v5325_v33 }
 0x4b2   : > { %8060 = vmatmul.msk.bf16.gmra.mxu1 %vm4371_vm6, %v11662_v1 }
 0x4b3   : > { %8000 = vmatmul.msk.bf16.gmra.mxu3 %vm4371_vm6, %v5094_v53 }
 0x4b4   : > { %v4958_v36 = vpop.f32.mrf.mxu2 }
 0x4b5   : > { %v4959_v38 = vadd.f32 %v4958_v36, %v10564_v50  ;;  %v5095_v36 = vpack.c.bf16 %v5068_v39, %v5067_v43 }
 0x4b6   : > { %v5240_v7 = vpop.f32.mrf.mxu3 }
 0x4b7   : > { %v5560_v15 = vpop.f32.mrf.mxu0  ;;  %v10836_v55 = vpop.f32.mrf.mxu1  ;;  %v5327_v56 = vadd.f32 %v5237_v30, %v4959_v38  ;;  %v11665_v30 = vld [vmem:[#allocation29_spill] sm:$0xff]  ;;  %v11666_v38 = vld [vmem:[#allocation28_spill] sm:$0xff] }
 0x4b8   : > { %11663 = vst [vmem:[#allocation23_spill] sm:$0xff] %v10836_v55  ;;  %v10838_v33 = vadd.f32 %v5560_v15, %v5326_v45  ;;  %v11667_v15 = vpack.c.bf16 %v11665_v30, %v11666_v38 }
 0x4b9   : > { %7965 = vmatmul.msk.bf16.gmra.mxu2 %vm4371_vm6, %v4537_v17 }
 0x4ba   : > { %8034 = vmatmul.msk.bf16.gmra.mxu0 %vm4371_vm6, %v5418_v59 }
 0x4bc   : > { %v4961_v8 = vpop.f32.mrf.mxu2 }
 0x4bd   : > { %v4962_v22 = vadd.f32 %v4961_v8, %v10570_v58  ;;  %v5391_v58 = vld [vmem:[#allocation2 + $0x12f] sm:$0xff] }
 0x4be   : > { %v5242_v53 = vpop.f32.mrf.mxu3 }
 0x4bf   : > { %v5562_v50 = vpop.f32.mrf.mxu0  ;;  %v5845_v1 = vpop.f32.mrf.mxu1  ;;  %v5328_v0 = vadd.f32 %v5240_v7, %v4962_v22  ;;  %v4538_v22 = vpack.c.bf16 %v10593_v63, %v10574_v49 }
 0x4c0   : > { %v10845_v37 = vadd.f32 %v5562_v50, %v5327_v56  ;;  %v10848_v45 = vadd.f32 %v5845_v1, %v10697_v24  ;;  %v5390_v50 = vld [vmem:[#allocation2 + $0x127] sm:$0xff] }
 0x4c1   : > { %v5419_v1 = vpack.c.bf16 %v5391_v58, %v5390_v50  ;;  %v5069_v58 = vld [vmem:[#allocation2 + $0x132] sm:$0xff] }
 0x4c2   : > { %11664 = vst [vmem:[#allocation22_spill] sm:$0xff] %v10848_v45  ;;  %8061 = vmatmul.msk.bf16.gmra.mxu1 %vm4371_vm6, %v11667_v15  ;;  %v11670_v50 = vld [vmem:[#allocation31_spill] sm:$0xff] }
 0x4c3   : > { %8001 = vmatmul.msk.bf16.gmra.mxu3 %vm4371_vm6, %v5095_v36 }
 0x4c4   : > { %v4963_v59 = vpop.f32.mrf.mxu2 }
 0x4c5   : > { %v4964_v17 = vadd.f32 %v4963_v59, %v10585_v25  ;;  %v8273_v25 = vld [vmem:[%s11524_s3 + $0x50] sm:$0xff] }
 0x4c6   : > { %v5245_v8 = vpop.f32.mrf.mxu3  ;;  %6168 = vmatpush.bf16.msra.mxu2 %v8273_v25 }
 0x4c7   : > { %v5565_v56 = vpop.f32.mrf.mxu0  ;;  %v5847_v24 = vpop.f32.mrf.mxu1  ;;  %v5329_v39 = vadd.f32 %v5242_v53, %v4964_v17  ;;  %v8275_v17 = vld [vmem:[%s11524_s3 + $0x60] sm:$0xff] }
 0x4c8   : > { %v10856_v55 = vadd.f32 %v5565_v56, %v5328_v0  ;;  %v10859_v7 = vadd.f32 %v5847_v24, %v10704_v28  ;;  %v5070_v28 = vld [vmem:[#allocation2 + $0x13a] sm:$0xff]  ;;  %v11671_v24 = vld [vmem:[#allocation30_spill] sm:$0xff]  ;;  %6493 = vmatpush.bf16.msra.mxu3 %v8275_v17 }
 0x4c9   : > { %7966 = vmatmul.msk.bf16.gmra.mxu2 %vm4371_vm6, %v4538_v22  ;;  %v5096_v56 = vpack.c.bf16 %v5070_v28, %v5069_v58 }
 0x4ca   : > { %11668 = vst [vmem:[#allocation25_spill] sm:$0xff] %v10859_v7  ;;  %8035 = vmatmul.msk.bf16.gmra.mxu0 %vm4371_vm6, %v5419_v1  ;;  %v11672_v1 = vpack.c.bf16 %v11670_v50, %v11671_v24 }
 0x4cc   : > { %v4966_v43 = vpop.f32.mrf.mxu2 }
 0x4cd   : > { %v4967_v0 = vadd.f32 %v4966_v43, %v10591_v10  ;;  %v5393_v10 = vld [vmem:[#allocation2 + $0x13f] sm:$0xff] }
 0x4ce   : > { %v5247_v30 = vpop.f32.mrf.mxu3 }
 0x4cf   : > { %v5567_v36 = vpop.f32.mrf.mxu0  ;;  %v5850_v15 = vpop.f32.mrf.mxu1  ;;  %v5330_v59 = vadd.f32 %v5245_v8, %v4967_v0  ;;  %v5392_v8 = vld [vmem:[#allocation2 + $0x137] sm:$0xff] }
 0x4d0   : > { %v10869_v38 = vadd.f32 %v5567_v36, %v5329_v39  ;;  %v10872_v53 = vadd.f32 %v5850_v15, %v10714_v27  ;;  %v5420_v36 = vpack.c.bf16 %v5393_v10, %v5392_v8  ;;  %v11674_v15 = vld [vmem:[#allocation3_spill] sm:$0xff] }
 0x4d1   : > { %v4539_v58 = vpack.c.bf16 %v10614_v11, %v11674_v15 }
 0x4d2   : > { %11669 = vst [vmem:[#allocation24_spill] sm:$0xff] %v10872_v53  ;;  %8062 = vmatmul.msk.bf16.gmra.mxu1 %vm4371_vm6, %v11672_v1  ;;  %v5394_v53 = vld [vmem:[#allocation2 + $0x147] sm:$0xff] }
 0x4d3   : > { %8002 = vmatmul.msk.bf16.gmra.mxu3 %vm4371_vm6, %v5096_v56  ;;  %v8277_v56 = vld [vmem:[%s11524_s3 + $0x70] sm:$0xff] }
 0x4d4   : > { %v4968_v22 = vpop.f32.mrf.mxu2  ;;  %6818 = vmatpush.bf16.msra.mxu0 %v8277_v56  ;;  %v5395_v56 = vld [vmem:[#allocation2 + $0x14f] sm:$0xff] }
 0x4d5   : > { %v4969_v27 = vadd.f32 %v4968_v22, %v10606_v29  ;;  %v8279_v29 = vld [vmem:[%s11524_s3 + $0x80] sm:$0xff] }
 0x4d6   : > { %v5250_v25 = vpop.f32.mrf.mxu3  ;;  %7143 = vmatpush.bf16.msra.mxu1 %v8279_v29 }
 0x4d7   : > { %v5570_v39 = vpop.f32.mrf.mxu0  ;;  %v5852_v0 = vpop.f32.mrf.mxu1  ;;  %v5331_v17 = vadd.f32 %v5247_v30, %v4969_v27  ;;  %v5072_v30 = vld [vmem:[#allocation2 + $0x14a] sm:$0xff] }
 0x4d8   : > { %v10883_v43 = vadd.f32 %v5570_v39, %v5330_v59  ;;  %v10886_v28 = vadd.f32 %v5852_v0, %v10721_v35  ;;  %v11675_v59 = vld [vmem:[#allocation5_spill] sm:$0xff] }
 0x4d9   : > { %7967 = vmatmul.msk.bf16.gmra.mxu2 %vm4371_vm6, %v4539_v58  ;;  %v5071_v39 = vld [vmem:[#allocation2 + $0x142] sm:$0xff] }
 0x4da   : > { %11673 = vst [vmem:[#allocation27_spill] sm:$0xff] %v10886_v28  ;;  %8036 = vmatmul.msk.bf16.gmra.mxu0 %vm4371_vm6, %v5420_v36  ;;  %v5097_v0 = vpack.c.bf16 %v5072_v30, %v5071_v39  ;;  %v11677_v36 = vld [vmem:[#allocation15_spill] sm:$0xff]  ;;  %v11678_v28 = vld [vmem:[#allocation14_spill] sm:$0xff] }
 0x4db   : > { %v11679_v58 = vpack.c.bf16 %v11677_v36, %v11678_v28 }
 0x4dc   : > { %v4971_v35 = vpop.f32.mrf.mxu2 }
 0x4dd   : > { %v4972_v50 = vadd.f32 %v4971_v35, %v11675_v59  ;;  %v11680_v35 = vld [vmem:[#allocation4_spill] sm:$0xff] }
 0x4de   : > { %v5252_v1 = vpop.f32.mrf.mxu3 }
 0x4df   : > { %v5572_v24 = vpop.f32.mrf.mxu0  ;;  %v5855_v22 = vpop.f32.mrf.mxu1  ;;  %v5332_v8 = vadd.f32 %v5250_v25, %v4972_v50  ;;  %v11682_v50 = vld [vmem:[#allocation6_spill] sm:$0xff] }
 0x4e0   : > { %v10899_v10 = vadd.f32 %v5572_v24, %v5331_v17  ;;  %v10902_v27 = vadd.f32 %v5855_v22, %v10731_v32  ;;  %v5421_v22 = vpack.c.bf16 %v5395_v56, %v5394_v53  ;;  %v4540_v28 = vpack.c.bf16 %v10635_v48, %v11682_v50  ;;  %v5073_v56 = vld [vmem:[#allocation2 + $0x152] sm:$0xff] }
 0x4e2   : > { %11676 = vst [vmem:[#allocation26_spill] sm:$0xff] %v10902_v27  ;;  %8063 = vmatmul.msk.bf16.gmra.mxu1 %vm4371_vm6, %v11679_v58  ;;  %v5396_v27 = vld [vmem:[#allocation2 + $0x157] sm:$0xff] }
 0x4e3   : > { %8003 = vmatmul.msk.bf16.gmra.mxu3 %vm4371_vm6, %v5097_v0  ;;  %v11683_v0 = vld [vmem:[#allocation32_spill] sm:$0xff] }
 0x4e4   : > { %v4973_v29 = vpop.f32.mrf.mxu2 }
 0x4e5   : > { %v4974_v59 = vadd.f32 %v4973_v29, %v11680_v35 }
 0x4e6   : > { %v5255_v24 = vpop.f32.mrf.mxu3 }
 0x4e7   : > { %v5575_v17 = vpop.f32.mrf.mxu0  ;;  %v5857_v32 = vpop.f32.mrf.mxu1  ;;  %v5333_v30 = vadd.f32 %v5252_v1, %v4974_v59  ;;  %v11684_v1 = vld [vmem:[#allocation17_spill] sm:$0xff] }
 0x4e8   : > { %v10910_v7 = vadd.f32 %v5575_v17, %v5332_v8  ;;  %v10913_v25 = vadd.f32 %v5857_v32, %v10738_v21  ;;  %v5074_v8 = vld [vmem:[#allocation2 + $0x15a] sm:$0xff]  ;;  %v11685_v59 = vld [vmem:[#allocation13_spill] sm:$0xff] }
 0x4e9   : > { %7968 = vmatmul.msk.bf16.gmra.mxu2 %vm4371_vm6, %v4540_v28  ;;  %v5098_v32 = vpack.c.bf16 %v5074_v8, %v5073_v56  ;;  %v5397_v28 = vld [vmem:[#allocation2 + $0x15f] sm:$0xff] }
 0x4ea   : > { %11681 = vst [vmem:[#allocation29_spill] sm:$0xff] %v10913_v25  ;;  %8037 = vmatmul.msk.bf16.gmra.mxu0 %vm4371_vm6, %v5421_v22  ;;  %v11686_v22 = vpack.c.bf16 %v11684_v1, %v11685_v59  ;;  %v11689_v1 = vld [vmem:[#allocation9_spill] sm:$0xff] }
 0x4ec   : > { %v4976_v39 = vpop.f32.mrf.mxu2 }
 0x4ed   : > { %v4977_v36 = vadd.f32 %v4976_v39, %v11683_v0  ;;  %v11687_v0 = vld [vmem:[#allocation7_spill] sm:$0xff] }
 0x4ee   : > { %v5257_v29 = vpop.f32.mrf.mxu3 }
 0x4ef   : > { %v5577_v58 = vpop.f32.mrf.mxu0  ;;  %v5860_v53 = vpop.f32.mrf.mxu1  ;;  %v5334_v17 = vadd.f32 %v5255_v24, %v4977_v36  ;;  %v11688_v36 = vld [vmem:[#allocation33_spill] sm:$0xff] }
 0x4f0   : > { %v10920_v35 = vadd.f32 %v5577_v58, %v5333_v30  ;;  %v10923_v21 = vadd.f32 %v5860_v53, %v10748_v41  ;;  %v5422_v53 = vpack.c.bf16 %v5397_v28, %v5396_v27  ;;  %v4541_v8 = vpack.c.bf16 %v10665_v61, %v11688_v36  ;;  %v5075_v28 = vld [vmem:[#allocation2 + $0x162] sm:$0xff] }
 0x4f2   : > { %8064 = vmatmul.msk.bf16.gmra.mxu1 %vm4371_vm6, %v11686_v22 }
 0x4f3   : > { %8004 = vmatmul.msk.bf16.gmra.mxu3 %vm4371_vm6, %v5098_v32 }
 0x4f4   : > { %v4978_v39 = vpop.f32.mrf.mxu2 }
 0x4f5   : > { %v4979_v25 = vadd.f32 %v4978_v39, %v11687_v0 }
 0x4f6   : > { %v5260_v58 = vpop.f32.mrf.mxu3 }
 0x4f7   : > { %v5580_v30 = vpop.f32.mrf.mxu0  ;;  %v5862_v41 = vpop.f32.mrf.mxu1  ;;  %v5335_v56 = vadd.f32 %v5257_v29, %v4979_v25  ;;  %v11691_v25 = vld [vmem:[#allocation18_spill] sm:$0xff] }
 0x4f8   : > { %v10931_v45 = vadd.f32 %v5580_v30, %v5334_v17  ;;  %v10934_v24 = vadd.f32 %v5862_v41, %v10755_v20  ;;  %v5076_v17 = vld [vmem:[#allocation2 + $0x16a] sm:$0xff]  ;;  %v11692_v29 = vpack.c.bf16 %v11691_v25, %v10487_v6  ;;  %v11694_v6 = vld [vmem:[#allocation8_spill] sm:$0xff] }
 0x4f9   : > { %7969 = vmatmul.msk.bf16.gmra.mxu2 %vm4371_vm6, %v4541_v8  ;;  %v5099_v41 = vpack.c.bf16 %v5076_v17, %v5075_v28 }
 0x4fa   : > { %8038 = vmatmul.msk.bf16.gmra.mxu0 %vm4371_vm6, %v5422_v53  ;;  %v5399_v53 = vld [vmem:[#allocation2 + $0x16f] sm:$0xff] }
 0x4fc   : > { %v4981_v32 = vpop.f32.mrf.mxu2 }
 0x4fd   : > { %v4982_v59 = vadd.f32 %v4981_v32, %v11689_v1  ;;  %v10951_v32 = vld [vmem:[#allocation2 + $0x168] sm:$0xff] }
 0x4fe   : > { %v5262_v39 = vpop.f32.mrf.mxu3  ;;  %v4542_v28 = vpack.c.bf16 %v10951_v32, %v11694_v6 }
 0x4ff   : > { %v5582_v22 = vpop.f32.mrf.mxu0  ;;  %v5865_v27 = vpop.f32.mrf.mxu1  ;;  %v5336_v30 = vadd.f32 %v5260_v58, %v4982_v59 }
 0x500   : > { %v10941_v0 = vadd.f32 %v5582_v22, %v5335_v56  ;;  %v10944_v20 = vadd.f32 %v5865_v27, %v10765_v34  ;;  %v5398_v34 = vld [vmem:[#allocation2 + $0x167] sm:$0xff] }
 0x501   : > { %v5423_v59 = vpack.c.bf16 %v5399_v53, %v5398_v34  ;;  %v6331_v34 = vld [vmem:[#allocation2 + $0x2e] sm:$0xff] }
 0x502   : > { %11690 = vst [vmem:[#allocation28_spill] sm:$0xff] %v10944_v20  ;;  %8065 = vmatmul.msk.bf16.gmra.mxu1 %vm4371_vm6, %v11692_v29  ;;  %v5400_v20 = vld [vmem:[#allocation2 + $0x177] sm:$0xff] }
 0x503   : > { %8005 = vmatmul.msk.bf16.gmra.mxu3 %vm4371_vm6, %v5099_v41 }
 0x504   : > { %v4983_v8 = vpop.f32.mrf.mxu2 }
 0x505   : > { %v4984_v56 = vadd.f32 %v4983_v8, %v10681_v13 }
 0x506   : > { %v5265_v22 = vpop.f32.mrf.mxu3 }
 0x507   : > { %v5585_v1 = vpop.f32.mrf.mxu0  ;;  %v5867_v58 = vpop.f32.mrf.mxu1  ;;  %v5337_v41 = vadd.f32 %v5262_v39, %v4984_v56  ;;  %v11695_v39 = vld [vmem:[#allocation16_spill] sm:$0xff] }
 0x508   : > { %v10954_v27 = vadd.f32 %v5585_v1, %v5336_v30  ;;  %v10957_v17 = vadd.f32 %v5867_v58, %v10773_v23  ;;  %v6332_v30 = vld [vmem:[#allocation2 + $0x36] sm:$0xff]  ;;  %v11696_v56 = vpack.c.bf16 %v11695_v39, %v10509_v46 }
 0x509   : > { %7970 = vmatmul.msk.bf16.gmra.mxu2 %vm4371_vm6, %v4542_v28  ;;  %v6007_v28 = vld [vmem:[#allocation2 + $0x21] sm:$0xff] }
 0x50a   : > { %11693 = vst [vmem:[#allocation31_spill] sm:$0xff] %v10957_v17  ;;  %8039 = vmatmul.msk.bf16.gmra.mxu0 %vm4371_vm6, %v5423_v59  ;;  %v6377_v17 = vpack.c.bf16 %v6332_v30, %v6331_v34 }
 0x50c   : > { %v4986_v25 = vpop.f32.mrf.mxu2 }
 0x50d   : > { %v4987_v13 = vadd.f32 %v4986_v25, %v10688_v2  ;;  %v5401_v2 = vld [vmem:[#allocation2 + $0x17f] sm:$0xff] }
 0x50e   : > { %v5267_v8 = vpop.f32.mrf.mxu3 }
 0x50f   : > { %v5587_v29 = vpop.f32.mrf.mxu0  ;;  %v5870_v53 = vpop.f32.mrf.mxu1  ;;  %v5338_v58 = vadd.f32 %v5265_v22, %v4987_v13  ;;  %v5424_v22 = vpack.c.bf16 %v5401_v2, %v5400_v20  ;;  %v6006_v13 = vld [vmem:[#allocation2 + $0x19] sm:$0xff] }
 0x510   : > { %v10964_v1 = vadd.f32 %v5587_v29, %v5337_v41  ;;  %v10967_v23 = vadd.f32 %v5870_v53, %v10783_v52  ;;  %v6052_v46 = vpack.c.bf16 %v6007_v28, %v6006_v13 }
 0x512   : > { %8066 = vmatmul.msk.bf16.gmra.mxu1 %vm4371_vm6, %v11696_v56 }
 0x513   : > { %8123 = vmatmul.msk.bf16.vlgmr.msra.gmra.mxu3 %vm4371_vm6, %v6377_v17 }
 0x514   : > { %v4988_v59 = vpop.f32.mrf.mxu2 }
 0x515   : > { %v4989_v41 = vadd.f32 %v4988_v59, %v10695_v62  ;;  %v6334_v59 = vld [vmem:[#allocation2 + $0x46] sm:$0xff] }
 0x516   : > { %v5270_v29 = vpop.f32.mrf.mxu3 }
 0x517   : > { %v5590_v25 = vpop.f32.mrf.mxu0  ;;  %v5872_v53 = vpop.f32.mrf.mxu1  ;;  %v5339_v34 = vadd.f32 %v5267_v8, %v4989_v41  ;;  %v11697_v8 = vpack.c.bf16 %v10532_v19, %v10530_v60 }
 0x518   : > { %v10975_v52 = vadd.f32 %v5590_v25, %v5338_v58  ;;  %v10978_v30 = vadd.f32 %v5872_v53, %v10791_v4  ;;  %v6333_v4 = vld [vmem:[#allocation2 + $0x3e] sm:$0xff]  ;;  %v6009_v53 = vld [vmem:[#allocation2 + $0x31] sm:$0xff] }
 0x519   : > { %8088 = vmatmul.msk.bf16.vlgmr.msra.gmra.mxu2 %vm4371_vm6, %v6052_v46  ;;  %v6378_v28 = vpack.c.bf16 %v6334_v59, %v6333_v4 }
 0x51a   : > { %8040 = vmatmul.msk.bf16.gmra.mxu0 %vm4371_vm6, %v5424_v22 }
 0x51c   : > { %v4991_v17 = vpop.f32.mrf.mxu2 }
 0x51d   : > { %v4992_v62 = vadd.f32 %v4991_v17, %v10702_v9  ;;  %v6657_v9 = vld [vmem:[#allocation2 + $0x37] sm:$0xff] }
 0x51e   : > { %v5272_v56 = vpop.f32.mrf.mxu3 }
 0x51f   : > { %v5592_v39 = vpop.f32.mrf.mxu0  ;;  %v5875_v25 = vpop.f32.mrf.mxu1  ;;  %v5340_v2 = vadd.f32 %v5270_v29, %v4992_v62  ;;  %v6008_v62 = vld [vmem:[#allocation2 + $0x29] sm:$0xff] }
 0x520   : > { %v10983_v58 = vadd.f32 %v5592_v39, %v5339_v34  ;;  %v10986_v20 = vadd.f32 %v5875_v25, %v10801_v47  ;;  %v6656_v34 = vld [vmem:[#allocation2 + $0x2f] sm:$0xff]  ;;  %v6053_v60 = vpack.c.bf16 %v6009_v53, %v6008_v62  ;;  %v6658_v62 = vld [vmem:[#allocation2 + $0x3f] sm:$0xff] }
 0x521   : > { %v6702_v29 = vpack.c.bf16 %v6657_v9, %v6656_v34 }
 0x522   : > { %8067 = vmatmul.msk.bf16.gmra.mxu1 %vm4371_vm6, %v11697_v8 }
 0x523   : > { %8124 = vmatmul.msk.bf16.gmra.mxu3 %vm4371_vm6, %v6378_v28  ;;  %v6336_v28 = vld [vmem:[#allocation2 + $0x56] sm:$0xff] }
 0x524   : > { %v4993_v41 = vpop.f32.mrf.mxu2 }
 0x525   : > { %v4994_v22 = vadd.f32 %v4993_v41, %v10712_v44 }
 0x526   : > { %v5275_v46 = vpop.f32.mrf.mxu3 }
 0x527   : > { %v5595_v13 = vpop.f32.mrf.mxu0  ;;  %v5877_v17 = vpop.f32.mrf.mxu1  ;;  %v5341_v19 = vadd.f32 %v5272_v56, %v4994_v22  ;;  %v11698_v56 = vpack.c.bf16 %v10553_v51, %v10551_v16 }
 0x528   : > { %v10994_v47 = vadd.f32 %v5595_v13, %v5340_v2  ;;  %v10997_v39 = vadd.f32 %v5877_v17, %v10809_v3  ;;  %v6335_v3 = vld [vmem:[#allocation2 + $0x4e] sm:$0xff]  ;;  %v6011_v13 = vld [vmem:[#allocation2 + $0x41] sm:$0xff] }
 0x529   : > { %8089 = vmatmul.msk.bf16.gmra.mxu2 %vm4371_vm6, %v6053_v60  ;;  %v6379_v53 = vpack.c.bf16 %v6336_v28, %v6335_v3 }
 0x52a   : > { %8158 = vmatmul.msk.bf16.vlgmr.msra.gmra.mxu0 %vm4371_vm6, %v6702_v29 }
 0x52c   : > { %v4996_v59 = vpop.f32.mrf.mxu2 }
 0x52d   : > { %v4997_v44 = vadd.f32 %v4996_v59, %v10719_v42  ;;  %v6659_v42 = vld [vmem:[#allocation2 + $0x47] sm:$0xff] }
 0x52e   : > { %v5277_v4 = vpop.f32.mrf.mxu3 }
 0x52f   : > { %v5597_v25 = vpop.f32.mrf.mxu0  ;;  %v5880_v8 = vpop.f32.mrf.mxu1  ;;  %v5342_v41 = vadd.f32 %v5275_v46, %v4997_v44  ;;  %v6703_v46 = vpack.c.bf16 %v6659_v42, %v6658_v62 }
 0x530   : > { %v11002_v2 = vadd.f32 %v5597_v25, %v5341_v19  ;;  %v11005_v9 = vadd.f32 %v5880_v8, %v10819_v12  ;;  %v6010_v19 = vld [vmem:[#allocation2 + $0x39] sm:$0xff]  ;;  %v6338_v8 = vld [vmem:[#allocation2 + $0x66] sm:$0xff] }
 0x531   : > { %v6054_v16 = vpack.c.bf16 %v6011_v13, %v6010_v19  ;;  %v6013_v13 = vld [vmem:[#allocation2 + $0x51] sm:$0xff]  ;;  %v6012_v19 = vld [vmem:[#allocation2 + $0x49] sm:$0xff] }
 0x532   : > { %8068 = vmatmul.msk.bf16.gmra.mxu1 %vm4371_vm6, %v11698_v56 }
 0x533   : > { %8125 = vmatmul.msk.bf16.gmra.mxu3 %vm4371_vm6, %v6379_v53 }
 0x534   : > { %v4998_v22 = vpop.f32.mrf.mxu2 }
 0x535   : > { %v4999_v34 = vadd.f32 %v4998_v22, %v10729_v26 }
 0x536   : > { %v5280_v29 = vpop.f32.mrf.mxu3 }
 0x537   : > { %v5600_v17 = vpop.f32.mrf.mxu0  ;;  %v5882_v60 = vpop.f32.mrf.mxu1  ;;  %v5343_v51 = vadd.f32 %v5277_v4, %v4999_v34  ;;  %v11699_v4 = vpack.c.bf16 %v10574_v49, %v10572_v57  ;;  %v6055_v57 = vpack.c.bf16 %v6013_v13, %v6012_v19 }
 0x538   : > { %v11013_v12 = vadd.f32 %v5600_v17, %v5342_v41  ;;  %v11016_v59 = vadd.f32 %v5882_v60, %v10828_v54  ;;  %v6337_v54 = vld [vmem:[#allocation2 + $0x5e] sm:$0xff]  ;;  %v6660_v60 = vld [vmem:[#allocation2 + $0x4f] sm:$0xff] }
 0x539   : > { %8090 = vmatmul.msk.bf16.gmra.mxu2 %vm4371_vm6, %v6054_v16  ;;  %v6380_v42 = vpack.c.bf16 %v6338_v8, %v6337_v54 }
 0x53a   : > { %8159 = vmatmul.msk.bf16.gmra.mxu0 %vm4371_vm6, %v6703_v46 }
 0x53c   : > { %v5001_v44 = vpop.f32.mrf.mxu2 }
 0x53d   : > { %v5002_v26 = vadd.f32 %v5001_v44, %v10736_v31  ;;  %v6661_v31 = vld [vmem:[#allocation2 + $0x57] sm:$0xff] }
 0x53e   : > { %v5282_v28 = vpop.f32.mrf.mxu3 }
 0x53f   : > { %v5602_v25 = vpop.f32.mrf.mxu0  ;;  %v5885_v41 = vpop.f32.mrf.mxu1  ;;  %v5344_v56 = vadd.f32 %v5280_v29, %v5002_v26  ;;  %v6704_v29 = vpack.c.bf16 %v6661_v31, %v6660_v60  ;;  %v6015_v31 = vld [vmem:[#allocation2 + $0x61] sm:$0xff] }
 0x540   : > { %v11021_v3 = vadd.f32 %v5602_v25, %v5343_v51  ;;  %v11024_v53 = vadd.f32 %v5885_v41, %v10838_v33  ;;  %v6340_v25 = vld [vmem:[#allocation2 + $0x76] sm:$0xff] }
 0x542   : > { %8069 = vmatmul.msk.bf16.gmra.mxu1 %vm4371_vm6, %v11699_v4 }
 0x543   : > { %8126 = vmatmul.msk.bf16.gmra.mxu3 %vm4371_vm6, %v6380_v42 }
 0x544   : > { %v5003_v22 = vpop.f32.mrf.mxu2 }
 0x545   : > { %v5004_v34 = vadd.f32 %v5003_v22, %v10746_v18 }
 0x546   : > { %v5285_v62 = vpop.f32.mrf.mxu3 }
 0x547   : > { %v5605_v17 = vpop.f32.mrf.mxu0  ;;  %v5887_v46 = vpop.f32.mrf.mxu1  ;;  %v5345_v49 = vadd.f32 %v5282_v28, %v5004_v34  ;;  %v11700_v28 = vpack.c.bf16 %v11674_v15, %v10593_v63 }
 0x548   : > { %v11032_v33 = vadd.f32 %v5605_v17, %v5344_v56  ;;  %v11035_v16 = vadd.f32 %v5887_v46, %v10845_v37  ;;  %v6339_v37 = vld [vmem:[#allocation2 + $0x6e] sm:$0xff]  ;;  %v6662_v17 = vld [vmem:[#allocation2 + $0x5f] sm:$0xff] }
 0x549   : > { %8091 = vmatmul.msk.bf16.gmra.mxu2 %vm4371_vm6, %v6055_v57  ;;  %v6381_v42 = vpack.c.bf16 %v6340_v25, %v6339_v37  ;;  %v6014_v46 = vld [vmem:[#allocation2 + $0x59] sm:$0xff] }
 0x54a   : > { %8160 = vmatmul.msk.bf16.gmra.mxu0 %vm4371_vm6, %v6704_v29  ;;  %v6056_v63 = vpack.c.bf16 %v6015_v31, %v6014_v46  ;;  %v11703_v46 = vld [vmem:[#allocation11_spill] sm:$0xff] }
 0x54c   : > { %v5006_v51 = vpop.f32.mrf.mxu2 }
 0x54d   : > { %v5007_v18 = vadd.f32 %v5006_v51, %v10753_v40  ;;  %v6663_v40 = vld [vmem:[#allocation2 + $0x67] sm:$0xff] }
 0x54e   : > { %v5287_v26 = vpop.f32.mrf.mxu3  ;;  %v6342_v51 = vld [vmem:[#allocation2 + $0x86] sm:$0xff] }
 0x54f   : > { %v5607_v44 = vpop.f32.mrf.mxu0  ;;  %v5890_v41 = vpop.f32.mrf.mxu1  ;;  %v5346_v56 = vadd.f32 %v5285_v62, %v5007_v18  ;;  %v6705_v62 = vpack.c.bf16 %v6663_v40, %v6662_v17  ;;  %v6016_v17 = vld [vmem:[#allocation2 + $0x69] sm:$0xff] }
 0x550   : > { %v11040_v8 = vadd.f32 %v5607_v44, %v5345_v49  ;;  %v11043_v54 = vadd.f32 %v5890_v41, %v10856_v55 }
 0x552   : > { %8070 = vmatmul.msk.bf16.gmra.mxu1 %vm4371_vm6, %v11700_v28  ;;  %v11702_v28 = vld [vmem:[#allocation10_spill] sm:$0xff] }
 0x553   : > { %8127 = vmatmul.msk.bf16.gmra.mxu3 %vm4371_vm6, %v6381_v42  ;;  %v6017_v42 = vld [vmem:[#allocation2 + $0x71] sm:$0xff] }
 0x554   : > { %v5008_v4 = vpop.f32.mrf.mxu2 }
 0x555   : > { %v5009_v22 = vadd.f32 %v5008_v4, %v10763_v14 }
 0x556   : > { %v5290_v34 = vpop.f32.mrf.mxu3 }
 0x557   : > { %v5610_v13 = vpop.f32.mrf.mxu0  ;;  %v5892_v60 = vpop.f32.mrf.mxu1  ;;  %v5347_v15 = vadd.f32 %v5287_v26, %v5009_v22  ;;  %v11701_v26 = vpack.c.bf16 %v11682_v50, %v10614_v11  ;;  %v6664_v22 = vld [vmem:[#allocation2 + $0x6f] sm:$0xff]  ;;  %v6057_v11 = vpack.c.bf16 %v6017_v42, %v6016_v17 }
 0x558   : > { %v11051_v55 = vadd.f32 %v5610_v13, %v5346_v56  ;;  %v11054_v29 = vadd.f32 %v5892_v60, %v10869_v38  ;;  %v6341_v38 = vld [vmem:[#allocation2 + $0x7e] sm:$0xff] }
 0x559   : > { %8092 = vmatmul.msk.bf16.gmra.mxu2 %vm4371_vm6, %v6056_v63  ;;  %v6382_v37 = vpack.c.bf16 %v6342_v51, %v6341_v38 }
 0x55a   : > { %8161 = vmatmul.msk.bf16.gmra.mxu0 %vm4371_vm6, %v6705_v62 }
 0x55c   : > { %v5011_v19 = vpop.f32.mrf.mxu2 }
 0x55d   : > { %v5012_v14 = vadd.f32 %v5011_v19, %v10771_v5  ;;  %v6665_v5 = vld [vmem:[#allocation2 + $0x77] sm:$0xff] }
 0x55e   : > { %v5292_v49 = vpop.f32.mrf.mxu3 }
 0x55f   : > { %v5612_v57 = vpop.f32.mrf.mxu0  ;;  %v5895_v44 = vpop.f32.mrf.mxu1  ;;  %v5348_v41 = vadd.f32 %v5290_v34, %v5012_v14  ;;  %v6706_v34 = vpack.c.bf16 %v6665_v5, %v6664_v22  ;;  %v6344_v14 = vld [vmem:[#allocation2 + $0x96] sm:$0xff]  ;;  %v6019_v5 = vld [vmem:[#allocation2 + $0x81] sm:$0xff] }
 0x560   : > { %v11059_v18 = vadd.f32 %v5612_v57, %v5347_v15  ;;  %v11062_v25 = vadd.f32 %v5895_v44, %v10883_v43 }
 0x562   : > { %8071 = vmatmul.msk.bf16.gmra.mxu1 %vm4371_vm6, %v11701_v26 }
 0x563   : > { %8128 = vmatmul.msk.bf16.gmra.mxu3 %vm4371_vm6, %v6382_v37  ;;  %v6667_v37 = vld [vmem:[#allocation2 + $0x87] sm:$0xff] }
 0x564   : > { %v5013_v56 = vpop.f32.mrf.mxu2 }
 0x565   : > { %v5014_v40 = vadd.f32 %v5013_v56, %v11702_v28  ;;  %v11705_v56 = vld [vmem:[#allocation19_spill] sm:$0xff] }
 0x566   : > { %v5295_v31 = vpop.f32.mrf.mxu3 }
 0x567   : > { %v5615_v4 = vpop.f32.mrf.mxu0  ;;  %v5897_v13 = vpop.f32.mrf.mxu1  ;;  %v5349_v50 = vadd.f32 %v5292_v49, %v5014_v40  ;;  %v11704_v49 = vpack.c.bf16 %v11688_v36, %v10635_v48 }
 0x568   : > { %v11070_v43 = vadd.f32 %v5615_v4, %v5348_v41  ;;  %v11073_v60 = vadd.f32 %v5897_v13, %v10899_v10  ;;  %v6343_v10 = vld [vmem:[#allocation2 + $0x8e] sm:$0xff]  ;;  %v6666_v4 = vld [vmem:[#allocation2 + $0x7f] sm:$0xff] }
 0x569   : > { %8093 = vmatmul.msk.bf16.gmra.mxu2 %vm4371_vm6, %v6057_v11  ;;  %v6383_v41 = vpack.c.bf16 %v6344_v14, %v6343_v10  ;;  %v6018_v13 = vld [vmem:[#allocation2 + $0x79] sm:$0xff] }
 0x56a   : > { %8162 = vmatmul.msk.bf16.gmra.mxu0 %vm4371_vm6, %v6706_v34  ;;  %v6058_v48 = vpack.c.bf16 %v6019_v5, %v6018_v13  ;;  %v11706_v11 = vld [vmem:[#allocation12_spill] sm:$0xff] }
 0x56c   : > { %v5016_v62 = vpop.f32.mrf.mxu2 }
 0x56d   : > { %v5017_v63 = vadd.f32 %v5016_v62, %v11703_v46 }
 0x56e   : > { %v5297_v19 = vpop.f32.mrf.mxu3 }
 0x56f   : > { %v5617_v15 = vpop.f32.mrf.mxu0  ;;  %v5900_v51 = vpop.f32.mrf.mxu1  ;;  %v5350_v38 = vadd.f32 %v5295_v31, %v5017_v63  ;;  %v6707_v31 = vpack.c.bf16 %v6667_v37, %v6666_v4  ;;  %v6346_v63 = vld [vmem:[#allocation2 + $0xa6] sm:$0xff]  ;;  %v6021_v37 = vld [vmem:[#allocation2 + $0x91] sm:$0xff] }
 0x570   : > { %v11078_v57 = vadd.f32 %v5617_v15, %v5349_v50  ;;  %v11081_v44 = vadd.f32 %v5900_v51, %v10910_v7 }
 0x572   : > { %8072 = vmatmul.msk.bf16.gmra.mxu1 %vm4371_vm6, %v11704_v49 }
 0x573   : > { %8129 = vmatmul.msk.bf16.gmra.mxu3 %vm4371_vm6, %v6383_v41  ;;  %v6669_v41 = vld [vmem:[#allocation2 + $0x97] sm:$0xff] }
 0x574   : > { %v5018_v26 = vpop.f32.mrf.mxu2 }
 0x575   : > { %v5019_v42 = vadd.f32 %v5018_v26, %v11705_v56  ;;  %v11708_v26 = vld [vmem:[#allocation21_spill] sm:$0xff] }
 0x576   : > { %v5300_v40 = vpop.f32.mrf.mxu3 }
 0x577   : > { %v5620_v28 = vpop.f32.mrf.mxu0  ;;  %v5902_v22 = vpop.f32.mrf.mxu1  ;;  %v5351_v36 = vadd.f32 %v5297_v19, %v5019_v42  ;;  %v11707_v19 = vpack.c.bf16 %v11694_v6, %v10665_v61 }
 0x578   : > { %v11089_v7 = vadd.f32 %v5620_v28, %v5350_v38  ;;  %v11092_v34 = vadd.f32 %v5902_v22, %v10920_v35  ;;  %v6345_v35 = vld [vmem:[#allocation2 + $0x9e] sm:$0xff]  ;;  %v6668_v28 = vld [vmem:[#allocation2 + $0x8f] sm:$0xff] }
 0x579   : > { %8094 = vmatmul.msk.bf16.gmra.mxu2 %vm4371_vm6, %v6058_v48  ;;  %v6384_v38 = vpack.c.bf16 %v6346_v63, %v6345_v35  ;;  %v6020_v22 = vld [vmem:[#allocation2 + $0x89] sm:$0xff] }
 0x57a   : > { %8163 = vmatmul.msk.bf16.gmra.mxu0 %vm4371_vm6, %v6707_v31  ;;  %v6059_v61 = vpack.c.bf16 %v6021_v37, %v6020_v22  ;;  %v5724_v48 = vld [vmem:[#allocation2 + $0x170] sm:$0xff]  ;;  %v11710_v37 = vld [vmem:[#allocation23_spill] sm:$0xff] }
 0x57c   : > { %v5021_v17 = vpop.f32.mrf.mxu2 }
 0x57d   : > { %v5022_v50 = vadd.f32 %v5021_v17, %v11706_v11 }
 0x57e   : > { %v5302_v46 = vpop.f32.mrf.mxu3 }
 0x57f   : > { %v5622_v62 = vpop.f32.mrf.mxu0  ;;  %v5905_v14 = vpop.f32.mrf.mxu1  ;;  %v5352_v10 = vadd.f32 %v5300_v40, %v5022_v50  ;;  %v6708_v40 = vpack.c.bf16 %v6669_v41, %v6668_v28  ;;  %v6670_v28 = vld [vmem:[#allocation2 + $0x9f] sm:$0xff] }
 0x580   : > { %v11097_v15 = vadd.f32 %v5622_v62, %v5351_v36  ;;  %v11100_v51 = vadd.f32 %v5905_v14, %v10931_v45  ;;  %v11709_v36 = vld [vmem:[#allocation20_spill] sm:$0xff]  ;;  %v6348_v62 = vld [vmem:[#allocation2 + $0xb6] sm:$0xff] }
 0x582   : > { %8073 = vmatmul.msk.bf16.gmra.mxu1 %vm4371_vm6, %v11707_v19  ;;  %v6671_v19 = vld [vmem:[#allocation2 + $0xa7] sm:$0xff] }
 0x583   : > { %8130 = vmatmul.msk.bf16.gmra.mxu3 %vm4371_vm6, %v6384_v38 }
 0x584   : > { %v5023_v49 = vpop.f32.mrf.mxu2 }
 0x585   : > { %v5024_v5 = vadd.f32 %v5023_v49, %v11708_v26  ;;  %v6023_v49 = vld [vmem:[#allocation2 + $0xa1] sm:$0xff] }
 0x586   : > { %v5305_v42 = vpop.f32.mrf.mxu3 }
 0x587   : > { %v5625_v56 = vpop.f32.mrf.mxu0  ;;  %v5907_v4 = vpop.f32.mrf.mxu1  ;;  %v5353_v6 = vadd.f32 %v5302_v46, %v5024_v5  ;;  %v6347_v46 = vld [vmem:[#allocation2 + $0xae] sm:$0xff] }
 0x588   : > { %v11108_v45 = vadd.f32 %v5625_v56, %v5352_v10  ;;  %v11111_v31 = vadd.f32 %v5907_v4, %v10941_v0  ;;  %v5748_v0 = vpack.c.bf16 %v5724_v48, %v10951_v32  ;;  %v6385_v38 = vpack.c.bf16 %v6348_v62, %v6347_v46  ;;  %v6022_v32 = vld [vmem:[#allocation2 + $0x99] sm:$0xff]  ;;  %v6350_v62 = vld [vmem:[#allocation2 + $0xc6] sm:$0xff] }
 0x589   : > { %8095 = vmatmul.msk.bf16.gmra.mxu2 %vm4371_vm6, %v6059_v61  ;;  %v6060_v22 = vpack.c.bf16 %v6023_v49, %v6022_v32  ;;  %v5725_v46 = vld [vmem:[#allocation2 + $0x178] sm:$0xff] }
 0x58a   : > { %8164 = vmatmul.msk.bf16.gmra.mxu0 %vm4371_vm6, %v6708_v40  ;;  %v6709_v40 = vpack.c.bf16 %v6671_v19, %v6670_v28 }
 0x58c   : > { %v5026_v13 = vpop.f32.mrf.mxu2 }
 0x58d   : > { %v5027_v17 = vadd.f32 %v5026_v13, %v11709_v36  ;;  %v5726_v13 = vld [vmem:[#allocation2 + $0x180] sm:$0xff]  ;;  %v11711_v36 = vld [vmem:[#allocation22_spill] sm:$0xff] }
 0x58e   : > { %v5307_v50 = vpop.f32.mrf.mxu3 }
 0x58f   : > { %v5627_v11 = vpop.f32.mrf.mxu0  ;;  %v5910_v14 = vpop.f32.mrf.mxu1  ;;  %v5354_v10 = vadd.f32 %v5305_v42, %v5027_v17 }
 0x590   : > { %v11116_v63 = vadd.f32 %v5627_v11, %v5353_v6  ;;  %v11119_v35 = vadd.f32 %v5910_v14, %v10954_v27 }
 0x592   : > { %8074 = vmatmul.msk.bf16.gmra.mxu1 %vm4371_vm6, %v5748_v0 }
 0x593   : > { %8131 = vmatmul.msk.bf16.gmra.mxu3 %vm4371_vm6, %v6385_v38 }
 0x594   : > { %v5028_v41 = vpop.f32.mrf.mxu2 }
 0x595   : > { %v5029_v26 = vadd.f32 %v5028_v41, %v11710_v37  ;;  %v6673_v41 = vld [vmem:[#allocation2 + $0xb7] sm:$0xff] }
 0x596   : > { %v6495_v56 = vpop.f32.mrf.mxu3  ;;  %v6025_v37 = vld [vmem:[#allocation2 + $0xb1] sm:$0xff] }
 0x597   : > { %v5630_v5 = vpop.f32.mrf.mxu0  ;;  %v5912_v27 = vpop.f32.mrf.mxu1  ;;  %v5355_v61 = vadd.f32 %v5307_v50, %v5029_v26  ;;  %v6349_v50 = vld [vmem:[#allocation2 + $0xbe] sm:$0xff]  ;;  %v11712_v26 = vld [vmem:[#allocation25_spill] sm:$0xff] }
 0x598   : > { %v11125_v4 = vadd.f32 %v5630_v5, %v5354_v10  ;;  %v11128_v42 = vadd.f32 %v5912_v27, %v10964_v1  ;;  %v5749_v10 = vpack.c.bf16 %v5726_v13, %v5725_v46  ;;  %v6386_v19 = vpack.c.bf16 %v6350_v62, %v6349_v50 }
 0x599   : > { %8096 = vmatmul.msk.bf16.gmra.mxu2 %vm4371_vm6, %v6060_v22 }
 0x59a   : > { %8165 = vmatmul.msk.bf16.gmra.mxu0 %vm4371_vm6, %v6709_v40  ;;  %v6672_v40 = vld [vmem:[#allocation2 + $0xaf] sm:$0xff] }
 0x59c   : > { %v6170_v6 = vpop.f32.mrf.mxu2 }
 0x59d   : > { %v6285_v17 = vadd.f32 %v6170_v6, %v11711_v36  ;;  %v6982_v36 = vld [vmem:[#allocation2 + $0x38] sm:$0xff] }
 0x59e   : > { %v6497_v11 = vpop.f32.mrf.mxu3 }
 0x59f   : > { %v5632_v48 = vpop.f32.mrf.mxu0  ;;  %v5915_v0 = vpop.f32.mrf.mxu1  ;;  %v6610_v38 = vadd.f32 %v6495_v56, %v6285_v17  ;;  %v11713_v17 = vld [vmem:[#allocation24_spill] sm:$0xff] }
 0x5a0   : > { %v11133_v14 = vadd.f32 %v5632_v48, %v5355_v61  ;;  %v11136_v1 = vadd.f32 %v5915_v0, %v10975_v52  ;;  %v6710_v52 = vpack.c.bf16 %v6673_v41, %v6672_v40  ;;  %v6024_v61 = vld [vmem:[#allocation2 + $0xa9] sm:$0xff]  ;;  %v11714_v40 = vld [vmem:[#allocation27_spill] sm:$0xff] }
 0x5a1   : > { %v6061_v6 = vpack.c.bf16 %v6025_v37, %v6024_v61 }
 0x5a2   : > { %8075 = vmatmul.msk.bf16.gmra.mxu1 %vm4371_vm6, %v5749_v10  ;;  %v6352_v10 = vld [vmem:[#allocation2 + $0xd6] sm:$0xff] }
 0x5a3   : > { %8132 = vmatmul.msk.bf16.gmra.mxu3 %vm4371_vm6, %v6386_v19  ;;  %v6981_v19 = vld [vmem:[#allocation2 + $0x30] sm:$0xff] }
 0x5a4   : > { %v6172_v49 = vpop.f32.mrf.mxu2  ;;  %v7027_v41 = vpack.c.bf16 %v6982_v36, %v6981_v19  ;;  %v6026_v36 = vld [vmem:[#allocation2 + $0xb9] sm:$0xff] }
 0x5a5   : > { %v6286_v5 = vadd.f32 %v6172_v49, %v11712_v26  ;;  %v6675_v26 = vld [vmem:[#allocation2 + $0xc7] sm:$0xff] }
 0x5a6   : > { %v6500_v27 = vpop.f32.mrf.mxu3 }
 0x5a7   : > { %v6820_v28 = vpop.f32.mrf.mxu0  ;;  %v5917_v32 = vpop.f32.mrf.mxu1  ;;  %v6611_v13 = vadd.f32 %v6497_v11, %v6286_v5  ;;  %v6351_v11 = vld [vmem:[#allocation2 + $0xce] sm:$0xff] }
 0x5a8   : > { %v11141_v22 = vadd.f32 %v6820_v28, %v6610_v38  ;;  %v11144_v56 = vadd.f32 %v5917_v32, %v10983_v58  ;;  %v6387_v37 = vpack.c.bf16 %v6352_v10, %v6351_v11  ;;  %v6027_v28 = vld [vmem:[#allocation2 + $0xc1] sm:$0xff] }
 0x5a9   : > { %8097 = vmatmul.msk.bf16.gmra.mxu2 %vm4371_vm6, %v6061_v6  ;;  %v6674_v6 = vld [vmem:[#allocation2 + $0xbf] sm:$0xff]  ;;  %v6984_v10 = vld [vmem:[#allocation2 + $0x48] sm:$0xff] }
 0x5aa   : > { %8166 = vmatmul.msk.bf16.gmra.mxu0 %vm4371_vm6, %v6710_v52 }
 0x5ac   : > { %v6175_v48 = vpop.f32.mrf.mxu2 }
 0x5ad   : > { %v6287_v62 = vadd.f32 %v6175_v48, %v11713_v17  ;;  %v6062_v17 = vpack.c.bf16 %v6027_v28, %v6026_v36 }
 0x5ae   : > { %v6502_v46 = vpop.f32.mrf.mxu3 }
 0x5af   : > { %v6822_v0 = vpop.f32.mrf.mxu0  ;;  %v5920_v50 = vpop.f32.mrf.mxu1  ;;  %v6612_v49 = vadd.f32 %v6500_v27, %v6287_v62 }
 0x5b0   : > { %v11149_v38 = vadd.f32 %v6822_v0, %v6611_v13  ;;  %v11152_v58 = vadd.f32 %v5920_v50, %v10994_v47  ;;  %v6711_v47 = vpack.c.bf16 %v6675_v26, %v6674_v6  ;;  %v11715_v50 = vld [vmem:[#allocation26_spill] sm:$0xff]  ;;  %v6983_v26 = vld [vmem:[#allocation2 + $0x40] sm:$0xff] }
 0x5b1   : > { %v7028_v28 = vpack.c.bf16 %v6984_v10, %v6983_v26  ;;  %v6028_v10 = vld [vmem:[#allocation2 + $0xc9] sm:$0xff]  ;;  %v6986_v26 = vld [vmem:[#allocation2 + $0x58] sm:$0xff] }
 0x5b2   : > { %8193 = vmatmul.msk.bf16.vlgmr.msra.gmra.mxu1 %vm4371_vm6, %v7027_v41 }
 0x5b3   : > { %8133 = vmatmul.msk.bf16.gmra.mxu3 %vm4371_vm6, %v6387_v37  ;;  %v6354_v37 = vld [vmem:[#allocation2 + $0xe6] sm:$0xff] }
 0x5b4   : > { %v6177_v5 = vpop.f32.mrf.mxu2 }
 0x5b5   : > { %v6288_v32 = vadd.f32 %v6177_v5, %v11714_v40 }
 0x5b6   : > { %v6505_v61 = vpop.f32.mrf.mxu3 }
 0x5b7   : > { %v6825_v52 = vpop.f32.mrf.mxu0  ;;  %v5922_v13 = vpop.f32.mrf.mxu1  ;;  %v6613_v62 = vadd.f32 %v6502_v46, %v6288_v32  ;;  %v6353_v46 = vld [vmem:[#allocation2 + $0xde] sm:$0xff] }
 0x5b8   : > { %v11157_v48 = vadd.f32 %v6825_v52, %v6612_v49  ;;  %v11160_v27 = vadd.f32 %v5922_v13, %v11002_v2  ;;  %v6388_v32 = vpack.c.bf16 %v6354_v37, %v6353_v46  ;;  %v6677_v52 = vld [vmem:[#allocation2 + $0xd7] sm:$0xff] }
 0x5b9   : > { %8098 = vmatmul.msk.bf16.gmra.mxu2 %vm4371_vm6, %v6062_v17  ;;  %v6029_v13 = vld [vmem:[#allocation2 + $0xd1] sm:$0xff] }
 0x5ba   : > { %8167 = vmatmul.msk.bf16.gmra.mxu0 %vm4371_vm6, %v6711_v47  ;;  %v11716_v47 = vld [vmem:[#allocation29_spill] sm:$0xff] }
 0x5bc   : > { %v6180_v0 = vpop.f32.mrf.mxu2 }
 0x5bd   : > { %v6289_v19 = vadd.f32 %v6180_v0, %v11715_v50  ;;  %v6676_v0 = vld [vmem:[#allocation2 + $0xcf] sm:$0xff] }
 0x5be   : > { %v6507_v11 = vpop.f32.mrf.mxu3 }
 0x5bf   : > { %v6827_v41 = vpop.f32.mrf.mxu0  ;;  %v5925_v49 = vpop.f32.mrf.mxu1  ;;  %v6614_v40 = vadd.f32 %v6505_v61, %v6289_v19  ;;  %v6063_v19 = vpack.c.bf16 %v6029_v13, %v6028_v10 }
 0x5c0   : > { %v11165_v5 = vadd.f32 %v6827_v41, %v6613_v62  ;;  %v11168_v2 = vadd.f32 %v5925_v49, %v11013_v12  ;;  %v6712_v12 = vpack.c.bf16 %v6677_v52, %v6676_v0  ;;  %v6985_v52 = vld [vmem:[#allocation2 + $0x50] sm:$0xff]  ;;  %v6679_v0 = vld [vmem:[#allocation2 + $0xe7] sm:$0xff] }
 0x5c1   : > { %v7029_v13 = vpack.c.bf16 %v6986_v26, %v6985_v52  ;;  %v6030_v26 = vld [vmem:[#allocation2 + $0xd9] sm:$0xff]  ;;  %v6988_v52 = vld [vmem:[#allocation2 + $0x68] sm:$0xff] }
 0x5c2   : > { %8194 = vmatmul.msk.bf16.gmra.mxu1 %vm4371_vm6, %v7028_v28 }
 0x5c3   : > { %8134 = vmatmul.msk.bf16.gmra.mxu3 %vm4371_vm6, %v6388_v32 }
 0x5c4   : > { %v6182_v6 = vpop.f32.mrf.mxu2 }
 0x5c5   : > { %v6290_v36 = vadd.f32 %v6182_v6, %v11716_v47  ;;  %v6356_v6 = vld [vmem:[#allocation2 + $0xf6] sm:$0xff] }
 0x5c6   : > { %v6510_v62 = vpop.f32.mrf.mxu3 }
 0x5c7   : > { %v6830_v17 = vpop.f32.mrf.mxu0  ;;  %v5927_v50 = vpop.f32.mrf.mxu1  ;;  %v6615_v37 = vadd.f32 %v6507_v11, %v6290_v36  ;;  %v6355_v11 = vld [vmem:[#allocation2 + $0xee] sm:$0xff] }
 0x5c8   : > { %v11173_v41 = vadd.f32 %v6830_v17, %v6614_v40  ;;  %v11176_v61 = vadd.f32 %v5927_v50, %v11021_v3  ;;  %v6389_v17 = vpack.c.bf16 %v6356_v6, %v6355_v11  ;;  %v6031_v50 = vld [vmem:[#allocation2 + $0xe1] sm:$0xff] }
 0x5c9   : > { %8099 = vmatmul.msk.bf16.gmra.mxu2 %vm4371_vm6, %v6063_v19 }
 0x5ca   : > { %8168 = vmatmul.msk.bf16.gmra.mxu0 %vm4371_vm6, %v6712_v12 }
 0x5cc   : > { %v6185_v49 = vpop.f32.mrf.mxu2 }
 0x5cd   : > { %v6291_v28 = vadd.f32 %v6185_v49, %v10923_v21 }
 0x5ce   : > { %v6512_v32 = vpop.f32.mrf.mxu3 }
 0x5cf   : > { %v6832_v46 = vpop.f32.mrf.mxu0  ;;  %v5930_v40 = vpop.f32.mrf.mxu1  ;;  %v6616_v36 = vadd.f32 %v6510_v62, %v6291_v28  ;;  %v6064_v28 = vpack.c.bf16 %v6031_v50, %v6030_v26  ;;  %v6033_v26 = vld [vmem:[#allocation2 + $0xf1] sm:$0xff] }
 0x5d0   : > { %v11181_v47 = vadd.f32 %v6832_v46, %v6615_v37  ;;  %v11184_v3 = vadd.f32 %v5930_v40, %v11032_v33  ;;  %v6678_v37 = vld [vmem:[#allocation2 + $0xdf] sm:$0xff] }
 0x5d1   : > { %v6713_v33 = vpack.c.bf16 %v6679_v0, %v6678_v37  ;;  %v6987_v0 = vld [vmem:[#allocation2 + $0x60] sm:$0xff] }
 0x5d2   : > { %11717 = vst [vmem:[#allocation30_spill] sm:$0xff] %v11184_v3  ;;  %8195 = vmatmul.msk.bf16.gmra.mxu1 %vm4371_vm6, %v7029_v13  ;;  %v7030_v50 = vpack.c.bf16 %v6988_v52, %v6987_v0  ;;  %v6032_v52 = vld [vmem:[#allocation2 + $0xe9] sm:$0xff]  ;;  %v6990_v0 = vld [vmem:[#allocation2 + $0x78] sm:$0xff] }
 0x5d3   : > { %8135 = vmatmul.msk.bf16.gmra.mxu3 %vm4371_vm6, %v6389_v17 }
 0x5d4   : > { %v6187_v21 = vpop.f32.mrf.mxu2 }
 0x5d5   : > { %v6292_v12 = vadd.f32 %v6187_v21, %v10934_v24  ;;  %v11719_v24 = vld [vmem:[#allocation28_spill] sm:$0xff] }
 0x5d6   : > { %v6515_v19 = vpop.f32.mrf.mxu3  ;;  %v6358_v21 = vld [vmem:[#allocation2 + $0x106] sm:$0xff] }
 0x5d7   : > { %v6835_v10 = vpop.f32.mrf.mxu0  ;;  %v5932_v49 = vpop.f32.mrf.mxu1  ;;  %v6617_v6 = vadd.f32 %v6512_v32, %v6292_v12  ;;  %v6357_v32 = vld [vmem:[#allocation2 + $0xfe] sm:$0xff] }
 0x5d8   : > { %v11189_v46 = vadd.f32 %v6835_v10, %v6616_v36  ;;  %v11192_v62 = vadd.f32 %v5932_v49, %v11040_v8  ;;  %v6390_v37 = vpack.c.bf16 %v6358_v21, %v6357_v32  ;;  %v6681_v49 = vld [vmem:[#allocation2 + $0xf7] sm:$0xff] }
 0x5d9   : > { %8100 = vmatmul.msk.bf16.gmra.mxu2 %vm4371_vm6, %v6064_v28  ;;  %v11720_v28 = vld [vmem:[#allocation31_spill] sm:$0xff] }
 0x5da   : > { %11718 = vst [vmem:[#allocation3_spill] sm:$0xff] %v11192_v62  ;;  %8169 = vmatmul.msk.bf16.gmra.mxu0 %vm4371_vm6, %v6713_v33 }
 0x5dc   : > { %v6190_v40 = vpop.f32.mrf.mxu2 }
 0x5dd   : > { %v6293_v13 = vadd.f32 %v6190_v40, %v11719_v24 }
 0x5de   : > { %v6517_v17 = vpop.f32.mrf.mxu3 }
 0x5df   : > { %v6837_v11 = vpop.f32.mrf.mxu0  ;;  %v5935_v36 = vpop.f32.mrf.mxu1  ;;  %v6618_v12 = vadd.f32 %v6515_v19, %v6293_v13  ;;  %v6065_v13 = vpack.c.bf16 %v6033_v26, %v6032_v52 }
 0x5e0   : > { %v11197_v10 = vadd.f32 %v6837_v11, %v6617_v6  ;;  %v11200_v8 = vadd.f32 %v5935_v36, %v11051_v55  ;;  %v6680_v11 = vld [vmem:[#allocation2 + $0xef] sm:$0xff] }
 0x5e1   : > { %v6714_v55 = vpack.c.bf16 %v6681_v49, %v6680_v11  ;;  %v6989_v49 = vld [vmem:[#allocation2 + $0x70] sm:$0xff]  ;;  %v6035_v11 = vld [vmem:[#allocation2 + $0x101] sm:$0xff] }
 0x5e2   : > { %8196 = vmatmul.msk.bf16.gmra.mxu1 %vm4371_vm6, %v7030_v50 }
 0x5e3   : > { %8136 = vmatmul.msk.bf16.gmra.mxu3 %vm4371_vm6, %v6390_v37 }
 0x5e4   : > { %v6192_v33 = vpop.f32.mrf.mxu2 }
 0x5e5   : > { %v6294_v40 = vadd.f32 %v6192_v33, %v11720_v28  ;;  %v6360_v33 = vld [vmem:[#allocation2 + $0x116] sm:$0xff] }
 0x5e6   : > { %v6520_v6 = vpop.f32.mrf.mxu3 }
 0x5e7   : > { %v6840_v24 = vpop.f32.mrf.mxu0  ;;  %v5937_v62 = vpop.f32.mrf.mxu1  ;;  %v6619_v21 = vadd.f32 %v6517_v17, %v6294_v40  ;;  %v6359_v17 = vld [vmem:[#allocation2 + $0x10e] sm:$0xff] }
 0x5e8   : > { %v11205_v3 = vadd.f32 %v6840_v24, %v6618_v12  ;;  %v11208_v19 = vadd.f32 %v5937_v62, %v11059_v18  ;;  %v7031_v62 = vpack.c.bf16 %v6990_v0, %v6989_v49  ;;  %v6391_v40 = vpack.c.bf16 %v6360_v33, %v6359_v17  ;;  %v6683_v24 = vld [vmem:[#allocation2 + $0x107] sm:$0xff]  ;;  %v6034_v0 = vld [vmem:[#allocation2 + $0xf9] sm:$0xff] }
 0x5e9   : > { %8101 = vmatmul.msk.bf16.gmra.mxu2 %vm4371_vm6, %v6065_v13  ;;  %v6992_v49 = vld [vmem:[#allocation2 + $0x88] sm:$0xff] }
 0x5ea   : > { %8170 = vmatmul.msk.bf16.gmra.mxu0 %vm4371_vm6, %v6714_v55 }
 0x5ec   : > { %v6195_v36 = vpop.f32.mrf.mxu2 }
 0x5ed   : > { %v6295_v50 = vadd.f32 %v6195_v36, %v10967_v23 }
 0x5ee   : > { %v6522_v37 = vpop.f32.mrf.mxu3 }
 0x5ef   : > { %v6842_v32 = vpop.f32.mrf.mxu0  ;;  %v5940_v12 = vpop.f32.mrf.mxu1  ;;  %v6620_v26 = vadd.f32 %v6520_v6, %v6295_v50  ;;  %v6066_v50 = vpack.c.bf16 %v6035_v11, %v6034_v0 }
 0x5f0   : > { %v11213_v28 = vadd.f32 %v6842_v32, %v6619_v21  ;;  %v11216_v18 = vadd.f32 %v5940_v12, %v11070_v43  ;;  %v6682_v21 = vld [vmem:[#allocation2 + $0xff] sm:$0xff] }
 0x5f1   : > { %v6715_v43 = vpack.c.bf16 %v6683_v24, %v6682_v21  ;;  %v6991_v24 = vld [vmem:[#allocation2 + $0x80] sm:$0xff]  ;;  %v6685_v21 = vld [vmem:[#allocation2 + $0x117] sm:$0xff] }
 0x5f2   : > { %8197 = vmatmul.msk.bf16.gmra.mxu1 %vm4371_vm6, %v7031_v62  ;;  %v7032_v11 = vpack.c.bf16 %v6992_v49, %v6991_v24  ;;  %v6036_v49 = vld [vmem:[#allocation2 + $0x109] sm:$0xff]  ;;  %v6994_v24 = vld [vmem:[#allocation2 + $0x98] sm:$0xff] }
 0x5f3   : > { %8137 = vmatmul.msk.bf16.gmra.mxu3 %vm4371_vm6, %v6391_v40  ;;  %v6362_v40 = vld [vmem:[#allocation2 + $0x126] sm:$0xff] }
 0x5f4   : > { %v6197_v23 = vpop.f32.mrf.mxu2 }
 0x5f5   : > { %v6296_v55 = vadd.f32 %v6197_v23, %v10978_v30 }
 0x5f6   : > { %v6525_v13 = vpop.f32.mrf.mxu3 }
 0x5f7   : > { %v6845_v52 = vpop.f32.mrf.mxu0  ;;  %v5942_v36 = vpop.f32.mrf.mxu1  ;;  %v6621_v33 = vadd.f32 %v6522_v37, %v6296_v55  ;;  %v6361_v37 = vld [vmem:[#allocation2 + $0x11e] sm:$0xff] }
 0x5f8   : > { %v11221_v32 = vadd.f32 %v6845_v52, %v6620_v26  ;;  %v11224_v6 = vadd.f32 %v5942_v36, %v11078_v57  ;;  %v6392_v52 = vpack.c.bf16 %v6362_v40, %v6361_v37  ;;  %v6037_v36 = vld [vmem:[#allocation2 + $0x111] sm:$0xff] }
 0x5f9   : > { %8102 = vmatmul.msk.bf16.gmra.mxu2 %vm4371_vm6, %v6066_v50 }
 0x5fa   : > { %8171 = vmatmul.msk.bf16.gmra.mxu0 %vm4371_vm6, %v6715_v43 }
 0x5fc   : > { %v6200_v12 = vpop.f32.mrf.mxu2 }
 0x5fd   : > { %v6297_v30 = vadd.f32 %v6200_v12, %v10986_v20 }
 0x5fe   : > { %v6527_v17 = vpop.f32.mrf.mxu3 }
 0x5ff   : > { %v6847_v62 = vpop.f32.mrf.mxu0  ;;  %v5945_v26 = vpop.f32.mrf.mxu1  ;;  %v6622_v55 = vadd.f32 %v6525_v13, %v6297_v30  ;;  %v6067_v30 = vpack.c.bf16 %v6037_v36, %v6036_v49 }
 0x600   : > { %v11229_v23 = vadd.f32 %v6847_v62, %v6621_v33  ;;  %v11232_v57 = vadd.f32 %v5945_v26, %v11089_v7  ;;  %v6684_v33 = vld [vmem:[#allocation2 + $0x10f] sm:$0xff] }
 0x601   : > { %v6716_v7 = vpack.c.bf16 %v6685_v21, %v6684_v33  ;;  %v6993_v21 = vld [vmem:[#allocation2 + $0x90] sm:$0xff]  ;;  %v6687_v33 = vld [vmem:[#allocation2 + $0x127] sm:$0xff] }
 0x602   : > { %8198 = vmatmul.msk.bf16.gmra.mxu1 %vm4371_vm6, %v7032_v11  ;;  %v7033_v36 = vpack.c.bf16 %v6994_v24, %v6993_v21  ;;  %v6038_v24 = vld [vmem:[#allocation2 + $0x119] sm:$0xff]  ;;  %v6996_v21 = vld [vmem:[#allocation2 + $0xa8] sm:$0xff] }
 0x603   : > { %8138 = vmatmul.msk.bf16.gmra.mxu3 %vm4371_vm6, %v6392_v52  ;;  %v6364_v52 = vld [vmem:[#allocation2 + $0x136] sm:$0xff] }
 0x604   : > { %v6202_v20 = vpop.f32.mrf.mxu2 }
 0x605   : > { %v6298_v43 = vadd.f32 %v6202_v20, %v10997_v39 }
 0x606   : > { %v6530_v50 = vpop.f32.mrf.mxu3 }
 0x607   : > { %v6850_v0 = vpop.f32.mrf.mxu0  ;;  %v5947_v12 = vpop.f32.mrf.mxu1  ;;  %v6623_v40 = vadd.f32 %v6527_v17, %v6298_v43  ;;  %v6363_v17 = vld [vmem:[#allocation2 + $0x12e] sm:$0xff] }
 0x608   : > { %v11237_v62 = vadd.f32 %v6850_v0, %v6622_v55  ;;  %v11240_v13 = vadd.f32 %v5947_v12, %v11097_v15  ;;  %v6393_v0 = vpack.c.bf16 %v6364_v52, %v6363_v17  ;;  %v6039_v12 = vld [vmem:[#allocation2 + $0x121] sm:$0xff] }
 0x609   : > { %8103 = vmatmul.msk.bf16.gmra.mxu2 %vm4371_vm6, %v6067_v30  ;;  %v6366_v17 = vld [vmem:[#allocation2 + $0x146] sm:$0xff] }
 0x60a   : > { %8172 = vmatmul.msk.bf16.gmra.mxu0 %vm4371_vm6, %v6716_v7 }
 0x60c   : > { %v6205_v26 = vpop.f32.mrf.mxu2 }
 0x60d   : > { %v6299_v39 = vadd.f32 %v6205_v26, %v11005_v9 }
 0x60e   : > { %v6532_v37 = vpop.f32.mrf.mxu3 }
 0x60f   : > { %v6852_v11 = vpop.f32.mrf.mxu0  ;;  %v5950_v55 = vpop.f32.mrf.mxu1  ;;  %v6624_v43 = vadd.f32 %v6530_v50, %v6299_v39  ;;  %v6068_v39 = vpack.c.bf16 %v6039_v12, %v6038_v24 }
 0x610   : > { %v11245_v20 = vadd.f32 %v6852_v11, %v6623_v40  ;;  %v11248_v15 = vadd.f32 %v5950_v55, %v11108_v45  ;;  %v6686_v40 = vld [vmem:[#allocation2 + $0x11f] sm:$0xff] }
 0x611   : > { %v6717_v45 = vpack.c.bf16 %v6687_v33, %v6686_v40  ;;  %v6689_v40 = vld [vmem:[#allocation2 + $0x137] sm:$0xff] }
 0x612   : > { %8199 = vmatmul.msk.bf16.gmra.mxu1 %vm4371_vm6, %v7033_v36 }
 0x613   : > { %8139 = vmatmul.msk.bf16.gmra.mxu3 %vm4371_vm6, %v6393_v0 }
 0x614   : > { %v6207_v9 = vpop.f32.mrf.mxu2 }
 0x615   : > { %v6300_v7 = vadd.f32 %v6207_v9, %v11016_v59  ;;  %v6995_v9 = vld [vmem:[#allocation2 + $0xa0] sm:$0xff] }
 0x616   : > { %v6535_v30 = vpop.f32.mrf.mxu3  ;;  %v7034_v12 = vpack.c.bf16 %v6996_v21, %v6995_v9  ;;  %v6040_v21 = vld [vmem:[#allocation2 + $0x129] sm:$0xff] }
 0x617   : > { %v6855_v49 = vpop.f32.mrf.mxu0  ;;  %v5952_v26 = vpop.f32.mrf.mxu1  ;;  %v6625_v52 = vadd.f32 %v6532_v37, %v6300_v7  ;;  %v6365_v37 = vld [vmem:[#allocation2 + $0x13e] sm:$0xff] }
 0x618   : > { %v11253_v11 = vadd.f32 %v6855_v49, %v6624_v43  ;;  %v11256_v50 = vadd.f32 %v5952_v26, %v11116_v63  ;;  %v6394_v49 = vpack.c.bf16 %v6366_v17, %v6365_v37  ;;  %v6041_v26 = vld [vmem:[#allocation2 + $0x131] sm:$0xff]  ;;  %v11280_v37 = vld [vmem:[%s11525_s4] ss:$0 sm:$0xff] }
 0x619   : > { %8104 = vmatmul.msk.bf16.gmra.mxu2 %vm4371_vm6, %v6068_v39  ;;  %v6688_v39 = vld [vmem:[#allocation2 + $0x12f] sm:$0xff] }
 0x61a   : > { %8173 = vmatmul.msk.bf16.gmra.mxu0 %vm4371_vm6, %v6717_v45 }
 0x61c   : > { %v6210_v55 = vpop.f32.mrf.mxu2 }
 0x61d   : > { %v6301_v59 = vadd.f32 %v6210_v55, %v11024_v53 }
 0x61e   : > { %v6537_v33 = vpop.f32.mrf.mxu3 }
 0x61f   : > { %v6857_v36 = vpop.f32.mrf.mxu0  ;;  %v5955_v0 = vpop.f32.mrf.mxu1  ;;  %v6626_v7 = vadd.f32 %v6535_v30, %v6301_v59  ;;  %v6069_v59 = vpack.c.bf16 %v6041_v26, %v6040_v21  ;;  %v6367_v26 = vld [vmem:[#allocation2 + $0x14e] sm:$0xff]  ;;  %v6043_v21 = vld [vmem:[#allocation2 + $0x141] sm:$0xff] }
 0x620   : > { %v11261_v43 = vadd.f32 %v6857_v36, %v6625_v52  ;;  %v11264_v63 = vadd.f32 %v5955_v0, %v11125_v4  ;;  %v6718_v4 = vpack.c.bf16 %v6689_v40, %v6688_v39 }
 0x622   : > { %8200 = vmatmul.msk.bf16.gmra.mxu1 %vm4371_vm6, %v7034_v12 }
 0x623   : > { %8140 = vmatmul.msk.bf16.gmra.mxu3 %vm4371_vm6, %v6394_v49  ;;  %v6997_v49 = vld [vmem:[#allocation2 + $0xb0] sm:$0xff] }
 0x624   : > { %v6212_v53 = vpop.f32.mrf.mxu2 }
 0x625   : > { %v6302_v45 = vadd.f32 %v6212_v53, %v11035_v16  ;;  %v6998_v16 = vld [vmem:[#allocation2 + $0xb8] sm:$0xff] }
 0x626   : > { %v6540_v17 = vpop.f32.mrf.mxu3  ;;  %v7035_v53 = vpack.c.bf16 %v6998_v16, %v6997_v49 }
 0x627   : > { %v6860_v24 = vpop.f32.mrf.mxu0  ;;  %v5957_v52 = vpop.f32.mrf.mxu1  ;;  %v6627_v36 = vadd.f32 %v6537_v33, %v6302_v45 }
 0x628   : > { %v11269_v55 = vadd.f32 %v6860_v24, %v6626_v7  ;;  %v11272_v30 = vadd.f32 %v5957_v52, %v11133_v14  ;;  %v6368_v7 = vld [vmem:[#allocation2 + $0x156] sm:$0xff] }
 0x629   : > { %8105 = vmatmul.msk.bf16.gmra.mxu2 %vm4371_vm6, %v6069_v59  ;;  %v6395_v24 = vpack.c.bf16 %v6368_v7, %v6367_v26 }
 0x62a   : > { %8174 = vmatmul.msk.bf16.gmra.mxu0 %vm4371_vm6, %v6718_v4  ;;  %v6691_v4 = vld [vmem:[#allocation2 + $0x147] sm:$0xff] }
 0x62c   : > { %v6215_v0 = vpop.f32.mrf.mxu2 }
 0x62d   : > { %v6303_v9 = vadd.f32 %v6215_v0, %v11043_v54 }
 0x62e   : > { %v6542_v39 = vpop.f32.mrf.mxu3 }
 0x62f   : > { %v6862_v12 = vpop.f32.mrf.mxu0  ;;  %v7145_v33 = vpop.f32.mrf.mxu1  ;;  %v6628_v45 = vadd.f32 %v6540_v17, %v6303_v9  ;;  %v6690_v17 = vld [vmem:[#allocation2 + $0x13f] sm:$0xff] }
 0x630   : > { %v11282_v14 = vadd.f32 %v6862_v12, %v6627_v36  ;;  %v7260_v40 = vadd.f32 %v7145_v33, %v11141_v22  ;;  %v6719_v9 = vpack.c.bf16 %v6691_v4, %v6690_v17  ;;  %v6042_v12 = vld [vmem:[#allocation2 + $0x139] sm:$0xff] }
 0x631   : > { %v6070_v33 = vpack.c.bf16 %v6043_v21, %v6042_v12  ;;  %v6999_v4 = vld [vmem:[#allocation2 + $0xc0] sm:$0xff] }
 0x632   : > { %v7310_v54 = vadd.f32 %v11280_v37, %v7260_v40  ;;  %8201 = vmatmul.msk.bf16.gmra.mxu1 %vm4371_vm6, %v7035_v53 }
 0x633   : > { %8141 = vmatmul.msk.bf16.gmra.mxu3 %vm4371_vm6, %v6395_v24  ;;  %v7000_v24 = vld [vmem:[#allocation2 + $0xc8] sm:$0xff] }
 0x634   : > { %v7356_v52 = vmax.f32 %v7310_v54, 0.0  ;;  %v6217_v22 = vpop.f32.mrf.mxu2  ;;  %v7036_v21 = vpack.c.bf16 %v7000_v24, %v6999_v4  ;;  %v6044_v24 = vld [vmem:[#allocation2 + $0x149] sm:$0xff]  ;;  %v7002_v4 = vld [vmem:[#allocation2 + $0xd8] sm:$0xff] }
 0x635   : > { %v6304_v59 = vadd.f32 %v6217_v22, %v11054_v29 }
 0x636   : > { %7402 = vst.msk [vmem:[%s11291_s9] sm:$0xff] %vm4371_vm6, %v7356_v52  ;;  %v6545_v29 = vpop.f32.mrf.mxu3  ;;  %v6370_v52 = vld [vmem:[#allocation2 + $0x166] sm:$0xff] }
 0x637   : > { %v6865_v36 = vpop.f32.mrf.mxu0  ;;  %v7147_v16 = vpop.f32.mrf.mxu1  ;;  %v6629_v49 = vadd.f32 %v6542_v39, %v6304_v59  ;;  %v6369_v59 = vld [vmem:[#allocation2 + $0x15e] sm:$0xff] }
 0x638   : > { %v11297_v0 = vadd.f32 %v6865_v36, %v6628_v45  ;;  %v7261_v7 = vadd.f32 %v7147_v16, %v11149_v38  ;;  %v6396_v17 = vpack.c.bf16 %v6370_v52, %v6369_v59 }
 0x639   : > { %8106 = vmatmul.msk.bf16.gmra.mxu2 %vm4371_vm6, %v6070_v33 }
 0x63a   : > { %8175 = vmatmul.msk.bf16.gmra.mxu0 %vm4371_vm6, %v6719_v9  ;;  %v7311_v40 = vadd.f32 %v11280_v37, %v7261_v7  ;;  %v6693_v9 = vld [vmem:[#allocation2 + $0x157] sm:$0xff] }
 0x63b   : > { %v6045_v7 = vld [vmem:[#allocation2 + $0x151] sm:$0xff] }
 0x63c   : > { %v7357_v53 = vmax.f32 %v7311_v40, 0.0  ;;  %v6220_v26 = vpop.f32.mrf.mxu2 }
 0x63d   : > { %v6305_v45 = vadd.f32 %v6220_v26, %v11062_v25 }
 0x63e   : > { %7403 = vst.msk [vmem:[%s11291_s9 + $0x8] sm:$0xff] %vm4371_vm6, %v7357_v53  ;;  %v6547_v40 = vpop.f32.mrf.mxu3 }
 0x63f   : > { %v6867_v54 = vpop.f32.mrf.mxu0  ;;  %v7150_v39 = vpop.f32.mrf.mxu1  ;;  %v6630_v36 = vadd.f32 %v6545_v29, %v6305_v45 }
 0x640   : > { %v11306_v38 = vadd.f32 %v6867_v54, %v6629_v49  ;;  %v7262_v22 = vadd.f32 %v7150_v39, %v11157_v48  ;;  %v6692_v49 = vld [vmem:[#allocation2 + $0x14f] sm:$0xff]  ;;  %v6071_v54 = vpack.c.bf16 %v6045_v7, %v6044_v24 }
 0x641   : > { %v6720_v26 = vpack.c.bf16 %v6693_v9, %v6692_v49  ;;  %v6694_v49 = vld [vmem:[#allocation2 + $0x15f] sm:$0xff] }
 0x642   : > { %v7312_v16 = vadd.f32 %v11280_v37, %v7262_v22  ;;  %8202 = vmatmul.msk.bf16.gmra.mxu1 %vm4371_vm6, %v7036_v21  ;;  %v6372_v21 = vld [vmem:[#allocation2 + $0x176] sm:$0xff] }
 0x643   : > { %8142 = vmatmul.msk.bf16.gmra.mxu3 %vm4371_vm6, %v6396_v17  ;;  %v7001_v17 = vld [vmem:[#allocation2 + $0xd0] sm:$0xff] }
 0x644   : > { %v7358_v25 = vmax.f32 %v7312_v16, 0.0  ;;  %v6222_v12 = vpop.f32.mrf.mxu2  ;;  %v7037_v16 = vpack.c.bf16 %v7002_v4, %v7001_v17 }
 0x645   : > { %v6306_v33 = vadd.f32 %v6222_v12, %v11073_v60 }
 0x646   : > { %7404 = vst.msk [vmem:[%s11291_s9 + $0x10] sm:$0xff] %vm4371_vm6, %v7358_v25  ;;  %v6371_v25 = vld [vmem:[#allocation2 + $0x16e] sm:$0xff] }
 0x647   : > { %v6870_v48 = vpop.f32.mrf.mxu0  ;;  %v7152_v29 = vpop.f32.mrf.mxu1  ;;  %v6631_v52 = vadd.f32 %v6547_v40, %v6306_v33  ;;  %v6397_v9 = vpack.c.bf16 %v6372_v21, %v6371_v25  ;;  %v6695_v33 = vld [vmem:[#allocation2 + $0x167] sm:$0xff]  ;;  %v6049_v25 = vld [vmem:[#allocation2 + $0x171] sm:$0xff] }
 0x648   : > { %v11315_v53 = vadd.f32 %v6870_v48, %v6630_v36  ;;  %v7263_v45 = vadd.f32 %v7152_v29, %v11165_v5  ;;  %v6047_v48 = vld [vmem:[#allocation2 + $0x161] sm:$0xff]  ;;  %v6721_v29 = vpack.c.bf16 %v6695_v33, %v6694_v49  ;;  %v6048_v33 = vld [vmem:[#allocation2 + $0x169] sm:$0xff] }
 0x649   : > { %8107 = vmatmul.msk.bf16.gmra.mxu2 %vm4371_vm6, %v6071_v54 }
 0x64a   : > { %8176 = vmatmul.msk.bf16.gmra.mxu0 %vm4371_vm6, %v6720_v26  ;;  %v7313_v39 = vadd.f32 %v11280_v37, %v7263_v45  ;;  %v6046_v26 = vld [vmem:[#allocation2 + $0x159] sm:$0xff] }
 0x64b   : > { %v6072_v24 = vpack.c.bf16 %v6047_v48, %v6046_v26  ;;  %v6073_v48 = vpack.c.bf16 %v6049_v25, %v6048_v33  ;;  %v6376_v26 = vld [vmem:[#allocation2 + $0x196] sm:$0xff] }
 0x64c   : > { %v7359_v60 = vmax.f32 %v7313_v39, 0.0  ;;  %v6373_v39 = vld [vmem:[#allocation2 + $0x17e] sm:$0xff] }
 0x64e   : > { %7405 = vst.msk [vmem:[%s11291_s9 + $0x18] sm:$0xff] %vm4371_vm6, %v7359_v60  ;;  %v6374_v60 = vld [vmem:[#allocation2 + $0x186] sm:$0xff] }
 0x64f   : > { %v6872_v22 = vpop.f32.mrf.mxu0  ;;  %v7155_v36 = vpop.f32.mrf.mxu1 }
 0x650   : > { %v11323_v59 = vadd.f32 %v6872_v22, %v6631_v52  ;;  %v7264_v5 = vadd.f32 %v7155_v36, %v11173_v41  ;;  %v7004_v52 = vld [vmem:[#allocation2 + $0xe8] sm:$0xff]  ;;  %v7003_v22 = vld [vmem:[#allocation2 + $0xe0] sm:$0xff] }
 0x651   : > { %v7038_v36 = vpack.c.bf16 %v7004_v52, %v7003_v22  ;;  %v6699_v22 = vld [vmem:[#allocation2 + $0x187] sm:$0xff] }
 0x652   : > { %v7314_v12 = vadd.f32 %v11280_v37, %v7264_v5  ;;  %8203 = vmatmul.msk.bf16.gmra.mxu1 %vm4371_vm6, %v7037_v16  ;;  %v6697_v16 = vld [vmem:[#allocation2 + $0x177] sm:$0xff] }
 0x653   : > { %8143 = vmatmul.msk.bf16.gmra.mxu3 %vm4371_vm6, %v6397_v9  ;;  %v6696_v9 = vld [vmem:[#allocation2 + $0x16f] sm:$0xff] }
 0x654   : > { %v7360_v7 = vmax.f32 %v7314_v12, 0.0 }
 0x656   : > { %7406 = vst.msk [vmem:[%s11291_s9 + $0x20] sm:$0xff] %vm4371_vm6, %v7360_v7  ;;  %v6722_v7 = vpack.c.bf16 %v6697_v16, %v6696_v9  ;;  %v7008_v9 = vld [vmem:[#allocation2 + $0x108] sm:$0xff] }
 0x657   : > { %v7157_v40 = vpop.f32.mrf.mxu1 }
 0x658   : > { %v7265_v41 = vadd.f32 %v7157_v40, %v11181_v47  ;;  %v6398_v47 = vpack.c.bf16 %v6374_v60, %v6373_v39 }
 0x659   : > { %8108 = vmatmul.msk.bf16.gmra.mxu2 %vm4371_vm6, %v6072_v24 }
 0x65a   : > { %8177 = vmatmul.msk.bf16.gmra.mxu0 %vm4371_vm6, %v6721_v29  ;;  %v7315_v45 = vadd.f32 %v11280_v37, %v7265_v41  ;;  %v6375_v29 = vld [vmem:[#allocation2 + $0x18e] sm:$0xff]  ;;  %v7006_v41 = vld [vmem:[#allocation2 + $0xf8] sm:$0xff] }
 0x65c   : > { %v7361_v54 = vmax.f32 %v7315_v45, 0.0  ;;  %v7005_v45 = vld [vmem:[#allocation2 + $0xf0] sm:$0xff] }
 0x65e   : > { %7407 = vst.msk [vmem:[%s11291_s9 + $0x28] sm:$0xff] %vm4371_vm6, %v7361_v54  ;;  %v6399_v54 = vpack.c.bf16 %v6376_v26, %v6375_v29 }
 0x65f   : > { %v7160_v4 = vpop.f32.mrf.mxu1 }
 0x660   : > { %v7266_v21 = vadd.f32 %v7160_v4, %v11189_v46  ;;  %v6698_v4 = vld [vmem:[#allocation2 + $0x17f] sm:$0xff] }
 0x662   : > { %v7316_v17 = vadd.f32 %v11280_v37, %v7266_v21  ;;  %8204 = vmatmul.msk.bf16.gmra.mxu1 %vm4371_vm6, %v7038_v36  ;;  %v6050_v21 = vld [vmem:[#allocation2 + $0x179] sm:$0xff]  ;;  %v6051_v36 = vld [vmem:[#allocation2 + $0x181] sm:$0xff] }
 0x663   : > { %8144 = vmatmul.msk.bf16.gmra.mxu3 %vm4371_vm6, %v6398_v47 }
 0x664   : > { %v7362_v5 = vmax.f32 %v7316_v17, 0.0  ;;  %v6723_v17 = vpack.c.bf16 %v6699_v22, %v6698_v4 }
 0x666   : > { %7408 = vst.msk [vmem:[%s11291_s9 + $0x30] sm:$0xff] %vm4371_vm6, %v7362_v5 }
 0x667   : > { %v7162_v12 = vpop.f32.mrf.mxu1 }
 0x668   : > { %v7267_v46 = vadd.f32 %v7162_v12, %v11197_v10  ;;  %v7039_v10 = vpack.c.bf16 %v7006_v41, %v7005_v45  ;;  %v7010_v45 = vld [vmem:[#allocation2 + $0x118] sm:$0xff] }
 0x669   : > { %8109 = vmatmul.msk.bf16.gmra.mxu2 %vm4371_vm6, %v6073_v48  ;;  %v6700_v48 = vld [vmem:[#allocation2 + $0x18f] sm:$0xff] }
 0x66a   : > { %8178 = vmatmul.msk.bf16.gmra.mxu0 %vm4371_vm6, %v6722_v7  ;;  %v7317_v49 = vadd.f32 %v11280_v37, %v7267_v46  ;;  %v7007_v7 = vld [vmem:[#allocation2 + $0x100] sm:$0xff] }
 0x66b   : > { %v7040_v46 = vpack.c.bf16 %v7008_v9, %v7007_v7 }
 0x66c   : > { %v7363_v40 = vmax.f32 %v7317_v49, 0.0  ;;  %v6701_v49 = vld [vmem:[#allocation2 + $0x197] sm:$0xff] }
 0x66d   : > { %v6724_v29 = vpack.c.bf16 %v6701_v49, %v6700_v48  ;;  %v7014_v48 = vld [vmem:[#allocation2 + $0x138] sm:$0xff]  ;;  %v7013_v49 = vld [vmem:[#allocation2 + $0x130] sm:$0xff] }
 0x66e   : > { %7409 = vst.msk [vmem:[%s11291_s9 + $0x38] sm:$0xff] %vm4371_vm6, %v7363_v40 }
 0x66f   : > { %v7165_v24 = vpop.f32.mrf.mxu1 }
 0x670   : > { %v7268_v52 = vadd.f32 %v7165_v24, %v11205_v3  ;;  %v6074_v3 = vpack.c.bf16 %v6051_v36, %v6050_v21 }
 0x672   : > { %v7318_v39 = vadd.f32 %v11280_v37, %v7268_v52  ;;  %8205 = vmatmul.msk.bf16.gmra.mxu1 %vm4371_vm6, %v7039_v10  ;;  %v7009_v52 = vld [vmem:[#allocation2 + $0x110] sm:$0xff] }
 0x673   : > { %8145 = vmatmul.msk.bf16.gmra.mxu3 %vm4371_vm6, %v6399_v54 }
 0x674   : > { %v7364_v60 = vmax.f32 %v7318_v39, 0.0  ;;  %v7041_v39 = vpack.c.bf16 %v7010_v45, %v7009_v52 }
 0x676   : > { %7410 = vst.msk [vmem:[%s11291_s9 + $0x40] sm:$0xff] %vm4371_vm6, %v7364_v60 }
 0x677   : > { %v7167_v47 = vpop.f32.mrf.mxu1 }
 0x678   : > { %v7269_v5 = vadd.f32 %v7167_v47, %v11213_v28  ;;  %v7012_v47 = vld [vmem:[#allocation2 + $0x128] sm:$0xff] }
 0x679   : > { %8110 = vmatmul.msk.bf16.gmra.mxu2 %vm4371_vm6, %v6074_v3 }
 0x67a   : > { %8179 = vmatmul.msk.bf16.gmra.mxu0 %vm4371_vm6, %v6723_v17  ;;  %v7319_v16 = vadd.f32 %v11280_v37, %v7269_v5 }
 0x67c   : > { %v7365_v25 = vmax.f32 %v7319_v16, 0.0 }
 0x67e   : > { %7411 = vst.msk [vmem:[%s11291_s9 + $0x48] sm:$0xff] %vm4371_vm6, %v7365_v25 }
 0x67f   : > { %v7170_v12 = vpop.f32.mrf.mxu1 }
 0x680   : > { %v7270_v33 = vadd.f32 %v7170_v12, %v11221_v32 }
 0x682   : > { %v7320_v28 = vadd.f32 %v11280_v37, %v7270_v33  ;;  %8206 = vmatmul.msk.bf16.gmra.mxu1 %vm4371_vm6, %v7040_v46  ;;  %v6550_v33 = vpop.f32.mrf.mxu3 }
 0x684   : > { %v7366_v40 = vmax.f32 %v7320_v28, 0.0  ;;  %v6875_v28 = vpop.f32.mrf.mxu0 }
 0x686   : > { %7412 = vst.msk [vmem:[%s11291_s9 + $0x50] sm:$0xff] %vm4371_vm6, %v7366_v40 }
 0x687   : > { %v7172_v26 = vpop.f32.mrf.mxu1 }
 0x688   : > { %v7271_v41 = vadd.f32 %v7172_v26, %v11229_v23 }
 0x68a   : > { %8180 = vmatmul.msk.bf16.gmra.mxu0 %vm4371_vm6, %v6724_v29  ;;  %v7321_v24 = vadd.f32 %v11280_v37, %v7271_v41  ;;  %v7043_v29 = vpack.c.bf16 %v7014_v48, %v7013_v49 }
 0x68c   : > { %v7367_v32 = vmax.f32 %v7321_v24, 0.0  ;;  %v6552_v24 = vpop.f32.mrf.mxu3 }
 0x68e   : > { %7413 = vst.msk [vmem:[%s11291_s9 + $0x58] sm:$0xff] %vm4371_vm6, %v7367_v32  ;;  %v6877_v32 = vpop.f32.mrf.mxu0 }
 0x68f   : > { %v7175_v54 = vpop.f32.mrf.mxu1 }
 0x690   : > { %v7272_v10 = vadd.f32 %v7175_v54, %v11237_v62  ;;  %v7011_v62 = vld [vmem:[#allocation2 + $0x120] sm:$0xff] }
 0x691   : > { %v7042_v3 = vpack.c.bf16 %v7012_v47, %v7011_v62 }
 0x692   : > { %v7322_v60 = vadd.f32 %v11280_v37, %v7272_v10  ;;  %8207 = vmatmul.msk.bf16.gmra.mxu1 %vm4371_vm6, %v7041_v39 }
 0x694   : > { %v7368_v23 = vmax.f32 %v7322_v60, 0.0 }
 0x696   : > { %7414 = vst.msk [vmem:[%s11291_s9 + $0x60] sm:$0xff] %vm4371_vm6, %v7368_v23  ;;  %v7015_v23 = vld [vmem:[#allocation2 + $0x140] sm:$0xff] }
 0x697   : > { %v7177_v4 = vpop.f32.mrf.mxu1 }
 0x698   : > { %v7273_v22 = vadd.f32 %v7177_v4, %v11245_v20  ;;  %v6225_v20 = vpop.f32.mrf.mxu2  ;;  %v6555_v4 = vpop.f32.mrf.mxu3 }
 0x69a   : > { %v7323_v21 = vadd.f32 %v11280_v37, %v7273_v22 }
 0x69c   : > { %v7369_v36 = vmax.f32 %v7323_v21, 0.0 }
 0x69e   : > { %7415 = vst.msk [vmem:[%s11291_s9 + $0x68] sm:$0xff] %vm4371_vm6, %v7369_v36  ;;  %v6880_v36 = vpop.f32.mrf.mxu0 }
 0x69f   : > { %v7180_v17 = vpop.f32.mrf.mxu1 }
 0x6a0   : > { %v7274_v5 = vadd.f32 %v7180_v17, %v11253_v11  ;;  %v6227_v26 = vpop.f32.mrf.mxu2 }
 0x6a2   : > { %v7324_v16 = vadd.f32 %v11280_v37, %v7274_v5  ;;  %8208 = vmatmul.msk.bf16.gmra.mxu1 %vm4371_vm6, %v7042_v3  ;;  %v6557_v3 = vpop.f32.mrf.mxu3 }
 0x6a4   : > { %v7370_v25 = vmax.f32 %v7324_v16, 0.0 }
 0x6a6   : > { %7416 = vst.msk [vmem:[%s11291_s9 + $0x70] sm:$0xff] %vm4371_vm6, %v7370_v25  ;;  %v6882_v25 = vpop.f32.mrf.mxu0 }
 0x6a7   : > { %v7182_v9 = vpop.f32.mrf.mxu1 }
 0x6a8   : > { %v7275_v12 = vadd.f32 %v7182_v9, %v11261_v43  ;;  %v6230_v10 = vpop.f32.mrf.mxu2 }
 0x6aa   : > { %v7325_v7 = vadd.f32 %v11280_v37, %v7275_v12 }
 0x6ac   : > { %v7371_v46 = vmax.f32 %v7325_v7, 0.0 }
 0x6ae   : > { %7417 = vst.msk [vmem:[%s11291_s9 + $0x78] sm:$0xff] %vm4371_vm6, %v7371_v46  ;;  %v7017_v46 = vld [vmem:[#allocation2 + $0x150] sm:$0xff] }
 0x6af   : > { %v7185_v11 = vpop.f32.mrf.mxu1 }
 0x6b0   : > { %v7276_v40 = vadd.f32 %v7185_v11, %v11269_v55  ;;  %v7016_v55 = vld [vmem:[#allocation2 + $0x148] sm:$0xff]  ;;  %v6232_v17 = vpop.f32.mrf.mxu2 }
 0x6b1   : > { %v7044_v21 = vpack.c.bf16 %v7016_v55, %v7015_v23  ;;  %v7020_v55 = vld [vmem:[#allocation2 + $0x168] sm:$0xff] }
 0x6b2   : > { %v7326_v41 = vadd.f32 %v11280_v37, %v7276_v40  ;;  %8209 = vmatmul.msk.bf16.gmra.mxu1 %vm4371_vm6, %v7043_v29  ;;  %v6885_v29 = vpop.f32.mrf.mxu0 }
 0x6b4   : > { %v7372_v43 = vmax.f32 %v7326_v41, 0.0 }
 0x6b6   : > { %7418 = vst.msk [vmem:[%s11291_s9 + $0x80] sm:$0xff] %vm4371_vm6, %v7372_v43  ;;  %v6307_v43 = vadd.f32 %v6225_v20, %v11081_v44 }
 0x6b7   : > { %v7187_v45 = vpop.f32.mrf.mxu1 }
 0x6b8   : > { %v7277_v54 = vadd.f32 %v7187_v45, %v11282_v14  ;;  %v6235_v12 = vpop.f32.mrf.mxu2 }
 0x6ba   : > { %v7327_v52 = vadd.f32 %v11280_v37, %v7277_v54 }
 0x6bc   : > { %v7373_v39 = vmax.f32 %v7327_v52, 0.0 }
 0x6be   : > { %7419 = vst.msk [vmem:[%s11291_s9 + $0x88] sm:$0xff] %vm4371_vm6, %v7373_v39 }
 0x6bf   : > { %v7190_v60 = vpop.f32.mrf.mxu1 }
 0x6c0   : > { %v7278_v22 = vadd.f32 %v7190_v60, %v11297_v0  ;;  %v7018_v0 = vld [vmem:[#allocation2 + $0x158] sm:$0xff]  ;;  %v6237_v54 = vpop.f32.mrf.mxu2 }
 0x6c1   : > { %v7045_v11 = vpack.c.bf16 %v7018_v0, %v7017_v46 }
 0x6c2   : > { %v7328_v47 = vadd.f32 %v11280_v37, %v7278_v22  ;;  %8210 = vmatmul.msk.bf16.gmra.mxu1 %vm4371_vm6, %v7044_v21  ;;  %v6887_v22 = vpop.f32.mrf.mxu0 }
 0x6c4   : > { %v7374_v14 = vmax.f32 %v7328_v47, 0.0  ;;  %v7019_v47 = vld [vmem:[#allocation2 + $0x160] sm:$0xff] }
 0x6c5   : > { %v7046_v44 = vpack.c.bf16 %v7020_v55, %v7019_v47 }
 0x6c6   : > { %7420 = vst.msk [vmem:[%s11291_s9 + $0x90] sm:$0xff] %vm4371_vm6, %v7374_v14  ;;  %v6308_v14 = vadd.f32 %v6227_v26, %v11092_v34 }
 0x6c7   : > { %v7192_v62 = vpop.f32.mrf.mxu1 }
 0x6c8   : > { %v7279_v5 = vadd.f32 %v7192_v62, %v11306_v38  ;;  %v6560_v38 = vpop.f32.mrf.mxu3  ;;  %v6240_v20 = vpop.f32.mrf.mxu2 }
 0x6ca   : > { %v7329_v16 = vadd.f32 %v11280_v37, %v7279_v5  ;;  %v6890_v46 = vpop.f32.mrf.mxu0 }
 0x6cc   : > { %v7375_v9 = vmax.f32 %v7329_v16, 0.0 }
 0x6ce   : > { %7421 = vst.msk [vmem:[%s11291_s9 + $0x98] sm:$0xff] %vm4371_vm6, %v7375_v9  ;;  %v6309_v9 = vadd.f32 %v6230_v10, %v11100_v51 }
 0x6cf   : > { %v7195_v7 = vpop.f32.mrf.mxu1 }
 0x6d0   : > { %v7280_v48 = vadd.f32 %v7195_v7, %v11315_v53  ;;  %v6632_v53 = vadd.f32 %v6550_v33, %v6307_v43  ;;  %v6562_v23 = vpop.f32.mrf.mxu3  ;;  %v6633_v33 = vadd.f32 %v6552_v24, %v6308_v14  ;;  %v6634_v26 = vadd.f32 %v6555_v4, %v6309_v9 }
 0x6d2   : > { %v7330_v49 = vadd.f32 %v11280_v37, %v7280_v48  ;;  %8211 = vmatmul.msk.bf16.gmra.mxu1 %vm4371_vm6, %v7045_v11  ;;  %v6957_v60 = vadd.f32 %v6875_v28, %v6632_v53  ;;  %v6958_v16 = vadd.f32 %v6877_v32, %v6633_v33  ;;  %v6242_v11 = vpop.f32.mrf.mxu2  ;;  %v7021_v32 = vld [vmem:[#allocation2 + $0x170] sm:$0xff]  ;;  %v6312_v33 = vadd.f32 %v6237_v54, %v11128_v42 }
 0x6d4   : > { %v7376_v40 = vmax.f32 %v7330_v49, 0.0  ;;  %v7022_v49 = vld [vmem:[#allocation2 + $0x178] sm:$0xff] }
 0x6d6   : > { %7422 = vst.msk [vmem:[%s11291_s9 + $0xa0] sm:$0xff] %vm4371_vm6, %v7376_v40  ;;  %v6959_v40 = vadd.f32 %v6880_v36, %v6634_v26  ;;  %v6313_v26 = vadd.f32 %v6240_v20, %v11136_v1 }
 0x6d7   : > { %v7197_v41 = vpop.f32.mrf.mxu1 }
 0x6d8   : > { %v7281_v45 = vadd.f32 %v7197_v41, %v11323_v59  ;;  %v6565_v0 = vpop.f32.mrf.mxu3  ;;  %v6310_v41 = vadd.f32 %v6232_v17, %v11111_v31 }
 0x6da   : > { %v7331_v52 = vadd.f32 %v11280_v37, %v7281_v45  ;;  %v7047_v45 = vpack.c.bf16 %v7022_v49, %v7021_v32  ;;  %v6635_v4 = vadd.f32 %v6557_v3, %v6310_v41  ;;  %v6245_v36 = vpop.f32.mrf.mxu2  ;;  %v7025_v49 = vld [vmem:[#allocation2 + $0x190] sm:$0xff] }
 0x6dc   : > { %v7377_v39 = vmax.f32 %v7331_v52, 0.0  ;;  %v6892_v52 = vpop.f32.mrf.mxu0 }
 0x6de   : > { %7423 = vst.msk [vmem:[%s11291_s9 + $0xa8] sm:$0xff] %vm4371_vm6, %v7377_v39  ;;  %v6960_v39 = vadd.f32 %v6882_v25, %v6635_v4 }
 0x6df   : > { %v7200_v21 = vpop.f32.mrf.mxu1 }
 0x6e0   : > { %v7282_v62 = vadd.f32 %v7200_v21, %v6957_v60  ;;  %v6567_v51 = vpop.f32.mrf.mxu3  ;;  %v6311_v60 = vadd.f32 %v6235_v12, %v11119_v35  ;;  %v6637_v12 = vadd.f32 %v6562_v23, %v6312_v33 }
 0x6e2   : > { %v7332_v59 = vadd.f32 %v11280_v37, %v7282_v62  ;;  %8212 = vmatmul.msk.bf16.gmra.mxu1 %vm4371_vm6, %v7046_v44  ;;  %v6636_v17 = vadd.f32 %v6560_v38, %v6311_v60  ;;  %v7023_v44 = vld [vmem:[#allocation2 + $0x180] sm:$0xff]  ;;  %v6962_v9 = vadd.f32 %v6887_v22, %v6637_v12 }
 0x6e4   : > { %v7378_v5 = vmax.f32 %v7332_v59, 0.0  ;;  %v6895_v62 = vpop.f32.mrf.mxu0  ;;  %v7024_v59 = vld [vmem:[#allocation2 + $0x188] sm:$0xff]  ;;  %v6961_v3 = vadd.f32 %v6885_v29, %v6636_v17 }
 0x6e6   : > { %7424 = vst.msk [vmem:[%s11291_s9 + $0xb0] sm:$0xff] %vm4371_vm6, %v7378_v5 }
 0x6e7   : > { %v7202_v28 = vpop.f32.mrf.mxu1 }
 0x6e8   : > { %v7283_v7 = vadd.f32 %v7202_v28, %v6958_v16  ;;  %v6570_v47 = vpop.f32.mrf.mxu3  ;;  %v7048_v16 = vpack.c.bf16 %v7024_v59, %v7023_v44  ;;  %v6247_v28 = vpop.f32.mrf.mxu2 }
 0x6ea   : > { %v7333_v34 = vadd.f32 %v11280_v37, %v7283_v7 }
 0x6ec   : > { %v7379_v48 = vmax.f32 %v7333_v34, 0.0  ;;  %v6897_v29 = vpop.f32.mrf.mxu0 }
 0x6ee   : > { %7425 = vst.msk [vmem:[%s11291_s9 + $0xb8] sm:$0xff] %vm4371_vm6, %v7379_v48 }
 0x6ef   : > { %v7205_v24 = vpop.f32.mrf.mxu1 }
 0x6f0   : > { %v7284_v43 = vadd.f32 %v7205_v24, %v6959_v40  ;;  %v6572_v7 = vpop.f32.mrf.mxu3  ;;  %v6250_v54 = vpop.f32.mrf.mxu2  ;;  %v7026_v40 = vld [vmem:[#allocation2 + $0x198] sm:$0xff]  ;;  %v6638_v24 = vadd.f32 %v6565_v0, %v6313_v26 }
 0x6f1   : > { %v7049_v22 = vpack.c.bf16 %v7026_v40, %v7025_v49 }
 0x6f2   : > { %v7334_v10 = vadd.f32 %v11280_v37, %v7284_v43  ;;  %8213 = vmatmul.msk.bf16.gmra.mxu1 %vm4371_vm6, %v7047_v45  ;;  %v6963_v23 = vadd.f32 %v6890_v46, %v6638_v24  ;;  %v6314_v43 = vadd.f32 %v6242_v11, %v11144_v56  ;;  %v11721_v24 = vld [vmem:[#allocation30_spill] sm:$0xff] }
 0x6f4   : > { %v7380_v53 = vmax.f32 %v7334_v10, 0.0  ;;  %v6900_v4 = vpop.f32.mrf.mxu0  ;;  %v6639_v20 = vadd.f32 %v6567_v51, %v6314_v43 }
 0x6f6   : > { %7426 = vst.msk [vmem:[%s11291_s9 + $0xc0] sm:$0xff] %vm4371_vm6, %v7380_v53 }
 0x6f7   : > { %v7207_v55 = vpop.f32.mrf.mxu1 }
 0x6f8   : > { %v7285_v21 = vadd.f32 %v7207_v55, %v6960_v39  ;;  %v6575_v45 = vpop.f32.mrf.mxu3  ;;  %v6252_v0 = vpop.f32.mrf.mxu2  ;;  %v6964_v39 = vadd.f32 %v6892_v52, %v6639_v20  ;;  %v6315_v55 = vadd.f32 %v6245_v36, %v11152_v58  ;;  %v6316_v52 = vadd.f32 %v6247_v28, %v11160_v27  ;;  %v11722_v20 = vld [vmem:[#allocation3_spill] sm:$0xff] }
 0x6fa   : > { %v7335_v31 = vadd.f32 %v11280_v37, %v7285_v21  ;;  %v6641_v58 = vadd.f32 %v6572_v7, %v6316_v52 }
 0x6fc   : > { %v7381_v14 = vmax.f32 %v7335_v31, 0.0  ;;  %v6902_v11 = vpop.f32.mrf.mxu0  ;;  %v6640_v31 = vadd.f32 %v6570_v47, %v6315_v55 }
 0x6fe   : > { %7427 = vst.msk [vmem:[%s11291_s9 + $0xc8] sm:$0xff] %vm4371_vm6, %v7381_v14  ;;  %v6965_v14 = vadd.f32 %v6895_v62, %v6640_v31  ;;  %v6317_v62 = vadd.f32 %v6250_v54, %v11168_v2 }
 0x6ff   : > { %v7210_v25 = vpop.f32.mrf.mxu1 }
 0x700   : > { %v7286_v5 = vadd.f32 %v7210_v25, %v6961_v3  ;;  %v6577_v21 = vpop.f32.mrf.mxu3  ;;  %v6255_v51 = vpop.f32.mrf.mxu2  ;;  %v6642_v27 = vadd.f32 %v6575_v45, %v6317_v62 }
 0x702   : > { %v7336_v35 = vadd.f32 %v11280_v37, %v7286_v5  ;;  %8214 = vmatmul.msk.bf16.gmra.mxu1 %vm4371_vm6, %v7048_v16  ;;  %v6966_v5 = vadd.f32 %v6897_v29, %v6641_v58  ;;  %v6318_v29 = vadd.f32 %v6252_v0, %v11176_v61 }
 0x704   : > { %v7382_v38 = vmax.f32 %v7336_v35, 0.0  ;;  %v6905_v33 = vpop.f32.mrf.mxu0 }
 0x706   : > { %7428 = vst.msk [vmem:[%s11291_s9 + $0xd0] sm:$0xff] %vm4371_vm6, %v7382_v38  ;;  %v6967_v38 = vadd.f32 %v6900_v4, %v6642_v27 }
 0x707   : > { %v7212_v34 = vpop.f32.mrf.mxu1 }
 0x708   : > { %v7287_v48 = vadd.f32 %v7212_v34, %v6962_v9  ;;  %v6580_v36 = vpop.f32.mrf.mxu3  ;;  %v6257_v35 = vpop.f32.mrf.mxu2 }
 0x70a   : > { %v7337_v42 = vadd.f32 %v11280_v37, %v7287_v48 }
 0x70c   : > { %v7383_v32 = vmax.f32 %v7337_v42, 0.0  ;;  %v6907_v7 = vpop.f32.mrf.mxu0  ;;  %v6643_v42 = vadd.f32 %v6577_v21, %v6318_v29 }
 0x70e   : > { %7429 = vst.msk [vmem:[%s11291_s9 + $0xd8] sm:$0xff] %vm4371_vm6, %v7383_v32  ;;  %v6968_v49 = vadd.f32 %v6902_v11, %v6643_v42  ;;  %v6319_v32 = vadd.f32 %v6255_v51, %v11721_v24 }
 0x70f   : > { %v7215_v41 = vpop.f32.mrf.mxu1 }
 0x710   : > { %v7288_v10 = vadd.f32 %v7215_v41, %v6963_v23  ;;  %v6582_v9 = vpop.f32.mrf.mxu3  ;;  %v6260_v2 = vpop.f32.mrf.mxu2  ;;  %v6644_v61 = vadd.f32 %v6580_v36, %v6319_v32 }
 0x712   : > { %v7338_v1 = vadd.f32 %v11280_v37, %v7288_v10  ;;  %8215 = vmatmul.msk.bf16.gmra.mxu1 %vm4371_vm6, %v7049_v22  ;;  %v6969_v4 = vadd.f32 %v6905_v33, %v6644_v61 }
 0x714   : > { %v7384_v53 = vmax.f32 %v7338_v1, 0.0  ;;  %v6910_v41 = vpop.f32.mrf.mxu0 }
 0x716   : > { %7430 = vst.msk [vmem:[%s11291_s9 + $0xe0] sm:$0xff] %vm4371_vm6, %v7384_v53  ;;  %v6320_v53 = vadd.f32 %v6257_v35, %v11722_v20 }
 0x717   : > { %v7217_v46 = vpop.f32.mrf.mxu1 }
 0x718   : > { %v7289_v60 = vadd.f32 %v7217_v46, %v6964_v39  ;;  %v6585_v23 = vpop.f32.mrf.mxu3  ;;  %v6262_v10 = vpop.f32.mrf.mxu2 }
 0x71a   : > { %v7339_v56 = vadd.f32 %v11280_v37, %v7289_v60  ;;  %v6645_v60 = vadd.f32 %v6582_v9, %v6320_v53 }
 0x71c   : > { %v7385_v17 = vmax.f32 %v7339_v56, 0.0  ;;  %v6912_v55 = vpop.f32.mrf.mxu0  ;;  %v6970_v56 = vadd.f32 %v6907_v7, %v6645_v60 }
 0x71e   : > { %7431 = vst.msk [vmem:[%s11291_s9 + $0xe8] sm:$0xff] %vm4371_vm6, %v7385_v17  ;;  %v6321_v17 = vadd.f32 %v6260_v2, %v11200_v8 }
 0x71f   : > { %v7220_v44 = vpop.f32.mrf.mxu1 }
 0x720   : > { %v7290_v59 = vadd.f32 %v7220_v44, %v6965_v14  ;;  %v6587_v39 = vpop.f32.mrf.mxu3  ;;  %v6265_v11 = vpop.f32.mrf.mxu2  ;;  %v6646_v44 = vadd.f32 %v6585_v23, %v6321_v17 }
 0x722   : > { %v7340_v3 = vadd.f32 %v11280_v37, %v7290_v59  ;;  %v6971_v58 = vadd.f32 %v6910_v41, %v6646_v44 }
 0x724   : > { %v7386_v25 = vmax.f32 %v7340_v3, 0.0  ;;  %v6915_v3 = vpop.f32.mrf.mxu0 }
 0x726   : > { %7432 = vst.msk [vmem:[%s11291_s9 + $0xf0] sm:$0xff] %vm4371_vm6, %v7386_v25  ;;  %v6322_v25 = vadd.f32 %v6262_v10, %v11208_v19 }
 0x727   : > { %v7222_v47 = vpop.f32.mrf.mxu1 }
 0x728   : > { %v7291_v16 = vadd.f32 %v7222_v47, %v6966_v5  ;;  %v6590_v52 = vpop.f32.mrf.mxu3  ;;  %v6267_v5 = vpop.f32.mrf.mxu2  ;;  %v6647_v8 = vadd.f32 %v6587_v39, %v6322_v25 }
 0x72a   : > { %v7341_v12 = vadd.f32 %v11280_v37, %v7291_v16  ;;  %v6972_v16 = vadd.f32 %v6912_v55, %v6647_v8 }
 0x72c   : > { %v7387_v28 = vmax.f32 %v7341_v12, 0.0  ;;  %v6917_v12 = vpop.f32.mrf.mxu0 }
 0x72e   : > { %7433 = vst.msk [vmem:[%s11291_s9 + $0xf8] sm:$0xff] %vm4371_vm6, %v7387_v28  ;;  %v6323_v28 = vadd.f32 %v6265_v11, %v11216_v18 }
 0x72f   : > { %v7225_v34 = vpop.f32.mrf.mxu1 }
 0x730   : > { %v7292_v26 = vadd.f32 %v7225_v34, %v6967_v38  ;;  %v6592_v35 = vpop.f32.mrf.mxu3  ;;  %v6270_v19 = vpop.f32.mrf.mxu2  ;;  %v6648_v7 = vadd.f32 %v6590_v52, %v6323_v28 }
 0x732   : > { %v7342_v48 = vadd.f32 %v11280_v37, %v7292_v26  ;;  %v6973_v29 = vadd.f32 %v6915_v3, %v6648_v7 }
 0x734   : > { %v7388_v54 = vmax.f32 %v7342_v48, 0.0  ;;  %v6324_v48 = vadd.f32 %v6267_v5, %v11224_v6 }
 0x736   : > { %7434 = vst.msk [vmem:[%s11291_s9 + $0x100] sm:$0xff] %vm4371_vm6, %v7388_v54  ;;  %v6920_v54 = vpop.f32.mrf.mxu0  ;;  %v6649_v18 = vadd.f32 %v6592_v35, %v6324_v48 }
 0x737   : > { %v7227_v40 = vpop.f32.mrf.mxu1 }
 0x738   : > { %v7293_v22 = vadd.f32 %v7227_v40, %v6968_v49  ;;  %v6595_v2 = vpop.f32.mrf.mxu3  ;;  %v6272_v24 = vpop.f32.mrf.mxu2  ;;  %v6974_v32 = vadd.f32 %v6917_v12, %v6649_v18  ;;  %v8864_v18 = vld [vmem:[%s11525_s4] ss:$0 sm:$0xff] }
 0x739   : > { %v6326_v53 = vadd.f32 %v6272_v24, %v11240_v13 }
 0x73a   : > { %v7343_v43 = vadd.f32 %v11280_v37, %v7293_v22  ;;  %v6325_v22 = vadd.f32 %v6270_v19, %v11232_v57 }
 0x73c   : > { %v7389_v45 = vmax.f32 %v7343_v43, 0.0 }
 0x73e   : > { %7435 = vst.msk [vmem:[%s11291_s9 + $0x108] sm:$0xff] %vm4371_vm6, %v7389_v45  ;;  %v6922_v6 = vpop.f32.mrf.mxu0  ;;  %v6650_v45 = vadd.f32 %v6595_v2, %v6325_v22 }
 0x73f   : > { %v7230_v1 = vpop.f32.mrf.mxu1 }
 0x740   : > { %v7294_v0 = vadd.f32 %v7230_v1, %v6969_v4  ;;  %v6597_v43 = vpop.f32.mrf.mxu3  ;;  %v6975_v4 = vadd.f32 %v6920_v54, %v6650_v45  ;;  %v6275_v1 = vpop.f32.mrf.mxu2 }
 0x741   : > { %v6327_v11 = vadd.f32 %v6275_v1, %v11248_v15 }
 0x742   : > { %v7344_v46 = vadd.f32 %v11280_v37, %v7294_v0 }
 0x744   : > { %v7390_v21 = vmax.f32 %v7344_v46, 0.0  ;;  %v6651_v46 = vadd.f32 %v6597_v43, %v6326_v53 }
 0x746   : > { %7436 = vst.msk [vmem:[%s11291_s9 + $0x110] sm:$0xff] %vm4371_vm6, %v7390_v21  ;;  %v6925_v60 = vpop.f32.mrf.mxu0  ;;  %v6976_v21 = vadd.f32 %v6922_v6, %v6651_v46 }
 0x747   : > { %v7232_v31 = vpop.f32.mrf.mxu1 }
 0x748   : > { %v7295_v14 = vadd.f32 %v7232_v31, %v6970_v56  ;;  %v6600_v57 = vpop.f32.mrf.mxu3  ;;  %v6277_v17 = vpop.f32.mrf.mxu2 }
 0x749   : > { %v6652_v13 = vadd.f32 %v6600_v57, %v6327_v11 }
 0x74a   : > { %v7345_v51 = vadd.f32 %v11280_v37, %v7295_v14 }
 0x74b   : > { %v6977_v52 = vadd.f32 %v6925_v60, %v6652_v13 }
 0x74c   : > { %v7391_v59 = vmax.f32 %v7345_v51, 0.0 }
 0x74e   : > { %7437 = vst.msk [vmem:[%s11291_s9 + $0x118] sm:$0xff] %vm4371_vm6, %v7391_v59  ;;  %v6927_v59 = vpop.f32.mrf.mxu0 }
 0x74f   : > { %v7235_v36 = vpop.f32.mrf.mxu1 }
 0x750   : > { %v7296_v33 = vadd.f32 %v7235_v36, %v6971_v58  ;;  %v6602_v44 = vpop.f32.mrf.mxu3  ;;  %v6328_v58 = vadd.f32 %v6277_v17, %v11256_v50  ;;  %v6280_v15 = vpop.f32.mrf.mxu2 }
 0x752   : > { %v7346_v47 = vadd.f32 %v11280_v37, %v7296_v33  ;;  %v6653_v33 = vadd.f32 %v6602_v44, %v6328_v58 }
 0x754   : > { %v7392_v62 = vmax.f32 %v7346_v47, 0.0  ;;  %v6978_v47 = vadd.f32 %v6927_v59, %v6653_v33 }
 0x756   : > { %7438 = vst.msk [vmem:[%s11291_s9 + $0x120] sm:$0xff] %vm4371_vm6, %v7392_v62  ;;  %v6930_v12 = vpop.f32.mrf.mxu0 }
 0x757   : > { %v7237_v27 = vpop.f32.mrf.mxu1 }
 0x758   : > { %v7297_v38 = vadd.f32 %v7237_v27, %v6972_v16  ;;  %v6605_v8 = vpop.f32.mrf.mxu3  ;;  %v6329_v16 = vadd.f32 %v6280_v15, %v11264_v63 }
 0x75a   : > { %v7347_v9 = vadd.f32 %v11280_v37, %v7297_v38  ;;  %v6654_v50 = vadd.f32 %v6605_v8, %v6329_v16  ;;  %v6282_v38 = vpop.f32.mrf.mxu2 }
 0x75b   : > { %v6330_v7 = vadd.f32 %v6282_v38, %v11272_v30 }
 0x75c   : > { %v7393_v34 = vmax.f32 %v7347_v9, 0.0  ;;  %v6979_v9 = vadd.f32 %v6930_v12, %v6654_v50 }
 0x75e   : > { %7439 = vst.msk [vmem:[%s11291_s9 + $0x128] sm:$0xff] %vm4371_vm6, %v7393_v34  ;;  %v6932_v63 = vpop.f32.mrf.mxu0 }
 0x75f   : > { %v7240_v26 = vpop.f32.mrf.mxu1 }
 0x760   : > { %v7298_v42 = vadd.f32 %v7240_v26, %v6973_v29  ;;  %v6607_v29 = vpop.f32.mrf.mxu3 }
 0x761   : > { %v6655_v48 = vadd.f32 %v6607_v29, %v6330_v7 }
 0x762   : > { %v7348_v49 = vadd.f32 %v11280_v37, %v7298_v42 }
 0x763   : > { %v6980_v42 = vadd.f32 %v6932_v63, %v6655_v48 }
 0x764   : > { %v7394_v40 = vmax.f32 %v7348_v49, 0.0 }
 0x766   : > { %7440 = vst.msk [vmem:[%s11291_s9 + $0x130] sm:$0xff] %vm4371_vm6, %v7394_v40 }
 0x767   : > { %v7242_v23 = vpop.f32.mrf.mxu1 }
 0x768   : > { %v7299_v41 = vadd.f32 %v7242_v23, %v6974_v32 }
 0x76a   : > { %v7349_v61 = vadd.f32 %v11280_v37, %v7299_v41 }
 0x76c   : > { %v7395_v10 = vmax.f32 %v7349_v61, 0.0 }
 0x76e   : > { %7441 = vst.msk [vmem:[%s11291_s9 + $0x138] sm:$0xff] %vm4371_vm6, %v7395_v10 }
 0x76f   : > { %v7245_v20 = vpop.f32.mrf.mxu1 }
 0x770   : > { %v7300_v0 = vadd.f32 %v7245_v20, %v6975_v4 }
 0x772   : > { %v7350_v39 = vadd.f32 %v11280_v37, %v7300_v0 }
 0x774   : > { %v7396_v55 = vmax.f32 %v7350_v39, 0.0 }
 0x776   : > { %7442 = vst.msk [vmem:[%s11291_s9 + $0x140] sm:$0xff] %vm4371_vm6, %v7396_v55 }
 0x777   : > { %v7247_v56 = vpop.f32.mrf.mxu1 }
 0x778   : > { %v7301_v31 = vadd.f32 %v7247_v56, %v6976_v21 }
 0x77a   : > { %v7351_v14 = vadd.f32 %v11280_v37, %v7301_v31 }
 0x77c   : > { %v7397_v51 = vmax.f32 %v7351_v14, 0.0 }
 0x77e   : > { %7443 = vst.msk [vmem:[%s11291_s9 + $0x148] sm:$0xff] %vm4371_vm6, %v7397_v51 }
 0x77f   : > { %v7250_v3 = vpop.f32.mrf.mxu1 }
 0x780   : > { %v7302_v36 = vadd.f32 %v7250_v3, %v6977_v52 }
 0x782   : > { %v7352_v25 = vadd.f32 %v11280_v37, %v7302_v36 }
 0x784   : > { %v7398_v5 = vmax.f32 %v7352_v25, 0.0 }
 0x786   : > { %7444 = vst.msk [vmem:[%s11291_s9 + $0x150] sm:$0xff] %vm4371_vm6, %v7398_v5 }
 0x787   : > { %v7252_v62 = vpop.f32.mrf.mxu1 }
 0x788   : > { %v7303_v35 = vadd.f32 %v7252_v62, %v6978_v47 }
 0x78a   : > { %v7353_v27 = vadd.f32 %v11280_v37, %v7303_v35 }
 0x78c   : > { %v7399_v28 = vmax.f32 %v7353_v27, 0.0 }
 0x78e   : > { %7445 = vst.msk [vmem:[%s11291_s9 + $0x158] sm:$0xff] %vm4371_vm6, %v7399_v28 }
 0x78f   : > { %v7255_v19 = vpop.f32.mrf.mxu1 }
 0x790   : > { %v7304_v34 = vadd.f32 %v7255_v19, %v6979_v9 }
 0x792   : > { %v7354_v26 = vadd.f32 %v11280_v37, %v7304_v34 }
 0x794   : > { %v7400_v2 = vmax.f32 %v7354_v26, 0.0 }
 0x796   : > { %7446 = vst.msk [vmem:[%s11291_s9 + $0x160] sm:$0xff] %vm4371_vm6, %v7400_v2 }
 0x797   : > { %v7257_v54 = vpop.f32.mrf.mxu1 }
 0x798   : > { %v7305_v49 = vadd.f32 %v7257_v54, %v6980_v42 }
 0x79a   : > { %v7355_v40 = vadd.f32 %v8864_v18, %v7305_v49 }
 0x79c   : > { %v7401_v24 = vmax.f32 %v7355_v40, 0.0 }
 0x79e   : > { %7447 = vst.msk [vmem:[%s11291_s9 + $0x168] sm:$0xff] %vm4371_vm6, %v7401_v24 }
 0x79f PF: > { %s16_s21 = sadd.s32 1, %s8878_s21  }
 0x7a0   : > { %p13_p4 = scmp.ge.s32.totalorder %s16_s21, 4  }
 0x7a2   :  { %15 = sbr.rel (!%p13_p4) target bundleno = 1 (0x1), region = 90 }

</bundles_post_ra>
